<compile_context>
chip_gen: v7x
topology: tpu7x:2x2x1
jax: 0.10.0
libtpu: 0.0.40
codegen_flags: <defaults>
</compile_context>

<pallas_src>
import functools

import jax
import jax.numpy as jnp
from jax.experimental import pallas as pl
from jax.experimental.pallas import tpu as pltpu


CHANNELS = [32, 64, 128, 256]
GROUPS = [4, 32, 32, 32]
STRIDES = [1, 2, 2, 2]
DOWN = [1024, 512, 256, 128]
UP = [128, 256, 512, 1024]
LAT_PAD = 128                       # latent lane padding -> every matmul output is lane-dense
VMEM_LIMIT = 32 * 1024 * 1024       # explicit scoped-VMEM budget (safe on v5e/v6e/v7x)


# ----------------------------- Pallas kernels -----------------------------

def conv_gn_relu_kernel(p_ref, w_ref, gamma_ref, beta_ref, gmat_ref, o_ref, *, inv_n):
    """One batch element: conv-as-matmul + GroupNorm + ReLU, fully fused in VMEM.

    p_ref:     [1, P, K]     bf16 im2col patches (P = Ho*Wo, K = 9*Cin)
    w_ref:     [K, Cout]     bf16 conv weights (rows ordered di, dj, cin)
    gamma/beta:[1, Cout]     f32 GroupNorm affine
    gmat_ref:  [Cout, Cout]  f32, 1.0 where two channels share a GroupNorm group
    o_ref:     [1, P, Cout]  f32 NHWC-flattened output
    """
    y = jnp.dot(p_ref[0], w_ref[...], preferred_element_type=jnp.float32)   # [P, Cout]
    s1 = jnp.sum(y, axis=0, keepdims=True)                                  # per-channel sum
    s2 = jnp.sum(y * y, axis=0, keepdims=True)                              # per-channel sumsq
    # One tiny matmul broadcasts each group's total back to all of its channels.
    mean = jnp.dot(s1, gmat_ref[...], preferred_element_type=jnp.float32) * inv_n
    ex2 = jnp.dot(s2, gmat_ref[...], preferred_element_type=jnp.float32) * inv_n
    var = ex2 - mean * mean                       # biased variance (matches torch.GroupNorm)
    xn = (y - mean) * jax.lax.rsqrt(var + 1e-5)
    o_ref[0] = jnp.maximum(xn * gamma_ref[...] + beta_ref[...], 0.0)


def _stable_silu(y):
    # x * sigmoid(x) without ever exponentiating a positive value.
    t = jnp.exp(-jnp.abs(y))
    sig = jnp.where(y >= 0.0, 1.0 / (1.0 + t), t / (1.0 + t))
    return y * sig


def dense_stack_kernel(h_ref, w1_ref, b1_ref, w2_ref, b2_ref, w3_ref, b3_ref,
                       wz_ref, bz_ref, eps_ref,
                       u1_ref, c1_ref, u2_ref, c2_ref, u3_ref, c3_ref, u4_ref, c4_ref,
                       o_ref):
    """Encoder dense1-3 + latent re-parameterisation + decoder up1-4, all VMEM-resident."""

    def dense(h, w_ref, b_ref):
        return (jnp.dot(h.astype(jnp.bfloat16), w_ref[...],
                        preferred_element_type=jnp.float32) + b_ref[...])

    h = h_ref[...]
    h = _stable_silu(dense(h, w1_ref, b1_ref))      # 1024 -> 512
    h = _stable_silu(dense(h, w2_ref, b2_ref))      # 512  -> 256
    h = _stable_silu(dense(h, w3_ref, b3_ref))      # 256  -> 128

    # Latent heads fused into one lane-dense matmul: columns [0:128) = mu head
    # (zero-padded past latent_dims), columns [128:256) = logsigma head.
    t = dense(h, wz_ref, bz_ref)                    # [B, 256]
    mu = t[:, :LAT_PAD]
    log_sigma = t[:, LAT_PAD:]
    # TODO(synk): the encoder's self.kl side-effect is not part of the returned output; not computed.
    z = mu + jnp.exp(log_sigma) * eps_ref[...]      # padded lanes are exactly zero

    h = _stable_silu(dense(z, u1_ref, c1_ref))      # latent (padded to 128) -> 128
    h = _stable_silu(dense(h, u2_ref, c2_ref))      # 128 -> 256
    h = _stable_silu(dense(h, u3_ref, c3_ref))      # 256 -> 512
    h = _stable_silu(dense(h, u4_ref, c4_ref))      # 512 -> 1024
    o_ref[...] = h


# ----------------------------- pallas_call wrappers -----------------------------

def _full_spec(shape):
    n = len(shape)
    return pl.BlockSpec(shape, lambda i, n=n: (0,) * n)


def _im2col(x_nhwc, k, s):
    """[B, H, W, C] -> bf16 patches [B, Ho*Wo, k*k*C] (last-dim order: di, dj, cin)."""
    B, H, W, C = x_nhwc.shape
    Ho = (H - k) // s + 1
    Wo = (W - k) // s + 1
    cols = []
    for di in range(k):
        for dj in range(k):
            cols.append(x_nhwc[:, di:di + s * (Ho - 1) + 1:s, dj:dj + s * (Wo - 1) + 1:s, :])
    patches = jnp.stack(cols, axis=3)                                   # [B, Ho, Wo, k*k, C]
    return patches.reshape(B, Ho * Wo, k * k * C).astype(jnp.bfloat16), Ho, Wo


def _conv_gn_relu(x_nhwc, layer, groups, stride):
    """Conv2d(3x3, bias=False) + GroupNorm + ReLU as one pallas_call. NHWC in, NHWC out."""
    B = x_nhwc.shape[0]
    w2d, gamma, beta, gmat = layer["w2d"], layer["gamma"], layer["beta"], layer["gmat"]
    K, Cout = w2d.shape
    patches, Ho, Wo = _im2col(x_nhwc, 3, stride)
    P = Ho * Wo
    inv_n = 1.0 / float((Cout // groups) * P)
    kernel = functools.partial(conv_gn_relu_kernel, inv_n=inv_n)
    y = pl.pallas_call(
        kernel,
        grid=(B,),
        in_specs=[
            pl.BlockSpec((1, P, K), lambda b: (b, 0, 0)),
            pl.BlockSpec((K, Cout), lambda b: (0, 0)),
            pl.BlockSpec((1, Cout), lambda b: (0, 0)),
            pl.BlockSpec((1, Cout), lambda b: (0, 0)),
            pl.BlockSpec((Cout, Cout), lambda b: (0, 0)),
        ],
        out_specs=pl.BlockSpec((1, P, Cout), lambda b: (b, 0, 0)),
        out_shape=jax.ShapeDtypeStruct((B, P, Cout), jnp.float32),
        compiler_params=pltpu.CompilerParams(
            dimension_semantics=("parallel",),          # v7x: 2 TensorCores split the batch
            vmem_limit_bytes=VMEM_LIMIT),
        cost_estimate=pl.CostEstimate(
            flops=2 * B * P * K * Cout + 4 * B * Cout * Cout,
            transcendentals=B * Cout,
            bytes_accessed=int(patches.size) * 2 + int(w2d.size) * 2
                           + (2 * Cout + Cout * Cout + B * P * Cout) * 4),
    )(patches, w2d, gamma, beta, gmat)
    return y.reshape(B, Ho, Wo, Cout)


def _dense_stack(prep, h, eps_pad):
    """dense1-3 + latent + decoder up1-4 in a single pallas_call."""
    B = h.shape[0]
    weights = [prep["d1_w"], prep["d2_w"], prep["d3_w"], prep["z_w"],
               prep["u1_w"], prep["u2_w"], prep["u3_w"], prep["u4_w"]]
    args = [h,
            prep["d1_w"], prep["d1_b"], prep["d2_w"], prep["d2_b"],
            prep["d3_w"], prep["d3_b"], prep["z_w"], prep["z_b"], eps_pad,
            prep["u1_w"], prep["u1_b"], prep["u2_w"], prep["u2_b"],
            prep["u3_w"], prep["u3_b"], prep["u4_w"], prep["u4_b"]]
    out_dim = int(prep["u4_w"].shape[1])
    flops = 2 * B * sum(int(w.shape[0]) * int(w.shape[1]) for w in weights)
    transc = 2 * B * sum(int(w.shape[1]) for w in weights)
    nbytes = sum(int(a.size) * a.dtype.itemsize for a in args) + B * out_dim * 4
    return pl.pallas_call(
        dense_stack_kernel,
        grid=(1,),
        in_specs=[_full_spec(a.shape) for a in args],
        out_specs=_full_spec((B, out_dim)),
        out_shape=jax.ShapeDtypeStruct((B, out_dim), jnp.float32),
        compiler_params=pltpu.CompilerParams(
            dimension_semantics=("arbitrary",),
            vmem_limit_bytes=VMEM_LIMIT),
        cost_estimate=pl.CostEstimate(flops=flops, transcendentals=transc,
                                      bytes_accessed=nbytes),
    )(*args)


# ----------------------------- parameters -----------------------------

def init_params(key, in_channels=1, latent_dims=2):
    """Canonical (torch-like) parameter shapes."""
    keys = iter(jax.random.split(key, 32))

    def w_init(shape, fan_in):
        return jax.random.normal(next(keys), shape, jnp.float32) / jnp.sqrt(jnp.float32(fan_in))

    p = {}
    cins = [in_channels] + CHANNELS[:-1]
    for i, (ci, co) in enumerate(zip(cins, CHANNELS)):
        p[f"conv{i+1}_w"] = w_init((3, 3, ci, co), 9 * ci)        # HWIO
        p[f"gn{i+1}_g"] = jnp.ones((co,), jnp.float32)            # GroupNorm default affine
        p[f"gn{i+1}_b"] = jnp.zeros((co,), jnp.float32)

    for i, (di, do) in enumerate(zip(DOWN[:-1], DOWN[1:])):       # dense1-3
        p[f"dense{i+1}_w"] = w_init((di, do), di)                 # stored [in, out]
        p[f"dense{i+1}_b"] = jnp.zeros((do,), jnp.float32)
    p["dense4_w"] = w_init((DOWN[3], latent_dims), DOWN[3])       # mu head
    p["dense4_b"] = jnp.zeros((latent_dims,), jnp.float32)
    p["dense5_w"] = w_init((DOWN[3], latent_dims), DOWN[3])       # logsigma head
    p["dense5_b"] = jnp.zeros((latent_dims,), jnp.float32)

    up_dims = [(latent_dims, UP[0])] + list(zip(UP[:-1], UP[1:]))
    for i, (di, do) in enumerate(up_dims):
        p[f"up{i+1}_w"] = w_init((di, do), di)
        p[f"up{i+1}_b"] = jnp.zeros((do,), jnp.float32)
    return p


def prepare_params(p, in_channels=1, latent_dims=2):
    """One-time host-side layout prep (outside jit): 2-D bf16 conv weights, GroupNorm
    group-mask matrices, bf16 dense weights, latent heads concatenated + lane-padded."""
    prep = {}
    cins = [in_channels] + CHANNELS[:-1]
    for i, (ci, co) in enumerate(zip(cins, CHANNELS)):
        gids = jnp.arange(co) // (co // GROUPS[i])
        prep[f"conv{i+1}"] = {
            "w2d": p[f"conv{i+1}_w"].reshape(9 * ci, co).astype(jnp.bfloat16),
            "gamma": p[f"gn{i+1}_g"].reshape(1, co),
            "beta": p[f"gn{i+1}_b"].reshape(1, co),
            "gmat": (gids[:, None] == gids[None, :]).astype(jnp.float32),
        }
    for i in range(1, 4):
        prep[f"d{i}_w"] = p[f"dense{i}_w"].astype(jnp.bfloat16)
        prep[f"d{i}_b"] = p[f"dense{i}_b"].reshape(1, -1)
    L = latent_dims
    wz = jnp.zeros((DOWN[3], 2 * LAT_PAD), jnp.float32)
    wz = wz.at[:, :L].set(p["dense4_w"]).at[:, LAT_PAD:LAT_PAD + L].set(p["dense5_w"])
    bz = jnp.zeros((2 * LAT_PAD,), jnp.float32)
    bz = bz.at[:L].set(p["dense4_b"]).at[LAT_PAD:LAT_PAD + L].set(p["dense5_b"])
    prep["z_w"] = wz.astype(jnp.bfloat16)
    prep["z_b"] = bz.reshape(1, -1)
    u1 = jnp.zeros((LAT_PAD, UP[0]), jnp.float32).at[:L, :].set(p["up1_w"])
    prep["u1_w"] = u1.astype(jnp.bfloat16)                        # zero rows past latent_dims
    prep["u1_b"] = p["up1_b"].reshape(1, -1)
    for i in range(2, 5):
        prep[f"u{i}_w"] = p[f"up{i}_w"].astype(jnp.bfloat16)
        prep[f"u{i}_b"] = p[f"up{i}_b"].reshape(1, -1)
    return prep


# ----------------------------- forward -----------------------------

def vae_forward(prep, x_nchw, eps):
    """x_nchw: [B, 1, 32, 32] f32 ; eps ~ N(0,1): [B, latent_dims]. Returns [B, 1024]."""
    B = x_nchw.shape[0]
    x = jnp.transpose(x_nchw, (0, 2, 3, 1)).astype(jnp.float32)   # NHWC, kept end-to-end
    for i in range(4):
        x = _conv_gn_relu(x, prep[f"conv{i+1}"], GROUPS[i], STRIDES[i])
    # torch.nn.Flatten flattens NCHW -> channel-major order (tiny [2,2,2,256] transpose).
    h = jnp.transpose(x, (0, 3, 1, 2)).reshape(B, -1)             # [B, 1024]
    eps_pad = jnp.pad(eps, ((0, 0), (0, LAT_PAD - eps.shape[1]))).astype(jnp.float32)
    return _dense_stack(prep, h, eps_pad)


if __name__ == "__main__":
    key = jax.random.PRNGKey(0)
    pkey, xkey, ekey = jax.random.split(key, 3)

    B, LATENT = 2, 2
    params = init_params(pkey, in_channels=1, latent_dims=LATENT)
    prep = prepare_params(params, in_channels=1, latent_dims=LATENT)

    # Encoder hard-codes img_size=32 (flatten must equal 1024), so spatial is 32x32.
    x = jax.random.normal(xkey, (B, 1, 32, 32), jnp.float32)
    eps = jax.random.normal(ekey, (B, LATENT), jnp.float32)

    out = jax.block_until_ready(jax.jit(vae_forward)(prep, x, eps))
    assert out.shape == (B, 1024), out.shape
    assert bool(jnp.all(jnp.isfinite(out)))
    print("KERNEL_OK")
</pallas_src>

<mosaic_0001>
module attributes {stable_mosaic.version = 11 : i64} {
  func.func @conv_gn_relu_kernel(%arg0: i32, %arg1: memref<1x900x9xbf16, #tpu.memory_space<vmem>>, %arg2: memref<9x32xbf16, #tpu.memory_space<vmem>>, %arg3: memref<1x32xf32, #tpu.memory_space<vmem>>, %arg4: memref<1x32xf32, #tpu.memory_space<vmem>>, %arg5: memref<32x32xf32, #tpu.memory_space<vmem>>, %arg6: memref<1x900x32xf32, #tpu.memory_space<vmem>>) attributes {dimension_semantics = [#tpu.dimension_semantics<parallel>], iteration_bounds = array<i64: 2>, scalar_prefetch = 0 : i64, scratch_operands = 0 : i64, tpu.core_type = #tpu.core_type<tc>, window_params = [{transform_indices = @transform_0, window_bounds = array<i64: 1, 900, 9>}, {pipeline_mode = #tpu.pipeline_mode<synchronous>, transform_indices = @transform_1, window_bounds = array<i64: 9, 32>}, {pipeline_mode = #tpu.pipeline_mode<synchronous>, transform_indices = @transform_2, window_bounds = array<i64: 1, 32>}, {pipeline_mode = #tpu.pipeline_mode<synchronous>, transform_indices = @transform_3, window_bounds = array<i64: 1, 32>}, {pipeline_mode = #tpu.pipeline_mode<synchronous>, transform_indices = @transform_4, window_bounds = array<i64: 32, 32>}, {transform_indices = @transform_5, window_bounds = array<i64: 1, 900, 32>}]} {
    %c0 = arith.constant 0 : index
    %c0_0 = arith.constant 0 : index
    %c0_1 = arith.constant 0 : index
    %0 = vector.load %arg1[%c0, %c0_0, %c0_1] : memref<1x900x9xbf16, #tpu.memory_space<vmem>>, vector<1x900x9xbf16>
    %1 = vector.shape_cast %0 : vector<1x900x9xbf16> to vector<900x9xbf16>
    %c0_2 = arith.constant 0 : index
    %c0_3 = arith.constant 0 : index
    %2 = vector.load %arg2[%c0_2, %c0_3] : memref<9x32xbf16, #tpu.memory_space<vmem>>, vector<9x32xbf16>
    %cst = arith.constant dense<0.000000e+00> : vector<900x32xf32>
    %3 = tpu.matmul %1, %2, %cst {dimension_numbers = #tpu.dot_dimension_numbers<[1], [0], [0], [1], [0, 0, 1, 1], [], []>} : vector<900x9xbf16>, vector<9x32xbf16>, vector<900x32xf32> -> vector<900x32xf32>
    %cst_4 = arith.constant dense<0.000000e+00> : vector<32xf32>
    %4 = vector.multi_reduction <add>, %3, %cst_4 [0] : vector<900x32xf32> to vector<32xf32>
    %5 = vector.shape_cast %4 : vector<32xf32> to vector<1x32xf32>
    %6 = arith.mulf %3, %3 : vector<900x32xf32>
    %cst_5 = arith.constant dense<0.000000e+00> : vector<32xf32>
    %7 = vector.multi_reduction <add>, %6, %cst_5 [0] : vector<900x32xf32> to vector<32xf32>
    %8 = vector.shape_cast %7 : vector<32xf32> to vector<1x32xf32>
    %c0_6 = arith.constant 0 : index
    %c0_7 = arith.constant 0 : index
    %9 = vector.load %arg5[%c0_6, %c0_7] : memref<32x32xf32, #tpu.memory_space<vmem>>, vector<32x32xf32>
    %cst_8 = arith.constant dense<0.000000e+00> : vector<1x32xf32>
    %10 = tpu.matmul %5, %9, %cst_8 {dimension_numbers = #tpu.dot_dimension_numbers<[1], [0], [0], [1], [0, 0, 1, 1], [], []>} : vector<1x32xf32>, vector<32x32xf32>, vector<1x32xf32> -> vector<1x32xf32>
    %cst_9 = arith.constant 1.38888892E-4 : f32
    %11 = vector.broadcast %cst_9 : f32 to vector<1x32xf32>
    %12 = arith.mulf %10, %11 : vector<1x32xf32>
    %c0_10 = arith.constant 0 : index
    %c0_11 = arith.constant 0 : index
    %13 = vector.load %arg5[%c0_10, %c0_11] : memref<32x32xf32, #tpu.memory_space<vmem>>, vector<32x32xf32>
    %cst_12 = arith.constant dense<0.000000e+00> : vector<1x32xf32>
    %14 = tpu.matmul %8, %13, %cst_12 {dimension_numbers = #tpu.dot_dimension_numbers<[1], [0], [0], [1], [0, 0, 1, 1], [], []>} : vector<1x32xf32>, vector<32x32xf32>, vector<1x32xf32> -> vector<1x32xf32>
    %cst_13 = arith.constant 1.38888892E-4 : f32
    %15 = vector.broadcast %cst_13 : f32 to vector<1x32xf32>
    %16 = arith.mulf %14, %15 : vector<1x32xf32>
    %17 = arith.mulf %12, %12 : vector<1x32xf32>
    %18 = arith.subf %16, %17 : vector<1x32xf32>
    %19 = vector.broadcast %12 : vector<1x32xf32> to vector<900x32xf32>
    %20 = arith.subf %3, %19 : vector<900x32xf32>
    %cst_14 = arith.constant 9.99999974E-6 : f32
    %21 = vector.broadcast %cst_14 : f32 to vector<1x32xf32>
    %22 = arith.addf %18, %21 : vector<1x32xf32>
    %23 = math.rsqrt %22 : vector<1x32xf32>
    %24 = vector.broadcast %23 : vector<1x32xf32> to vector<900x32xf32>
    %25 = arith.mulf %20, %24 : vector<900x32xf32>
    %c0_15 = arith.constant 0 : index
    %c0_16 = arith.constant 0 : index
    %26 = vector.load %arg3[%c0_15, %c0_16] : memref<1x32xf32, #tpu.memory_space<vmem>>, vector<1x32xf32>
    %27 = vector.broadcast %26 : vector<1x32xf32> to vector<900x32xf32>
    %28 = arith.mulf %25, %27 : vector<900x32xf32>
    %c0_17 = arith.constant 0 : index
    %c0_18 = arith.constant 0 : index
    %29 = vector.load %arg4[%c0_17, %c0_18] : memref<1x32xf32, #tpu.memory_space<vmem>>, vector<1x32xf32>
    %30 = vector.broadcast %29 : vector<1x32xf32> to vector<900x32xf32>
    %31 = arith.addf %28, %30 : vector<900x32xf32>
    %cst_19 = arith.constant 0.000000e+00 : f32
    %32 = vector.broadcast %cst_19 : f32 to vector<900x32xf32>
    %33 = arith.maximumf %31, %32 : vector<900x32xf32>
    %c0_20 = arith.constant 0 : index
    %c0_21 = arith.constant 0 : index
    %c0_22 = arith.constant 0 : index
    %34 = vector.load %arg6[%c0_20, %c0_21, %c0_22] : memref<1x900x32xf32, #tpu.memory_space<vmem>>, vector<1x900x32xf32>
    %35 = vector.shape_cast %34 : vector<1x900x32xf32> to vector<900x32xf32>
    %36 = vector.shape_cast %33 : vector<900x32xf32> to vector<1x900x32xf32>
    tpu.vector_store %arg6[%c0_20, %c0_21, %c0_22], %36 {strides = array<i32>} : memref<1x900x32xf32, #tpu.memory_space<vmem>>, vector<1x900x32xf32>,
    return
  }
  func.func @transform_0(%arg0: i32) -> (i32, i32, i32) {
    %c0_i32 = arith.constant 0 : i32
    %c0_i32_0 = arith.constant 0 : i32
    %c0_i32_1 = arith.constant 0 : i32
    return %arg0, %c0_i32, %c0_i32_0 : i32, i32, i32
  }
  func.func @transform_1(%arg0: i32) -> (i32, i32) {
    %c0_i32 = arith.constant 0 : i32
    %c0_i32_0 = arith.constant 0 : i32
    %c0_i32_1 = arith.constant 0 : i32
    return %c0_i32, %c0_i32_0 : i32, i32
  }
  func.func @transform_2(%arg0: i32) -> (i32, i32) {
    %c0_i32 = arith.constant 0 : i32
    %c0_i32_0 = arith.constant 0 : i32
    %c0_i32_1 = arith.constant 0 : i32
    return %c0_i32, %c0_i32_0 : i32, i32
  }
  func.func @transform_3(%arg0: i32) -> (i32, i32) {
    %c0_i32 = arith.constant 0 : i32
    %c0_i32_0 = arith.constant 0 : i32
    %c0_i32_1 = arith.constant 0 : i32
    return %c0_i32, %c0_i32_0 : i32, i32
  }
  func.func @transform_4(%arg0: i32) -> (i32, i32) {
    %c0_i32 = arith.constant 0 : i32
    %c0_i32_0 = arith.constant 0 : i32
    %c0_i32_1 = arith.constant 0 : i32
    return %c0_i32, %c0_i32_0 : i32, i32
  }
  func.func @transform_5(%arg0: i32) -> (i32, i32, i32) {
    %c0_i32 = arith.constant 0 : i32
    %c0_i32_0 = arith.constant 0 : i32
    %c0_i32_1 = arith.constant 0 : i32
    return %arg0, %c0_i32, %c0_i32_0 : i32, i32, i32
  }
}

module attributes {stable_mosaic.version = 11 : i64} {
  func.func @conv_gn_relu_kernel(%arg0: i32, %arg1: memref<1x196x288xbf16, #tpu.memory_space<vmem>>, %arg2: memref<288x64xbf16, #tpu.memory_space<vmem>>, %arg3: memref<1x64xf32, #tpu.memory_space<vmem>>, %arg4: memref<1x64xf32, #tpu.memory_space<vmem>>, %arg5: memref<64x64xf32, #tpu.memory_space<vmem>>, %arg6: memref<1x196x64xf32, #tpu.memory_space<vmem>>) attributes {dimension_semantics = [#tpu.dimension_semantics<parallel>], iteration_bounds = array<i64: 2>, scalar_prefetch = 0 : i64, scratch_operands = 0 : i64, tpu.core_type = #tpu.core_type<tc>, window_params = [{transform_indices = @transform_0, window_bounds = array<i64: 1, 196, 288>}, {pipeline_mode = #tpu.pipeline_mode<synchronous>, transform_indices = @transform_1, window_bounds = array<i64: 288, 64>}, {pipeline_mode = #tpu.pipeline_mode<synchronous>, transform_indices = @transform_2, window_bounds = array<i64: 1, 64>}, {pipeline_mode = #tpu.pipeline_mode<synchronous>, transform_indices = @transform_3, window_bounds = array<i64: 1, 64>}, {pipeline_mode = #tpu.pipeline_mode<synchronous>, transform_indices = @transform_4, window_bounds = array<i64: 64, 64>}, {transform_indices = @transform_5, window_bounds = array<i64: 1, 196, 64>}]} {
    %c0 = arith.constant 0 : index
    %c0_0 = arith.constant 0 : index
    %c0_1 = arith.constant 0 : index
    %0 = vector.load %arg1[%c0, %c0_0, %c0_1] : memref<1x196x288xbf16, #tpu.memory_space<vmem>>, vector<1x196x288xbf16>
    %1 = vector.shape_cast %0 : vector<1x196x288xbf16> to vector<196x288xbf16>
    %c0_2 = arith.constant 0 : index
    %c0_3 = arith.constant 0 : index
    %2 = vector.load %arg2[%c0_2, %c0_3] : memref<288x64xbf16, #tpu.memory_space<vmem>>, vector<288x64xbf16>
    %cst = arith.constant dense<0.000000e+00> : vector<196x64xf32>
    %3 = tpu.matmul %1, %2, %cst {dimension_numbers = #tpu.dot_dimension_numbers<[1], [0], [0], [1], [0, 0, 1, 1], [], []>} : vector<196x288xbf16>, vector<288x64xbf16>, vector<196x64xf32> -> vector<196x64xf32>
    %cst_4 = arith.constant dense<0.000000e+00> : vector<64xf32>
    %4 = vector.multi_reduction <add>, %3, %cst_4 [0] : vector<196x64xf32> to vector<64xf32>
    %5 = vector.shape_cast %4 : vector<64xf32> to vector<1x64xf32>
    %6 = arith.mulf %3, %3 : vector<196x64xf32>
    %cst_5 = arith.constant dense<0.000000e+00> : vector<64xf32>
    %7 = vector.multi_reduction <add>, %6, %cst_5 [0] : vector<196x64xf32> to vector<64xf32>
    %8 = vector.shape_cast %7 : vector<64xf32> to vector<1x64xf32>
    %c0_6 = arith.constant 0 : index
    %c0_7 = arith.constant 0 : index
    %9 = vector.load %arg5[%c0_6, %c0_7] : memref<64x64xf32, #tpu.memory_space<vmem>>, vector<64x64xf32>
    %cst_8 = arith.constant dense<0.000000e+00> : vector<1x64xf32>
    %10 = tpu.matmul %5, %9, %cst_8 {dimension_numbers = #tpu.dot_dimension_numbers<[1], [0], [0], [1], [0, 0, 1, 1], [], []>} : vector<1x64xf32>, vector<64x64xf32>, vector<1x64xf32> -> vector<1x64xf32>
    %cst_9 = arith.constant 0.00255102036 : f32
    %11 = vector.broadcast %cst_9 : f32 to vector<1x64xf32>
    %12 = arith.mulf %10, %11 : vector<1x64xf32>
    %c0_10 = arith.constant 0 : index
    %c0_11 = arith.constant 0 : index
    %13 = vector.load %arg5[%c0_10, %c0_11] : memref<64x64xf32, #tpu.memory_space<vmem>>, vector<64x64xf32>
    %cst_12 = arith.constant dense<0.000000e+00> : vector<1x64xf32>
    %14 = tpu.matmul %8, %13, %cst_12 {dimension_numbers = #tpu.dot_dimension_numbers<[1], [0], [0], [1], [0, 0, 1, 1], [], []>} : vector<1x64xf32>, vector<64x64xf32>, vector<1x64xf32> -> vector<1x64xf32>
    %cst_13 = arith.constant 0.00255102036 : f32
    %15 = vector.broadcast %cst_13 : f32 to vector<1x64xf32>
    %16 = arith.mulf %14, %15 : vector<1x64xf32>
    %17 = arith.mulf %12, %12 : vector<1x64xf32>
    %18 = arith.subf %16, %17 : vector<1x64xf32>
    %19 = vector.broadcast %12 : vector<1x64xf32> to vector<196x64xf32>
    %20 = arith.subf %3, %19 : vector<196x64xf32>
    %cst_14 = arith.constant 9.99999974E-6 : f32
    %21 = vector.broadcast %cst_14 : f32 to vector<1x64xf32>
    %22 = arith.addf %18, %21 : vector<1x64xf32>
    %23 = math.rsqrt %22 : vector<1x64xf32>
    %24 = vector.broadcast %23 : vector<1x64xf32> to vector<196x64xf32>
    %25 = arith.mulf %20, %24 : vector<196x64xf32>
    %c0_15 = arith.constant 0 : index
    %c0_16 = arith.constant 0 : index
    %26 = vector.load %arg3[%c0_15, %c0_16] : memref<1x64xf32, #tpu.memory_space<vmem>>, vector<1x64xf32>
    %27 = vector.broadcast %26 : vector<1x64xf32> to vector<196x64xf32>
    %28 = arith.mulf %25, %27 : vector<196x64xf32>
    %c0_17 = arith.constant 0 : index
    %c0_18 = arith.constant 0 : index
    %29 = vector.load %arg4[%c0_17, %c0_18] : memref<1x64xf32, #tpu.memory_space<vmem>>, vector<1x64xf32>
    %30 = vector.broadcast %29 : vector<1x64xf32> to vector<196x64xf32>
    %31 = arith.addf %28, %30 : vector<196x64xf32>
    %cst_19 = arith.constant 0.000000e+00 : f32
    %32 = vector.broadcast %cst_19 : f32 to vector<196x64xf32>
    %33 = arith.maximumf %31, %32 : vector<196x64xf32>
    %c0_20 = arith.constant 0 : index
    %c0_21 = arith.constant 0 : index
    %c0_22 = arith.constant 0 : index
    %34 = vector.load %arg6[%c0_20, %c0_21, %c0_22] : memref<1x196x64xf32, #tpu.memory_space<vmem>>, vector<1x196x64xf32>
    %35 = vector.shape_cast %34 : vector<1x196x64xf32> to vector<196x64xf32>
    %36 = vector.shape_cast %33 : vector<196x64xf32> to vector<1x196x64xf32>
    tpu.vector_store %arg6[%c0_20, %c0_21, %c0_22], %36 {strides = array<i32>} : memref<1x196x64xf32, #tpu.memory_space<vmem>>, vector<1x196x64xf32>,
    return
  }
  func.func @transform_0(%arg0: i32) -> (i32, i32, i32) {
    %c0_i32 = arith.constant 0 : i32
    %c0_i32_0 = arith.constant 0 : i32
    %c0_i32_1 = arith.constant 0 : i32
    return %arg0, %c0_i32, %c0_i32_0 : i32, i32, i32
  }
  func.func @transform_1(%arg0: i32) -> (i32, i32) {
    %c0_i32 = arith.constant 0 : i32
    %c0_i32_0 = arith.constant 0 : i32
    %c0_i32_1 = arith.constant 0 : i32
    return %c0_i32, %c0_i32_0 : i32, i32
  }
  func.func @transform_2(%arg0: i32) -> (i32, i32) {
    %c0_i32 = arith.constant 0 : i32
    %c0_i32_0 = arith.constant 0 : i32
    %c0_i32_1 = arith.constant 0 : i32
    return %c0_i32, %c0_i32_0 : i32, i32
  }
  func.func @transform_3(%arg0: i32) -> (i32, i32) {
    %c0_i32 = arith.constant 0 : i32
    %c0_i32_0 = arith.constant 0 : i32
    %c0_i32_1 = arith.constant 0 : i32
    return %c0_i32, %c0_i32_0 : i32, i32
  }
  func.func @transform_4(%arg0: i32) -> (i32, i32) {
    %c0_i32 = arith.constant 0 : i32
    %c0_i32_0 = arith.constant 0 : i32
    %c0_i32_1 = arith.constant 0 : i32
    return %c0_i32, %c0_i32_0 : i32, i32
  }
  func.func @transform_5(%arg0: i32) -> (i32, i32, i32) {
    %c0_i32 = arith.constant 0 : i32
    %c0_i32_0 = arith.constant 0 : i32
    %c0_i32_1 = arith.constant 0 : i32
    return %arg0, %c0_i32, %c0_i32_0 : i32, i32, i32
  }
}

module attributes {stable_mosaic.version = 11 : i64} {
  func.func @conv_gn_relu_kernel(%arg0: i32, %arg1: memref<1x36x576xbf16, #tpu.memory_space<vmem>>, %arg2: memref<576x128xbf16, #tpu.memory_space<vmem>>, %arg3: memref<1x128xf32, #tpu.memory_space<vmem>>, %arg4: memref<1x128xf32, #tpu.memory_space<vmem>>, %arg5: memref<128x128xf32, #tpu.memory_space<vmem>>, %arg6: memref<1x36x128xf32, #tpu.memory_space<vmem>>) attributes {dimension_semantics = [#tpu.dimension_semantics<parallel>], iteration_bounds = array<i64: 2>, scalar_prefetch = 0 : i64, scratch_operands = 0 : i64, tpu.core_type = #tpu.core_type<tc>, window_params = [{transform_indices = @transform_0, window_bounds = array<i64: 1, 36, 576>}, {pipeline_mode = #tpu.pipeline_mode<synchronous>, transform_indices = @transform_1, window_bounds = array<i64: 576, 128>}, {pipeline_mode = #tpu.pipeline_mode<synchronous>, transform_indices = @transform_2, window_bounds = array<i64: 1, 128>}, {pipeline_mode = #tpu.pipeline_mode<synchronous>, transform_indices = @transform_3, window_bounds = array<i64: 1, 128>}, {pipeline_mode = #tpu.pipeline_mode<synchronous>, transform_indices = @transform_4, window_bounds = array<i64: 128, 128>}, {transform_indices = @transform_5, window_bounds = array<i64: 1, 36, 128>}]} {
    %c0 = arith.constant 0 : index
    %c0_0 = arith.constant 0 : index
    %c0_1 = arith.constant 0 : index
    %0 = vector.load %arg1[%c0, %c0_0, %c0_1] : memref<1x36x576xbf16, #tpu.memory_space<vmem>>, vector<1x36x576xbf16>
    %1 = vector.shape_cast %0 : vector<1x36x576xbf16> to vector<36x576xbf16>
    %c0_2 = arith.constant 0 : index
    %c0_3 = arith.constant 0 : index
    %2 = vector.load %arg2[%c0_2, %c0_3] : memref<576x128xbf16, #tpu.memory_space<vmem>>, vector<576x128xbf16>
    %cst = arith.constant dense<0.000000e+00> : vector<36x128xf32>
    %3 = tpu.matmul %1, %2, %cst {dimension_numbers = #tpu.dot_dimension_numbers<[1], [0], [0], [1], [0, 0, 1, 1], [], []>} : vector<36x576xbf16>, vector<576x128xbf16>, vector<36x128xf32> -> vector<36x128xf32>
    %cst_4 = arith.constant dense<0.000000e+00> : vector<128xf32>
    %4 = vector.multi_reduction <add>, %3, %cst_4 [0] : vector<36x128xf32> to vector<128xf32>
    %5 = vector.shape_cast %4 : vector<128xf32> to vector<1x128xf32>
    %6 = arith.mulf %3, %3 : vector<36x128xf32>
    %cst_5 = arith.constant dense<0.000000e+00> : vector<128xf32>
    %7 = vector.multi_reduction <add>, %6, %cst_5 [0] : vector<36x128xf32> to vector<128xf32>
    %8 = vector.shape_cast %7 : vector<128xf32> to vector<1x128xf32>
    %c0_6 = arith.constant 0 : index
    %c0_7 = arith.constant 0 : index
    %9 = vector.load %arg5[%c0_6, %c0_7] : memref<128x128xf32, #tpu.memory_space<vmem>>, vector<128x128xf32>
    %cst_8 = arith.constant dense<0.000000e+00> : vector<1x128xf32>
    %10 = tpu.matmul %5, %9, %cst_8 {dimension_numbers = #tpu.dot_dimension_numbers<[1], [0], [0], [1], [0, 0, 1, 1], [], []>} : vector<1x128xf32>, vector<128x128xf32>, vector<1x128xf32> -> vector<1x128xf32>
    %cst_9 = arith.constant 0.0069444445 : f32
    %11 = vector.broadcast %cst_9 : f32 to vector<1x128xf32>
    %12 = arith.mulf %10, %11 : vector<1x128xf32>
    %c0_10 = arith.constant 0 : index
    %c0_11 = arith.constant 0 : index
    %13 = vector.load %arg5[%c0_10, %c0_11] : memref<128x128xf32, #tpu.memory_space<vmem>>, vector<128x128xf32>
    %cst_12 = arith.constant dense<0.000000e+00> : vector<1x128xf32>
    %14 = tpu.matmul %8, %13, %cst_12 {dimension_numbers = #tpu.dot_dimension_numbers<[1], [0], [0], [1], [0, 0, 1, 1], [], []>} : vector<1x128xf32>, vector<128x128xf32>, vector<1x128xf32> -> vector<1x128xf32>
    %cst_13 = arith.constant 0.0069444445 : f32
    %15 = vector.broadcast %cst_13 : f32 to vector<1x128xf32>
    %16 = arith.mulf %14, %15 : vector<1x128xf32>
    %17 = arith.mulf %12, %12 : vector<1x128xf32>
    %18 = arith.subf %16, %17 : vector<1x128xf32>
    %19 = vector.broadcast %12 : vector<1x128xf32> to vector<36x128xf32>
    %20 = arith.subf %3, %19 : vector<36x128xf32>
    %cst_14 = arith.constant 9.99999974E-6 : f32
    %21 = vector.broadcast %cst_14 : f32 to vector<1x128xf32>
    %22 = arith.addf %18, %21 : vector<1x128xf32>
    %23 = math.rsqrt %22 : vector<1x128xf32>
    %24 = vector.broadcast %23 : vector<1x128xf32> to vector<36x128xf32>
    %25 = arith.mulf %20, %24 : vector<36x128xf32>
    %c0_15 = arith.constant 0 : index
    %c0_16 = arith.constant 0 : index
    %26 = vector.load %arg3[%c0_15, %c0_16] : memref<1x128xf32, #tpu.memory_space<vmem>>, vector<1x128xf32>
    %27 = vector.broadcast %26 : vector<1x128xf32> to vector<36x128xf32>
    %28 = arith.mulf %25, %27 : vector<36x128xf32>
    %c0_17 = arith.constant 0 : index
    %c0_18 = arith.constant 0 : index
    %29 = vector.load %arg4[%c0_17, %c0_18] : memref<1x128xf32, #tpu.memory_space<vmem>>, vector<1x128xf32>
    %30 = vector.broadcast %29 : vector<1x128xf32> to vector<36x128xf32>
    %31 = arith.addf %28, %30 : vector<36x128xf32>
    %cst_19 = arith.constant 0.000000e+00 : f32
    %32 = vector.broadcast %cst_19 : f32 to vector<36x128xf32>
    %33 = arith.maximumf %31, %32 : vector<36x128xf32>
    %c0_20 = arith.constant 0 : index
    %c0_21 = arith.constant 0 : index
    %c0_22 = arith.constant 0 : index
    %34 = vector.load %arg6[%c0_20, %c0_21, %c0_22] : memref<1x36x128xf32, #tpu.memory_space<vmem>>, vector<1x36x128xf32>
    %35 = vector.shape_cast %34 : vector<1x36x128xf32> to vector<36x128xf32>
    %36 = vector.shape_cast %33 : vector<36x128xf32> to vector<1x36x128xf32>
    tpu.vector_store %arg6[%c0_20, %c0_21, %c0_22], %36 {strides = array<i32>} : memref<1x36x128xf32, #tpu.memory_space<vmem>>, vector<1x36x128xf32>,
    return
  }
  func.func @transform_0(%arg0: i32) -> (i32, i32, i32) {
    %c0_i32 = arith.constant 0 : i32
    %c0_i32_0 = arith.constant 0 : i32
    %c0_i32_1 = arith.constant 0 : i32
    return %arg0, %c0_i32, %c0_i32_0 : i32, i32, i32
  }
  func.func @transform_1(%arg0: i32) -> (i32, i32) {
    %c0_i32 = arith.constant 0 : i32
    %c0_i32_0 = arith.constant 0 : i32
    %c0_i32_1 = arith.constant 0 : i32
    return %c0_i32, %c0_i32_0 : i32, i32
  }
  func.func @transform_2(%arg0: i32) -> (i32, i32) {
    %c0_i32 = arith.constant 0 : i32
    %c0_i32_0 = arith.constant 0 : i32
    %c0_i32_1 = arith.constant 0 : i32
    return %c0_i32, %c0_i32_0 : i32, i32
  }
  func.func @transform_3(%arg0: i32) -> (i32, i32) {
    %c0_i32 = arith.constant 0 : i32
    %c0_i32_0 = arith.constant 0 : i32
    %c0_i32_1 = arith.constant 0 : i32
    return %c0_i32, %c0_i32_0 : i32, i32
  }
  func.func @transform_4(%arg0: i32) -> (i32, i32) {
    %c0_i32 = arith.constant 0 : i32
    %c0_i32_0 = arith.constant 0 : i32
    %c0_i32_1 = arith.constant 0 : i32
    return %c0_i32, %c0_i32_0 : i32, i32
  }
  func.func @transform_5(%arg0: i32) -> (i32, i32, i32) {
    %c0_i32 = arith.constant 0 : i32
    %c0_i32_0 = arith.constant 0 : i32
    %c0_i32_1 = arith.constant 0 : i32
    return %arg0, %c0_i32, %c0_i32_0 : i32, i32, i32
  }
}

module attributes {stable_mosaic.version = 11 : i64} {
  func.func @conv_gn_relu_kernel(%arg0: i32, %arg1: memref<1x4x1152xbf16, #tpu.memory_space<vmem>>, %arg2: memref<1152x256xbf16, #tpu.memory_space<vmem>>, %arg3: memref<1x256xf32, #tpu.memory_space<vmem>>, %arg4: memref<1x256xf32, #tpu.memory_space<vmem>>, %arg5: memref<256x256xf32, #tpu.memory_space<vmem>>, %arg6: memref<1x4x256xf32, #tpu.memory_space<vmem>>) attributes {dimension_semantics = [#tpu.dimension_semantics<parallel>], iteration_bounds = array<i64: 2>, scalar_prefetch = 0 : i64, scratch_operands = 0 : i64, tpu.core_type = #tpu.core_type<tc>, window_params = [{transform_indices = @transform_0, window_bounds = array<i64: 1, 4, 1152>}, {pipeline_mode = #tpu.pipeline_mode<synchronous>, transform_indices = @transform_1, window_bounds = array<i64: 1152, 256>}, {pipeline_mode = #tpu.pipeline_mode<synchronous>, transform_indices = @transform_2, window_bounds = array<i64: 1, 256>}, {pipeline_mode = #tpu.pipeline_mode<synchronous>, transform_indices = @transform_3, window_bounds = array<i64: 1, 256>}, {pipeline_mode = #tpu.pipeline_mode<synchronous>, transform_indices = @transform_4, window_bounds = array<i64: 256, 256>}, {transform_indices = @transform_5, window_bounds = array<i64: 1, 4, 256>}]} {
    %c0 = arith.constant 0 : index
    %c0_0 = arith.constant 0 : index
    %c0_1 = arith.constant 0 : index
    %0 = vector.load %arg1[%c0, %c0_0, %c0_1] : memref<1x4x1152xbf16, #tpu.memory_space<vmem>>, vector<1x4x1152xbf16>
    %1 = vector.shape_cast %0 : vector<1x4x1152xbf16> to vector<4x1152xbf16>
    %c0_2 = arith.constant 0 : index
    %c0_3 = arith.constant 0 : index
    %2 = vector.load %arg2[%c0_2, %c0_3] : memref<1152x256xbf16, #tpu.memory_space<vmem>>, vector<1152x256xbf16>
    %cst = arith.constant dense<0.000000e+00> : vector<4x256xf32>
    %3 = tpu.matmul %1, %2, %cst {dimension_numbers = #tpu.dot_dimension_numbers<[1], [0], [0], [1], [0, 0, 1, 1], [], []>} : vector<4x1152xbf16>, vector<1152x256xbf16>, vector<4x256xf32> -> vector<4x256xf32>
    %cst_4 = arith.constant dense<0.000000e+00> : vector<256xf32>
    %4 = vector.multi_reduction <add>, %3, %cst_4 [0] : vector<4x256xf32> to vector<256xf32>
    %5 = vector.shape_cast %4 : vector<256xf32> to vector<1x256xf32>
    %6 = arith.mulf %3, %3 : vector<4x256xf32>
    %cst_5 = arith.constant dense<0.000000e+00> : vector<256xf32>
    %7 = vector.multi_reduction <add>, %6, %cst_5 [0] : vector<4x256xf32> to vector<256xf32>
    %8 = vector.shape_cast %7 : vector<256xf32> to vector<1x256xf32>
    %c0_6 = arith.constant 0 : index
    %c0_7 = arith.constant 0 : index
    %9 = vector.load %arg5[%c0_6, %c0_7] : memref<256x256xf32, #tpu.memory_space<vmem>>, vector<256x256xf32>
    %cst_8 = arith.constant dense<0.000000e+00> : vector<1x256xf32>
    %10 = tpu.matmul %5, %9, %cst_8 {dimension_numbers = #tpu.dot_dimension_numbers<[1], [0], [0], [1], [0, 0, 1, 1], [], []>} : vector<1x256xf32>, vector<256x256xf32>, vector<1x256xf32> -> vector<1x256xf32>
    %cst_9 = arith.constant 3.125000e-02 : f32
    %11 = vector.broadcast %cst_9 : f32 to vector<1x256xf32>
    %12 = arith.mulf %10, %11 : vector<1x256xf32>
    %c0_10 = arith.constant 0 : index
    %c0_11 = arith.constant 0 : index
    %13 = vector.load %arg5[%c0_10, %c0_11] : memref<256x256xf32, #tpu.memory_space<vmem>>, vector<256x256xf32>
    %cst_12 = arith.constant dense<0.000000e+00> : vector<1x256xf32>
    %14 = tpu.matmul %8, %13, %cst_12 {dimension_numbers = #tpu.dot_dimension_numbers<[1], [0], [0], [1], [0, 0, 1, 1], [], []>} : vector<1x256xf32>, vector<256x256xf32>, vector<1x256xf32> -> vector<1x256xf32>
    %cst_13 = arith.constant 3.125000e-02 : f32
    %15 = vector.broadcast %cst_13 : f32 to vector<1x256xf32>
    %16 = arith.mulf %14, %15 : vector<1x256xf32>
    %17 = arith.mulf %12, %12 : vector<1x256xf32>
    %18 = arith.subf %16, %17 : vector<1x256xf32>
    %19 = vector.broadcast %12 : vector<1x256xf32> to vector<4x256xf32>
    %20 = arith.subf %3, %19 : vector<4x256xf32>
    %cst_14 = arith.constant 9.99999974E-6 : f32
    %21 = vector.broadcast %cst_14 : f32 to vector<1x256xf32>
    %22 = arith.addf %18, %21 : vector<1x256xf32>
    %23 = math.rsqrt %22 : vector<1x256xf32>
    %24 = vector.broadcast %23 : vector<1x256xf32> to vector<4x256xf32>
    %25 = arith.mulf %20, %24 : vector<4x256xf32>
    %c0_15 = arith.constant 0 : index
    %c0_16 = arith.constant 0 : index
    %26 = vector.load %arg3[%c0_15, %c0_16] : memref<1x256xf32, #tpu.memory_space<vmem>>, vector<1x256xf32>
    %27 = vector.broadcast %26 : vector<1x256xf32> to vector<4x256xf32>
    %28 = arith.mulf %25, %27 : vector<4x256xf32>
    %c0_17 = arith.constant 0 : index
    %c0_18 = arith.constant 0 : index
    %29 = vector.load %arg4[%c0_17, %c0_18] : memref<1x256xf32, #tpu.memory_space<vmem>>, vector<1x256xf32>
    %30 = vector.broadcast %29 : vector<1x256xf32> to vector<4x256xf32>
    %31 = arith.addf %28, %30 : vector<4x256xf32>
    %cst_19 = arith.constant 0.000000e+00 : f32
    %32 = vector.broadcast %cst_19 : f32 to vector<4x256xf32>
    %33 = arith.maximumf %31, %32 : vector<4x256xf32>
    %c0_20 = arith.constant 0 : index
    %c0_21 = arith.constant 0 : index
    %c0_22 = arith.constant 0 : index
    %34 = vector.load %arg6[%c0_20, %c0_21, %c0_22] : memref<1x4x256xf32, #tpu.memory_space<vmem>>, vector<1x4x256xf32>
    %35 = vector.shape_cast %34 : vector<1x4x256xf32> to vector<4x256xf32>
    %36 = vector.shape_cast %33 : vector<4x256xf32> to vector<1x4x256xf32>
    tpu.vector_store %arg6[%c0_20, %c0_21, %c0_22], %36 {strides = array<i32>} : memref<1x4x256xf32, #tpu.memory_space<vmem>>, vector<1x4x256xf32>,
    return
  }
  func.func @transform_0(%arg0: i32) -> (i32, i32, i32) {
    %c0_i32 = arith.constant 0 : i32
    %c0_i32_0 = arith.constant 0 : i32
    %c0_i32_1 = arith.constant 0 : i32
    return %arg0, %c0_i32, %c0_i32_0 : i32, i32, i32
  }
  func.func @transform_1(%arg0: i32) -> (i32, i32) {
    %c0_i32 = arith.constant 0 : i32
    %c0_i32_0 = arith.constant 0 : i32
    %c0_i32_1 = arith.constant 0 : i32
    return %c0_i32, %c0_i32_0 : i32, i32
  }
  func.func @transform_2(%arg0: i32) -> (i32, i32) {
    %c0_i32 = arith.constant 0 : i32
    %c0_i32_0 = arith.constant 0 : i32
    %c0_i32_1 = arith.constant 0 : i32
    return %c0_i32, %c0_i32_0 : i32, i32
  }
  func.func @transform_3(%arg0: i32) -> (i32, i32) {
    %c0_i32 = arith.constant 0 : i32
    %c0_i32_0 = arith.constant 0 : i32
    %c0_i32_1 = arith.constant 0 : i32
    return %c0_i32, %c0_i32_0 : i32, i32
  }
  func.func @transform_4(%arg0: i32) -> (i32, i32) {
    %c0_i32 = arith.constant 0 : i32
    %c0_i32_0 = arith.constant 0 : i32
    %c0_i32_1 = arith.constant 0 : i32
    return %c0_i32, %c0_i32_0 : i32, i32
  }
  func.func @transform_5(%arg0: i32) -> (i32, i32, i32) {
    %c0_i32 = arith.constant 0 : i32
    %c0_i32_0 = arith.constant 0 : i32
    %c0_i32_1 = arith.constant 0 : i32
    return %arg0, %c0_i32, %c0_i32_0 : i32, i32, i32
  }
}

module attributes {stable_mosaic.version = 11 : i64} {
  func.func @dense_stack_kernel(%arg0: i32, %arg1: memref<2x1024xf32, #tpu.memory_space<vmem>>, %arg2: memref<1024x512xbf16, #tpu.memory_space<vmem>>, %arg3: memref<1x512xf32, #tpu.memory_space<vmem>>, %arg4: memref<512x256xbf16, #tpu.memory_space<vmem>>, %arg5: memref<1x256xf32, #tpu.memory_space<vmem>>, %arg6: memref<256x128xbf16, #tpu.memory_space<vmem>>, %arg7: memref<1x128xf32, #tpu.memory_space<vmem>>, %arg8: memref<128x256xbf16, #tpu.memory_space<vmem>>, %arg9: memref<1x256xf32, #tpu.memory_space<vmem>>, %arg10: memref<2x128xf32, #tpu.memory_space<vmem>>, %arg11: memref<128x128xbf16, #tpu.memory_space<vmem>>, %arg12: memref<1x128xf32, #tpu.memory_space<vmem>>, %arg13: memref<128x256xbf16, #tpu.memory_space<vmem>>, %arg14: memref<1x256xf32, #tpu.memory_space<vmem>>, %arg15: memref<256x512xbf16, #tpu.memory_space<vmem>>, %arg16: memref<1x512xf32, #tpu.memory_space<vmem>>, %arg17: memref<512x1024xbf16, #tpu.memory_space<vmem>>, %arg18: memref<1x1024xf32, #tpu.memory_space<vmem>>, %arg19: memref<2x1024xf32, #tpu.memory_space<vmem>>) attributes {dimension_semantics = [#tpu.dimension_semantics<arbitrary>], iteration_bounds = array<i64: 1>, scalar_prefetch = 0 : i64, scratch_operands = 0 : i64, tpu.core_type = #tpu.core_type<tc>, window_params = [{pipeline_mode = #tpu.pipeline_mode<synchronous>, transform_indices = @transform_0, window_bounds = array<i64: 2, 1024>}, {pipeline_mode = #tpu.pipeline_mode<synchronous>, transform_indices = @transform_1, window_bounds = array<i64: 1024, 512>}, {pipeline_mode = #tpu.pipeline_mode<synchronous>, transform_indices = @transform_2, window_bounds = array<i64: 1, 512>}, {pipeline_mode = #tpu.pipeline_mode<synchronous>, transform_indices = @transform_3, window_bounds = array<i64: 512, 256>}, {pipeline_mode = #tpu.pipeline_mode<synchronous>, transform_indices = @transform_4, window_bounds = array<i64: 1, 256>}, {pipeline_mode = #tpu.pipeline_mode<synchronous>, transform_indices = @transform_5, window_bounds = array<i64: 256, 128>}, {pipeline_mode = #tpu.pipeline_mode<synchronous>, transform_indices = @transform_6, window_bounds = array<i64: 1, 128>}, {pipeline_mode = #tpu.pipeline_mode<synchronous>, transform_indices = @transform_7, window_bounds = array<i64: 128, 256>}, {pipeline_mode = #tpu.pipeline_mode<synchronous>, transform_indices = @transform_8, window_bounds = array<i64: 1, 256>}, {pipeline_mode = #tpu.pipeline_mode<synchronous>, transform_indices = @transform_9, window_bounds = array<i64: 2, 128>}, {pipeline_mode = #tpu.pipeline_mode<synchronous>, transform_indices = @transform_10, window_bounds = array<i64: 128, 128>}, {pipeline_mode = #tpu.pipeline_mode<synchronous>, transform_indices = @transform_11, window_bounds = array<i64: 1, 128>}, {pipeline_mode = #tpu.pipeline_mode<synchronous>, transform_indices = @transform_12, window_bounds = array<i64: 128, 256>}, {pipeline_mode = #tpu.pipeline_mode<synchronous>, transform_indices = @transform_13, window_bounds = array<i64: 1, 256>}, {pipeline_mode = #tpu.pipeline_mode<synchronous>, transform_indices = @transform_14, window_bounds = array<i64: 256, 512>}, {pipeline_mode = #tpu.pipeline_mode<synchronous>, transform_indices = @transform_15, window_bounds = array<i64: 1, 512>}, {pipeline_mode = #tpu.pipeline_mode<synchronous>, transform_indices = @transform_16, window_bounds = array<i64: 512, 1024>}, {pipeline_mode = #tpu.pipeline_mode<synchronous>, transform_indices = @transform_17, window_bounds = array<i64: 1, 1024>}, {pipeline_mode = #tpu.pipeline_mode<synchronous>, transform_indices = @transform_18, window_bounds = array<i64: 2, 1024>}]} {
    %c0 = arith.constant 0 : index
    %c0_0 = arith.constant 0 : index
    %0 = vector.load %arg1[%c0, %c0_0] : memref<2x1024xf32, #tpu.memory_space<vmem>>, vector<2x1024xf32>
    %1 = arith.truncf %0 : vector<2x1024xf32> to vector<2x1024xbf16>
    %c0_1 = arith.constant 0 : index
    %c0_2 = arith.constant 0 : index
    %2 = vector.load %arg2[%c0_1, %c0_2] : memref<1024x512xbf16, #tpu.memory_space<vmem>>, vector<1024x512xbf16>
    %cst = arith.constant dense<0.000000e+00> : vector<2x512xf32>
    %3 = tpu.matmul %1, %2, %cst {dimension_numbers = #tpu.dot_dimension_numbers<[1], [0], [0], [1], [0, 0, 1, 1], [], []>} : vector<2x1024xbf16>, vector<1024x512xbf16>, vector<2x512xf32> -> vector<2x512xf32>
    %c0_3 = arith.constant 0 : index
    %c0_4 = arith.constant 0 : index
    %4 = vector.load %arg3[%c0_3, %c0_4] : memref<1x512xf32, #tpu.memory_space<vmem>>, vector<1x512xf32>
    %5 = vector.broadcast %4 : vector<1x512xf32> to vector<2x512xf32>
    %6 = arith.addf %3, %5 : vector<2x512xf32>
    %7 = math.absf %6 : vector<2x512xf32>
    %cst_5 = arith.constant 0.000000e+00 : f32
    %8 = vector.broadcast %cst_5 : f32 to vector<2x512xf32>
    %9 = arith.subf %8, %7 : vector<2x512xf32>
    %10 = math.exp %9 : vector<2x512xf32>
    %cst_6 = arith.constant 0.000000e+00 : f32
    %11 = vector.broadcast %cst_6 : f32 to vector<2x512xf32>
    %12 = arith.cmpf oge, %6, %11 : vector<2x512xf32>
    %cst_7 = arith.constant 1.000000e+00 : f32
    %13 = vector.broadcast %cst_7 : f32 to vector<2x512xf32>
    %14 = arith.addf %13, %10 : vector<2x512xf32>
    %cst_8 = arith.constant 1.000000e+00 : f32
    %15 = vector.broadcast %cst_8 : f32 to vector<2x512xf32>
    %16 = arith.divf %15, %14 : vector<2x512xf32>
    %cst_9 = arith.constant 1.000000e+00 : f32
    %17 = vector.broadcast %cst_9 : f32 to vector<2x512xf32>
    %18 = arith.addf %17, %10 : vector<2x512xf32>
    %19 = arith.divf %10, %18 : vector<2x512xf32>
    %20 = arith.select %12, %16, %19 : vector<2x512xi1>, vector<2x512xf32>
    %21 = arith.mulf %6, %20 : vector<2x512xf32>
    %22 = arith.truncf %21 : vector<2x512xf32> to vector<2x512xbf16>
    %c0_10 = arith.constant 0 : index
    %c0_11 = arith.constant 0 : index
    %23 = vector.load %arg4[%c0_10, %c0_11] : memref<512x256xbf16, #tpu.memory_space<vmem>>, vector<512x256xbf16>
    %cst_12 = arith.constant dense<0.000000e+00> : vector<2x256xf32>
    %24 = tpu.matmul %22, %23, %cst_12 {dimension_numbers = #tpu.dot_dimension_numbers<[1], [0], [0], [1], [0, 0, 1, 1], [], []>} : vector<2x512xbf16>, vector<512x256xbf16>, vector<2x256xf32> -> vector<2x256xf32>
    %c0_13 = arith.constant 0 : index
    %c0_14 = arith.constant 0 : index
    %25 = vector.load %arg5[%c0_13, %c0_14] : memref<1x256xf32, #tpu.memory_space<vmem>>, vector<1x256xf32>
    %26 = vector.broadcast %25 : vector<1x256xf32> to vector<2x256xf32>
    %27 = arith.addf %24, %26 : vector<2x256xf32>
    %28 = math.absf %27 : vector<2x256xf32>
    %cst_15 = arith.constant 0.000000e+00 : f32
    %29 = vector.broadcast %cst_15 : f32 to vector<2x256xf32>
    %30 = arith.subf %29, %28 : vector<2x256xf32>
    %31 = math.exp %30 : vector<2x256xf32>
    %cst_16 = arith.constant 0.000000e+00 : f32
    %32 = vector.broadcast %cst_16 : f32 to vector<2x256xf32>
    %33 = arith.cmpf oge, %27, %32 : vector<2x256xf32>
    %cst_17 = arith.constant 1.000000e+00 : f32
    %34 = vector.broadcast %cst_17 : f32 to vector<2x256xf32>
    %35 = arith.addf %34, %31 : vector<2x256xf32>
    %cst_18 = arith.constant 1.000000e+00 : f32
    %36 = vector.broadcast %cst_18 : f32 to vector<2x256xf32>
    %37 = arith.divf %36, %35 : vector<2x256xf32>
    %cst_19 = arith.constant 1.000000e+00 : f32
    %38 = vector.broadcast %cst_19 : f32 to vector<2x256xf32>
    %39 = arith.addf %38, %31 : vector<2x256xf32>
    %40 = arith.divf %31, %39 : vector<2x256xf32>
    %41 = arith.select %33, %37, %40 : vector<2x256xi1>, vector<2x256xf32>
    %42 = arith.mulf %27, %41 : vector<2x256xf32>
    %43 = arith.truncf %42 : vector<2x256xf32> to vector<2x256xbf16>
    %c0_20 = arith.constant 0 : index
    %c0_21 = arith.constant 0 : index
    %44 = vector.load %arg6[%c0_20, %c0_21] : memref<256x128xbf16, #tpu.memory_space<vmem>>, vector<256x128xbf16>
    %cst_22 = arith.constant dense<0.000000e+00> : vector<2x128xf32>
    %45 = tpu.matmul %43, %44, %cst_22 {dimension_numbers = #tpu.dot_dimension_numbers<[1], [0], [0], [1], [0, 0, 1, 1], [], []>} : vector<2x256xbf16>, vector<256x128xbf16>, vector<2x128xf32> -> vector<2x128xf32>
    %c0_23 = arith.constant 0 : index
    %c0_24 = arith.constant 0 : index
    %46 = vector.load %arg7[%c0_23, %c0_24] : memref<1x128xf32, #tpu.memory_space<vmem>>, vector<1x128xf32>
    %47 = vector.broadcast %46 : vector<1x128xf32> to vector<2x128xf32>
    %48 = arith.addf %45, %47 : vector<2x128xf32>
    %49 = math.absf %48 : vector<2x128xf32>
    %cst_25 = arith.constant 0.000000e+00 : f32
    %50 = vector.broadcast %cst_25 : f32 to vector<2x128xf32>
    %51 = arith.subf %50, %49 : vector<2x128xf32>
    %52 = math.exp %51 : vector<2x128xf32>
    %cst_26 = arith.constant 0.000000e+00 : f32
    %53 = vector.broadcast %cst_26 : f32 to vector<2x128xf32>
    %54 = arith.cmpf oge, %48, %53 : vector<2x128xf32>
    %cst_27 = arith.constant 1.000000e+00 : f32
    %55 = vector.broadcast %cst_27 : f32 to vector<2x128xf32>
    %56 = arith.addf %55, %52 : vector<2x128xf32>
    %cst_28 = arith.constant 1.000000e+00 : f32
    %57 = vector.broadcast %cst_28 : f32 to vector<2x128xf32>
    %58 = arith.divf %57, %56 : vector<2x128xf32>
    %cst_29 = arith.constant 1.000000e+00 : f32
    %59 = vector.broadcast %cst_29 : f32 to vector<2x128xf32>
    %60 = arith.addf %59, %52 : vector<2x128xf32>
    %61 = arith.divf %52, %60 : vector<2x128xf32>
    %62 = arith.select %54, %58, %61 : vector<2x128xi1>, vector<2x128xf32>
    %63 = arith.mulf %48, %62 : vector<2x128xf32>
    %64 = arith.truncf %63 : vector<2x128xf32> to vector<2x128xbf16>
    %c0_30 = arith.constant 0 : index
    %c0_31 = arith.constant 0 : index
    %65 = vector.load %arg8[%c0_30, %c0_31] : memref<128x256xbf16, #tpu.memory_space<vmem>>, vector<128x256xbf16>
    %cst_32 = arith.constant dense<0.000000e+00> : vector<2x256xf32>
    %66 = tpu.matmul %64, %65, %cst_32 {dimension_numbers = #tpu.dot_dimension_numbers<[1], [0], [0], [1], [0, 0, 1, 1], [], []>} : vector<2x128xbf16>, vector<128x256xbf16>, vector<2x256xf32> -> vector<2x256xf32>
    %c0_33 = arith.constant 0 : index
    %c0_34 = arith.constant 0 : index
    %67 = vector.load %arg9[%c0_33, %c0_34] : memref<1x256xf32, #tpu.memory_space<vmem>>, vector<1x256xf32>
    %68 = vector.broadcast %67 : vector<1x256xf32> to vector<2x256xf32>
    %69 = arith.addf %66, %68 : vector<2x256xf32>
    %70 = vector.extract_strided_slice %69 {offsets = [0, 0], sizes = [2, 128], strides = [1, 1]} : vector<2x256xf32> to vector<2x128xf32>
    %71 = vector.extract_strided_slice %69 {offsets = [0, 128], sizes = [2, 128], strides = [1, 1]} : vector<2x256xf32> to vector<2x128xf32>
    %72 = math.exp %71 : vector<2x128xf32>
    %c0_35 = arith.constant 0 : index
    %c0_36 = arith.constant 0 : index
    %73 = vector.load %arg10[%c0_35, %c0_36] : memref<2x128xf32, #tpu.memory_space<vmem>>, vector<2x128xf32>
    %74 = arith.mulf %72, %73 : vector<2x128xf32>
    %75 = arith.addf %70, %74 : vector<2x128xf32>
    %76 = arith.truncf %75 : vector<2x128xf32> to vector<2x128xbf16>
    %c0_37 = arith.constant 0 : index
    %c0_38 = arith.constant 0 : index
    %77 = vector.load %arg11[%c0_37, %c0_38] : memref<128x128xbf16, #tpu.memory_space<vmem>>, vector<128x128xbf16>
    %cst_39 = arith.constant dense<0.000000e+00> : vector<2x128xf32>
    %78 = tpu.matmul %76, %77, %cst_39 {dimension_numbers = #tpu.dot_dimension_numbers<[1], [0], [0], [1], [0, 0, 1, 1], [], []>} : vector<2x128xbf16>, vector<128x128xbf16>, vector<2x128xf32> -> vector<2x128xf32>
    %c0_40 = arith.constant 0 : index
    %c0_41 = arith.constant 0 : index
    %79 = vector.load %arg12[%c0_40, %c0_41] : memref<1x128xf32, #tpu.memory_space<vmem>>, vector<1x128xf32>
    %80 = vector.broadcast %79 : vector<1x128xf32> to vector<2x128xf32>
    %81 = arith.addf %78, %80 : vector<2x128xf32>
    %82 = math.absf %81 : vector<2x128xf32>
    %cst_42 = arith.constant 0.000000e+00 : f32
    %83 = vector.broadcast %cst_42 : f32 to vector<2x128xf32>
    %84 = arith.subf %83, %82 : vector<2x128xf32>
    %85 = math.exp %84 : vector<2x128xf32>
    %cst_43 = arith.constant 0.000000e+00 : f32
    %86 = vector.broadcast %cst_43 : f32 to vector<2x128xf32>
    %87 = arith.cmpf oge, %81, %86 : vector<2x128xf32>
    %cst_44 = arith.constant 1.000000e+00 : f32
    %88 = vector.broadcast %cst_44 : f32 to vector<2x128xf32>
    %89 = arith.addf %88, %85 : vector<2x128xf32>
    %cst_45 = arith.constant 1.000000e+00 : f32
    %90 = vector.broadcast %cst_45 : f32 to vector<2x128xf32>
    %91 = arith.divf %90, %89 : vector<2x128xf32>
    %cst_46 = arith.constant 1.000000e+00 : f32
    %92 = vector.broadcast %cst_46 : f32 to vector<2x128xf32>
    %93 = arith.addf %92, %85 : vector<2x128xf32>
    %94 = arith.divf %85, %93 : vector<2x128xf32>
    %95 = arith.select %87, %91, %94 : vector<2x128xi1>, vector<2x128xf32>
    %96 = arith.mulf %81, %95 : vector<2x128xf32>
    %97 = arith.truncf %96 : vector<2x128xf32> to vector<2x128xbf16>
    %c0_47 = arith.constant 0 : index
    %c0_48 = arith.constant 0 : index
    %98 = vector.load %arg13[%c0_47, %c0_48] : memref<128x256xbf16, #tpu.memory_space<vmem>>, vector<128x256xbf16>
    %cst_49 = arith.constant dense<0.000000e+00> : vector<2x256xf32>
    %99 = tpu.matmul %97, %98, %cst_49 {dimension_numbers = #tpu.dot_dimension_numbers<[1], [0], [0], [1], [0, 0, 1, 1], [], []>} : vector<2x128xbf16>, vector<128x256xbf16>, vector<2x256xf32> -> vector<2x256xf32>
    %c0_50 = arith.constant 0 : index
    %c0_51 = arith.constant 0 : index
    %100 = vector.load %arg14[%c0_50, %c0_51] : memref<1x256xf32, #tpu.memory_space<vmem>>, vector<1x256xf32>
    %101 = vector.broadcast %100 : vector<1x256xf32> to vector<2x256xf32>
    %102 = arith.addf %99, %101 : vector<2x256xf32>
    %103 = math.absf %102 : vector<2x256xf32>
    %cst_52 = arith.constant 0.000000e+00 : f32
    %104 = vector.broadcast %cst_52 : f32 to vector<2x256xf32>
    %105 = arith.subf %104, %103 : vector<2x256xf32>
    %106 = math.exp %105 : vector<2x256xf32>
    %cst_53 = arith.constant 0.000000e+00 : f32
    %107 = vector.broadcast %cst_53 : f32 to vector<2x256xf32>
    %108 = arith.cmpf oge, %102, %107 : vector<2x256xf32>
    %cst_54 = arith.constant 1.000000e+00 : f32
    %109 = vector.broadcast %cst_54 : f32 to vector<2x256xf32>
    %110 = arith.addf %109, %106 : vector<2x256xf32>
    %cst_55 = arith.constant 1.000000e+00 : f32
    %111 = vector.broadcast %cst_55 : f32 to vector<2x256xf32>
    %112 = arith.divf %111, %110 : vector<2x256xf32>
    %cst_56 = arith.constant 1.000000e+00 : f32
    %113 = vector.broadcast %cst_56 : f32 to vector<2x256xf32>
    %114 = arith.addf %113, %106 : vector<2x256xf32>
    %115 = arith.divf %106, %114 : vector<2x256xf32>
    %116 = arith.select %108, %112, %115 : vector<2x256xi1>, vector<2x256xf32>
    %117 = arith.mulf %102, %116 : vector<2x256xf32>
    %118 = arith.truncf %117 : vector<2x256xf32> to vector<2x256xbf16>
    %c0_57 = arith.constant 0 : index
    %c0_58 = arith.constant 0 : index
    %119 = vector.load %arg15[%c0_57, %c0_58] : memref<256x512xbf16, #tpu.memory_space<vmem>>, vector<256x512xbf16>
    %cst_59 = arith.constant dense<0.000000e+00> : vector<2x512xf32>
    %120 = tpu.matmul %118, %119, %cst_59 {dimension_numbers = #tpu.dot_dimension_numbers<[1], [0], [0], [1], [0, 0, 1, 1], [], []>} : vector<2x256xbf16>, vector<256x512xbf16>, vector<2x512xf32> -> vector<2x512xf32>
    %c0_60 = arith.constant 0 : index
    %c0_61 = arith.constant 0 : index
    %121 = vector.load %arg16[%c0_60, %c0_61] : memref<1x512xf32, #tpu.memory_space<vmem>>, vector<1x512xf32>
    %122 = vector.broadcast %121 : vector<1x512xf32> to vector<2x512xf32>
    %123 = arith.addf %120, %122 : vector<2x512xf32>
    %124 = math.absf %123 : vector<2x512xf32>
    %cst_62 = arith.constant 0.000000e+00 : f32
    %125 = vector.broadcast %cst_62 : f32 to vector<2x512xf32>
    %126 = arith.subf %125, %124 : vector<2x512xf32>
    %127 = math.exp %126 : vector<2x512xf32>
    %cst_63 = arith.constant 0.000000e+00 : f32
    %128 = vector.broadcast %cst_63 : f32 to vector<2x512xf32>
    %129 = arith.cmpf oge, %123, %128 : vector<2x512xf32>
    %cst_64 = arith.constant 1.000000e+00 : f32
    %130 = vector.broadcast %cst_64 : f32 to vector<2x512xf32>
    %131 = arith.addf %130, %127 : vector<2x512xf32>
    %cst_65 = arith.constant 1.000000e+00 : f32
    %132 = vector.broadcast %cst_65 : f32 to vector<2x512xf32>
    %133 = arith.divf %132, %131 : vector<2x512xf32>
    %cst_66 = arith.constant 1.000000e+00 : f32
    %134 = vector.broadcast %cst_66 : f32 to vector<2x512xf32>
    %135 = arith.addf %134, %127 : vector<2x512xf32>
    %136 = arith.divf %127, %135 : vector<2x512xf32>
    %137 = arith.select %129, %133, %136 : vector<2x512xi1>, vector<2x512xf32>
    %138 = arith.mulf %123, %137 : vector<2x512xf32>
    %139 = arith.truncf %138 : vector<2x512xf32> to vector<2x512xbf16>
    %c0_67 = arith.constant 0 : index
    %c0_68 = arith.constant 0 : index
    %140 = vector.load %arg17[%c0_67, %c0_68] : memref<512x1024xbf16, #tpu.memory_space<vmem>>, vector<512x1024xbf16>
    %cst_69 = arith.constant dense<0.000000e+00> : vector<2x1024xf32>
    %141 = tpu.matmul %139, %140, %cst_69 {dimension_numbers = #tpu.dot_dimension_numbers<[1], [0], [0], [1], [0, 0, 1, 1], [], []>} : vector<2x512xbf16>, vector<512x1024xbf16>, vector<2x1024xf32> -> vector<2x1024xf32>
    %c0_70 = arith.constant 0 : index
    %c0_71 = arith.constant 0 : index
    %142 = vector.load %arg18[%c0_70, %c0_71] : memref<1x1024xf32, #tpu.memory_space<vmem>>, vector<1x1024xf32>
    %143 = vector.broadcast %142 : vector<1x1024xf32> to vector<2x1024xf32>
    %144 = arith.addf %141, %143 : vector<2x1024xf32>
    %145 = math.absf %144 : vector<2x1024xf32>
    %cst_72 = arith.constant 0.000000e+00 : f32
    %146 = vector.broadcast %cst_72 : f32 to vector<2x1024xf32>
    %147 = arith.subf %146, %145 : vector<2x1024xf32>
    %148 = math.exp %147 : vector<2x1024xf32>
    %cst_73 = arith.constant 0.000000e+00 : f32
    %149 = vector.broadcast %cst_73 : f32 to vector<2x1024xf32>
    %150 = arith.cmpf oge, %144, %149 : vector<2x1024xf32>
    %cst_74 = arith.constant 1.000000e+00 : f32
    %151 = vector.broadcast %cst_74 : f32 to vector<2x1024xf32>
    %152 = arith.addf %151, %148 : vector<2x1024xf32>
    %cst_75 = arith.constant 1.000000e+00 : f32
    %153 = vector.broadcast %cst_75 : f32 to vector<2x1024xf32>
    %154 = arith.divf %153, %152 : vector<2x1024xf32>
    %cst_76 = arith.constant 1.000000e+00 : f32
    %155 = vector.broadcast %cst_76 : f32 to vector<2x1024xf32>
    %156 = arith.addf %155, %148 : vector<2x1024xf32>
    %157 = arith.divf %148, %156 : vector<2x1024xf32>
    %158 = arith.select %150, %154, %157 : vector<2x1024xi1>, vector<2x1024xf32>
    %159 = arith.mulf %144, %158 : vector<2x1024xf32>
    %c0_77 = arith.constant 0 : index
    %c0_78 = arith.constant 0 : index
    %160 = vector.load %arg19[%c0_77, %c0_78] : memref<2x1024xf32, #tpu.memory_space<vmem>>, vector<2x1024xf32>
    tpu.vector_store %arg19[%c0_77, %c0_78], %159 {strides = array<i32>} : memref<2x1024xf32, #tpu.memory_space<vmem>>, vector<2x1024xf32>,
    return
  }
  func.func @transform_0(%arg0: i32) -> (i32, i32) {
    %c0_i32 = arith.constant 0 : i32
    %c0_i32_0 = arith.constant 0 : i32
    %c0_i32_1 = arith.constant 0 : i32
    return %c0_i32, %c0_i32_0 : i32, i32
  }
  func.func @transform_1(%arg0: i32) -> (i32, i32) {
    %c0_i32 = arith.constant 0 : i32
    %c0_i32_0 = arith.constant 0 : i32
    %c0_i32_1 = arith.constant 0 : i32
    return %c0_i32, %c0_i32_0 : i32, i32
  }
  func.func @transform_2(%arg0: i32) -> (i32, i32) {
    %c0_i32 = arith.constant 0 : i32
    %c0_i32_0 = arith.constant 0 : i32
    %c0_i32_1 = arith.constant 0 : i32
    return %c0_i32, %c0_i32_0 : i32, i32
  }
  func.func @transform_3(%arg0: i32) -> (i32, i32) {
    %c0_i32 = arith.constant 0 : i32
    %c0_i32_0 = arith.constant 0 : i32
    %c0_i32_1 = arith.constant 0 : i32
    return %c0_i32, %c0_i32_0 : i32, i32
  }
  func.func @transform_4(%arg0: i32) -> (i32, i32) {
    %c0_i32 = arith.constant 0 : i32
    %c0_i32_0 = arith.constant 0 : i32
    %c0_i32_1 = arith.constant 0 : i32
    return %c0_i32, %c0_i32_0 : i32, i32
  }
  func.func @transform_5(%arg0: i32) -> (i32, i32) {
    %c0_i32 = arith.constant 0 : i32
    %c0_i32_0 = arith.constant 0 : i32
    %c0_i32_1 = arith.constant 0 : i32
    return %c0_i32, %c0_i32_0 : i32, i32
  }
  func.func @transform_6(%arg0: i32) -> (i32, i32) {
    %c0_i32 = arith.constant 0 : i32
    %c0_i32_0 = arith.constant 0 : i32
    %c0_i32_1 = arith.constant 0 : i32
    return %c0_i32, %c0_i32_0 : i32, i32
  }
  func.func @transform_7(%arg0: i32) -> (i32, i32) {
    %c0_i32 = arith.constant 0 : i32
    %c0_i32_0 = arith.constant 0 : i32
    %c0_i32_1 = arith.constant 0 : i32
    return %c0_i32, %c0_i32_0 : i32, i32
  }
  func.func @transform_8(%arg0: i32) -> (i32, i32) {
    %c0_i32 = arith.constant 0 : i32
    %c0_i32_0 = arith.constant 0 : i32
    %c0_i32_1 = arith.constant 0 : i32
    return %c0_i32, %c0_i32_0 : i32, i32
  }
  func.func @transform_9(%arg0: i32) -> (i32, i32) {
    %c0_i32 = arith.constant 0 : i32
    %c0_i32_0 = arith.constant 0 : i32
    %c0_i32_1 = arith.constant 0 : i32
    return %c0_i32, %c0_i32_0 : i32, i32
  }
  func.func @transform_10(%arg0: i32) -> (i32, i32) {
    %c0_i32 = arith.constant 0 : i32
    %c0_i32_0 = arith.constant 0 : i32
    %c0_i32_1 = arith.constant 0 : i32
    return %c0_i32, %c0_i32_0 : i32, i32
  }
  func.func @transform_11(%arg0: i32) -> (i32, i32) {
    %c0_i32 = arith.constant 0 : i32
    %c0_i32_0 = arith.constant 0 : i32
    %c0_i32_1 = arith.constant 0 : i32
    return %c0_i32, %c0_i32_0 : i32, i32
  }
  func.func @transform_12(%arg0: i32) -> (i32, i32) {
    %c0_i32 = arith.constant 0 : i32
    %c0_i32_0 = arith.constant 0 : i32
    %c0_i32_1 = arith.constant 0 : i32
    return %c0_i32, %c0_i32_0 : i32, i32
  }
  func.func @transform_13(%arg0: i32) -> (i32, i32) {
    %c0_i32 = arith.constant 0 : i32
    %c0_i32_0 = arith.constant 0 : i32
    %c0_i32_1 = arith.constant 0 : i32
    return %c0_i32, %c0_i32_0 : i32, i32
  }
  func.func @transform_14(%arg0: i32) -> (i32, i32) {
    %c0_i32 = arith.constant 0 : i32
    %c0_i32_0 = arith.constant 0 : i32
    %c0_i32_1 = arith.constant 0 : i32
    return %c0_i32, %c0_i32_0 : i32, i32
  }
  func.func @transform_15(%arg0: i32) -> (i32, i32) {
    %c0_i32 = arith.constant 0 : i32
    %c0_i32_0 = arith.constant 0 : i32
    %c0_i32_1 = arith.constant 0 : i32
    return %c0_i32, %c0_i32_0 : i32, i32
  }
  func.func @transform_16(%arg0: i32) -> (i32, i32) {
    %c0_i32 = arith.constant 0 : i32
    %c0_i32_0 = arith.constant 0 : i32
    %c0_i32_1 = arith.constant 0 : i32
    return %c0_i32, %c0_i32_0 : i32, i32
  }
  func.func @transform_17(%arg0: i32) -> (i32, i32) {
    %c0_i32 = arith.constant 0 : i32
    %c0_i32_0 = arith.constant 0 : i32
    %c0_i32_1 = arith.constant 0 : i32
    return %c0_i32, %c0_i32_0 : i32, i32
  }
  func.func @transform_18(%arg0: i32) -> (i32, i32) {
    %c0_i32 = arith.constant 0 : i32
    %c0_i32_0 = arith.constant 0 : i32
    %c0_i32_1 = arith.constant 0 : i32
    return %c0_i32, %c0_i32_0 : i32, i32
  }
}

</mosaic_0001>

<bundles_post_ra>
// kernel: vae_forward.5
= control target key start
LH: loop header
LB: loop body
LE: loop exit
PB: predicated region body
PF: predicated region fallthrough
CT: control target
= control target key end

     0   :  { %10 = vsyncpa [#allocation3], 0  ;;  %s7012_s0 = inlined_call_operand.vmem [shape: bf16[2,900,9], index: 0, kind: input, shape index: {}]   ;;  %s7013_s1 = inlined_call_operand.hbm [shape: bf16[9,32], index: 1, kind: input, shape index: {}]   ;;  %s7014_s2 = inlined_call_operand.hbm [shape: f32[1,32], index: 2, kind: input, shape index: {}]   ;;  %s7015_s3 = inlined_call_operand.hbm [shape: f32[1,32], index: 3, kind: input, shape index: {}]   ;;  %s7016_s4 = inlined_call_operand.hbm [shape: f32[32,32], index: 4, kind: input, shape index: {}]   ;;  %s7017_s5 = inlined_call_operand.vmem [shape: f32[2,900,32], index: 5, kind: output, shape index: {}]  }
   0x1   :  { %11 = vsyncpa [#allocation5], 0 }
   0x2   :  { %12 = vsyncpa [#allocation8], 0  ;;  %s3643_s18 = smov 0  }
   0x3 LB: > { %s3601_s19 = smov [#allocation4]   ;;  %s3649_s21 = sadd.s32 4294967295, %s3599_s18   ;;  %s3599_s18 = sphi %s3643_s18, %s18_s18  }
   0x4   : > { %s185_s20 = sshll.u32 %s3601_s19, 4  ;;  %p2882_p0 = scmp.ge.s32.totalorder %s3599_s18, 1  ;;  %s3654_s20 = int_to_ptr.vmem [resolvable:$true] %s185_s20 }
   0x5   : > { %p159_p1 = scmp.lt.s32.totalorder %s3599_s18, 3  ;;  %p7018_p2 = scmp.eq.s32.totalorder %s3649_s21, 0 }
   0x6   : > { %s3602_s23 = smov [#allocation2]   ;;  %s3603_s26 = smov [#allocation6]  }
   0x7   : > { %p3656_p3 = pnand %p2882_p0, %p159_p1  ;;  %s171_s24 = sshll.u32 %s3602_s23, 4  ;;  %s3662_s24 = int_to_ptr.vmem [resolvable:$true] %s171_s24 }
   0x8   : > { %s196_s27 = sshll.u32 %s3603_s26, 4  ;;  %s3604_s28 = smov [#allocation7]   ;;  %s3670_s27 = int_to_ptr.vmem [resolvable:$true] %s196_s27 }
   0x9   : > { %s7179_s22 = scalar_select %p3656_p3, 1, 0 }
   0xa   : > { %p3368_p4 = pneg %p3656_p3  ;;  %s3672_s29 = sshll.u32 %s3604_s28, 4  ;;  %s207_s29 = int_to_ptr.vmem [resolvable:$true] %s3672_s29 }
   0xb   : > { %s3469_s7 = scalar_lea.hbm %s7014_s2, 16 }
   0xc   : > { %p3666_p5 = pnand %p7018_p2, %p3368_p4  ;;  %p3470_p6 = scmp.ne.s32.totalorder %s7014_s2, %s3469_s7 }
   0xd   : > { %p3476_p10 = scmp.lt.u32.totalorder %s3469_s7, %s7014_s2 }
   0xe   : > { %p3682_p7 = pneg %p3666_p5 }
  0x10   : > { %p3472_p8 = pnand %p3682_p7, %p3470_p6 }
  0x12   : > { %p3473_p9 = pneg %p3472_p8 }
  0x14   : > { %p3478_p11 = pnand %p3476_p10, %p3473_p9 }
  0x16   : > { %3481 = shalt.err (!%p3478_p11)
}
  0x17   : > { %s3482_s13 = scalar_lea.vmem %s3654_s20, 16  ;;  %s3489_s14 = scalar_lea.vmem %s3654_s20, 32 }
  0x18   : > { %p3483_p12 = scmp.ne.s32.totalorder %s3654_s20, %s3482_s13  ;;  %p3490_p1 = scmp.lt.s32.totalorder %s3654_s20, %s3654_s20 }
  0x19   : > { %p3491_p4 = scmp.lt.s32.totalorder %s3489_s14, %s3482_s13 }
  0x1a   : > { %p3485_p13 = pnand %p3483_p12, %p3682_p7 }
  0x1b   : > { %p3492_p6 = por %p3491_p4, %p3490_p1 }
  0x1c   : > { %p3486_p0 = pneg %p3485_p13 }
  0x1e   : > { %p3493_p8 = pnand %p3492_p6, %p3486_p0 }
  0x20   : > { %3496 = shalt.err (!%p3493_p8)
}
  0x21   : > { %3374 = dma.hbm_to_vmem [thread:$0]  (!%p3666_p5), %s7014_s2, 16, %s3654_s20, [#allocation5]  }
  0x22   : > { %s3497_s23 = scalar_lea.hbm %s7013_s1, 128 }
  0x23   : > { %p3498_p9 = scmp.ne.s32.totalorder %s7013_s1, %s3497_s23  ;;  %p3504_p12 = scmp.lt.u32.totalorder %s3497_s23, %s7013_s1 }
  0x25   : > { %p3500_p10 = pnand %p3498_p9, %p3682_p7 }
  0x27   : > { %p3501_p11 = pneg %p3500_p10 }
  0x29   : > { %p3506_p13 = pnand %p3504_p12, %p3501_p11 }
  0x2b   : > { %3509 = shalt.err (!%p3506_p13)
}
  0x2c   : > { %s3510_s20 = scalar_lea.vmem %s3662_s24, 128  ;;  %p3518_p6 = scmp.lt.s32.totalorder %s3662_s24, %s3662_s24 }
  0x2d   : > { %p3511_p0 = scmp.ne.s32.totalorder %s3662_s24, %s3510_s20  ;;  %p3519_p8 = scmp.lt.s32.totalorder %s3510_s20, %s3510_s20 }
  0x2f   : > { %p3513_p1 = pnand %p3511_p0, %p3682_p7  ;;  %p3520_p9 = por %p3519_p8, %p3518_p6 }
  0x31   : > { %p3514_p4 = pneg %p3513_p1 }
  0x33   : > { %p3521_p10 = pnand %p3520_p9, %p3514_p4 }
  0x35   : > { %3524 = shalt.err (!%p3521_p10)
}
  0x36   : > { %s3605_s7 = smov 64   ;;  %s3606_s8 = smov 4  }
  0x37   : > { %3371 = dma.hbm_to_vmem [thread:$0]  (!%p3666_p5), %s7013_s1, 128, %s3662_s24, [#allocation3], %s3605_s7, %s3605_s7, %s3606_s8  }
  0x38   : > { %s3525_s14 = scalar_lea.hbm %s7015_s3, 16 }
  0x39   : > { %p3526_p11 = scmp.ne.s32.totalorder %s7015_s3, %s3525_s14  ;;  %p3532_p0 = scmp.lt.u32.totalorder %s3525_s14, %s7015_s3 }
  0x3b   : > { %p3528_p12 = pnand %p3526_p11, %p3682_p7 }
  0x3d   : > { %p3529_p13 = pneg %p3528_p12 }
  0x3f   : > { %p3534_p1 = pnand %p3532_p0, %p3529_p13 }
  0x41   : > { %3537 = shalt.err (!%p3534_p1)
}
  0x42   : > { %s3538_s24 = scalar_lea.vmem %s3670_s27, 16  ;;  %s3545_s23 = scalar_lea.vmem %s3670_s27, 32 }
  0x43   : > { %p3539_p4 = scmp.ne.s32.totalorder %s3670_s27, %s3538_s24  ;;  %p3546_p9 = scmp.lt.s32.totalorder %s3670_s27, %s3670_s27 }
  0x44   : > { %p3547_p10 = scmp.lt.s32.totalorder %s3545_s23, %s3538_s24 }
  0x45   : > { %p3541_p6 = pnand %p3539_p4, %p3682_p7 }
  0x46   : > { %p3548_p11 = por %p3547_p10, %p3546_p9 }
  0x47   : > { %p3542_p8 = pneg %p3541_p6 }
  0x49   : > { %p3549_p12 = pnand %p3548_p11, %p3542_p8 }
  0x4b   : > { %3552 = shalt.err (!%p3549_p12)
}
  0x4c   : > { %3377 = dma.hbm_to_vmem [thread:$0]  (!%p3666_p5), %s7015_s3, 16, %s3670_s27, [#allocation5]  }
  0x4d   : > { %s3553_s20 = scalar_lea.hbm %s7016_s4, 512 }
  0x4e   : > { %p3554_p13 = scmp.ne.s32.totalorder %s7016_s4, %s3553_s20  ;;  %p3560_p4 = scmp.lt.u32.totalorder %s3553_s20, %s7016_s4 }
  0x50   : > { %p3556_p0 = pnand %p3554_p13, %p3682_p7 }
  0x52   : > { %p3557_p1 = pneg %p3556_p0 }
  0x54   : > { %p3562_p6 = pnand %p3560_p4, %p3557_p1 }
  0x56   : > { %3565 = shalt.err (!%p3562_p6)
}
  0x57   : > { %s3566_s12 = scalar_lea.vmem %s207_s29, 512  ;;  %p3574_p11 = scmp.lt.s32.totalorder %s207_s29, %s207_s29 }
  0x58   : > { %p3567_p8 = scmp.ne.s32.totalorder %s207_s29, %s3566_s12  ;;  %p3575_p12 = scmp.lt.s32.totalorder %s3566_s12, %s3566_s12 }
  0x5a   : > { %p3569_p9 = pnand %p3567_p8, %p3682_p7  ;;  %p3576_p2 = por %p3575_p12, %p3574_p11 }
  0x5c   : > { %p3570_p10 = pneg %p3569_p9 }
  0x5e   : > { %p3577_p3 = pnand %p3576_p2, %p3570_p10 }
  0x60   : > { %3580 = shalt.err (!%p3577_p3)
}
  0x61   : > { %s3607_s27 = smov 128   ;;  %s3608_s13 = smov 8  }
  0x62   : > { %3380 = dma.hbm_to_vmem [thread:$0]  (!%p3666_p5), %s7016_s4, 512, %s207_s29, [#allocation8], %s3607_s27, %s3607_s27, %s3608_s13  }
  0x63   : > { %p7182_p13 = scmp.ne.s32.totalorder %s7179_s22, 0 }
  0x65   : > { %230 = sbr.rel (%p7182_p13) target bundleno = 1164 (0x48c), region = 40 }
  0x6c   : > { %p7183_p0 = scmp.eq.s32.totalorder %s3649_s21, 0 }
  0x6e   : > { %3586 = dma.done.wait (%p7183_p0), [#allocation3], 128   ;;  %p7184_p7 = pmov %p7183_p0 }
  0x6f   : > { %p7185_p2 = pmov %p7183_p0 }
  0x70   : > { %3588 = vsyncadd (%p7184_p7), [#allocation3], 4294967168 }
  0x71   : > { %3590 = dma.done.wait (%p7185_p2), [#allocation5], 32   ;;  %p7186_p3 = pmov %p7183_p0 }
  0x72   : > { %p7187_p1 = pmov %p7183_p0 }
  0x73   : > { %3592 = vsyncadd (%p7186_p3), [#allocation5], 4294967264 }
  0x74   : > { %3594 = dma.done.wait (%p7187_p1), [#allocation8], 512   ;;  %p7188_p5 = pmov %p7183_p0 }
  0x75   : > { %vm856_vm0 = vcmask 1043456   ;;  %v7020_v0 = vmov 0.0   ;;  %p270_p4 = scmp.lt.s32.totalorder %s3649_s21, 1  ;;  %vm3610_vm1 = vmmov 0   ;;  %vm857_vm2 = vcmask 1044480  }
  0x76   : > { %3596 = vsyncadd (%p7188_p5), [#allocation8], 4294966784  ;;  %3084 = vmatprep.subr.bf16.mxu0 %v7020_v0  ;;  %3348 = vmatprep.subr.bf16.mxu1 %v7020_v0  ;;  %v3611_v1 = vmov 65535   ;;  %v3409_v4 = vld [vmem:[#allocation2] sm:$0x1f]   ;;  %vm684_vm3 = vcmask 72704  }
  0x77   : > { %3086 = vmatprep.mubr.msk.bf16.mxu0 %vm3610_vm1, %v7020_v0  ;;  %3206 = vmatprep.mubr.msk.bf16.mxu1 %vm3610_vm1, %v7020_v0  ;;  %v858_v2 = vsel %vm856_vm0, 4294967295, %v3611_v1  ;;  %s7901_s21 = smov (!%p270_p4, %s3649_s21), 1  ;;  %vm1351_vm4 = vcmask 261120   ;;  %vm1575_vm5 = vcmask 257024  }
  0x78   : > { %s3350_s22 = smul.u32 452, %s7901_s21  ;;  %v859_v3 = vsel %vm857_vm2, %v858_v2, 0 }
  0x79   : > { %v861_v5 = vand.u32 %v3409_v4, %v859_v3  ;;  %s3351_s16 = smul.u32 904, %s7901_s21 }
  0x7a   : > { %s3798_s10 = scalar_lea.vmem %s7012_s0, %s3350_s22 }
  0x7b   : > { %v3410_v6 = vld [vmem:[%s3798_s10] sm:$0xff]   ;;  %3085 = vmatpush3.bf16.msra.mxu0 %v861_v5  ;;  %3349 = vmatpush3.bf16.msra.mxu1 %v861_v5  ;;  %v3411_v7 = vld [vmem:[%s3798_s10 + $0x8] sm:$0xff]   ;;  %v3427_v8 = vld [vmem:[%s3798_s10 + $0xf0] sm:$0xff]   ;;  %s6640_s19 = scalar_lea.vmem %s7017_s5, %s3351_s16 }
  0x7c   : > { %v3412_v9 = vld [vmem:[%s3798_s10 + $0x10] sm:$0xff]   ;;  %v3429_v10 = vld [vmem:[%s3798_s10 + $0xf8] sm:$0xff]   ;;  %v3431_v12 = vld [vmem:[%s3798_s10 + $0x100] sm:$0xff]  }
  0x7d   : > { %v3413_v11 = vld [vmem:[%s3798_s10 + $0x18] sm:$0xff]   ;;  %v3414_v13 = vld [vmem:[%s3798_s10 + $0x20] sm:$0xff]   ;;  %v3433_v14 = vld [vmem:[%s3798_s10 + $0x108] sm:$0xff]  }
  0x7e   : > { %3087 = vmatmul.mubr.msk.bf16.vlgmr.msra.gmra.mrb[0].mxu0 %vm684_vm3, %v3410_v6  ;;  %3207 = vmatmul.mubr.msk.bf16.vlgmr.msra.gmra.mrb[0].mxu1 %vm684_vm3, %v3427_v8  ;;  %v3415_v15 = vld [vmem:[%s3798_s10 + $0x28] sm:$0xff]   ;;  %v3435_v16 = vld [vmem:[%s3798_s10 + $0x110] sm:$0xff]   ;;  %v3437_v18 = vld [vmem:[%s3798_s10 + $0x118] sm:$0xff]  }
  0x7f   : > { %3090 = vmatprep.mubr.msk.bf16.mxu0 %vm3610_vm1, %v7020_v0  ;;  %3210 = vmatprep.mubr.msk.bf16.mxu1 %vm3610_vm1, %v7020_v0  ;;  %v3416_v17 = vld [vmem:[%s3798_s10 + $0x30] sm:$0xff]   ;;  %v3417_v19 = vld [vmem:[%s3798_s10 + $0x38] sm:$0xff]   ;;  %v3439_v20 = vld [vmem:[%s3798_s10 + $0x120] sm:$0xff]  }
  0x80   : > { %v3418_v21 = vld [vmem:[%s3798_s10 + $0x40] sm:$0xff]   ;;  %v3441_v22 = vld [vmem:[%s3798_s10 + $0x128] sm:$0xff]   ;;  %v3443_v24 = vld [vmem:[%s3798_s10 + $0x130] sm:$0xff]  }
  0x81   : > { %v3419_v23 = vld [vmem:[%s3798_s10 + $0x48] sm:$0xff]   ;;  %v3420_v25 = vld [vmem:[%s3798_s10 + $0x50] sm:$0xff]   ;;  %v3445_v26 = vld [vmem:[%s3798_s10 + $0x138] sm:$0xff]  }
  0x82   : > { %v3421_v27 = vld [vmem:[%s3798_s10 + $0x58] sm:$0xff]   ;;  %v3447_v28 = vld [vmem:[%s3798_s10 + $0x140] sm:$0xff]   ;;  %v3449_v30 = vld [vmem:[%s3798_s10 + $0x148] sm:$0xff]  }
  0x83   : > { %v3422_v29 = vld [vmem:[%s3798_s10 + $0x60] sm:$0xff]   ;;  %v3423_v31 = vld [vmem:[%s3798_s10 + $0x68] sm:$0xff]   ;;  %v3451_v32 = vld [vmem:[%s3798_s10 + $0x150] sm:$0xff]  }
  0x84   : > { %v3424_v33 = vld [vmem:[%s3798_s10 + $0x70] sm:$0xff]   ;;  %v3453_v34 = vld [vmem:[%s3798_s10 + $0x158] sm:$0xff]   ;;  %v3454_v36 = vld [vmem:[%s3798_s10 + $0x160] sm:$0xff]  }
  0x85   : > { %v3425_v35 = vld [vmem:[%s3798_s10 + $0x78] sm:$0xff]   ;;  %v3426_v37 = vld [vmem:[%s3798_s10 + $0x80] sm:$0xff]   ;;  %v3455_v38 = vld [vmem:[%s3798_s10 + $0x168] sm:$0xff]  }
  0x86   : > { %3091 = vmatmul.mubr.msk.bf16.gmra.mrb[4].mxu0 %vm684_vm3, %v3411_v7  ;;  %3211 = vmatmul.mubr.msk.bf16.gmra.mrb[4].mxu1 %vm684_vm3, %v3429_v10  ;;  %v3428_v39 = vld [vmem:[%s3798_s10 + $0x88] sm:$0xff]   ;;  %v3456_v40 = vld [vmem:[%s3798_s10 + $0x170] sm:$0xff]   ;;  %v3457_v42 = vld [vmem:[%s3798_s10 + $0x178] sm:$0xff]  }
  0x87   : > { %3094 = vmatprep.mubr.msk.bf16.mxu0 %vm3610_vm1, %v7020_v0  ;;  %3214 = vmatprep.mubr.msk.bf16.mxu1 %vm3610_vm1, %v7020_v0  ;;  %v3430_v41 = vld [vmem:[%s3798_s10 + $0x90] sm:$0xff]   ;;  %v3432_v43 = vld [vmem:[%s3798_s10 + $0x98] sm:$0xff]   ;;  %v3458_v44 = vld [vmem:[%s3798_s10 + $0x180] sm:$0xff]  }
  0x88   : > { %v3434_v45 = vld [vmem:[%s3798_s10 + $0xa0] sm:$0xff]   ;;  %v3459_v46 = vld [vmem:[%s3798_s10 + $0x188] sm:$0xff]   ;;  %v3460_v48 = vld [vmem:[%s3798_s10 + $0x190] sm:$0xff]  }
  0x89   : > { %v3436_v47 = vld [vmem:[%s3798_s10 + $0xa8] sm:$0xff]   ;;  %v3438_v49 = vld [vmem:[%s3798_s10 + $0xb0] sm:$0xff]   ;;  %v3461_v50 = vld [vmem:[%s3798_s10 + $0x198] sm:$0xff]  }
  0x8a   : > { %v3440_v51 = vld [vmem:[%s3798_s10 + $0xb8] sm:$0xff]   ;;  %v3462_v52 = vld [vmem:[%s3798_s10 + $0x1a0] sm:$0xff]   ;;  %v3463_v54 = vld [vmem:[%s3798_s10 + $0x1a8] sm:$0xff]  }
  0x8b   : > { %v3442_v53 = vld [vmem:[%s3798_s10 + $0xc0] sm:$0xff]   ;;  %v3444_v55 = vld [vmem:[%s3798_s10 + $0xc8] sm:$0xff]   ;;  %v3464_v56 = vld [vmem:[%s3798_s10 + $0x1b0] sm:$0xff]  }
  0x8c   : > { %v3446_v57 = vld [vmem:[%s3798_s10 + $0xd0] sm:$0xff]   ;;  %v3465_v58 = vld [vmem:[%s3798_s10 + $0x1b8] sm:$0xff]  }
  0x8d   : > { %v3448_v62 = vld [vmem:[%s3798_s10 + $0xd8] sm:$0xff]  }
  0x8e   : > { %3095 = vmatmul.mubr.msk.bf16.gmra.mrb[8].mxu0 %vm684_vm3, %v3412_v9  ;;  %3215 = vmatmul.mubr.msk.bf16.gmra.mrb[8].mxu1 %vm684_vm3, %v3431_v12  ;;  %v3466_v9 = vld [vmem:[%s3798_s10 + $0x1c0] ss:$0 sps:$4 sm:$0x33]  }
  0x8f   : > { %3098 = vmatprep.mubr.msk.bf16.mxu0 %vm3610_vm1, %v7020_v0  ;;  %3218 = vmatprep.mubr.msk.bf16.mxu1 %vm3610_vm1, %v7020_v0 }
  0x96   : > { %3099 = vmatmul.mubr.msk.bf16.gmra.mrb[12].mxu0 %vm684_vm3, %v3413_v11  ;;  %3219 = vmatmul.mubr.msk.bf16.gmra.mrb[12].mxu1 %vm684_vm3, %v3433_v14  ;;  %v3450_v14 = vld [vmem:[%s3798_s10 + $0xe0] sm:$0xff]  }
  0x97   : > { %3102 = vmatprep.mubr.msk.bf16.mxu0 %vm3610_vm1, %v7020_v0  ;;  %3222 = vmatprep.mubr.msk.bf16.mxu1 %vm3610_vm1, %v7020_v0 }
  0x9e   : > { %3103 = vmatmul.mubr.msk.bf16.gmra.mrb[16].mxu0 %vm684_vm3, %v3414_v13  ;;  %3223 = vmatmul.mubr.msk.bf16.gmra.mrb[16].mxu1 %vm684_vm3, %v3435_v16 }
  0x9f   : > { %3106 = vmatprep.mubr.msk.bf16.mxu0 %vm3610_vm1, %v7020_v0  ;;  %3226 = vmatprep.mubr.msk.bf16.mxu1 %vm3610_vm1, %v7020_v0 }
  0xa6   : > { %3107 = vmatmul.mubr.msk.bf16.gmra.mrb[20].mxu0 %vm684_vm3, %v3415_v15  ;;  %3227 = vmatmul.mubr.msk.bf16.gmra.mrb[20].mxu1 %vm684_vm3, %v3437_v18 }
  0xa7   : > { %3110 = vmatprep.mubr.msk.bf16.mxu0 %vm3610_vm1, %v7020_v0  ;;  %3230 = vmatprep.mubr.msk.bf16.mxu1 %vm3610_vm1, %v7020_v0 }
  0xae   : > { %3111 = vmatmul.mubr.msk.bf16.gmra.mrb[24].mxu0 %vm684_vm3, %v3416_v17  ;;  %3231 = vmatmul.mubr.msk.bf16.gmra.mrb[24].mxu1 %vm684_vm3, %v3439_v20 }
  0xaf   : > { %3114 = vmatprep.mubr.msk.bf16.mxu0 %vm3610_vm1, %v7020_v0  ;;  %3234 = vmatprep.mubr.msk.bf16.mxu1 %vm3610_vm1, %v7020_v0 }
  0xb6   : > { %3115 = vmatmul.mubr.msk.bf16.gmra.mrb[28].mxu0 %vm684_vm3, %v3417_v19  ;;  %3235 = vmatmul.mubr.msk.bf16.gmra.mrb[28].mxu1 %vm684_vm3, %v3441_v22 }
  0xb7   : > { %3118 = vmatprep.mubr.msk.bf16.mxu0 %vm3610_vm1, %v7020_v0  ;;  %3238 = vmatprep.mubr.msk.bf16.mxu1 %vm3610_vm1, %v7020_v0 }
  0xbe   : > { %3119 = vmatmul.mubr.msk.bf16.gmra.mrb[32].mxu0 %vm684_vm3, %v3418_v21  ;;  %3239 = vmatmul.mubr.msk.bf16.gmra.mrb[32].mxu1 %vm684_vm3, %v3443_v24 }
  0xbf   : > { %3122 = vmatprep.mubr.msk.bf16.mxu0 %vm3610_vm1, %v7020_v0  ;;  %3242 = vmatprep.mubr.msk.bf16.mxu1 %vm3610_vm1, %v7020_v0 }
  0xc6   : > { %3123 = vmatmul.mubr.msk.bf16.gmra.mrb[36].mxu0 %vm684_vm3, %v3419_v23  ;;  %3243 = vmatmul.mubr.msk.bf16.gmra.mrb[36].mxu1 %vm684_vm3, %v3445_v26 }
  0xc7   : > { %3126 = vmatprep.mubr.msk.bf16.mxu0 %vm3610_vm1, %v7020_v0  ;;  %3246 = vmatprep.mubr.msk.bf16.mxu1 %vm3610_vm1, %v7020_v0 }
  0xce   : > { %3127 = vmatmul.mubr.msk.bf16.gmra.mrb[40].mxu0 %vm684_vm3, %v3420_v25  ;;  %3247 = vmatmul.mubr.msk.bf16.gmra.mrb[40].mxu1 %vm684_vm3, %v3447_v28  ;;  %v1929_v28 = vld [vmem:[#allocation7 + $0x8] sm:$0xff] }
  0xcf   : > { %3130 = vmatprep.mubr.msk.bf16.mxu0 %vm3610_vm1, %v7020_v0  ;;  %3250 = vmatprep.mubr.msk.bf16.mxu1 %vm3610_vm1, %v7020_v0 }
  0xd6   : > { %3131 = vmatmul.mubr.msk.bf16.gmra.mrb[44].mxu0 %vm684_vm3, %v3421_v27  ;;  %3251 = vmatmul.mubr.msk.bf16.gmra.mrb[44].mxu1 %vm684_vm3, %v3449_v30  ;;  %v1928_v27 = vld [vmem:[#allocation7] sm:$0xff]  ;;  %v7021_v30 = vmov 0.0|0.0  }
  0xd7   : > { %3134 = vmatprep.mubr.msk.bf16.mxu0 %vm3610_vm1, %v7020_v0  ;;  %3254 = vmatprep.mubr.msk.bf16.mxu1 %vm3610_vm1, %v7020_v0 }
  0xd8   : > { %3336 = vmatprep.subr.bf16.mxu1 %v7021_v30 }
  0xde   : > { %3135 = vmatmul.mubr.msk.bf16.gmra.mrb[48].mxu0 %vm684_vm3, %v3422_v29  ;;  %3255 = vmatmul.mubr.msk.bf16.gmra.mrb[48].mxu1 %vm684_vm3, %v3451_v32 }
  0xdf   : > { %3138 = vmatprep.mubr.msk.bf16.mxu0 %vm3610_vm1, %v7020_v0  ;;  %3258 = vmatprep.mubr.msk.bf16.mxu1 %vm3610_vm1, %v7020_v0 }
  0xe6   : > { %3139 = vmatmul.mubr.msk.bf16.gmra.mrb[52].mxu0 %vm684_vm3, %v3423_v31  ;;  %3259 = vmatmul.mubr.msk.bf16.gmra.mrb[52].mxu1 %vm684_vm3, %v3453_v34  ;;  %v4057_v31 = vpack.c.bf16 %v1929_v28, %v1928_v27 }
  0xe7   : > { %3142 = vmatprep.mubr.msk.bf16.mxu0 %vm3610_vm1, %v7020_v0  ;;  %3262 = vmatprep.mubr.msk.bf16.mxu1 %vm3610_vm1, %v7020_v0 }
  0xe8   : > { %7193 = vst [vmem:[#allocation16_spill] sm:$0xff] %v4057_v31  ;;  %3338 = vmatpush3.bf16.msra.mxu1 %v4057_v31 }
  0xe9   : > { %3339 = vmatprep.subr.bf16.mxu1 %v7021_v30 }
  0xee   : > { %3143 = vmatmul.mubr.msk.bf16.gmra.mrb[56].mxu0 %vm684_vm3, %v3424_v33  ;;  %3263 = vmatmul.mubr.msk.bf16.gmra.mrb[56].mxu1 %vm684_vm3, %v3454_v36 }
  0xef   : > { %3146 = vmatprep.mubr.msk.bf16.mxu0 %vm3610_vm1, %v7020_v0  ;;  %3266 = vmatprep.mubr.msk.bf16.mxu1 %vm3610_vm1, %v7020_v0 }
  0xf6   : > { %3147 = vmatmul.mubr.msk.bf16.gmra.mrb[60].mxu0 %vm684_vm3, %v3425_v35  ;;  %3267 = vmatmul.mubr.msk.bf16.gmra.mrb[60].mxu1 %vm684_vm3, %v3455_v38 }
  0xf7   : > { %3150 = vmatprep.mubr.msk.bf16.mxu0 %vm3610_vm1, %v7020_v0  ;;  %3270 = vmatprep.mubr.msk.bf16.mxu1 %vm3610_vm1, %v7020_v0 }
  0xfe   : > { %3151 = vmatmul.mubr.msk.bf16.gmra.mrb[64].mxu0 %vm684_vm3, %v3426_v37  ;;  %3271 = vmatmul.mubr.msk.bf16.gmra.mrb[64].mxu1 %vm684_vm3, %v3456_v40  ;;  %v3452_v37 = vld [vmem:[%s3798_s10 + $0xe8] sm:$0xff]  }
  0xff   : > { %3154 = vmatprep.mubr.msk.bf16.mxu0 %vm3610_vm1, %v7020_v0  ;;  %3274 = vmatprep.mubr.msk.bf16.mxu1 %vm3610_vm1, %v7020_v0 }
 0x106   : > { %3155 = vmatmul.mubr.msk.bf16.gmra.mrb[68].mxu0 %vm684_vm3, %v3428_v39  ;;  %3275 = vmatmul.mubr.msk.bf16.gmra.mrb[68].mxu1 %vm684_vm3, %v3457_v42 }
 0x107   : > { %3158 = vmatprep.mubr.msk.bf16.mxu0 %vm3610_vm1, %v7020_v0  ;;  %3278 = vmatprep.mubr.msk.bf16.mxu1 %vm3610_vm1, %v7020_v0 }
 0x10e   : > { %3159 = vmatmul.mubr.msk.bf16.gmra.mrb[72].mxu0 %vm684_vm3, %v3430_v41  ;;  %3279 = vmatmul.mubr.msk.bf16.gmra.mrb[72].mxu1 %vm684_vm3, %v3458_v44 }
 0x10f   : > { %3162 = vmatprep.mubr.msk.bf16.mxu0 %vm3610_vm1, %v7020_v0  ;;  %3282 = vmatprep.mubr.msk.bf16.mxu1 %vm3610_vm1, %v7020_v0 }
 0x116   : > { %3163 = vmatmul.mubr.msk.bf16.gmra.mrb[76].mxu0 %vm684_vm3, %v3432_v43  ;;  %3283 = vmatmul.mubr.msk.bf16.gmra.mrb[76].mxu1 %vm684_vm3, %v3459_v46 }
 0x117   : > { %3166 = vmatprep.mubr.msk.bf16.mxu0 %vm3610_vm1, %v7020_v0  ;;  %3286 = vmatprep.mubr.msk.bf16.mxu1 %vm3610_vm1, %v7020_v0 }
 0x11e   : > { %3167 = vmatmul.mubr.msk.bf16.gmra.mrb[80].mxu0 %vm684_vm3, %v3434_v45  ;;  %3287 = vmatmul.mubr.msk.bf16.gmra.mrb[80].mxu1 %vm684_vm3, %v3460_v48 }
 0x11f   : > { %3170 = vmatprep.mubr.msk.bf16.mxu0 %vm3610_vm1, %v7020_v0  ;;  %3290 = vmatprep.mubr.msk.bf16.mxu1 %vm3610_vm1, %v7020_v0 }
 0x126   : > { %3171 = vmatmul.mubr.msk.bf16.gmra.mrb[84].mxu0 %vm684_vm3, %v3436_v47  ;;  %3291 = vmatmul.mubr.msk.bf16.gmra.mrb[84].mxu1 %vm684_vm3, %v3461_v50 }
 0x127   : > { %3174 = vmatprep.mubr.msk.bf16.mxu0 %vm3610_vm1, %v7020_v0  ;;  %3294 = vmatprep.mubr.msk.bf16.mxu1 %vm3610_vm1, %v7020_v0 }
 0x12e   : > { %3175 = vmatmul.mubr.msk.bf16.gmra.mrb[88].mxu0 %vm684_vm3, %v3438_v49  ;;  %3295 = vmatmul.mubr.msk.bf16.gmra.mrb[88].mxu1 %vm684_vm3, %v3462_v52 }
 0x12f   : > { %3178 = vmatprep.mubr.msk.bf16.mxu0 %vm3610_vm1, %v7020_v0  ;;  %3298 = vmatprep.mubr.msk.bf16.mxu1 %vm3610_vm1, %v7020_v0 }
 0x136   : > { %3179 = vmatmul.mubr.msk.bf16.gmra.mrb[92].mxu0 %vm684_vm3, %v3440_v51  ;;  %3299 = vmatmul.mubr.msk.bf16.gmra.mrb[92].mxu1 %vm684_vm3, %v3463_v54 }
 0x137   : > { %3182 = vmatprep.mubr.msk.bf16.mxu0 %vm3610_vm1, %v7020_v0  ;;  %3302 = vmatprep.mubr.msk.bf16.mxu1 %vm3610_vm1, %v7020_v0 }
 0x13e   : > { %3183 = vmatmul.mubr.msk.bf16.gmra.mrb[96].mxu0 %vm684_vm3, %v3442_v53  ;;  %3303 = vmatmul.mubr.msk.bf16.gmra.mrb[96].mxu1 %vm684_vm3, %v3464_v56 }
 0x13f   : > { %3186 = vmatprep.mubr.msk.bf16.mxu0 %vm3610_vm1, %v7020_v0  ;;  %3306 = vmatprep.mubr.msk.bf16.mxu1 %vm3610_vm1, %v7020_v0 }
 0x146   : > { %3187 = vmatmul.mubr.msk.bf16.gmra.mrb[100].mxu0 %vm684_vm3, %v3444_v55  ;;  %3307 = vmatmul.mubr.msk.bf16.gmra.mrb[100].mxu1 %vm684_vm3, %v3465_v58 }
 0x147   : > { %3190 = vmatprep.mubr.msk.bf16.mxu0 %vm3610_vm1, %v7020_v0  ;;  %3310 = vmatprep.mubr.msk.bf16.mxu1 %vm3610_vm1, %v7020_v0 }
 0x14e   : > { %3191 = vmatmul.mubr.msk.bf16.gmra.mrb[104].mxu0 %vm684_vm3, %v3446_v57  ;;  %3311 = vmatmul.mubr.msk.bf16.gmra.mrb[104].mxu1 %vm684_vm3, %v3466_v9 }
 0x14f   : > { %3194 = vmatprep.mubr.msk.bf16.mxu0 %vm3610_vm1, %v7020_v0  ;;  %3322 = vmatprep.mubr.msk.f32.mxu1 %vm3610_vm1, %v7020_v0 }
 0x151   : > { %v4009_v59 = vpop.f32.mrb[0].mxu0  ;;  %v4050_v24 = vpop.f32.mrb[0].mxu1 }
 0x152   : > { %7189 = vst [vmem:[#allocation12_spill] sm:$0xff] %v4009_v59  ;;  %v1584_v60 = vmul.f32 %v4009_v59, %v4009_v59  ;;  %v3088_v61 = vpop.f32.mrb[1].mxu0  ;;  %v1352_v1 = vsel %vm1351_vm4, %v4009_v59, 0.0  ;;  %v3208_v26 = vpop.f32.mrb[1].mxu1 }
 0x153   : > { %v4014_v63 = vpop.f32.mrb[2].mxu0  ;;  %v4054_v29 = vpop.f32.mrb[2].mxu1 }
 0x154   : > { %7190 = vst [vmem:[#allocation13_spill] sm:$0xff] %v4014_v63  ;;  %v1353_v2 = vsel %vm1351_vm4, %v4014_v63, 0.0  ;;  %v1585_v3 = vmul.f32 %v4014_v63, %v4014_v63  ;;  %v3089_v4 = vpop.f32.mrb[3].mxu0  ;;  %v1697_v6 = vsel %vm1351_vm4, %v1584_v60, 0.0  ;;  %v3209_v33 = vpop.f32.mrb[3].mxu1 }
 0x155   : > { %v1354_v5 = vadd.f32 %v1353_v2, %v1352_v1 }
 0x156   : > { %v1698_v7 = vsel %vm1351_vm4, %v1585_v3, 0.0  ;;  %3195 = vmatmul.mubr.msk.bf16.gmra.mrb[108].mxu0 %vm684_vm3, %v3448_v62 }
 0x157   : > { %v1699_v8 = vadd.f32 %v1698_v7, %v1697_v6  ;;  %3198 = vmatprep.mubr.msk.bf16.mxu0 %vm3610_vm1, %v7020_v0 }
 0x159   : > { %v4031_v10 = vpop.f32.mrb[4].mxu0  ;;  %v4077_v47 = vpop.f32.mrb[4].mxu1 }
 0x15a   : > { %7191 = vst [vmem:[#allocation14_spill] sm:$0xff] %v4031_v10  ;;  %v1355_v11 = vsel %vm1351_vm4, %v4031_v10, 0.0  ;;  %v1586_v12 = vmul.f32 %v4031_v10, %v4031_v10  ;;  %v3092_v13 = vpop.f32.mrb[5].mxu0  ;;  %v3212_v49 = vpop.f32.mrb[5].mxu1 }
 0x15b   : > { %v1356_v15 = vadd.f32 %v1355_v11, %v1354_v5  ;;  %v4038_v16 = vpop.f32.mrb[6].mxu0  ;;  %v4079_v50 = vpop.f32.mrb[6].mxu1 }
 0x15c   : > { %7192 = vst [vmem:[#allocation15_spill] sm:$0xff] %v4038_v16  ;;  %v1700_v17 = vsel %vm1351_vm4, %v1586_v12, 0.0  ;;  %v1357_v18 = vsel %vm1351_vm4, %v4038_v16, 0.0  ;;  %v1587_v19 = vmul.f32 %v4038_v16, %v4038_v16  ;;  %v3093_v20 = vpop.f32.mrb[7].mxu0  ;;  %v3213_v52 = vpop.f32.mrb[7].mxu1 }
 0x15d   : > { %v1701_v21 = vadd.f32 %v1700_v17, %v1699_v8  ;;  %v1358_v22 = vadd.f32 %v1357_v18, %v1356_v15 }
 0x15e   : > { %v1702_v23 = vsel %vm1351_vm4, %v1587_v19, 0.0  ;;  %3199 = vmatmul.mubr.msk.bf16.gmra.mrb[112].mxu0 %vm684_vm3, %v3450_v14 }
 0x15f   : > { %v1703_v25 = vadd.f32 %v1702_v23, %v1701_v21  ;;  %3202 = vmatprep.mubr.msk.bf16.mxu0 %vm3610_vm1, %v7020_v0 }
 0x161   : > { %v4059_v32 = vpop.f32.mrb[8].mxu0  ;;  %v4095_v4 = vpop.f32.mrb[8].mxu1 }
 0x162   : > { %7194 = vst [vmem:[#allocation17_spill] sm:$0xff] %v4059_v32  ;;  %v1359_v34 = vsel %vm1351_vm4, %v4059_v32, 0.0  ;;  %v1588_v35 = vmul.f32 %v4059_v32, %v4059_v32  ;;  %v3096_v36 = vpop.f32.mrb[9].mxu0  ;;  %v3216_v6 = vpop.f32.mrb[9].mxu1 }
 0x163   : > { %v1360_v38 = vadd.f32 %v1359_v34, %v1358_v22  ;;  %v4067_v39 = vpop.f32.mrb[10].mxu0  ;;  %v4097_v7 = vpop.f32.mrb[10].mxu1 }
 0x164   : > { %7195 = vst [vmem:[#allocation18_spill] sm:$0xff] %v4067_v39  ;;  %v1704_v40 = vsel %vm1351_vm4, %v1588_v35, 0.0  ;;  %v1361_v41 = vsel %vm1351_vm4, %v4067_v39, 0.0  ;;  %v1589_v42 = vmul.f32 %v4067_v39, %v4067_v39  ;;  %v3097_v43 = vpop.f32.mrb[11].mxu0  ;;  %v3217_v9 = vpop.f32.mrb[11].mxu1 }
 0x165   : > { %v1705_v44 = vadd.f32 %v1704_v40, %v1703_v25  ;;  %v1362_v45 = vadd.f32 %v1361_v41, %v1360_v38 }
 0x166   : > { %v1706_v46 = vsel %vm1351_vm4, %v1589_v42, 0.0  ;;  %3203 = vmatmul.mubr.msk.bf16.gmra.mrb[116].mxu0 %vm684_vm3, %v3452_v37 }
 0x167   : > { %v1707_v48 = vadd.f32 %v1706_v46, %v1705_v44 }
 0x169   : > { %v4081_v51 = vpop.f32.mrb[12].mxu0  ;;  %v4113_v25 = vpop.f32.mrb[12].mxu1 }
 0x16a   : > { %7196 = vst [vmem:[#allocation19_spill] sm:$0xff] %v4081_v51  ;;  %v1363_v53 = vsel %vm1351_vm4, %v4081_v51, 0.0  ;;  %v1590_v54 = vmul.f32 %v4081_v51, %v4081_v51  ;;  %v3100_v55 = vpop.f32.mrb[13].mxu0  ;;  %v3220_v27 = vpop.f32.mrb[13].mxu1 }
 0x16b   : > { %v1364_v56 = vadd.f32 %v1363_v53, %v1362_v45  ;;  %v4087_v57 = vpop.f32.mrb[14].mxu0  ;;  %v4115_v28 = vpop.f32.mrb[14].mxu1 }
 0x16c   : > { %7197 = vst [vmem:[#allocation20_spill] sm:$0xff] %v4087_v57  ;;  %v1708_v58 = vsel %vm1351_vm4, %v1590_v54, 0.0  ;;  %v1365_v60 = vsel %vm1351_vm4, %v4087_v57, 0.0  ;;  %v1591_v61 = vmul.f32 %v4087_v57, %v4087_v57  ;;  %v3101_v62 = vpop.f32.mrb[15].mxu0  ;;  %v3221_v34 = vpop.f32.mrb[15].mxu1 }
 0x16d   : > { %v1709_v1 = vadd.f32 %v1708_v58, %v1707_v48  ;;  %v1366_v2 = vadd.f32 %v1365_v60, %v1364_v56 }
 0x16e   : > { %v1710_v3 = vsel %vm1351_vm4, %v1591_v61, 0.0 }
 0x16f   : > { %v1711_v5 = vadd.f32 %v1710_v3, %v1709_v1 }
 0x171   : > { %v4099_v8 = vpop.f32.mrb[16].mxu0  ;;  %v4131_v49 = vpop.f32.mrb[16].mxu1 }
 0x172   : > { %7198 = vst [vmem:[#allocation21_spill] sm:$0xff] %v4099_v8  ;;  %v1367_v11 = vsel %vm1351_vm4, %v4099_v8, 0.0  ;;  %v1592_v12 = vmul.f32 %v4099_v8, %v4099_v8  ;;  %v3104_v13 = vpop.f32.mrb[17].mxu0  ;;  %v3224_v53 = vpop.f32.mrb[17].mxu1 }
 0x173   : > { %v1368_v14 = vadd.f32 %v1367_v11, %v1366_v2  ;;  %v4105_v15 = vpop.f32.mrb[18].mxu0  ;;  %v4133_v54 = vpop.f32.mrb[18].mxu1 }
 0x174   : > { %7199 = vst [vmem:[#allocation22_spill] sm:$0xff] %v4105_v15  ;;  %v1712_v17 = vsel %vm1351_vm4, %v1592_v12, 0.0  ;;  %v1369_v18 = vsel %vm1351_vm4, %v4105_v15, 0.0  ;;  %v1593_v19 = vmul.f32 %v4105_v15, %v4105_v15  ;;  %v3105_v20 = vpop.f32.mrb[19].mxu0  ;;  %v3225_v56 = vpop.f32.mrb[19].mxu1 }
 0x175   : > { %v1713_v21 = vadd.f32 %v1712_v17, %v1711_v5  ;;  %v1370_v22 = vadd.f32 %v1369_v18, %v1368_v14 }
 0x176   : > { %v1714_v23 = vsel %vm1351_vm4, %v1593_v19, 0.0 }
 0x177   : > { %v1715_v26 = vadd.f32 %v1714_v23, %v1713_v21 }
 0x179   : > { %v4117_v33 = vpop.f32.mrb[20].mxu0  ;;  %v4149_v13 = vpop.f32.mrb[20].mxu1 }
 0x17a   : > { %7200 = vst [vmem:[#allocation23_spill] sm:$0xff] %v4117_v33  ;;  %v1371_v35 = vsel %vm1351_vm4, %v4117_v33, 0.0  ;;  %v1594_v36 = vmul.f32 %v4117_v33, %v4117_v33  ;;  %v3108_v37 = vpop.f32.mrb[21].mxu0  ;;  %v3228_v17 = vpop.f32.mrb[21].mxu1 }
 0x17b   : > { %v1372_v38 = vadd.f32 %v1371_v35, %v1370_v22  ;;  %v4123_v40 = vpop.f32.mrb[22].mxu0  ;;  %v4151_v18 = vpop.f32.mrb[22].mxu1 }
 0x17c   : > { %7201 = vst [vmem:[#allocation24_spill] sm:$0xff] %v4123_v40  ;;  %v1716_v41 = vsel %vm1351_vm4, %v1594_v36, 0.0  ;;  %v1373_v42 = vsel %vm1351_vm4, %v4123_v40, 0.0  ;;  %v1595_v43 = vmul.f32 %v4123_v40, %v4123_v40  ;;  %v3109_v44 = vpop.f32.mrb[23].mxu0  ;;  %v3229_v20 = vpop.f32.mrb[23].mxu1 }
 0x17d   : > { %v1717_v45 = vadd.f32 %v1716_v41, %v1715_v26  ;;  %v1374_v46 = vadd.f32 %v1373_v42, %v1372_v38 }
 0x17e   : > { %v1718_v48 = vsel %vm1351_vm4, %v1595_v43, 0.0 }
 0x17f   : > { %v1719_v52 = vadd.f32 %v1718_v48, %v1717_v45 }
 0x181   : > { %v4135_v55 = vpop.f32.mrb[24].mxu0  ;;  %v4167_v43 = vpop.f32.mrb[24].mxu1 }
 0x182   : > { %7202 = vst [vmem:[#allocation25_spill] sm:$0xff] %v4135_v55  ;;  %v1375_v58 = vsel %vm1351_vm4, %v4135_v55, 0.0  ;;  %v1596_v60 = vmul.f32 %v4135_v55, %v4135_v55  ;;  %v3112_v61 = vpop.f32.mrb[25].mxu0  ;;  %v3232_v45 = vpop.f32.mrb[25].mxu1 }
 0x183   : > { %v1376_v62 = vadd.f32 %v1375_v58, %v1374_v46  ;;  %v4141_v1 = vpop.f32.mrb[26].mxu0  ;;  %v4169_v46 = vpop.f32.mrb[26].mxu1 }
 0x184   : > { %7203 = vst [vmem:[#allocation26_spill] sm:$0xff] %v4141_v1  ;;  %v1720_v2 = vsel %vm1351_vm4, %v1596_v60, 0.0  ;;  %v1377_v3 = vsel %vm1351_vm4, %v4141_v1, 0.0  ;;  %v1597_v5 = vmul.f32 %v4141_v1, %v4141_v1  ;;  %v3113_v6 = vpop.f32.mrb[27].mxu0 }
 0x185   : > { %v1721_v9 = vadd.f32 %v1720_v2, %v1719_v52  ;;  %v1378_v11 = vadd.f32 %v1377_v3, %v1376_v62  ;;  %v3233_v52 = vpop.f32.mrb[27].mxu1 }
 0x186   : > { %v1722_v12 = vsel %vm1351_vm4, %v1597_v5, 0.0 }
 0x187   : > { %v1723_v14 = vadd.f32 %v1722_v12, %v1721_v9 }
 0x189   : > { %v4153_v19 = vpop.f32.mrb[28].mxu0  ;;  %v4185_v12 = vpop.f32.mrb[28].mxu1 }
 0x18a   : > { %7204 = vst [vmem:[#allocation27_spill] sm:$0xff] %v4153_v19  ;;  %v1379_v21 = vsel %vm1351_vm4, %v4153_v19, 0.0  ;;  %v1598_v22 = vmul.f32 %v4153_v19, %v4153_v19  ;;  %v3116_v23 = vpop.f32.mrb[29].mxu0  ;;  %v3236_v17 = vpop.f32.mrb[29].mxu1 }
 0x18b   : > { %v1380_v26 = vadd.f32 %v1379_v21, %v1378_v11  ;;  %v4159_v27 = vpop.f32.mrb[30].mxu0  ;;  %v4187_v20 = vpop.f32.mrb[30].mxu1 }
 0x18c   : > { %7205 = vst [vmem:[#allocation28_spill] sm:$0xff] %v4159_v27  ;;  %v1724_v34 = vsel %vm1351_vm4, %v1598_v22, 0.0  ;;  %v1381_v35 = vsel %vm1351_vm4, %v4159_v27, 0.0  ;;  %v1599_v36 = vmul.f32 %v4159_v27, %v4159_v27  ;;  %v3117_v37 = vpop.f32.mrb[31].mxu0  ;;  %v3237_v22 = vpop.f32.mrb[31].mxu1 }
 0x18d   : > { %v1725_v38 = vadd.f32 %v1724_v34, %v1723_v14  ;;  %v1382_v41 = vadd.f32 %v1381_v35, %v1380_v26 }
 0x18e   : > { %v1726_v42 = vsel %vm1351_vm4, %v1599_v36, 0.0 }
 0x18f   : > { %v1727_v44 = vadd.f32 %v1726_v42, %v1725_v38 }
 0x191   : > { %v4171_v48 = vpop.f32.mrb[32].mxu0 }
 0x192   : > { %7206 = vst [vmem:[#allocation29_spill] sm:$0xff] %v4171_v48  ;;  %v1383_v53 = vsel %vm1351_vm4, %v4171_v48, 0.0  ;;  %v1600_v56 = vmul.f32 %v4171_v48, %v4171_v48  ;;  %v3120_v58 = vpop.f32.mrb[33].mxu0 }
 0x193   : > { %v1384_v60 = vadd.f32 %v1383_v53, %v1382_v41  ;;  %v4177_v61 = vpop.f32.mrb[34].mxu0  ;;  %v4203_v53 = vpop.f32.mrb[32].mxu1 }
 0x194   : > { %7207 = vst [vmem:[#allocation30_spill] sm:$0xff] %v4177_v61  ;;  %v1728_v62 = vsel %vm1351_vm4, %v1600_v56, 0.0  ;;  %v1385_v2 = vsel %vm1351_vm4, %v4177_v61, 0.0  ;;  %v1601_v3 = vmul.f32 %v4177_v61, %v4177_v61  ;;  %v3121_v5 = vpop.f32.mrb[35].mxu0  ;;  %v3240_v58 = vpop.f32.mrb[33].mxu1 }
 0x195   : > { %v1729_v6 = vadd.f32 %v1728_v62, %v1727_v44  ;;  %v1386_v9 = vadd.f32 %v1385_v2, %v1384_v60  ;;  %v4205_v60 = vpop.f32.mrb[34].mxu1 }
 0x196   : > { %v1730_v11 = vsel %vm1351_vm4, %v1601_v3, 0.0  ;;  %v3241_v2 = vpop.f32.mrb[35].mxu1 }
 0x197   : > { %v1731_v14 = vadd.f32 %v1730_v11, %v1729_v6 }
 0x199   : > { %v4189_v21 = vpop.f32.mrb[36].mxu0 }
 0x19a   : > { %7208 = vst [vmem:[#allocation31_spill] sm:$0xff] %v4189_v21  ;;  %v1387_v23 = vsel %vm1351_vm4, %v4189_v21, 0.0  ;;  %v1602_v26 = vmul.f32 %v4189_v21, %v4189_v21  ;;  %v3124_v34 = vpop.f32.mrb[37].mxu0 }
 0x19b   : > { %v1388_v35 = vadd.f32 %v1387_v23, %v1386_v9  ;;  %v4195_v36 = vpop.f32.mrb[38].mxu0 }
 0x19c   : > { %7209 = vst [vmem:[#allocation32_spill] sm:$0xff] %v4195_v36  ;;  %v1732_v37 = vsel %vm1351_vm4, %v1602_v26, 0.0  ;;  %v1389_v38 = vsel %vm1351_vm4, %v4195_v36, 0.0  ;;  %v1603_v41 = vmul.f32 %v4195_v36, %v4195_v36  ;;  %v3125_v42 = vpop.f32.mrb[39].mxu0 }
 0x19d   : > { %v1733_v44 = vadd.f32 %v1732_v37, %v1731_v14  ;;  %v1390_v45 = vadd.f32 %v1389_v38, %v1388_v35  ;;  %v4221_v37 = vpop.f32.mrb[36].mxu1 }
 0x19e   : > { %v1734_v52 = vsel %vm1351_vm4, %v1603_v41, 0.0  ;;  %v3244_v41 = vpop.f32.mrb[37].mxu1 }
 0x19f   : > { %v1735_v56 = vadd.f32 %v1734_v52, %v1733_v44  ;;  %v4223_v42 = vpop.f32.mrb[38].mxu1 }
 0x1a1   : > { %v4207_v62 = vpop.f32.mrb[40].mxu0 }
 0x1a2   : > { %7210 = vst [vmem:[#allocation33_spill] sm:$0xff] %v4207_v62  ;;  %v1391_v3 = vsel %vm1351_vm4, %v4207_v62, 0.0  ;;  %v1604_v5 = vmul.f32 %v4207_v62, %v4207_v62  ;;  %v3128_v6 = vpop.f32.mrb[41].mxu0 }
 0x1a3   : > { %v1392_v9 = vadd.f32 %v1391_v3, %v1390_v45  ;;  %v4213_v11 = vpop.f32.mrb[42].mxu0  ;;  %v3245_v45 = vpop.f32.mrb[39].mxu1 }
 0x1a4   : > { %7211 = vst [vmem:[#allocation34_spill] sm:$0xff] %v4213_v11  ;;  %v1736_v14 = vsel %vm1351_vm4, %v1604_v5, 0.0  ;;  %v1393_v17 = vsel %vm1351_vm4, %v4213_v11, 0.0  ;;  %v1605_v22 = vmul.f32 %v4213_v11, %v4213_v11  ;;  %v3129_v23 = vpop.f32.mrb[43].mxu0 }
 0x1a5   : > { %v1737_v26 = vadd.f32 %v1736_v14, %v1735_v56  ;;  %v1394_v34 = vadd.f32 %v1393_v17, %v1392_v9 }
 0x1a6   : > { %v1738_v35 = vsel %vm1351_vm4, %v1605_v22, 0.0 }
 0x1a7   : > { %v1739_v38 = vadd.f32 %v1738_v35, %v1737_v26  ;;  %v4239_v26 = vpop.f32.mrb[40].mxu1 }
 0x1a8   : > { %v3248_v41 = vpop.f32.mrb[41].mxu1 }
 0x1a9   : > { %v4225_v44 = vpop.f32.mrb[44].mxu0 }
 0x1aa   : > { %7212 = vst [vmem:[#allocation35_spill] sm:$0xff] %v4225_v44  ;;  %v1395_v52 = vsel %vm1351_vm4, %v4225_v44, 0.0  ;;  %v1606_v58 = vmul.f32 %v4225_v44, %v4225_v44  ;;  %v3132_v2 = vpop.f32.mrb[45].mxu0 }
 0x1ab   : > { %v1396_v56 = vadd.f32 %v1395_v52, %v1394_v34  ;;  %v4231_v3 = vpop.f32.mrb[46].mxu0  ;;  %v4241_v34 = vpop.f32.mrb[42].mxu1 }
 0x1ac   : > { %7213 = vst [vmem:[#allocation36_spill] sm:$0xff] %v4231_v3  ;;  %v1740_v5 = vsel %vm1351_vm4, %v1606_v58, 0.0  ;;  %v1397_v6 = vsel %vm1351_vm4, %v4231_v3, 0.0  ;;  %v1607_v9 = vmul.f32 %v4231_v3, %v4231_v3  ;;  %v3133_v14 = vpop.f32.mrb[47].mxu0  ;;  %v3249_v52 = vpop.f32.mrb[43].mxu1 }
 0x1ad   : > { %v1741_v17 = vadd.f32 %v1740_v5, %v1739_v38  ;;  %v1398_v22 = vadd.f32 %v1397_v6, %v1396_v56  ;;  %v4257_v0 = vpop.f32.mrb[44].mxu1 }
 0x1ae   : > { %v1742_v23 = vsel %vm1351_vm4, %v1607_v9, 0.0 }
 0x1af   : > { %v1743_v35 = vadd.f32 %v1742_v23, %v1741_v17 }
 0x1b1   : > { %v4243_v45 = vpop.f32.mrb[48].mxu0 }
 0x1b2   : > { %7214 = vst [vmem:[#allocation37_spill] sm:$0xff] %v4243_v45  ;;  %v1399_v58 = vsel %vm1351_vm4, %v4243_v45, 0.0  ;;  %v1608_v2 = vmul.f32 %v4243_v45, %v4243_v45  ;;  %v3136_v14 = vpop.f32.mrb[49].mxu0 }
 0x1b3   : > { %v1400_v38 = vadd.f32 %v1399_v58, %v1398_v22  ;;  %v4249_v56 = vpop.f32.mrb[50].mxu0  ;;  %v3252_v14 = vpop.f32.mrb[45].mxu1 }
 0x1b4   : > { %7215 = vst [vmem:[#allocation38_spill] sm:$0xff] %v4249_v56  ;;  %v1744_v5 = vsel %vm1351_vm4, %v1608_v2, 0.0  ;;  %v1401_v6 = vsel %vm1351_vm4, %v4249_v56, 0.0  ;;  %v1609_v9 = vmul.f32 %v4249_v56, %v4249_v56  ;;  %v3137_v17 = vpop.f32.mrb[51].mxu0  ;;  %v4259_v22 = vpop.f32.mrb[46].mxu1 }
 0x1b5   : > { %v1745_v23 = vadd.f32 %v1744_v5, %v1743_v35  ;;  %v1402_v41 = vadd.f32 %v1401_v6, %v1400_v38  ;;  %v3253_v2 = vpop.f32.mrb[47].mxu1 }
 0x1b6   : > { %v1746_v52 = vsel %vm1351_vm4, %v1609_v9, 0.0  ;;  %v4275_v3 = vpop.f32.mrb[48].mxu1 }
 0x1b7   : > { %v1747_v30 = vadd.f32 %v1746_v52, %v1745_v23 }
 0x1b9   : > { %v4261_v58 = vpop.f32.mrb[52].mxu0 }
 0x1ba   : > { %7216 = vst [vmem:[#allocation39_spill] sm:$0xff] %v4261_v58  ;;  %v1403_v45 = vsel %vm1351_vm4, %v4261_v58, 0.0  ;;  %v1610_v56 = vmul.f32 %v4261_v58, %v4261_v58  ;;  %v3140_v17 = vpop.f32.mrb[53].mxu0 }
 0x1bb   : > { %v1404_v35 = vadd.f32 %v1403_v45, %v1402_v41  ;;  %v4267_v38 = vpop.f32.mrb[54].mxu0  ;;  %v3256_v17 = vpop.f32.mrb[49].mxu1 }
 0x1bc   : > { %7217 = vst [vmem:[#allocation40_spill] sm:$0xff] %v4267_v38  ;;  %v1748_v5 = vsel %vm1351_vm4, %v1610_v56, 0.0  ;;  %v1405_v6 = vsel %vm1351_vm4, %v4267_v38, 0.0  ;;  %v1611_v9 = vmul.f32 %v4267_v38, %v4267_v38  ;;  %v3141_v23 = vpop.f32.mrb[55].mxu0  ;;  %v4277_v45 = vpop.f32.mrb[50].mxu1 }
 0x1bd   : > { %v1749_v52 = vadd.f32 %v1748_v5, %v1747_v30  ;;  %v1406_v14 = vadd.f32 %v1405_v6, %v1404_v35  ;;  %v3257_v56 = vpop.f32.mrb[51].mxu1 }
 0x1be   : > { %v1750_v2 = vsel %vm1351_vm4, %v1611_v9, 0.0  ;;  %v4293_v11 = vpop.f32.mrb[52].mxu1 }
 0x1bf   : > { %v1751_v58 = vadd.f32 %v1750_v2, %v1749_v52 }
 0x1c1   : > { %v4279_v41 = vpop.f32.mrb[56].mxu0 }
 0x1c2   : > { %7218 = vst [vmem:[#allocation41_spill] sm:$0xff] %v4279_v41  ;;  %v1407_v44 = vsel %vm1351_vm4, %v4279_v41, 0.0  ;;  %v1612_v38 = vmul.f32 %v4279_v41, %v4279_v41  ;;  %v3144_v23 = vpop.f32.mrb[57].mxu0 }
 0x1c3   : > { %v1408_v30 = vadd.f32 %v1407_v44, %v1406_v14  ;;  %v4285_v35 = vpop.f32.mrb[58].mxu0  ;;  %v3260_v23 = vpop.f32.mrb[53].mxu1 }
 0x1c4   : > { %7219 = vst [vmem:[#allocation42_spill] sm:$0xff] %v4285_v35  ;;  %v1752_v5 = vsel %vm1351_vm4, %v1612_v38, 0.0  ;;  %v1409_v6 = vsel %vm1351_vm4, %v4285_v35, 0.0  ;;  %v1613_v9 = vmul.f32 %v4285_v35, %v4285_v35  ;;  %v3145_v52 = vpop.f32.mrb[59].mxu0  ;;  %v4295_v44 = vpop.f32.mrb[54].mxu1 }
 0x1c5   : > { %v1753_v2 = vadd.f32 %v1752_v5, %v1751_v58  ;;  %v1410_v17 = vadd.f32 %v1409_v6, %v1408_v30  ;;  %v3261_v38 = vpop.f32.mrb[55].mxu1 }
 0x1c6   : > { %v1754_v56 = vsel %vm1351_vm4, %v1613_v9, 0.0  ;;  %v4311_v36 = vpop.f32.mrb[56].mxu1 }
 0x1c7   : > { %v1755_v41 = vadd.f32 %v1754_v56, %v1753_v2 }
 0x1c9   : > { %v4297_v14 = vpop.f32.mrb[60].mxu0 }
 0x1ca   : > { %7220 = vst [vmem:[#allocation43_spill] sm:$0xff] %v4297_v14  ;;  %v1411_v62 = vsel %vm1351_vm4, %v4297_v14, 0.0  ;;  %v1614_v35 = vmul.f32 %v4297_v14, %v4297_v14  ;;  %v3148_v52 = vpop.f32.mrb[61].mxu0 }
 0x1cb   : > { %v1412_v58 = vadd.f32 %v1411_v62, %v1410_v17  ;;  %v4303_v30 = vpop.f32.mrb[62].mxu0  ;;  %v3264_v52 = vpop.f32.mrb[57].mxu1 }
 0x1cc   : > { %7221 = vst [vmem:[#allocation44_spill] sm:$0xff] %v4303_v30  ;;  %v1756_v5 = vsel %vm1351_vm4, %v1614_v35, 0.0  ;;  %v1413_v6 = vsel %vm1351_vm4, %v4303_v30, 0.0  ;;  %v1615_v9 = vmul.f32 %v4303_v30, %v4303_v30  ;;  %v3149_v2 = vpop.f32.mrb[63].mxu0  ;;  %v4313_v62 = vpop.f32.mrb[58].mxu1 }
 0x1cd   : > { %v1757_v56 = vadd.f32 %v1756_v5, %v1755_v41  ;;  %v1414_v23 = vadd.f32 %v1413_v6, %v1412_v58  ;;  %v3265_v35 = vpop.f32.mrb[59].mxu1 }
 0x1ce   : > { %v1758_v38 = vsel %vm1351_vm4, %v1615_v9, 0.0  ;;  %v4329_v61 = vpop.f32.mrb[60].mxu1 }
 0x1cf   : > { %v1759_v14 = vadd.f32 %v1758_v38, %v1757_v56 }
 0x1d1   : > { %v4315_v17 = vpop.f32.mrb[64].mxu0 }
 0x1d2   : > { %7222 = vst [vmem:[#allocation45_spill] sm:$0xff] %v4315_v17  ;;  %v1415_v21 = vsel %vm1351_vm4, %v4315_v17, 0.0  ;;  %v1616_v30 = vmul.f32 %v4315_v17, %v4315_v17  ;;  %v3152_v2 = vpop.f32.mrb[65].mxu0 }
 0x1d3   : > { %v1416_v41 = vadd.f32 %v1415_v21, %v1414_v23  ;;  %v4321_v58 = vpop.f32.mrb[66].mxu0  ;;  %v3268_v2 = vpop.f32.mrb[61].mxu1 }
 0x1d4   : > { %7223 = vst [vmem:[#allocation46_spill] sm:$0xff] %v4321_v58  ;;  %v1760_v5 = vsel %vm1351_vm4, %v1616_v30, 0.0  ;;  %v1417_v6 = vsel %vm1351_vm4, %v4321_v58, 0.0  ;;  %v1617_v9 = vmul.f32 %v4321_v58, %v4321_v58  ;;  %v3153_v56 = vpop.f32.mrb[67].mxu0  ;;  %v4331_v21 = vpop.f32.mrb[62].mxu1 }
 0x1d5   : > { %v1761_v38 = vadd.f32 %v1760_v5, %v1759_v14  ;;  %v1418_v52 = vadd.f32 %v1417_v6, %v1416_v41  ;;  %7224 = vst [vmem:[#allocation47_spill] sm:$0xff] %v4331_v21  ;;  %v3269_v30 = vpop.f32.mrb[63].mxu1 }
 0x1d6   : > { %v1762_v35 = vsel %vm1351_vm4, %v1617_v9, 0.0  ;;  %v4347_v27 = vpop.f32.mrb[64].mxu1 }
 0x1d7   : > { %v1763_v17 = vadd.f32 %v1762_v35, %v1761_v38  ;;  %7227 = vst [vmem:[#allocation50_spill] sm:$0xff] %v4347_v27 }
 0x1d9   : > { %v4333_v23 = vpop.f32.mrb[68].mxu0 }
 0x1da   : > { %7225 = vst [vmem:[#allocation48_spill] sm:$0xff] %v4333_v23  ;;  %v1419_v48 = vsel %vm1351_vm4, %v4333_v23, 0.0  ;;  %v1618_v58 = vmul.f32 %v4333_v23, %v4333_v23  ;;  %v3156_v56 = vpop.f32.mrb[69].mxu0 }
 0x1db   : > { %v1420_v14 = vadd.f32 %v1419_v48, %v1418_v52  ;;  %v4339_v41 = vpop.f32.mrb[70].mxu0  ;;  %v3272_v56 = vpop.f32.mrb[65].mxu1 }
 0x1dc   : > { %7226 = vst [vmem:[#allocation49_spill] sm:$0xff] %v4339_v41  ;;  %v1764_v5 = vsel %vm1351_vm4, %v1618_v58, 0.0  ;;  %v1421_v6 = vsel %vm1351_vm4, %v4339_v41, 0.0  ;;  %v1619_v9 = vmul.f32 %v4339_v41, %v4339_v41  ;;  %v3157_v38 = vpop.f32.mrb[71].mxu0  ;;  %v4349_v48 = vpop.f32.mrb[66].mxu1 }
 0x1dd   : > { %v1765_v35 = vadd.f32 %v1764_v5, %v1763_v17  ;;  %v1422_v2 = vadd.f32 %v1421_v6, %v1420_v14  ;;  %7228 = vst [vmem:[#allocation51_spill] sm:$0xff] %v4349_v48  ;;  %v3273_v58 = vpop.f32.mrb[67].mxu1 }
 0x1de   : > { %v1766_v30 = vsel %vm1351_vm4, %v1619_v9, 0.0  ;;  %v4365_v1 = vpop.f32.mrb[68].mxu1 }
 0x1df   : > { %v1767_v23 = vadd.f32 %v1766_v30, %v1765_v35  ;;  %7231 = vst [vmem:[#allocation54_spill] sm:$0xff] %v4365_v1 }
 0x1e1   : > { %v4351_v52 = vpop.f32.mrb[72].mxu0 }
 0x1e2   : > { %7229 = vst [vmem:[#allocation52_spill] sm:$0xff] %v4351_v52  ;;  %v1423_v19 = vsel %vm1351_vm4, %v4351_v52, 0.0  ;;  %v1620_v41 = vmul.f32 %v4351_v52, %v4351_v52  ;;  %v3160_v38 = vpop.f32.mrb[73].mxu0 }
 0x1e3   : > { %v1424_v17 = vadd.f32 %v1423_v19, %v1422_v2  ;;  %v4357_v14 = vpop.f32.mrb[74].mxu0  ;;  %v3276_v38 = vpop.f32.mrb[69].mxu1 }
 0x1e4   : > { %7230 = vst [vmem:[#allocation53_spill] sm:$0xff] %v4357_v14  ;;  %v1768_v5 = vsel %vm1351_vm4, %v1620_v41, 0.0  ;;  %v1425_v6 = vsel %vm1351_vm4, %v4357_v14, 0.0  ;;  %v1621_v9 = vmul.f32 %v4357_v14, %v4357_v14  ;;  %v3161_v35 = vpop.f32.mrb[75].mxu0  ;;  %v4367_v19 = vpop.f32.mrb[70].mxu1 }
 0x1e5   : > { %v1769_v30 = vadd.f32 %v1768_v5, %v1767_v23  ;;  %v1426_v56 = vadd.f32 %v1425_v6, %v1424_v17  ;;  %7232 = vst [vmem:[#allocation55_spill] sm:$0xff] %v4367_v19  ;;  %v3277_v41 = vpop.f32.mrb[71].mxu1 }
 0x1e6   : > { %v1770_v58 = vsel %vm1351_vm4, %v1621_v9, 0.0  ;;  %v4383_v40 = vpop.f32.mrb[72].mxu1 }
 0x1e7   : > { %v1771_v52 = vadd.f32 %v1770_v58, %v1769_v30  ;;  %7235 = vst [vmem:[#allocation58_spill] sm:$0xff] %v4383_v40 }
 0x1e9   : > { %v4369_v2 = vpop.f32.mrb[76].mxu0 }
 0x1ea   : > { %7233 = vst [vmem:[#allocation56_spill] sm:$0xff] %v4369_v2  ;;  %v1427_v55 = vsel %vm1351_vm4, %v4369_v2, 0.0  ;;  %v1622_v14 = vmul.f32 %v4369_v2, %v4369_v2  ;;  %v3164_v35 = vpop.f32.mrb[77].mxu0 }
 0x1eb   : > { %v1428_v23 = vadd.f32 %v1427_v55, %v1426_v56  ;;  %v4375_v17 = vpop.f32.mrb[78].mxu0  ;;  %v3280_v35 = vpop.f32.mrb[73].mxu1 }
 0x1ec   : > { %7234 = vst [vmem:[#allocation57_spill] sm:$0xff] %v4375_v17  ;;  %v1772_v5 = vsel %vm1351_vm4, %v1622_v14, 0.0  ;;  %v1429_v6 = vsel %vm1351_vm4, %v4375_v17, 0.0  ;;  %v1623_v9 = vmul.f32 %v4375_v17, %v4375_v17  ;;  %v3165_v30 = vpop.f32.mrb[79].mxu0  ;;  %v4385_v55 = vpop.f32.mrb[74].mxu1 }
 0x1ed   : > { %v1773_v58 = vadd.f32 %v1772_v5, %v1771_v52  ;;  %v1430_v38 = vadd.f32 %v1429_v6, %v1428_v23  ;;  %7236 = vst [vmem:[#allocation59_spill] sm:$0xff] %v4385_v55  ;;  %v3281_v14 = vpop.f32.mrb[75].mxu1 }
 0x1ee   : > { %v1774_v41 = vsel %vm1351_vm4, %v1623_v9, 0.0  ;;  %v4401_v15 = vpop.f32.mrb[76].mxu1 }
 0x1ef   : > { %v1775_v2 = vadd.f32 %v1774_v41, %v1773_v58  ;;  %7239 = vst [vmem:[#allocation62_spill] sm:$0xff] %v4401_v15 }
 0x1f1   : > { %v4387_v56 = vpop.f32.mrb[80].mxu0 }
 0x1f2   : > { %7237 = vst [vmem:[#allocation60_spill] sm:$0xff] %v4387_v56  ;;  %v1431_v33 = vsel %vm1351_vm4, %v4387_v56, 0.0  ;;  %v1624_v17 = vmul.f32 %v4387_v56, %v4387_v56  ;;  %v3168_v30 = vpop.f32.mrb[81].mxu0 }
 0x1f3   : > { %v1432_v52 = vadd.f32 %v1431_v33, %v1430_v38  ;;  %v4393_v23 = vpop.f32.mrb[82].mxu0  ;;  %v3284_v30 = vpop.f32.mrb[77].mxu1 }
 0x1f4   : > { %7238 = vst [vmem:[#allocation61_spill] sm:$0xff] %v4393_v23  ;;  %v1776_v5 = vsel %vm1351_vm4, %v1624_v17, 0.0  ;;  %v1433_v6 = vsel %vm1351_vm4, %v4393_v23, 0.0  ;;  %v1625_v9 = vmul.f32 %v4393_v23, %v4393_v23  ;;  %v3169_v58 = vpop.f32.mrb[83].mxu0  ;;  %v4403_v33 = vpop.f32.mrb[78].mxu1 }
 0x1f5   : > { %v1777_v41 = vadd.f32 %v1776_v5, %v1775_v2  ;;  %v1434_v35 = vadd.f32 %v1433_v6, %v1432_v52  ;;  %7240 = vst [vmem:[#allocation63_spill] sm:$0xff] %v4403_v33  ;;  %v3285_v17 = vpop.f32.mrb[79].mxu1  ;;  %v1930_v5 = vld [vmem:[#allocation7 + $0x10] sm:$0xff]  ;;  %v1931_v6 = vld [vmem:[#allocation7 + $0x18] sm:$0xff] }
 0x1f6   : > { %v1778_v14 = vsel %vm1351_vm4, %v1625_v9, 0.0  ;;  %v4418_v17 = vpack.c.bf16 %v1931_v6, %v1930_v5 }
 0x1f7   : > { %v1779_v56 = vadd.f32 %v1778_v14, %v1777_v41 }
 0x1f8   : > { %7243 = vst [vmem:[#allocation66_spill] sm:$0xff] %v4418_v17  ;;  %3341 = vmatpush3.bf16.msra.mxu1 %v4418_v17 }
 0x1f9   : > { %v4405_v38 = vpop.f32.mrb[84].mxu0 }
 0x1fa   : > { %7241 = vst [vmem:[#allocation64_spill] sm:$0xff] %v4405_v38  ;;  %v1435_v8 = vsel %vm1351_vm4, %v4405_v38, 0.0  ;;  %v1626_v23 = vmul.f32 %v4405_v38, %v4405_v38  ;;  %v3172_v58 = vpop.f32.mrb[85].mxu0 }
 0x1fb   : > { %v1436_v2 = vadd.f32 %v1435_v8, %v1434_v35  ;;  %v4411_v52 = vpop.f32.mrb[86].mxu0  ;;  %v4422_v8 = vpop.f32.mrb[80].mxu1 }
 0x1fc   : > { %7242 = vst [vmem:[#allocation65_spill] sm:$0xff] %v4411_v52  ;;  %v1780_v9 = vsel %vm1351_vm4, %v1626_v23, 0.0  ;;  %v1437_v41 = vsel %vm1351_vm4, %v4411_v52, 0.0  ;;  %v1627_v14 = vmul.f32 %v4411_v52, %v4411_v52  ;;  %v3173_v30 = vpop.f32.mrb[87].mxu0  ;;  %7244 = vst [vmem:[#allocation67_spill] sm:$0xff] %v4422_v8  ;;  %v3288_v38 = vpop.f32.mrb[81].mxu1 }
 0x1fd   : > { %v1781_v57 = vadd.f32 %v1780_v9, %v1779_v56  ;;  %v1438_v51 = vadd.f32 %v1437_v41, %v1436_v2  ;;  %v7245_v23 = vmov 0.0|0.0   ;;  %v4425_v39 = vpop.f32.mrb[82].mxu1 }
 0x1fe   : > { %v1782_v58 = vsel %vm1351_vm4, %v1627_v14, 0.0  ;;  %3342 = vmatprep.subr.bf16.mxu1 %v7245_v23  ;;  %7246 = vst [vmem:[#allocation68_spill] sm:$0xff] %v4425_v39  ;;  %v3289_v52 = vpop.f32.mrb[83].mxu1 }
 0x1ff   : > { %v1783_v35 = vadd.f32 %v1782_v58, %v1781_v57  ;;  %v4441_v16 = vpop.f32.mrb[84].mxu1 }
 0x200   : > { %7249 = vst [vmem:[#allocation71_spill] sm:$0xff] %v4441_v16 }
 0x201   : > { %v4427_v32 = vpop.f32.mrb[88].mxu0 }
 0x202   : > { %7247 = vst [vmem:[#allocation69_spill] sm:$0xff] %v4427_v32  ;;  %v1439_v5 = vsel %vm1351_vm4, %v4427_v32, 0.0  ;;  %v1628_v56 = vmul.f32 %v4427_v32, %v4427_v32  ;;  %v3176_v2 = vpop.f32.mrb[89].mxu0 }
 0x203   : > { %v1440_v6 = vadd.f32 %v1439_v5, %v1438_v51  ;;  %v4433_v9 = vpop.f32.mrb[90].mxu0  ;;  %v3292_v2 = vpop.f32.mrb[85].mxu1 }
 0x204   : > { %7248 = vst [vmem:[#allocation70_spill] sm:$0xff] %v4433_v9  ;;  %v1784_v57 = vsel %vm1351_vm4, %v1628_v56, 0.0  ;;  %v1441_v38 = vsel %vm1351_vm4, %v4433_v9, 0.0  ;;  %v1629_v41 = vmul.f32 %v4433_v9, %v4433_v9  ;;  %v3177_v14 = vpop.f32.mrb[91].mxu0  ;;  %v4443_v51 = vpop.f32.mrb[86].mxu1 }
 0x205   : > { %v1785_v52 = vadd.f32 %v1784_v57, %v1783_v35  ;;  %v1442_v30 = vadd.f32 %v1441_v38, %v1440_v6  ;;  %7250 = vst [vmem:[#allocation72_spill] sm:$0xff] %v4443_v51  ;;  %v3293_v56 = vpop.f32.mrb[87].mxu1 }
 0x206   : > { %v1786_v58 = vsel %vm1351_vm4, %v1629_v41, 0.0  ;;  %v4459_v63 = vpop.f32.mrb[88].mxu1 }
 0x207   : > { %v1787_v32 = vadd.f32 %v1786_v58, %v1785_v52  ;;  %7253 = vst [vmem:[#allocation75_spill] sm:$0xff] %v4459_v63 }
 0x209   : > { %v4445_v5 = vpop.f32.mrb[92].mxu0 }
 0x20a   : > { %7251 = vst [vmem:[#allocation73_spill] sm:$0xff] %v4445_v5  ;;  %v1443_v10 = vsel %vm1351_vm4, %v4445_v5, 0.0  ;;  %v1630_v9 = vmul.f32 %v4445_v5, %v4445_v5  ;;  %v3180_v14 = vpop.f32.mrb[93].mxu0 }
 0x20b   : > { %v1444_v35 = vadd.f32 %v1443_v10, %v1442_v30  ;;  %v4451_v6 = vpop.f32.mrb[94].mxu0  ;;  %v3296_v14 = vpop.f32.mrb[89].mxu1 }
 0x20c   : > { %7252 = vst [vmem:[#allocation74_spill] sm:$0xff] %v4451_v6  ;;  %v1788_v57 = vsel %vm1351_vm4, %v1630_v9, 0.0  ;;  %v1445_v38 = vsel %vm1351_vm4, %v4451_v6, 0.0  ;;  %v1631_v41 = vmul.f32 %v4451_v6, %v4451_v6  ;;  %v3181_v52 = vpop.f32.mrb[95].mxu0  ;;  %v4461_v10 = vpop.f32.mrb[90].mxu1 }
 0x20d   : > { %v1789_v58 = vadd.f32 %v1788_v57, %v1787_v32  ;;  %v1446_v2 = vadd.f32 %v1445_v38, %v1444_v35  ;;  %7254 = vst [vmem:[#allocation76_spill] sm:$0xff] %v4461_v10  ;;  %v3297_v9 = vpop.f32.mrb[91].mxu1 }
 0x20e   : > { %v1790_v56 = vsel %vm1351_vm4, %v1631_v41, 0.0  ;;  %v4477_v17 = vpop.f32.mrb[92].mxu1 }
 0x20f   : > { %v1791_v5 = vadd.f32 %v1790_v56, %v1789_v58  ;;  %7257 = vst [vmem:[#allocation79_spill] sm:$0xff] %v4477_v17 }
 0x211   : > { %v4463_v30 = vpop.f32.mrb[96].mxu0 }
 0x212   : > { %7255 = vst [vmem:[#allocation77_spill] sm:$0xff] %v4463_v30  ;;  %v1447_v59 = vsel %vm1351_vm4, %v4463_v30, 0.0  ;;  %v1632_v6 = vmul.f32 %v4463_v30, %v4463_v30  ;;  %v3184_v52 = vpop.f32.mrb[97].mxu0 }
 0x213   : > { %v1448_v32 = vadd.f32 %v1447_v59, %v1446_v2  ;;  %v4469_v35 = vpop.f32.mrb[98].mxu0  ;;  %v3300_v52 = vpop.f32.mrb[93].mxu1 }
 0x214   : > { %7256 = vst [vmem:[#allocation78_spill] sm:$0xff] %v4469_v35  ;;  %v1792_v57 = vsel %vm1351_vm4, %v1632_v6, 0.0  ;;  %v1449_v38 = vsel %vm1351_vm4, %v4469_v35, 0.0  ;;  %v1633_v41 = vmul.f32 %v4469_v35, %v4469_v35  ;;  %v3185_v58 = vpop.f32.mrb[99].mxu0  ;;  %v4479_v59 = vpop.f32.mrb[94].mxu1 }
 0x215   : > { %v1793_v56 = vadd.f32 %v1792_v57, %v1791_v5  ;;  %v1450_v14 = vadd.f32 %v1449_v38, %v1448_v32  ;;  %7258 = vst [vmem:[#allocation80_spill] sm:$0xff] %v4479_v59  ;;  %v3301_v6 = vpop.f32.mrb[95].mxu1 }
 0x216   : > { %v1794_v9 = vsel %vm1351_vm4, %v1633_v41, 0.0  ;;  %v4495_v31 = vpop.f32.mrb[96].mxu1 }
 0x217   : > { %v1795_v30 = vadd.f32 %v1794_v9, %v1793_v56  ;;  %7261 = vst [vmem:[#allocation83_spill] sm:$0xff] %v4495_v31 }
 0x219   : > { %v4481_v2 = vpop.f32.mrb[100].mxu0 }
 0x21a   : > { %7259 = vst [vmem:[#allocation81_spill] sm:$0xff] %v4481_v2  ;;  %v1451_v23 = vsel %vm1351_vm4, %v4481_v2, 0.0  ;;  %v1634_v35 = vmul.f32 %v4481_v2, %v4481_v2  ;;  %v3188_v58 = vpop.f32.mrb[101].mxu0 }
 0x21b   : > { %v1452_v5 = vadd.f32 %v1451_v23, %v1450_v14  ;;  %v4487_v32 = vpop.f32.mrb[102].mxu0  ;;  %v3304_v58 = vpop.f32.mrb[97].mxu1 }
 0x21c   : > { %7260 = vst [vmem:[#allocation82_spill] sm:$0xff] %v4487_v32  ;;  %v1796_v57 = vsel %vm1351_vm4, %v1634_v35, 0.0  ;;  %v1453_v38 = vsel %vm1351_vm4, %v4487_v32, 0.0  ;;  %v1635_v41 = vmul.f32 %v4487_v32, %v4487_v32  ;;  %v3189_v56 = vpop.f32.mrb[103].mxu0  ;;  %v4497_v23 = vpop.f32.mrb[98].mxu1 }
 0x21d   : > { %v1797_v9 = vadd.f32 %v1796_v57, %v1795_v30  ;;  %v1454_v52 = vadd.f32 %v1453_v38, %v1452_v5  ;;  %7262 = vst [vmem:[#allocation84_spill] sm:$0xff] %v4497_v23  ;;  %v3305_v35 = vpop.f32.mrb[99].mxu1 }
 0x21e   : > { %v1798_v6 = vsel %vm1351_vm4, %v1635_v41, 0.0  ;;  %v4513_v23 = vpop.f32.mrb[100].mxu1 }
 0x21f   : > { %v1799_v2 = vadd.f32 %v1798_v6, %v1797_v9  ;;  %7265 = vst [vmem:[#allocation87_spill] sm:$0xff] %v4513_v23 }
 0x221   : > { %v4499_v14 = vpop.f32.mrb[104].mxu0 }
 0x222   : > { %7263 = vst [vmem:[#allocation85_spill] sm:$0xff] %v4499_v14  ;;  %v1455_v59 = vsel %vm1351_vm4, %v4499_v14, 0.0  ;;  %v1636_v32 = vmul.f32 %v4499_v14, %v4499_v14  ;;  %v3192_v56 = vpop.f32.mrb[105].mxu0 }
 0x223   : > { %v1456_v30 = vadd.f32 %v1455_v59, %v1454_v52  ;;  %v4505_v5 = vpop.f32.mrb[106].mxu0  ;;  %v3308_v56 = vpop.f32.mrb[101].mxu1 }
 0x224   : > { %7264 = vst [vmem:[#allocation86_spill] sm:$0xff] %v4505_v5  ;;  %v1800_v57 = vsel %vm1351_vm4, %v1636_v32, 0.0  ;;  %v1457_v38 = vsel %vm1351_vm4, %v4505_v5, 0.0  ;;  %v1637_v41 = vmul.f32 %v4505_v5, %v4505_v5  ;;  %v3193_v9 = vpop.f32.mrb[107].mxu0  ;;  %v4515_v59 = vpop.f32.mrb[102].mxu1 }
 0x225   : > { %v1801_v6 = vadd.f32 %v1800_v57, %v1799_v2  ;;  %v1458_v58 = vadd.f32 %v1457_v38, %v1456_v30  ;;  %7266 = vst [vmem:[#allocation88_spill] sm:$0xff] %v4515_v59  ;;  %v3309_v32 = vpop.f32.mrb[103].mxu1 }
 0x226   : > { %v1802_v35 = vsel %vm1351_vm4, %v1637_v41, 0.0  ;;  %v4531_v59 = vpop.f32.mrb[104].mxu1 }
 0x227   : > { %v1803_v14 = vadd.f32 %v1802_v35, %v1801_v6 }
 0x229   : > { %v4517_v52 = vpop.f32.mrb[108].mxu0 }
 0x22a   : > { %7267 = vst [vmem:[#allocation89_spill] sm:$0xff] %v4517_v52  ;;  %v1459_v31 = vsel %vm1351_vm4, %v4517_v52, 0.0  ;;  %v1638_v5 = vmul.f32 %v4517_v52, %v4517_v52  ;;  %v3196_v9 = vpop.f32.mrb[109].mxu0 }
 0x22b   : > { %v1460_v2 = vadd.f32 %v1459_v31, %v1458_v58  ;;  %v4523_v30 = vpop.f32.mrb[110].mxu0  ;;  %v3312_v9 = vpop.f32.mrb[105].mxu1 }
 0x22c   : > { %7268 = vst [vmem:[#allocation90_spill] sm:$0xff] %v4523_v30  ;;  %v1804_v57 = vsel %vm1351_vm4, %v1638_v5, 0.0  ;;  %v1461_v38 = vsel %vm1351_vm4, %v4523_v30, 0.0  ;;  %v1639_v41 = vmul.f32 %v4523_v30, %v4523_v30  ;;  %v3197_v6 = vpop.f32.mrb[111].mxu0  ;;  %v1348_v31 = vpop.f32.mrb[106].mxu1 }
 0x22d   : > { %v1805_v35 = vadd.f32 %v1804_v57, %v1803_v14  ;;  %v1462_v56 = vadd.f32 %v1461_v38, %v1460_v2  ;;  %v3313_v23 = vpop.f32.mrb[107].mxu1 }
 0x22e   : > { %v1806_v32 = vsel %vm1351_vm4, %v1639_v41, 0.0 }
 0x22f   : > { %v1807_v52 = vadd.f32 %v1806_v32, %v1805_v35 }
 0x231   : > { %v4533_v58 = vpop.f32.mrb[112].mxu0 }
 0x232   : > { %7269 = vst [vmem:[#allocation91_spill] sm:$0xff] %v4533_v58  ;;  %v1463_v5 = vsel %vm1351_vm4, %v4533_v58, 0.0  ;;  %v1640_v17 = vmul.f32 %v4533_v58, %v4533_v58  ;;  %v3200_v30 = vpop.f32.mrb[113].mxu0 }
 0x233   : > { %v1464_v6 = vadd.f32 %v1463_v5, %v1462_v56  ;;  %v4539_v14 = vpop.f32.mrb[114].mxu0 }
 0x234   : > { %7270 = vst [vmem:[#allocation92_spill] sm:$0xff] %v4539_v14  ;;  %v1808_v2 = vsel %vm1351_vm4, %v1640_v17, 0.0  ;;  %v1465_v57 = vsel %vm1351_vm4, %v4539_v14, 0.0  ;;  %v1641_v38 = vmul.f32 %v4539_v14, %v4539_v14  ;;  %v3201_v41 = vpop.f32.mrb[115].mxu0  ;;  %v1473_v14 = vsel %vm1351_vm4, %v4054_v29, 0.0 }
 0x235   : > { %v1809_v23 = vadd.f32 %v1808_v2, %v1807_v52  ;;  %v1466_v35 = vadd.f32 %v1465_v57, %v1464_v6  ;;  %v1644_v41 = vmul.f32 %v4050_v24, %v4050_v24 }
 0x236   : > { %v1810_v32 = vsel %vm1351_vm4, %v1641_v38, 0.0 }
 0x237   : > { %v1811_v9 = vadd.f32 %v1810_v32, %v1809_v23  ;;  %v1471_v32 = vsel %vm1351_vm4, %v4050_v24, 0.0 }
 0x239   : > { %v4547_v31 = vpop.f32.mrb[116].mxu0 }
 0x23a   : > { %7271 = vst [vmem:[#allocation93_spill] sm:$0xff] %v4547_v31  ;;  %v1467_v30 = vsel %vm1351_vm4, %v4547_v31, 0.0  ;;  %v1642_v17 = vmul.f32 %v4547_v31, %v4547_v31  ;;  %v3204_v56 = vpop.f32.mrb[117].mxu0 }
 0x23b   : > { %v1468_v5 = vadd.f32 %v1467_v30, %v1466_v35  ;;  %v4553_v58 = vpop.f32.mrb[118].mxu0  ;;  %v1645_v35 = vmul.f32 %v4054_v29, %v4054_v29 }
 0x23c   : > { %v1812_v52 = vsel %vm1351_vm4, %v1642_v17, 0.0  ;;  %v1469_v6 = vsel %vm1351_vm4, %v4553_v58, 0.0  ;;  %v1643_v2 = vmul.f32 %v4553_v58, %v4553_v58  ;;  %v3205_v57 = vpop.f32.mrb[119].mxu0  ;;  %v1816_v17 = vsel %vm1351_vm4, %v1644_v41, 0.0 }
 0x23d   : > { %v1813_v38 = vadd.f32 %v1812_v52, %v1811_v9  ;;  %v1470_v23 = vadd.f32 %v1469_v6, %v1468_v5  ;;  %v1646_v57 = vmul.f32 %v4077_v47, %v4077_v47  ;;  %v1818_v52 = vsel %vm1351_vm4, %v1645_v35, 0.0 }
 0x23e   : > { %v1814_v30 = vsel %vm1351_vm4, %v1643_v2, 0.0  ;;  %v1475_v6 = vsel %vm1351_vm4, %v4077_v47, 0.0  ;;  %v1647_v2 = vmul.f32 %v4079_v50, %v4079_v50 }
 0x23f   : > { %v1472_v56 = vadd.f32 %v1471_v32, %v1470_v23  ;;  %v1815_v31 = vadd.f32 %v1814_v30, %v1813_v38  ;;  %v1820_v41 = vsel %vm1351_vm4, %v1646_v57, 0.0  ;;  %v1477_v32 = vsel %vm1351_vm4, %v4079_v50, 0.0 }
 0x240   : > { %v1648_v30 = vmul.f32 %v4095_v4, %v4095_v4  ;;  %v1822_v35 = vsel %vm1351_vm4, %v1647_v2, 0.0 }
 0x241   : > { %v1474_v9 = vadd.f32 %v1473_v14, %v1472_v56  ;;  %v1817_v5 = vadd.f32 %v1816_v17, %v1815_v31  ;;  %v1479_v56 = vsel %vm1351_vm4, %v4095_v4, 0.0  ;;  %v1649_v17 = vmul.f32 %v4097_v7, %v4097_v7 }
 0x242   : > { %v1824_v57 = vsel %vm1351_vm4, %v1648_v30, 0.0 }
 0x243   : > { %v1476_v23 = vadd.f32 %v1475_v6, %v1474_v9  ;;  %v1819_v38 = vadd.f32 %v1818_v52, %v1817_v5  ;;  %v1481_v52 = vsel %vm1351_vm4, %v4097_v7, 0.0  ;;  %v1650_v6 = vmul.f32 %v4113_v25, %v4113_v25 }
 0x244   : > { %v1826_v2 = vsel %vm1351_vm4, %v1649_v17, 0.0 }
 0x245   : > { %v1478_v14 = vadd.f32 %v1477_v32, %v1476_v23  ;;  %v1821_v31 = vadd.f32 %v1820_v41, %v1819_v38  ;;  %v1483_v41 = vsel %vm1351_vm4, %v4113_v25, 0.0  ;;  %v1651_v32 = vmul.f32 %v4115_v28, %v4115_v28 }
 0x246   : > { %v1828_v30 = vsel %vm1351_vm4, %v1650_v6, 0.0 }
 0x247   : > { %v1480_v9 = vadd.f32 %v1479_v56, %v1478_v14  ;;  %v1823_v5 = vadd.f32 %v1822_v35, %v1821_v31  ;;  %v1485_v35 = vsel %vm1351_vm4, %v4115_v28, 0.0  ;;  %v1652_v56 = vmul.f32 %v4131_v49, %v4131_v49 }
 0x248   : > { %v1830_v17 = vsel %vm1351_vm4, %v1651_v32, 0.0 }
 0x249   : > { %v1482_v23 = vadd.f32 %v1481_v52, %v1480_v9  ;;  %v1825_v38 = vadd.f32 %v1824_v57, %v1823_v5  ;;  %v1487_v57 = vsel %vm1351_vm4, %v4131_v49, 0.0  ;;  %v1653_v52 = vmul.f32 %v4133_v54, %v4133_v54 }
 0x24a   : > { %v1832_v6 = vsel %vm1351_vm4, %v1652_v56, 0.0 }
 0x24b   : > { %v1484_v14 = vadd.f32 %v1483_v41, %v1482_v23  ;;  %v1827_v31 = vadd.f32 %v1826_v2, %v1825_v38  ;;  %v1489_v2 = vsel %vm1351_vm4, %v4133_v54, 0.0  ;;  %v1654_v41 = vmul.f32 %v4149_v13, %v4149_v13 }
 0x24c   : > { %v1834_v32 = vsel %vm1351_vm4, %v1653_v52, 0.0 }
 0x24d   : > { %v1486_v9 = vadd.f32 %v1485_v35, %v1484_v14  ;;  %v1829_v5 = vadd.f32 %v1828_v30, %v1827_v31  ;;  %v1491_v30 = vsel %vm1351_vm4, %v4149_v13, 0.0  ;;  %v1655_v35 = vmul.f32 %v4151_v18, %v4151_v18 }
 0x24e   : > { %v1836_v56 = vsel %vm1351_vm4, %v1654_v41, 0.0 }
 0x24f   : > { %v1488_v23 = vadd.f32 %v1487_v57, %v1486_v9  ;;  %v1831_v38 = vadd.f32 %v1830_v17, %v1829_v5  ;;  %v1493_v17 = vsel %vm1351_vm4, %v4151_v18, 0.0  ;;  %v1656_v57 = vmul.f32 %v4167_v43, %v4167_v43 }
 0x250   : > { %v1838_v52 = vsel %vm1351_vm4, %v1655_v35, 0.0 }
 0x251   : > { %v1490_v14 = vadd.f32 %v1489_v2, %v1488_v23  ;;  %v1833_v31 = vadd.f32 %v1832_v6, %v1831_v38  ;;  %v1495_v6 = vsel %vm1351_vm4, %v4167_v43, 0.0  ;;  %v1657_v2 = vmul.f32 %v4169_v46, %v4169_v46 }
 0x252   : > { %v1840_v41 = vsel %vm1351_vm4, %v1656_v57, 0.0 }
 0x253   : > { %v1492_v9 = vadd.f32 %v1491_v30, %v1490_v14  ;;  %v1835_v5 = vadd.f32 %v1834_v32, %v1833_v31  ;;  %v1497_v32 = vsel %vm1351_vm4, %v4169_v46, 0.0  ;;  %v1658_v30 = vmul.f32 %v4185_v12, %v4185_v12 }
 0x254   : > { %v1842_v35 = vsel %vm1351_vm4, %v1657_v2, 0.0 }
 0x255   : > { %v1494_v23 = vadd.f32 %v1493_v17, %v1492_v9  ;;  %v1837_v38 = vadd.f32 %v1836_v56, %v1835_v5  ;;  %v1499_v56 = vsel %vm1351_vm4, %v4185_v12, 0.0  ;;  %v1659_v17 = vmul.f32 %v4187_v20, %v4187_v20 }
 0x256   : > { %v1844_v57 = vsel %vm1351_vm4, %v1658_v30, 0.0 }
 0x257   : > { %v1496_v14 = vadd.f32 %v1495_v6, %v1494_v23  ;;  %v1839_v31 = vadd.f32 %v1838_v52, %v1837_v38  ;;  %v1501_v52 = vsel %vm1351_vm4, %v4187_v20, 0.0  ;;  %v1660_v6 = vmul.f32 %v4203_v53, %v4203_v53 }
 0x258   : > { %v1846_v2 = vsel %vm1351_vm4, %v1659_v17, 0.0 }
 0x259   : > { %v1841_v9 = vadd.f32 %v1840_v41, %v1839_v31  ;;  %v1498_v5 = vadd.f32 %v1497_v32, %v1496_v14  ;;  %v1503_v41 = vsel %vm1351_vm4, %v4203_v53, 0.0  ;;  %v1661_v32 = vmul.f32 %v4205_v60, %v4205_v60 }
 0x25a   : > { %v1848_v30 = vsel %vm1351_vm4, %v1660_v6, 0.0 }
 0x25b   : > { %v1500_v23 = vadd.f32 %v1499_v56, %v1498_v5  ;;  %v1843_v38 = vadd.f32 %v1842_v35, %v1841_v9  ;;  %v1505_v35 = vsel %vm1351_vm4, %v4205_v60, 0.0  ;;  %v1662_v56 = vmul.f32 %v4221_v37, %v4221_v37 }
 0x25c   : > { %v1850_v17 = vsel %vm1351_vm4, %v1661_v32, 0.0 }
 0x25d   : > { %v1502_v31 = vadd.f32 %v1501_v52, %v1500_v23  ;;  %v1845_v14 = vadd.f32 %v1844_v57, %v1843_v38  ;;  %v1507_v57 = vsel %vm1351_vm4, %v4221_v37, 0.0  ;;  %v1663_v52 = vmul.f32 %v4223_v42, %v4223_v42 }
 0x25e   : > { %v1852_v6 = vsel %vm1351_vm4, %v1662_v56, 0.0 }
 0x25f   : > { %v1504_v5 = vadd.f32 %v1503_v41, %v1502_v31  ;;  %v1847_v9 = vadd.f32 %v1846_v2, %v1845_v14  ;;  %v1509_v2 = vsel %vm1351_vm4, %v4223_v42, 0.0  ;;  %v1664_v41 = vmul.f32 %v4239_v26, %v4239_v26 }
 0x260   : > { %v1854_v32 = vsel %vm1351_vm4, %v1663_v52, 0.0 }
 0x261   : > { %v1506_v23 = vadd.f32 %v1505_v35, %v1504_v5  ;;  %v1849_v38 = vadd.f32 %v1848_v30, %v1847_v9  ;;  %v1511_v30 = vsel %vm1351_vm4, %v4239_v26, 0.0  ;;  %v1665_v35 = vmul.f32 %v4241_v34, %v4241_v34 }
 0x262   : > { %v1856_v56 = vsel %vm1351_vm4, %v1664_v41, 0.0 }
 0x263   : > { %v1508_v31 = vadd.f32 %v1507_v57, %v1506_v23  ;;  %v1851_v14 = vadd.f32 %v1850_v17, %v1849_v38  ;;  %v1513_v17 = vsel %vm1351_vm4, %v4241_v34, 0.0  ;;  %v1666_v57 = vmul.f32 %v4257_v0, %v4257_v0 }
 0x264   : > { %v1858_v52 = vsel %vm1351_vm4, %v1665_v35, 0.0 }
 0x265   : > { %v1510_v5 = vadd.f32 %v1509_v2, %v1508_v31  ;;  %v1853_v9 = vadd.f32 %v1852_v6, %v1851_v14  ;;  %v1515_v6 = vsel %vm1351_vm4, %v4257_v0, 0.0  ;;  %v1667_v2 = vmul.f32 %v4259_v22, %v4259_v22 }
 0x266   : > { %v1860_v41 = vsel %vm1351_vm4, %v1666_v57, 0.0 }
 0x267   : > { %v1512_v23 = vadd.f32 %v1511_v30, %v1510_v5  ;;  %v1855_v38 = vadd.f32 %v1854_v32, %v1853_v9  ;;  %v1517_v32 = vsel %vm1351_vm4, %v4259_v22, 0.0  ;;  %v1668_v30 = vmul.f32 %v4275_v3, %v4275_v3 }
 0x268   : > { %v1862_v35 = vsel %vm1351_vm4, %v1667_v2, 0.0 }
 0x269   : > { %v1514_v31 = vadd.f32 %v1513_v17, %v1512_v23  ;;  %v1857_v14 = vadd.f32 %v1856_v56, %v1855_v38  ;;  %v1519_v56 = vsel %vm1351_vm4, %v4275_v3, 0.0  ;;  %v1669_v17 = vmul.f32 %v4277_v45, %v4277_v45 }
 0x26a   : > { %v1864_v57 = vsel %vm1351_vm4, %v1668_v30, 0.0 }
 0x26b   : > { %v1516_v5 = vadd.f32 %v1515_v6, %v1514_v31  ;;  %v1859_v9 = vadd.f32 %v1858_v52, %v1857_v14  ;;  %v1521_v52 = vsel %vm1351_vm4, %v4277_v45, 0.0  ;;  %v1670_v6 = vmul.f32 %v4293_v11, %v4293_v11 }
 0x26c   : > { %v1866_v2 = vsel %vm1351_vm4, %v1669_v17, 0.0 }
 0x26d   : > { %v1518_v23 = vadd.f32 %v1517_v32, %v1516_v5  ;;  %v1861_v38 = vadd.f32 %v1860_v41, %v1859_v9  ;;  %v1523_v41 = vsel %vm1351_vm4, %v4293_v11, 0.0  ;;  %v1671_v32 = vmul.f32 %v4295_v44, %v4295_v44 }
 0x26e   : > { %v1868_v30 = vsel %vm1351_vm4, %v1670_v6, 0.0 }
 0x26f   : > { %v1520_v31 = vadd.f32 %v1519_v56, %v1518_v23  ;;  %v1863_v14 = vadd.f32 %v1862_v35, %v1861_v38  ;;  %v1525_v35 = vsel %vm1351_vm4, %v4295_v44, 0.0  ;;  %v1672_v56 = vmul.f32 %v4311_v36, %v4311_v36 }
 0x270   : > { %v1870_v17 = vsel %vm1351_vm4, %v1671_v32, 0.0 }
 0x271   : > { %v1522_v5 = vadd.f32 %v1521_v52, %v1520_v31  ;;  %v1865_v9 = vadd.f32 %v1864_v57, %v1863_v14  ;;  %v1527_v57 = vsel %vm1351_vm4, %v4311_v36, 0.0  ;;  %v1673_v52 = vmul.f32 %v4313_v62, %v4313_v62 }
 0x272   : > { %v1872_v6 = vsel %vm1351_vm4, %v1672_v56, 0.0 }
 0x273   : > { %v1524_v23 = vadd.f32 %v1523_v41, %v1522_v5  ;;  %v1867_v38 = vadd.f32 %v1866_v2, %v1865_v9  ;;  %v1529_v2 = vsel %vm1351_vm4, %v4313_v62, 0.0  ;;  %v1674_v41 = vmul.f32 %v4329_v61, %v4329_v61 }
 0x274   : > { %v1874_v32 = vsel %vm1351_vm4, %v1673_v52, 0.0 }
 0x275   : > { %v1526_v31 = vadd.f32 %v1525_v35, %v1524_v23  ;;  %v1869_v14 = vadd.f32 %v1868_v30, %v1867_v38  ;;  %v1531_v30 = vsel %vm1351_vm4, %v4329_v61, 0.0  ;;  %v1675_v35 = vmul.f32 %v4331_v21, %v4331_v21 }
 0x276   : > { %v1876_v56 = vsel %vm1351_vm4, %v1674_v41, 0.0 }
 0x277   : > { %v1871_v5 = vadd.f32 %v1870_v17, %v1869_v14  ;;  %v1528_v9 = vadd.f32 %v1527_v57, %v1526_v31  ;;  %v1533_v17 = vsel %vm1351_vm4, %v4331_v21, 0.0  ;;  %v1676_v57 = vmul.f32 %v4347_v27, %v4347_v27  ;;  %v7348_v21 = vld [vmem:[#allocation76_spill] sm:$0xff] }
 0x278   : > { %v1878_v52 = vsel %vm1351_vm4, %v1675_v35, 0.0 }
 0x279   : > { %v1873_v23 = vadd.f32 %v1872_v6, %v1871_v5  ;;  %v1530_v38 = vadd.f32 %v1529_v2, %v1528_v9  ;;  %v1535_v6 = vsel %vm1351_vm4, %v4347_v27, 0.0  ;;  %v1677_v2 = vmul.f32 %v4349_v48, %v4349_v48 }
 0x27a   : > { %v1880_v41 = vsel %vm1351_vm4, %v1676_v57, 0.0 }
 0x27b   : > { %v1875_v14 = vadd.f32 %v1874_v32, %v1873_v23  ;;  %v1532_v31 = vadd.f32 %v1531_v30, %v1530_v38  ;;  %v1537_v32 = vsel %vm1351_vm4, %v4349_v48, 0.0  ;;  %v1678_v30 = vmul.f32 %v4365_v1, %v4365_v1 }
 0x27c   : > { %v1882_v35 = vsel %vm1351_vm4, %v1677_v2, 0.0 }
 0x27d   : > { %v1877_v5 = vadd.f32 %v1876_v56, %v1875_v14  ;;  %v1534_v9 = vadd.f32 %v1533_v17, %v1532_v31  ;;  %v1539_v56 = vsel %vm1351_vm4, %v4365_v1, 0.0  ;;  %v1679_v17 = vmul.f32 %v4367_v19, %v4367_v19  ;;  %v7351_v1 = vld [vmem:[#allocation83_spill] sm:$0xff] }
 0x27e   : > { %v1884_v57 = vsel %vm1351_vm4, %v1678_v30, 0.0 }
 0x27f   : > { %v1879_v23 = vadd.f32 %v1878_v52, %v1877_v5  ;;  %v1536_v38 = vadd.f32 %v1535_v6, %v1534_v9  ;;  %v1541_v52 = vsel %vm1351_vm4, %v4367_v19, 0.0  ;;  %v1680_v6 = vmul.f32 %v4383_v40, %v4383_v40 }
 0x280   : > { %v1886_v2 = vsel %vm1351_vm4, %v1679_v17, 0.0 }
 0x281   : > { %v1881_v14 = vadd.f32 %v1880_v41, %v1879_v23  ;;  %v1538_v31 = vadd.f32 %v1537_v32, %v1536_v38  ;;  %v1543_v41 = vsel %vm1351_vm4, %v4383_v40, 0.0  ;;  %v1681_v32 = vmul.f32 %v4385_v55, %v4385_v55  ;;  %v7353_v40 = vld [vmem:[#allocation87_spill] sm:$0xff] }
 0x282   : > { %v1888_v30 = vsel %vm1351_vm4, %v1680_v6, 0.0 }
 0x283   : > { %v1883_v5 = vadd.f32 %v1882_v35, %v1881_v14  ;;  %v1540_v9 = vadd.f32 %v1539_v56, %v1538_v31  ;;  %v1545_v35 = vsel %vm1351_vm4, %v4385_v55, 0.0  ;;  %v1682_v56 = vmul.f32 %v4401_v15, %v4401_v15  ;;  %v7354_v55 = vld [vmem:[#allocation88_spill] sm:$0xff] }
 0x284   : > { %v1890_v17 = vsel %vm1351_vm4, %v1681_v32, 0.0 }
 0x285   : > { %v1885_v23 = vadd.f32 %v1884_v57, %v1883_v5  ;;  %v1542_v38 = vadd.f32 %v1541_v52, %v1540_v9  ;;  %v1547_v57 = vsel %vm1351_vm4, %v4401_v15, 0.0  ;;  %v1683_v52 = vmul.f32 %v4403_v33, %v4403_v33 }
 0x286   : > { %v1892_v6 = vsel %vm1351_vm4, %v1682_v56, 0.0 }
 0x287   : > { %v1887_v14 = vadd.f32 %v1886_v2, %v1885_v23  ;;  %v1544_v31 = vadd.f32 %v1543_v41, %v1542_v38  ;;  %v1549_v2 = vsel %vm1351_vm4, %v4403_v33, 0.0  ;;  %v1684_v41 = vmul.f32 %v4422_v8, %v4422_v8 }
 0x288   : > { %v1894_v32 = vsel %vm1351_vm4, %v1683_v52, 0.0 }
 0x289   : > { %v1889_v5 = vadd.f32 %v1888_v30, %v1887_v14  ;;  %v1546_v9 = vadd.f32 %v1545_v35, %v1544_v31  ;;  %v1551_v30 = vsel %vm1351_vm4, %v4422_v8, 0.0  ;;  %v1685_v35 = vmul.f32 %v4425_v39, %v4425_v39 }
 0x28a   : > { %v1896_v56 = vsel %vm1351_vm4, %v1684_v41, 0.0 }
 0x28b   : > { %v1891_v23 = vadd.f32 %v1890_v17, %v1889_v5  ;;  %v1548_v38 = vadd.f32 %v1547_v57, %v1546_v9  ;;  %v1553_v17 = vsel %vm1351_vm4, %v4425_v39, 0.0  ;;  %v1686_v57 = vmul.f32 %v4441_v16, %v4441_v16 }
 0x28c   : > { %v1898_v52 = vsel %vm1351_vm4, %v1685_v35, 0.0 }
 0x28d   : > { %v1893_v14 = vadd.f32 %v1892_v6, %v1891_v23  ;;  %v1550_v31 = vadd.f32 %v1549_v2, %v1548_v38  ;;  %v1555_v6 = vsel %vm1351_vm4, %v4441_v16, 0.0  ;;  %v1687_v2 = vmul.f32 %v4443_v51, %v4443_v51 }
 0x28e   : > { %v1900_v41 = vsel %vm1351_vm4, %v1686_v57, 0.0 }
 0x28f   : > { %v1895_v5 = vadd.f32 %v1894_v32, %v1893_v14  ;;  %v1552_v9 = vadd.f32 %v1551_v30, %v1550_v31  ;;  %v1557_v32 = vsel %vm1351_vm4, %v4443_v51, 0.0  ;;  %v1688_v30 = vmul.f32 %v4459_v63, %v4459_v63 }
 0x290   : > { %v1902_v35 = vsel %vm1351_vm4, %v1687_v2, 0.0 }
 0x291   : > { %v1897_v23 = vadd.f32 %v1896_v56, %v1895_v5  ;;  %v1554_v38 = vadd.f32 %v1553_v17, %v1552_v9  ;;  %v1559_v56 = vsel %vm1351_vm4, %v4459_v63, 0.0  ;;  %v1689_v17 = vmul.f32 %v4461_v10, %v4461_v10 }
 0x292   : > { %v1904_v57 = vsel %vm1351_vm4, %v1688_v30, 0.0 }
 0x293   : > { %v1899_v14 = vadd.f32 %v1898_v52, %v1897_v23  ;;  %v1556_v31 = vadd.f32 %v1555_v6, %v1554_v38  ;;  %v1561_v52 = vsel %vm1351_vm4, %v4461_v10, 0.0  ;;  %v7272_v6 = vld [vmem:[#allocation79_spill] sm:$0xff]  ;;  %v1906_v2 = vsel %vm1351_vm4, %v1689_v17, 0.0 }
 0x294   : > { %v1690_v51 = vmul.f32 %v7272_v6, %v7272_v6 }
 0x295   : > { %v1901_v5 = vadd.f32 %v1900_v41, %v1899_v14  ;;  %v1558_v9 = vadd.f32 %v1557_v32, %v1556_v31  ;;  %v1563_v41 = vsel %vm1351_vm4, %v7272_v6, 0.0  ;;  %v7273_v32 = vld [vmem:[#allocation80_spill] sm:$0xff] }
 0x296   : > { %v1691_v63 = vmul.f32 %v7273_v32, %v7273_v32  ;;  %v1908_v30 = vsel %vm1351_vm4, %v1690_v51, 0.0 }
 0x297   : > { %v1903_v23 = vadd.f32 %v1902_v35, %v1901_v5  ;;  %v1560_v38 = vadd.f32 %v1559_v56, %v1558_v9  ;;  %v1565_v35 = vsel %vm1351_vm4, %v7273_v32, 0.0  ;;  %v7274_v56 = vld [vmem:[#allocation83_spill] sm:$0xff] }
 0x298   : > { %v1692_v10 = vmul.f32 %v7274_v56, %v7274_v56  ;;  %v1910_v17 = vsel %vm1351_vm4, %v1691_v63, 0.0 }
 0x299   : > { %v1905_v14 = vadd.f32 %v1904_v57, %v1903_v23  ;;  %v1562_v31 = vadd.f32 %v1561_v52, %v1560_v38  ;;  %v1567_v57 = vsel %vm1351_vm4, %v7274_v56, 0.0  ;;  %v7275_v52 = vld [vmem:[#allocation84_spill] sm:$0xff] }
 0x29a   : > { %v1693_v6 = vmul.f32 %v7275_v52, %v7275_v52  ;;  %v1912_v51 = vsel %vm1351_vm4, %v1692_v10, 0.0  ;;  %v1696_v10 = vmul.f32 %v4531_v59, %v4531_v59 }
 0x29b   : > { %v1907_v5 = vadd.f32 %v1906_v2, %v1905_v14  ;;  %v1564_v9 = vadd.f32 %v1563_v41, %v1562_v31  ;;  %v1569_v2 = vsel %vm1351_vm4, %v7275_v52, 0.0  ;;  %v7276_v41 = vld [vmem:[#allocation87_spill] sm:$0xff] }
 0x29c   : > { %v1694_v32 = vmul.f32 %v7276_v41, %v7276_v41  ;;  %v1914_v63 = vsel %vm1351_vm4, %v1693_v6, 0.0 }
 0x29d   : > { %v1909_v23 = vadd.f32 %v1908_v30, %v1907_v5  ;;  %v1566_v38 = vadd.f32 %v1565_v35, %v1564_v9  ;;  %v1571_v30 = vsel %vm1351_vm4, %v7276_v41, 0.0  ;;  %v7277_v35 = vld [vmem:[#allocation88_spill] sm:$0xff]  ;;  %v1920_v41 = vsel %vm1575_vm5, %v1696_v10, 0.0 }
 0x29f   : > { %v1911_v14 = vadd.f32 %v1910_v17, %v1909_v23  ;;  %v1568_v31 = vadd.f32 %v1567_v57, %v1566_v38  ;;  %v1695_v23 = vmul.f32 %v7277_v35, %v7277_v35  ;;  %v1916_v57 = vsel %vm1351_vm4, %v1694_v32, 0.0 }
 0x2a1   : > { %v1913_v5 = vadd.f32 %v1912_v51, %v1911_v14  ;;  %v1570_v9 = vadd.f32 %v1569_v2, %v1568_v31  ;;  %v1573_v14 = vsel %vm1351_vm4, %v7277_v35, 0.0  ;;  %v1576_v31 = vsel %vm1575_vm5, %v4531_v59, 0.0 }
 0x2a2   : > { %v1918_v2 = vsel %vm1351_vm4, %v1695_v23, 0.0  ;;  %v7279_v23 = vmov 0.0  }
 0x2a3   : > { %v1915_v38 = vadd.f32 %v1914_v63, %v1913_v5  ;;  %v1572_v17 = vadd.f32 %v1571_v30, %v1570_v9 }
 0x2a5   : > { %v1917_v6 = vadd.f32 %v1916_v57, %v1915_v38  ;;  %v1574_v51 = vadd.f32 %v1573_v14, %v1572_v17  ;;  %v7278_v38 = vld [vmem:[#allocation16_spill] sm:$0xff]  ;;  %v7280_v17 = vmov 0.0|0.0  }
 0x2a6   : > { %v7282_v14 = vld [vmem:[#allocation12_spill] sm:$0xff] }
 0x2a7   : > { %v1919_v52 = vadd.f32 %v1918_v2, %v1917_v6  ;;  %v1577_v56 = vadd.f32 %v1576_v31, %v1574_v51  ;;  %v7284_v51 = vld [vmem:[#allocation14_spill] sm:$0xff]  ;;  %v7334_v6 = vld [vmem:[#allocation85_spill] sm:$0xff] }
 0x2a8   : > { %v7335_v31 = vld [vmem:[#allocation86_spill] sm:$0xff] }
 0x2a9   : > { %v1578_v16 = vrot.slane %v1577_v56, 4  ;;  %v1921_v39 = vadd.f32 %v1920_v41, %v1919_v52  ;;  %v7281_v52 = vld [vmem:[#allocation66_spill] sm:$0xff] }
 0x2ab   : > { %v1579_v5 = vadd.f32 %v1578_v16, %v1577_v56  ;;  %v1922_v9 = vrot.slane %v1921_v39, 4 }
 0x2ad   : > { %v1580_v63 = vrot.slane %v1579_v5, 2  ;;  %v1923_v32 = vadd.f32 %v1922_v9, %v1921_v39  ;;  %v2082_v39 = vlaneseq }
 0x2af   : > { %v1581_v30 = vadd.f32 %v1580_v63, %v1579_v5  ;;  %v1924_v8 = vrot.slane %v1923_v32, 2  ;;  %v4833_v56 = vshrl.u32 %v2082_v39, 7  ;;  %v7285_v5 = vld [vmem:[#allocation15_spill] sm:$0xff]  ;;  %v7286_v63 = vld [vmem:[#allocation17_spill] sm:$0xff] }
 0x2b0   : > { %v7338_v39 = vld [vmem:[#allocation91_spill] sm:$0xff] }
 0x2b1   : > { %v1582_v35 = vrot.slane %v1581_v30, 1  ;;  %v1925_v15 = vadd.f32 %v1924_v8, %v1923_v32  ;;  %v7171_v8 = vsub.s32 0, %v4833_v56  ;;  %v7355_v32 = vsub.s32 0, %v4833_v56 }
 0x2b3   : > { %v1583_v33 = vadd.f32 %v1582_v35, %v1581_v30  ;;  %v1926_v10 = vrot.slane %v1925_v15, 1  ;;  %v7339_v30 = vld [vmem:[#allocation92_spill] sm:$0xff] }
 0x2b5   : > { %3323 = vmatmul.mubr.msk.f32.vlgmr.msra.gmra.mrb[108].mxu1 %vm1351_vm4, %v1583_v33  ;;  %v1927_v16 = vadd.f32 %v1926_v10, %v1925_v15  ;;  %v7283_v15 = vld [vmem:[#allocation13_spill] sm:$0xff] }
 0x2b6   : > { %3344 = vmatpush3.bf16.msra.mxu1 %v7278_v38  ;;  %3333 = vmatprep.mubr.msk.f32.mxu1 %vm3610_vm1, %v7279_v23  ;;  %v7301_v38 = vld [vmem:[#allocation32_spill] sm:$0xff] }
 0x2b7   : > { %3345 = vmatprep.subr.bf16.mxu1 %v7280_v17 }
 0x2ba   : > { %3347 = vmatpush3.bf16.msra.mxu1 %v7281_v52  ;;  %v7337_v52 = vld [vmem:[#allocation90_spill] sm:$0xff] }
 0x2bd   : > { %3334 = vmatmul.mubr.msk.f32.vlgmr.msra.gmra.mrb[110].mxu1 %vm1351_vm4, %v1927_v16 }
 0x388   : > { %v2001_v41 = vpop.f32.mrb[108].mxu1 }
 0x389   : > { %v4836_v33 = vmul.f32 0.00013888889, %v2001_v41  ;;  %v3324_v35 = vpop.f32.mrb[109].mxu1 }
 0x38a   : > { %v7340_v35 = vld [vmem:[#allocation93_spill] sm:$0xff] }
 0x38b   : > { %v4841_v57 = vrot.slane %v4836_v33, %v7171_v8  ;;  %v2080_v16 = vmul.f32 %v4836_v33, %v4836_v33 }
 0x38d   : > { %v7356_v8 = vsub.f32 %v7282_v14, %v4841_v57  ;;  %v7357_v33 = vsub.f32 %v7283_v15, %v4841_v57  ;;  %v7359_v56 = vsub.f32 %v7285_v5, %v4841_v57 }
 0x390   : > { %v4875_v23 = vpop.f32.mrb[110].mxu1 }
 0x391   : > { %v3335_v10 = vpop.f32.mrb[111].mxu1  ;;  %v2079_v2 = vmul.f32 0.00013888889, %v4875_v23 }
 0x392   : > { %v7336_v10 = vld [vmem:[#allocation89_spill] sm:$0xff] }
 0x393   : > { %v2081_v48 = vsub.f32 %v2079_v2, %v2080_v16  ;;  %v7361_v2 = vld [vmem:[#allocation18_spill] sm:$0xff]  ;;  %v7366_v16 = vld [vmem:[#allocation20_spill] sm:$0xff] }
 0x395   : > { %v2199_v27 = vadd.f32 1e-05, %v2081_v48 }
 0x397   : > { %3467 = vrsqrt.f32 %v2199_v27  ;;  %v7358_v27 = vsub.f32 %v7284_v51, %v4841_v57 }
 0x3a1   : > { %v3468_v9 = vpop.eup %3467 }
 0x3a2   : > { %v5076_v19 = vrot.slane %v3468_v9, %v7355_v32  ;;  %v7362_v9 = vsub.f32 %v7361_v2, %v4841_v57  ;;  %v7363_v32 = vld [vmem:[#allocation19_spill] sm:$0xff]  ;;  %v7372_v2 = vld [vmem:[#allocation22_spill] sm:$0xff] }
 0x3a3   : > { %v7364_v23 = vsub.f32 %v7363_v32, %v4841_v57 }
 0x3a4   : > { %v5082_v17 = vmul.f32 %v5076_v19, %v7356_v8  ;;  %v5088_v41 = vmul.f32 %v5076_v19, %v7357_v33  ;;  %v5094_v48 = vmul.f32 %v5076_v19, %v7358_v27  ;;  %v5100_v14 = vmul.f32 %v5076_v19, %v7359_v56  ;;  %v7369_v27 = vld [vmem:[#allocation21_spill] sm:$0xff] }
 0x3a5   : > { %v7360_v8 = vsub.f32 %v7286_v63, %v4841_v57  ;;  %v5112_v51 = vmul.f32 %v5076_v19, %v7362_v9  ;;  %v5118_v5 = vmul.f32 %v5076_v19, %v7364_v23  ;;  %v7367_v33 = vsub.f32 %v7366_v16, %v4841_v57  ;;  %v7375_v23 = vld [vmem:[#allocation23_spill] sm:$0xff] }
 0x3a6   : > { %v7370_v56 = vsub.f32 %v7369_v27, %v4841_v57  ;;  %v7373_v9 = vsub.f32 %v7372_v2, %v4841_v57 }
 0x3a7   : > { %v5106_v15 = vmul.f32 %v5076_v19, %v7360_v8  ;;  %7365 = vst [vmem:[#allocation16_spill] sm:$0xff] %v5118_v5  ;;  %v5124_v63 = vmul.f32 %v5076_v19, %v7367_v33  ;;  %v7376_v5 = vsub.f32 %v7375_v23, %v4841_v57  ;;  %v7378_v33 = vld [vmem:[#allocation24_spill] sm:$0xff] }
 0x3a8   : > { %v5130_v8 = vmul.f32 %v5076_v19, %v7370_v56  ;;  %v5136_v32 = vmul.f32 %v5076_v19, %v7373_v9  ;;  %v7381_v56 = vld [vmem:[#allocation25_spill] sm:$0xff]  ;;  %v7384_v9 = vld [vmem:[#allocation26_spill] sm:$0xff] }
 0x3a9   : > { %7368 = vst [vmem:[#allocation66_spill] sm:$0xff] %v5124_v63  ;;  %v5142_v16 = vmul.f32 %v5076_v19, %v7376_v5  ;;  %v7379_v63 = vsub.f32 %v7378_v33, %v4841_v57  ;;  %v7387_v5 = vld [vmem:[#allocation27_spill] sm:$0xff] }
 0x3aa   : > { %7371 = vst [vmem:[#allocation12_spill] sm:$0xff] %v5130_v8  ;;  %7374 = vst [vmem:[#allocation13_spill] sm:$0xff] %v5136_v32  ;;  %v7382_v8 = vsub.f32 %v7381_v56, %v4841_v57  ;;  %v7385_v32 = vsub.f32 %v7384_v9, %v4841_v57 }
 0x3ab   : > { %7377 = vst [vmem:[#allocation14_spill] sm:$0xff] %v5142_v16  ;;  %v5148_v27 = vmul.f32 %v5076_v19, %v7379_v63  ;;  %v7388_v16 = vsub.f32 %v7387_v5, %v4841_v57  ;;  %v7390_v63 = vld [vmem:[#allocation28_spill] sm:$0xff] }
 0x3ac   : > { %v5154_v2 = vmul.f32 %v5076_v19, %v7382_v8  ;;  %v5160_v23 = vmul.f32 %v5076_v19, %v7385_v32  ;;  %v7392_v8 = vld [vmem:[#allocation29_spill] sm:$0xff]  ;;  %v7395_v32 = vld [vmem:[#allocation30_spill] sm:$0xff] }
 0x3ad   : > { %7380 = vst [vmem:[#allocation15_spill] sm:$0xff] %v5148_v27  ;;  %v5166_v33 = vmul.f32 %v5076_v19, %v7388_v16  ;;  %v7391_v27 = vsub.f32 %v7390_v63, %v4841_v57  ;;  %v7398_v16 = vld [vmem:[#allocation31_spill] sm:$0xff] }
 0x3ae   : > { %7383 = vst [vmem:[#allocation17_spill] sm:$0xff] %v5154_v2  ;;  %7386 = vst [vmem:[#allocation32_spill] sm:$0xff] %v5160_v23  ;;  %v7393_v2 = vsub.f32 %v7392_v8, %v4841_v57  ;;  %v7396_v23 = vsub.f32 %v7395_v32, %v4841_v57 }
 0x3af   : > { %7389 = vst [vmem:[#allocation85_spill] sm:$0xff] %v5166_v33  ;;  %v5172_v56 = vmul.f32 %v5076_v19, %v7391_v27  ;;  %v7399_v33 = vsub.f32 %v7398_v16, %v4841_v57  ;;  %v7401_v27 = vsub.f32 %v7301_v38, %v4841_v57 }
 0x3b0   : > { %v5178_v9 = vmul.f32 %v5076_v19, %v7393_v2  ;;  %v5184_v5 = vmul.f32 %v5076_v19, %v7396_v23  ;;  %v7403_v2 = vld [vmem:[#allocation33_spill] sm:$0xff]  ;;  %v7406_v23 = vld [vmem:[#allocation34_spill] sm:$0xff] }
 0x3b1   : > { %v5190_v63 = vmul.f32 %v5076_v19, %v7399_v33  ;;  %v5196_v8 = vmul.f32 %v5076_v19, %v7401_v27  ;;  %v7409_v33 = vld [vmem:[#allocation35_spill] sm:$0xff]  ;;  %v7412_v27 = vld [vmem:[#allocation36_spill] sm:$0xff] }
 0x3b2   : > { %7394 = vst [vmem:[#allocation86_spill] sm:$0xff] %v5178_v9  ;;  %7397 = vst [vmem:[#allocation89_spill] sm:$0xff] %v5184_v5  ;;  %v7404_v9 = vsub.f32 %v7403_v2, %v4841_v57  ;;  %v7407_v5 = vsub.f32 %v7406_v23, %v4841_v57 }
 0x3b3   : > { %7400 = vst [vmem:[#allocation90_spill] sm:$0xff] %v5190_v63  ;;  %7402 = vst [vmem:[#allocation91_spill] sm:$0xff] %v5196_v8  ;;  %v7410_v63 = vsub.f32 %v7409_v33, %v4841_v57  ;;  %v7413_v8 = vsub.f32 %v7412_v27, %v4841_v57 }
 0x3b4   : > { %v5202_v32 = vmul.f32 %v5076_v19, %v7404_v9  ;;  %v5208_v16 = vmul.f32 %v5076_v19, %v7407_v5  ;;  %v7415_v9 = vld [vmem:[#allocation37_spill] sm:$0xff]  ;;  %v7418_v5 = vld [vmem:[#allocation38_spill] sm:$0xff] }
 0x3b5   : > { %v5214_v38 = vmul.f32 %v5076_v19, %v7410_v63  ;;  %v5220_v2 = vmul.f32 %v5076_v19, %v7413_v8  ;;  %v7421_v63 = vld [vmem:[#allocation39_spill] sm:$0xff]  ;;  %v7424_v8 = vld [vmem:[#allocation40_spill] sm:$0xff] }
 0x3b6   : > { %7405 = vst [vmem:[#allocation92_spill] sm:$0xff] %v5202_v32  ;;  %7408 = vst [vmem:[#allocation93_spill] sm:$0xff] %v5208_v16  ;;  %v7416_v32 = vsub.f32 %v7415_v9, %v4841_v57  ;;  %v7419_v16 = vsub.f32 %v7418_v5, %v4841_v57 }
 0x3b7   : > { %7411 = vst [vmem:[#allocation76_spill] sm:$0xff] %v5214_v38  ;;  %7414 = vst [vmem:[#allocation83_spill] sm:$0xff] %v5220_v2  ;;  %v7422_v38 = vsub.f32 %v7421_v63, %v4841_v57  ;;  %v7425_v2 = vsub.f32 %v7424_v8, %v4841_v57 }
 0x3b8   : > { %v5226_v23 = vmul.f32 %v5076_v19, %v7416_v32  ;;  %v5232_v33 = vmul.f32 %v5076_v19, %v7419_v16  ;;  %v7427_v32 = vld [vmem:[#allocation41_spill] sm:$0xff]  ;;  %v7430_v16 = vld [vmem:[#allocation42_spill] sm:$0xff] }
 0x3b9   : > { %v5238_v27 = vmul.f32 %v5076_v19, %v7422_v38  ;;  %v5244_v9 = vmul.f32 %v5076_v19, %v7425_v2  ;;  %v7433_v38 = vld [vmem:[#allocation43_spill] sm:$0xff]  ;;  %v7436_v2 = vld [vmem:[#allocation44_spill] sm:$0xff] }
 0x3ba   : > { %7417 = vst [vmem:[#allocation87_spill] sm:$0xff] %v5226_v23  ;;  %7420 = vst [vmem:[#allocation88_spill] sm:$0xff] %v5232_v33  ;;  %v7428_v23 = vsub.f32 %v7427_v32, %v4841_v57  ;;  %v7431_v33 = vsub.f32 %v7430_v16, %v4841_v57 }
 0x3bb   : > { %7423 = vst [vmem:[#allocation18_spill] sm:$0xff] %v5238_v27  ;;  %7426 = vst [vmem:[#allocation19_spill] sm:$0xff] %v5244_v9  ;;  %v7434_v27 = vsub.f32 %v7433_v38, %v4841_v57  ;;  %v7437_v9 = vsub.f32 %v7436_v2, %v4841_v57 }
 0x3bc   : > { %v5250_v5 = vmul.f32 %v5076_v19, %v7428_v23  ;;  %v5256_v63 = vmul.f32 %v5076_v19, %v7431_v33  ;;  %v7439_v23 = vld [vmem:[#allocation45_spill] sm:$0xff]  ;;  %v7442_v33 = vld [vmem:[#allocation46_spill] sm:$0xff] }
 0x3bd   : > { %v5262_v8 = vmul.f32 %v5076_v19, %v7434_v27  ;;  %v5268_v32 = vmul.f32 %v5076_v19, %v7437_v9  ;;  %v7445_v27 = vld [vmem:[#allocation48_spill] sm:$0xff]  ;;  %v7448_v9 = vld [vmem:[#allocation49_spill] sm:$0xff] }
 0x3be   : > { %7429 = vst [vmem:[#allocation20_spill] sm:$0xff] %v5250_v5  ;;  %7432 = vst [vmem:[#allocation21_spill] sm:$0xff] %v5256_v63  ;;  %v7440_v5 = vsub.f32 %v7439_v23, %v4841_v57  ;;  %v7443_v63 = vsub.f32 %v7442_v33, %v4841_v57 }
 0x3bf   : > { %7435 = vst [vmem:[#allocation22_spill] sm:$0xff] %v5262_v8  ;;  %7438 = vst [vmem:[#allocation23_spill] sm:$0xff] %v5268_v32  ;;  %v7446_v8 = vsub.f32 %v7445_v27, %v4841_v57  ;;  %v7449_v32 = vsub.f32 %v7448_v9, %v4841_v57 }
 0x3c0   : > { %v5274_v16 = vmul.f32 %v5076_v19, %v7440_v5  ;;  %v5280_v38 = vmul.f32 %v5076_v19, %v7443_v63  ;;  %v7451_v5 = vld [vmem:[#allocation52_spill] sm:$0xff]  ;;  %v7454_v63 = vld [vmem:[#allocation53_spill] sm:$0xff] }
 0x3c1   : > { %v5286_v2 = vmul.f32 %v5076_v19, %v7446_v8  ;;  %v5292_v23 = vmul.f32 %v5076_v19, %v7449_v32  ;;  %v7457_v8 = vld [vmem:[#allocation56_spill] sm:$0xff]  ;;  %v7460_v32 = vld [vmem:[#allocation57_spill] sm:$0xff] }
 0x3c2   : > { %7441 = vst [vmem:[#allocation24_spill] sm:$0xff] %v5274_v16  ;;  %7444 = vst [vmem:[#allocation25_spill] sm:$0xff] %v5280_v38  ;;  %v7452_v16 = vsub.f32 %v7451_v5, %v4841_v57  ;;  %v7455_v38 = vsub.f32 %v7454_v63, %v4841_v57 }
 0x3c3   : > { %7447 = vst [vmem:[#allocation26_spill] sm:$0xff] %v5286_v2  ;;  %7450 = vst [vmem:[#allocation27_spill] sm:$0xff] %v5292_v23  ;;  %v7458_v2 = vsub.f32 %v7457_v8, %v4841_v57  ;;  %v7461_v23 = vsub.f32 %v7460_v32, %v4841_v57 }
 0x3c4   : > { %v5298_v33 = vmul.f32 %v5076_v19, %v7452_v16  ;;  %v5304_v27 = vmul.f32 %v5076_v19, %v7455_v38  ;;  %v7463_v16 = vld [vmem:[#allocation60_spill] sm:$0xff]  ;;  %v7466_v38 = vld [vmem:[#allocation61_spill] sm:$0xff] }
 0x3c5   : > { %v5310_v9 = vmul.f32 %v5076_v19, %v7458_v2  ;;  %v5316_v5 = vmul.f32 %v5076_v19, %v7461_v23  ;;  %v7469_v2 = vld [vmem:[#allocation64_spill] sm:$0xff]  ;;  %v7472_v23 = vld [vmem:[#allocation65_spill] sm:$0xff] }
 0x3c6   : > { %7453 = vst [vmem:[#allocation28_spill] sm:$0xff] %v5298_v33  ;;  %7456 = vst [vmem:[#allocation29_spill] sm:$0xff] %v5304_v27  ;;  %v7464_v33 = vsub.f32 %v7463_v16, %v4841_v57  ;;  %v7467_v27 = vsub.f32 %v7466_v38, %v4841_v57 }
 0x3c7   : > { %7459 = vst [vmem:[#allocation30_spill] sm:$0xff] %v5310_v9  ;;  %7462 = vst [vmem:[#allocation31_spill] sm:$0xff] %v5316_v5  ;;  %v7470_v9 = vsub.f32 %v7469_v2, %v4841_v57  ;;  %v7473_v5 = vsub.f32 %v7472_v23, %v4841_v57 }
 0x3c8   : > { %v5322_v63 = vmul.f32 %v5076_v19, %v7464_v33  ;;  %v5328_v8 = vmul.f32 %v5076_v19, %v7467_v27  ;;  %v7475_v33 = vld [vmem:[#allocation69_spill] sm:$0xff]  ;;  %v7478_v27 = vld [vmem:[#allocation70_spill] sm:$0xff] }
 0x3c9   : > { %v5334_v32 = vmul.f32 %v5076_v19, %v7470_v9  ;;  %v5340_v16 = vmul.f32 %v5076_v19, %v7473_v5  ;;  %v7481_v9 = vld [vmem:[#allocation73_spill] sm:$0xff]  ;;  %v7484_v5 = vld [vmem:[#allocation74_spill] sm:$0xff] }
 0x3ca   : > { %7465 = vst [vmem:[#allocation33_spill] sm:$0xff] %v5322_v63  ;;  %7468 = vst [vmem:[#allocation34_spill] sm:$0xff] %v5328_v8  ;;  %v7476_v63 = vsub.f32 %v7475_v33, %v4841_v57  ;;  %v7479_v8 = vsub.f32 %v7478_v27, %v4841_v57 }
 0x3cb   : > { %7471 = vst [vmem:[#allocation35_spill] sm:$0xff] %v5334_v32  ;;  %7474 = vst [vmem:[#allocation36_spill] sm:$0xff] %v5340_v16  ;;  %v7482_v32 = vsub.f32 %v7481_v9, %v4841_v57  ;;  %v7485_v16 = vsub.f32 %v7484_v5, %v4841_v57 }
 0x3cc   : > { %v5346_v38 = vmul.f32 %v5076_v19, %v7476_v63  ;;  %v5352_v2 = vmul.f32 %v5076_v19, %v7479_v8  ;;  %v7487_v63 = vld [vmem:[#allocation77_spill] sm:$0xff]  ;;  %v7489_v8 = vld [vmem:[#allocation78_spill] sm:$0xff] }
 0x3cd   : > { %v5358_v23 = vmul.f32 %v5076_v19, %v7482_v32  ;;  %v5364_v33 = vmul.f32 %v5076_v19, %v7485_v16  ;;  %v7491_v32 = vld [vmem:[#allocation81_spill] sm:$0xff]  ;;  %v7493_v16 = vld [vmem:[#allocation82_spill] sm:$0xff] }
 0x3ce   : > { %7477 = vst [vmem:[#allocation37_spill] sm:$0xff] %v5346_v38  ;;  %7480 = vst [vmem:[#allocation38_spill] sm:$0xff] %v5352_v2  ;;  %v7488_v38 = vsub.f32 %v7487_v63, %v4841_v57  ;;  %v7490_v2 = vsub.f32 %v7489_v8, %v4841_v57 }
 0x3cf   : > { %7483 = vst [vmem:[#allocation39_spill] sm:$0xff] %v5358_v23  ;;  %7486 = vst [vmem:[#allocation40_spill] sm:$0xff] %v5364_v33  ;;  %v7492_v23 = vsub.f32 %v7491_v32, %v4841_v57  ;;  %v7494_v33 = vsub.f32 %v7493_v16, %v4841_v57 }
 0x3d0   : > { %v5370_v27 = vmul.f32 %v5076_v19, %v7488_v38  ;;  %v5376_v9 = vmul.f32 %v5076_v19, %v7490_v2  ;;  %v7495_v38 = vsub.f32 %v7334_v6, %v4841_v57  ;;  %v7496_v2 = vsub.f32 %v7335_v31, %v4841_v57 }
 0x3d1   : > { %v5382_v5 = vmul.f32 %v5076_v19, %v7492_v23  ;;  %v5388_v63 = vmul.f32 %v5076_v19, %v7494_v33  ;;  %v7497_v23 = vsub.f32 %v7336_v10, %v4841_v57  ;;  %v7498_v33 = vsub.f32 %v7337_v52, %v4841_v57 }
 0x3d2   : > { %v5394_v8 = vmul.f32 %v5076_v19, %v7495_v38  ;;  %v5400_v32 = vmul.f32 %v5076_v19, %v7496_v2  ;;  %v7499_v38 = vsub.f32 %v7338_v39, %v4841_v57  ;;  %v7500_v2 = vsub.f32 %v7339_v30, %v4841_v57 }
 0x3d3   : > { %v5406_v16 = vmul.f32 %v5076_v19, %v7497_v23  ;;  %v5412_v6 = vmul.f32 %v5076_v19, %v7498_v33  ;;  %v7501_v23 = vsub.f32 %v7340_v35, %v4841_v57  ;;  %v7502_v33 = vsub.f32 %v4553_v58, %v4841_v57 }
 0x3d4   : > { %v5418_v31 = vmul.f32 %v5076_v19, %v7499_v38  ;;  %v5424_v10 = vmul.f32 %v5076_v19, %v7500_v2  ;;  %v7503_v38 = vsub.f32 %v4050_v24, %v4841_v57  ;;  %v7504_v2 = vsub.f32 %v4054_v29, %v4841_v57 }
 0x3d5   : > { %v5430_v52 = vmul.f32 %v5076_v19, %v7501_v23  ;;  %v5436_v39 = vmul.f32 %v5076_v19, %v7502_v33  ;;  %v7505_v23 = vsub.f32 %v4077_v47, %v4841_v57  ;;  %v7506_v33 = vsub.f32 %v4079_v50, %v4841_v57 }
 0x3d6   : > { %v5442_v30 = vmul.f32 %v5076_v19, %v7503_v38  ;;  %v5448_v35 = vmul.f32 %v5076_v19, %v7504_v2  ;;  %v7507_v38 = vsub.f32 %v4095_v4, %v4841_v57  ;;  %v7508_v2 = vsub.f32 %v4097_v7, %v4841_v57 }
 0x3d7   : > { %v5454_v58 = vmul.f32 %v5076_v19, %v7505_v23  ;;  %v5460_v24 = vmul.f32 %v5076_v19, %v7506_v33  ;;  %v7509_v23 = vsub.f32 %v4113_v25, %v4841_v57  ;;  %v7510_v33 = vsub.f32 %v4115_v28, %v4841_v57 }
 0x3d8   : > { %v5466_v29 = vmul.f32 %v5076_v19, %v7507_v38  ;;  %v5472_v47 = vmul.f32 %v5076_v19, %v7508_v2  ;;  %v7511_v38 = vsub.f32 %v4131_v49, %v4841_v57  ;;  %v7512_v2 = vsub.f32 %v4133_v54, %v4841_v57 }
 0x3d9   : > { %v5478_v50 = vmul.f32 %v5076_v19, %v7509_v23  ;;  %v5484_v4 = vmul.f32 %v5076_v19, %v7510_v33  ;;  %v7513_v23 = vsub.f32 %v4149_v13, %v4841_v57  ;;  %v7514_v33 = vsub.f32 %v4151_v18, %v4841_v57 }
 0x3da   : > { %v5490_v7 = vmul.f32 %v5076_v19, %v7511_v38  ;;  %v5496_v25 = vmul.f32 %v5076_v19, %v7512_v2  ;;  %v7515_v38 = vsub.f32 %v4167_v43, %v4841_v57  ;;  %v7516_v2 = vsub.f32 %v4169_v46, %v4841_v57 }
 0x3db   : > { %v5502_v28 = vmul.f32 %v5076_v19, %v7513_v23  ;;  %v5508_v49 = vmul.f32 %v5076_v19, %v7514_v33  ;;  %v7517_v23 = vsub.f32 %v4185_v12, %v4841_v57  ;;  %v7518_v33 = vsub.f32 %v4187_v20, %v4841_v57 }
 0x3dc   : > { %v5514_v54 = vmul.f32 %v5076_v19, %v7515_v38  ;;  %v5520_v13 = vmul.f32 %v5076_v19, %v7516_v2  ;;  %v7519_v38 = vsub.f32 %v4203_v53, %v4841_v57  ;;  %v7520_v2 = vsub.f32 %v4205_v60, %v4841_v57 }
 0x3dd   : > { %v5526_v18 = vmul.f32 %v5076_v19, %v7517_v23  ;;  %v5532_v43 = vmul.f32 %v5076_v19, %v7518_v33  ;;  %v7521_v23 = vsub.f32 %v4221_v37, %v4841_v57  ;;  %v7522_v33 = vsub.f32 %v4223_v42, %v4841_v57 }
 0x3de   : > { %v5538_v46 = vmul.f32 %v5076_v19, %v7519_v38  ;;  %v5544_v12 = vmul.f32 %v5076_v19, %v7520_v2  ;;  %v7523_v38 = vsub.f32 %v4239_v26, %v4841_v57  ;;  %v7524_v2 = vsub.f32 %v4241_v34, %v4841_v57 }
 0x3df   : > { %v5550_v20 = vmul.f32 %v5076_v19, %v7521_v23  ;;  %v5556_v53 = vmul.f32 %v5076_v19, %v7522_v33  ;;  %v7525_v23 = vsub.f32 %v4257_v0, %v4841_v57  ;;  %v7526_v33 = vsub.f32 %v4259_v22, %v4841_v57 }
 0x3e0   : > { %v5562_v60 = vmul.f32 %v5076_v19, %v7523_v38  ;;  %v5568_v37 = vmul.f32 %v5076_v19, %v7524_v2  ;;  %v7527_v38 = vsub.f32 %v4275_v3, %v4841_v57  ;;  %v7528_v2 = vsub.f32 %v4277_v45, %v4841_v57 }
 0x3e1   : > { %v5574_v42 = vmul.f32 %v5076_v19, %v7525_v23  ;;  %v5580_v26 = vmul.f32 %v5076_v19, %v7526_v33  ;;  %v7529_v23 = vsub.f32 %v4293_v11, %v4841_v57  ;;  %v7530_v33 = vsub.f32 %v4295_v44, %v4841_v57 }
 0x3e2   : > { %v5586_v34 = vmul.f32 %v5076_v19, %v7527_v38  ;;  %v5592_v0 = vmul.f32 %v5076_v19, %v7528_v2  ;;  %v7532_v38 = vsub.f32 %v4311_v36, %v4841_v57  ;;  %v7534_v2 = vsub.f32 %v4313_v62, %v4841_v57 }
 0x3e3   : > { %v5598_v22 = vmul.f32 %v5076_v19, %v7529_v23  ;;  %v5604_v3 = vmul.f32 %v5076_v19, %v7530_v33  ;;  %v7536_v23 = vsub.f32 %v4329_v61, %v4841_v57  ;;  %v7538_v33 = vld [vmem:[#allocation47_spill] sm:$0xff] }
 0x3e4   : > { %v5610_v45 = vmul.f32 %v5076_v19, %v7532_v38  ;;  %v5616_v11 = vmul.f32 %v5076_v19, %v7534_v2  ;;  %v7541_v38 = vld [vmem:[#allocation50_spill] sm:$0xff]  ;;  %v7544_v2 = vld [vmem:[#allocation51_spill] sm:$0xff] }
 0x3e5   : > { %7531 = vst [vmem:[#allocation41_spill] sm:$0xff] %v5604_v3  ;;  %v5622_v44 = vmul.f32 %v5076_v19, %v7536_v23  ;;  %v7539_v3 = vsub.f32 %v7538_v33, %v4841_v57  ;;  %v7547_v23 = vld [vmem:[#allocation54_spill] sm:$0xff] }
 0x3e6   : > { %7533 = vst [vmem:[#allocation42_spill] sm:$0xff] %v5610_v45  ;;  %7535 = vst [vmem:[#allocation43_spill] sm:$0xff] %v5616_v11  ;;  %v7542_v45 = vsub.f32 %v7541_v38, %v4841_v57  ;;  %v7545_v11 = vsub.f32 %v7544_v2, %v4841_v57 }
 0x3e7   : > { %7537 = vst [vmem:[#allocation44_spill] sm:$0xff] %v5622_v44  ;;  %v5628_v36 = vmul.f32 %v5076_v19, %v7539_v3  ;;  %v7548_v44 = vsub.f32 %v7547_v23, %v4841_v57  ;;  %v7550_v3 = vld [vmem:[#allocation55_spill] sm:$0xff] }
 0x3e8   : > { %v5634_v62 = vmul.f32 %v5076_v19, %v7542_v45  ;;  %v5640_v61 = vmul.f32 %v5076_v19, %v7545_v11  ;;  %v7553_v45 = vld [vmem:[#allocation58_spill] sm:$0xff]  ;;  %v7556_v11 = vld [vmem:[#allocation59_spill] sm:$0xff] }
 0x3e9   : > { %7540 = vst [vmem:[#allocation45_spill] sm:$0xff] %v5628_v36  ;;  %v5646_v33 = vmul.f32 %v5076_v19, %v7548_v44  ;;  %v7551_v36 = vsub.f32 %v7550_v3, %v4841_v57  ;;  %v7559_v44 = vld [vmem:[#allocation62_spill] sm:$0xff] }
 0x3ea   : > { %7543 = vst [vmem:[#allocation46_spill] sm:$0xff] %v5634_v62  ;;  %7546 = vst [vmem:[#allocation48_spill] sm:$0xff] %v5640_v61  ;;  %v7554_v62 = vsub.f32 %v7553_v45, %v4841_v57  ;;  %v7557_v61 = vsub.f32 %v7556_v11, %v4841_v57 }
 0x3eb   : > { %7549 = vst [vmem:[#allocation49_spill] sm:$0xff] %v5646_v33  ;;  %v5652_v38 = vmul.f32 %v5076_v19, %v7551_v36  ;;  %v7560_v33 = vsub.f32 %v7559_v44, %v4841_v57  ;;  %v7562_v36 = vld [vmem:[#allocation63_spill] sm:$0xff] }
 0x3ec   : > { %v5658_v2 = vmul.f32 %v5076_v19, %v7554_v62  ;;  %v5664_v23 = vmul.f32 %v5076_v19, %v7557_v61  ;;  %v7565_v62 = vld [vmem:[#allocation67_spill] sm:$0xff]  ;;  %v7568_v61 = vld [vmem:[#allocation68_spill] sm:$0xff] }
 0x3ed   : > { %7552 = vst [vmem:[#allocation52_spill] sm:$0xff] %v5652_v38  ;;  %v5670_v3 = vmul.f32 %v5076_v19, %v7560_v33  ;;  %v7563_v38 = vsub.f32 %v7562_v36, %v4841_v57  ;;  %v7571_v33 = vld [vmem:[#allocation71_spill] sm:$0xff] }
 0x3ee   : > { %7555 = vst [vmem:[#allocation53_spill] sm:$0xff] %v5658_v2  ;;  %7558 = vst [vmem:[#allocation56_spill] sm:$0xff] %v5664_v23  ;;  %v7566_v2 = vsub.f32 %v7565_v62, %v4841_v57  ;;  %v7569_v23 = vsub.f32 %v7568_v61, %v4841_v57 }
 0x3ef   : > { %7561 = vst [vmem:[#allocation57_spill] sm:$0xff] %v5670_v3  ;;  %v5676_v45 = vmul.f32 %v5076_v19, %v7563_v38  ;;  %v7572_v3 = vsub.f32 %v7571_v33, %v4841_v57  ;;  %v7574_v38 = vld [vmem:[#allocation72_spill] sm:$0xff]  ;;  %v7579_v33 = vsub.f32 %v7348_v21, %v4841_v57 }
 0x3f0   : > { %v5682_v11 = vmul.f32 %v5076_v19, %v7566_v2  ;;  %v5688_v44 = vmul.f32 %v5076_v19, %v7569_v23  ;;  %v5702_v2 = vld [vmem:[#allocation4] ss:$0 sm:$0xff] }
 0x3f1   : > { %7564 = vst [vmem:[#allocation60_spill] sm:$0xff] %v5676_v45  ;;  %v5694_v36 = vmul.f32 %v5076_v19, %v7572_v3  ;;  %v7575_v45 = vsub.f32 %v7574_v38, %v4841_v57  ;;  %v5714_v3 = vmul.f32 %v5076_v19, %v7579_v33  ;;  %v7586_v33 = vld [vmem:[#allocation84_spill] sm:$0xff] }
 0x3f2   : > { %7567 = vst [vmem:[#allocation61_spill] sm:$0xff] %v5682_v11  ;;  %7570 = vst [vmem:[#allocation64_spill] sm:$0xff] %v5688_v44  ;;  %v7577_v11 = vld [vmem:[#allocation75_spill] sm:$0xff] }
 0x3f3   : > { %7573 = vst [vmem:[#allocation65_spill] sm:$0xff] %v5694_v36  ;;  %v5700_v62 = vmul.f32 %v5076_v19, %v7575_v45  ;;  %v7578_v61 = vsub.f32 %v7577_v11, %v4841_v57  ;;  %7580 = vst [vmem:[#allocation70_spill] sm:$0xff] %v5714_v3  ;;  %v7581_v36 = vld [vmem:[#allocation79_spill] sm:$0xff]  ;;  %v7587_v3 = vsub.f32 %v7586_v33, %v4841_v57 }
 0x3f4   : > { %v7582_v38 = vsub.f32 %v7581_v36, %v4841_v57 }
 0x3f5   : > { %7576 = vst [vmem:[#allocation69_spill] sm:$0xff] %v5700_v62  ;;  %v5708_v23 = vmul.f32 %v5076_v19, %v7578_v61  ;;  %v7583_v62 = vld [vmem:[#allocation80_spill] sm:$0xff]  ;;  %v7585_v61 = vsub.f32 %v7351_v1, %v4841_v57  ;;  %v5738_v36 = vmul.f32 %v5076_v19, %v7587_v3  ;;  %v5760_v3 = vmul.f32 %v5702_v2, %v5082_v17 }
 0x3f6   : > { %v5720_v45 = vmul.f32 %v5076_v19, %v7582_v38  ;;  %v7584_v44 = vsub.f32 %v7583_v62, %v4841_v57  ;;  %v7588_v38 = vsub.f32 %v7353_v40, %v4841_v57  ;;  %v5764_v40 = vmul.f32 %v5702_v2, %v5088_v41  ;;  %v7595_v41 = vld [vmem:[#allocation66_spill] sm:$0xff] }
 0x3f7   : > { %v5732_v21 = vmul.f32 %v5076_v19, %v7585_v61  ;;  %v7590_v61 = vsub.f32 %v4531_v59, %v4841_v57  ;;  %v5780_v59 = vmul.f32 %v5702_v2, %v5112_v51 }
 0x3f8   : > { %v5726_v11 = vmul.f32 %v5076_v19, %v7584_v44  ;;  %v5744_v62 = vmul.f32 %v5076_v19, %v7588_v38  ;;  %v7589_v44 = vsub.f32 %v7354_v55, %v4841_v57  ;;  %v5768_v55 = vmul.f32 %v5702_v2, %v5094_v48  ;;  %v7593_v57 = vld [vmem:[#allocation16_spill] sm:$0xff] }
 0x3f9   : > { %v5756_v33 = vmul.f32 %v5076_v19, %v7590_v61  ;;  %v5772_v38 = vmul.f32 %v5702_v2, %v5100_v14  ;;  %7592 = vst [vmem:[#allocation74_spill] sm:$0xff] %v5780_v59  ;;  %v5784_v17 = vmul.f32 %v5702_v2, %v7593_v57  ;;  %v5788_v48 = vmul.f32 %v5702_v2, %v7595_v41  ;;  %v7599_v61 = vld [vmem:[#allocation13_spill] sm:$0xff]  ;;  %v7602_v59 = vld [vmem:[#allocation15_spill] sm:$0xff] }
 0x3fa   : > { %v5750_v1 = vmul.f32 %v5076_v19, %v7589_v44  ;;  %v5776_v19 = vmul.f32 %v5702_v2, %v5106_v15  ;;  %v7597_v44 = vld [vmem:[#allocation12_spill] sm:$0xff]  ;;  %v5796_v15 = vmul.f32 %v5702_v2, %v7599_v61  ;;  %v5804_v57 = vmul.f32 %v5702_v2, %v7602_v59 }
 0x3fb   : > { %7594 = vst [vmem:[#allocation77_spill] sm:$0xff] %v5784_v17  ;;  %7596 = vst [vmem:[#allocation78_spill] sm:$0xff] %v5788_v48  ;;  %v5792_v14 = vmul.f32 %v5702_v2, %v7597_v44  ;;  %v7604_v17 = vld [vmem:[#allocation17_spill] sm:$0xff]  ;;  %v7606_v48 = vld [vmem:[#allocation32_spill] sm:$0xff] }
 0x3fc   : > { %7591 = vst [vmem:[#allocation73_spill] sm:$0xff] %v5776_v19  ;;  %v7600_v19 = vld [vmem:[#allocation14_spill] sm:$0xff]  ;;  %7603 = vst [vmem:[#allocation47_spill] sm:$0xff] %v5804_v57  ;;  %v5808_v41 = vmul.f32 %v5702_v2, %v7604_v17  ;;  %v5812_v44 = vmul.f32 %v5702_v2, %v7606_v48  ;;  %v7613_v57 = vld [vmem:[#allocation89_spill] sm:$0xff] }
 0x3fd   : > { %7598 = vst [vmem:[#allocation81_spill] sm:$0xff] %v5792_v14  ;;  %v5800_v51 = vmul.f32 %v5702_v2, %v7600_v19  ;;  %v7608_v14 = vld [vmem:[#allocation85_spill] sm:$0xff]  ;;  %v5820_v19 = vmul.f32 %v5702_v2, %v5172_v56  ;;  %v5828_v17 = vmul.f32 %v5702_v2, %v7613_v57 }
 0x3fe   : > { %7605 = vst [vmem:[#allocation50_spill] sm:$0xff] %v5808_v41  ;;  %7607 = vst [vmem:[#allocation51_spill] sm:$0xff] %v5812_v44  ;;  %v5816_v61 = vmul.f32 %v5702_v2, %v7608_v14  ;;  %v7615_v41 = vld [vmem:[#allocation90_spill] sm:$0xff]  ;;  %v7617_v44 = vld [vmem:[#allocation91_spill] sm:$0xff] }
 0x3ff   : > { %7601 = vst [vmem:[#allocation82_spill] sm:$0xff] %v5800_v51  ;;  %7610 = vst [vmem:[#allocation55_spill] sm:$0xff] %v5820_v19  ;;  %v7611_v51 = vld [vmem:[#allocation86_spill] sm:$0xff]  ;;  %v5832_v48 = vmul.f32 %v5702_v2, %v7615_v41  ;;  %v5836_v14 = vmul.f32 %v5702_v2, %v7617_v44  ;;  %v7621_v19 = vld [vmem:[#allocation93_spill] sm:$0xff] }
 0x400   : > { %7609 = vst [vmem:[#allocation54_spill] sm:$0xff] %v5816_v61  ;;  %v5824_v59 = vmul.f32 %v5702_v2, %v7611_v51  ;;  %7614 = vst [vmem:[#allocation59_spill] sm:$0xff] %v5828_v17  ;;  %v7619_v61 = vld [vmem:[#allocation92_spill] sm:$0xff]  ;;  %v5844_v51 = vmul.f32 %v5702_v2, %v7621_v19  ;;  %v7625_v17 = vld [vmem:[#allocation83_spill] sm:$0xff] }
 0x401   : > { %7616 = vst [vmem:[#allocation62_spill] sm:$0xff] %v5832_v48  ;;  %7618 = vst [vmem:[#allocation63_spill] sm:$0xff] %v5836_v14  ;;  %v5840_v56 = vmul.f32 %v5702_v2, %v7619_v61  ;;  %v5852_v41 = vmul.f32 %v5702_v2, %v7625_v17  ;;  %v7627_v48 = vld [vmem:[#allocation87_spill] sm:$0xff]  ;;  %v7629_v14 = vld [vmem:[#allocation88_spill] sm:$0xff] }
 0x402   : > { %7612 = vst [vmem:[#allocation58_spill] sm:$0xff] %v5824_v59  ;;  %7622 = vst [vmem:[#allocation68_spill] sm:$0xff] %v5844_v51  ;;  %v7623_v59 = vld [vmem:[#allocation76_spill] sm:$0xff]  ;;  %v5856_v44 = vmul.f32 %v5702_v2, %v7627_v48  ;;  %v5860_v61 = vmul.f32 %v5702_v2, %v7629_v14  ;;  %v7633_v51 = vld [vmem:[#allocation19_spill] sm:$0xff] }
 0x403   : > { %7620 = vst [vmem:[#allocation67_spill] sm:$0xff] %v5840_v56  ;;  %v5848_v57 = vmul.f32 %v5702_v2, %v7623_v59  ;;  %7626 = vst [vmem:[#allocation72_spill] sm:$0xff] %v5852_v41  ;;  %v7631_v56 = vld [vmem:[#allocation18_spill] sm:$0xff]  ;;  %v5868_v59 = vmul.f32 %v5702_v2, %v7633_v51  ;;  %v7637_v41 = vld [vmem:[#allocation21_spill] sm:$0xff] }
 0x404   : > { %7628 = vst [vmem:[#allocation75_spill] sm:$0xff] %v5856_v44  ;;  %7630 = vst [vmem:[#allocation79_spill] sm:$0xff] %v5860_v61  ;;  %v5864_v19 = vmul.f32 %v5702_v2, %v7631_v56  ;;  %v5876_v48 = vmul.f32 %v5702_v2, %v7637_v41  ;;  %v7639_v44 = vld [vmem:[#allocation22_spill] sm:$0xff]  ;;  %v7641_v61 = vld [vmem:[#allocation23_spill] sm:$0xff] }
 0x405   : > { %7624 = vst [vmem:[#allocation71_spill] sm:$0xff] %v5848_v57  ;;  %7634 = vst [vmem:[#allocation84_spill] sm:$0xff] %v5868_v59  ;;  %v7635_v57 = vld [vmem:[#allocation20_spill] sm:$0xff]  ;;  %v5880_v14 = vmul.f32 %v5702_v2, %v7639_v44  ;;  %v5884_v56 = vmul.f32 %v5702_v2, %v7641_v61  ;;  %v7645_v59 = vld [vmem:[#allocation25_spill] sm:$0xff] }
 0x406   : > { %7632 = vst [vmem:[#allocation80_spill] sm:$0xff] %v5864_v19  ;;  %v5872_v17 = vmul.f32 %v5702_v2, %v7635_v57  ;;  %7638 = vst [vmem:[#allocation66_spill] sm:$0xff] %v5876_v48  ;;  %v7643_v19 = vld [vmem:[#allocation24_spill] sm:$0xff]  ;;  %v5892_v57 = vmul.f32 %v5702_v2, %v7645_v59  ;;  %v7649_v48 = vld [vmem:[#allocation27_spill] sm:$0xff] }
 0x407   : > { %7640 = vst [vmem:[#allocation12_spill] sm:$0xff] %v5880_v14  ;;  %7642 = vst [vmem:[#allocation13_spill] sm:$0xff] %v5884_v56  ;;  %v5888_v51 = vmul.f32 %v5702_v2, %v7643_v19  ;;  %v5900_v44 = vmul.f32 %v5702_v2, %v7649_v48  ;;  %v7651_v14 = vld [vmem:[#allocation28_spill] sm:$0xff]  ;;  %v7653_v56 = vld [vmem:[#allocation29_spill] sm:$0xff] }
 0x408   : > { %7636 = vst [vmem:[#allocation16_spill] sm:$0xff] %v5872_v17  ;;  %7646 = vst [vmem:[#allocation15_spill] sm:$0xff] %v5892_v57  ;;  %v7647_v17 = vld [vmem:[#allocation26_spill] sm:$0xff]  ;;  %v5904_v61 = vmul.f32 %v5702_v2, %v7651_v14  ;;  %v5908_v19 = vmul.f32 %v5702_v2, %v7653_v56  ;;  %v7657_v57 = vld [vmem:[#allocation31_spill] sm:$0xff] }
 0x409   : > { %7644 = vst [vmem:[#allocation14_spill] sm:$0xff] %v5888_v51  ;;  %v5896_v41 = vmul.f32 %v5702_v2, %v7647_v17  ;;  %7650 = vst [vmem:[#allocation32_spill] sm:$0xff] %v5900_v44  ;;  %v7655_v51 = vld [vmem:[#allocation30_spill] sm:$0xff]  ;;  %v5916_v17 = vmul.f32 %v5702_v2, %v7657_v57 }
 0x40a   : > { %7652 = vst [vmem:[#allocation85_spill] sm:$0xff] %v5904_v61  ;;  %7654 = vst [vmem:[#allocation86_spill] sm:$0xff] %v5908_v19  ;;  %v5912_v59 = vmul.f32 %v5702_v2, %v7655_v51  ;;  %v7661_v44 = vld [vmem:[#allocation34_spill] sm:$0xff]  ;;  %v7663_v61 = vld [vmem:[#allocation35_spill] sm:$0xff] }
 0x40b   : > { %7648 = vst [vmem:[#allocation17_spill] sm:$0xff] %v5896_v41  ;;  %7658 = vst [vmem:[#allocation90_spill] sm:$0xff] %v5916_v17  ;;  %v7659_v41 = vld [vmem:[#allocation33_spill] sm:$0xff]  ;;  %v5924_v14 = vmul.f32 %v5702_v2, %v7661_v44  ;;  %v5928_v56 = vmul.f32 %v5702_v2, %v7663_v61  ;;  %v7664_v19 = vld [vmem:[#allocation36_spill] sm:$0xff] }
 0x40c   : > { %7656 = vst [vmem:[#allocation89_spill] sm:$0xff] %v5912_v59  ;;  %v5920_v48 = vmul.f32 %v5702_v2, %v7659_v41  ;;  %v5932_v51 = vmul.f32 %v5702_v2, %v7664_v19  ;;  %v7665_v59 = vld [vmem:[#allocation37_spill] sm:$0xff]  ;;  %v7666_v17 = vld [vmem:[#allocation38_spill] sm:$0xff]  ;;  %v5952_v19 = vmul.f32 %v5702_v2, %v5370_v27  ;;  %v5972_v27 = vmul.f32 %v5702_v2, %v5400_v32 }
 0x40d   : > { %7662 = vst [vmem:[#allocation92_spill] sm:$0xff] %v5924_v14  ;;  %v5936_v57 = vmul.f32 %v5702_v2, %v7665_v59  ;;  %v5940_v41 = vmul.f32 %v5702_v2, %v7666_v17  ;;  %v7668_v14 = vld [vmem:[#allocation40_spill] sm:$0xff]  ;;  %v5956_v59 = vmul.f32 %v5702_v2, %v5376_v9  ;;  %v5960_v17 = vmul.f32 %v5702_v2, %v5382_v5 }
 0x40e   : > { %7660 = vst [vmem:[#allocation91_spill] sm:$0xff] %v5920_v48  ;;  %v7667_v48 = vld [vmem:[#allocation39_spill] sm:$0xff]  ;;  %v5948_v61 = vmul.f32 %v5702_v2, %v7668_v14  ;;  %v5968_v14 = vmul.f32 %v5702_v2, %v5394_v8  ;;  %v5976_v9 = vmul.f32 %v5702_v2, %v5406_v16  ;;  %v5980_v5 = vmul.f32 %v5702_v2, %v5412_v6 }
 0x40f   : > { %v5944_v44 = vmul.f32 %v5702_v2, %v7667_v48  ;;  %v5964_v48 = vmul.f32 %v5702_v2, %v5388_v63  ;;  %v5984_v63 = vmul.f32 %v5702_v2, %v5418_v31  ;;  %v5988_v8 = vmul.f32 %v5702_v2, %v5424_v10 }
 0x410   : > { %v5992_v32 = vmul.f32 %v5702_v2, %v5430_v52  ;;  %v5996_v16 = vmul.f32 %v5702_v2, %v5436_v39  ;;  %v6000_v6 = vmul.f32 %v5702_v2, %v5442_v30  ;;  %v6004_v31 = vmul.f32 %v5702_v2, %v5448_v35 }
 0x411   : > { %v6008_v10 = vmul.f32 %v5702_v2, %v5454_v58  ;;  %v6012_v52 = vmul.f32 %v5702_v2, %v5460_v24  ;;  %v6016_v39 = vmul.f32 %v5702_v2, %v5466_v29  ;;  %v6020_v30 = vmul.f32 %v5702_v2, %v5472_v47 }
 0x412   : > { %v6024_v35 = vmul.f32 %v5702_v2, %v5478_v50  ;;  %v6028_v58 = vmul.f32 %v5702_v2, %v5484_v4  ;;  %v6032_v24 = vmul.f32 %v5702_v2, %v5490_v7  ;;  %v6036_v29 = vmul.f32 %v5702_v2, %v5496_v25 }
 0x413   : > { %v6040_v47 = vmul.f32 %v5702_v2, %v5502_v28  ;;  %v6044_v50 = vmul.f32 %v5702_v2, %v5508_v49  ;;  %v6048_v4 = vmul.f32 %v5702_v2, %v5514_v54  ;;  %v6052_v7 = vmul.f32 %v5702_v2, %v5520_v13 }
 0x414   : > { %v6056_v25 = vmul.f32 %v5702_v2, %v5526_v18  ;;  %v6060_v28 = vmul.f32 %v5702_v2, %v5532_v43  ;;  %v6064_v49 = vmul.f32 %v5702_v2, %v5538_v46  ;;  %v6068_v54 = vmul.f32 %v5702_v2, %v5544_v12 }
 0x415   : > { %v6072_v13 = vmul.f32 %v5702_v2, %v5550_v20  ;;  %v6076_v18 = vmul.f32 %v5702_v2, %v5556_v53  ;;  %v6080_v43 = vmul.f32 %v5702_v2, %v5562_v60  ;;  %v6084_v46 = vmul.f32 %v5702_v2, %v5568_v37 }
 0x416   : > { %v6088_v12 = vmul.f32 %v5702_v2, %v5574_v42  ;;  %v6092_v20 = vmul.f32 %v5702_v2, %v5580_v26  ;;  %v6096_v53 = vmul.f32 %v5702_v2, %v5586_v34  ;;  %v6100_v60 = vmul.f32 %v5702_v2, %v5592_v0 }
 0x417   : > { %7669 = vst [vmem:[#allocation93_spill] sm:$0xff] %v6084_v46  ;;  %v6104_v37 = vmul.f32 %v5702_v2, %v5598_v22  ;;  %v7675_v46 = vld [vmem:[#allocation41_spill] sm:$0xff] }
 0x418   : > { %7670 = vst [vmem:[#allocation76_spill] sm:$0xff] %v6088_v12  ;;  %7671 = vst [vmem:[#allocation83_spill] sm:$0xff] %v6092_v20  ;;  %v6108_v42 = vmul.f32 %v5702_v2, %v7675_v46  ;;  %v7677_v12 = vld [vmem:[#allocation42_spill] sm:$0xff]  ;;  %v7679_v20 = vld [vmem:[#allocation43_spill] sm:$0xff] }
 0x419   : > { %7672 = vst [vmem:[#allocation87_spill] sm:$0xff] %v6096_v53  ;;  %7673 = vst [vmem:[#allocation88_spill] sm:$0xff] %v6100_v60  ;;  %v6112_v26 = vmul.f32 %v5702_v2, %v7677_v12  ;;  %v6116_v34 = vmul.f32 %v5702_v2, %v7679_v20  ;;  %v7681_v53 = vld [vmem:[#allocation44_spill] sm:$0xff]  ;;  %v7683_v60 = vld [vmem:[#allocation45_spill] sm:$0xff] }
 0x41a   : > { %7674 = vst [vmem:[#allocation18_spill] sm:$0xff] %v6104_v37  ;;  %7676 = vst [vmem:[#allocation19_spill] sm:$0xff] %v6108_v42  ;;  %v6120_v0 = vmul.f32 %v5702_v2, %v7681_v53  ;;  %v6124_v22 = vmul.f32 %v5702_v2, %v7683_v60  ;;  %v7685_v37 = vld [vmem:[#allocation46_spill] sm:$0xff]  ;;  %v7687_v42 = vld [vmem:[#allocation48_spill] sm:$0xff] }
 0x41b   : > { %7678 = vst [vmem:[#allocation20_spill] sm:$0xff] %v6112_v26  ;;  %7680 = vst [vmem:[#allocation21_spill] sm:$0xff] %v6116_v34  ;;  %v6128_v46 = vmul.f32 %v5702_v2, %v7685_v37  ;;  %v6132_v12 = vmul.f32 %v5702_v2, %v7687_v42  ;;  %v7689_v26 = vld [vmem:[#allocation49_spill] sm:$0xff]  ;;  %v7691_v34 = vld [vmem:[#allocation52_spill] sm:$0xff] }
 0x41c   : > { %7682 = vst [vmem:[#allocation22_spill] sm:$0xff] %v6120_v0  ;;  %7684 = vst [vmem:[#allocation23_spill] sm:$0xff] %v6124_v22  ;;  %v6136_v20 = vmul.f32 %v5702_v2, %v7689_v26  ;;  %v6140_v53 = vmul.f32 %v5702_v2, %v7691_v34  ;;  %v7693_v0 = vld [vmem:[#allocation53_spill] sm:$0xff]  ;;  %v7695_v22 = vld [vmem:[#allocation56_spill] sm:$0xff] }
 0x41d   : > { %7686 = vst [vmem:[#allocation24_spill] sm:$0xff] %v6128_v46  ;;  %7688 = vst [vmem:[#allocation25_spill] sm:$0xff] %v6132_v12  ;;  %v6144_v60 = vmul.f32 %v5702_v2, %v7693_v0  ;;  %v6148_v37 = vmul.f32 %v5702_v2, %v7695_v22  ;;  %v7697_v46 = vld [vmem:[#allocation57_spill] sm:$0xff]  ;;  %v7699_v12 = vld [vmem:[#allocation60_spill] sm:$0xff] }
 0x41e   : > { %7690 = vst [vmem:[#allocation26_spill] sm:$0xff] %v6136_v20  ;;  %7692 = vst [vmem:[#allocation27_spill] sm:$0xff] %v6140_v53  ;;  %v6152_v42 = vmul.f32 %v5702_v2, %v7697_v46  ;;  %v6156_v26 = vmul.f32 %v5702_v2, %v7699_v12  ;;  %v7700_v20 = vld [vmem:[#allocation61_spill] sm:$0xff]  ;;  %v7702_v53 = vld [vmem:[#allocation64_spill] sm:$0xff]  ;;  %v6178_v12 = vmul.f32 %v5702_v2, %v5708_v23 }
 0x41f   : > { %7694 = vst [vmem:[#allocation28_spill] sm:$0xff] %v6144_v60  ;;  %7696 = vst [vmem:[#allocation29_spill] sm:$0xff] %v6148_v37  ;;  %v6160_v34 = vmul.f32 %v5702_v2, %v7700_v20  ;;  %v6164_v0 = vmul.f32 %v5702_v2, %v7702_v53  ;;  %v7703_v60 = vld [vmem:[#allocation65_spill] sm:$0xff]  ;;  %v6170_v37 = vld [vmem:[#allocation6] ss:$0 sm:$0xff]  ;;  %v6186_v53 = vmul.f32 %v5702_v2, %v5720_v45 }
 0x420   : > { %7698 = vst [vmem:[#allocation30_spill] sm:$0xff] %v6152_v42  ;;  %v6168_v22 = vmul.f32 %v5702_v2, %v7703_v60  ;;  %v7704_v46 = vld [vmem:[#allocation69_spill] sm:$0xff]  ;;  %v7705_v20 = vld [vmem:[#allocation70_spill] sm:$0xff]  ;;  %v6190_v60 = vmul.f32 %v5702_v2, %v5726_v11  ;;  %v6198_v23 = vmul.f32 %v5702_v2, %v5738_v36  ;;  %v6206_v45 = vmul.f32 %v5702_v2, %v5750_v1 }
 0x421   : > { %7701 = vst [vmem:[#allocation31_spill] sm:$0xff] %v6160_v34  ;;  %v6174_v42 = vmul.f32 %v5702_v2, %v7704_v46  ;;  %v6182_v34 = vmul.f32 %v5702_v2, %v7705_v20  ;;  %v6194_v46 = vmul.f32 %v5702_v2, %v5732_v21  ;;  %v6202_v20 = vmul.f32 %v5702_v2, %v5744_v62 }
 0x422   : > { %7706 = vst [vmem:[#allocation33_spill] sm:$0xff] %v6206_v45  ;;  %v6210_v11 = vmul.f32 %v5702_v2, %v5756_v33  ;;  %v6214_v21 = vadd.f32 %v6170_v37, %v5760_v3  ;;  %v6218_v36 = vadd.f32 %v6170_v37, %v5764_v40  ;;  %v6222_v62 = vadd.f32 %v6170_v37, %v5768_v55  ;;  %v7710_v45 = vld [vmem:[#allocation73_spill] sm:$0xff]  ;;  %v7712_v33 = vld [vmem:[#allocation74_spill] sm:$0xff] }
 0x423   : > { %v6226_v1 = vadd.f32 %v6170_v37, %v5772_v38  ;;  %v6230_v2 = vadd.f32 %v6170_v37, %v7710_v45  ;;  %v6234_v3 = vadd.f32 %v6170_v37, %v7712_v33  ;;  %v6250_v45 = vadd.f32 %v6170_v37, %v5796_v15 }
 0x424   : > { %7707 = vst [vmem:[#allocation34_spill] sm:$0xff] %v6214_v21  ;;  %7708 = vst [vmem:[#allocation35_spill] sm:$0xff] %v6218_v36  ;;  %v7714_v21 = vld [vmem:[#allocation77_spill] sm:$0xff]  ;;  %v7716_v36 = vld [vmem:[#allocation78_spill] sm:$0xff] }
 0x425   : > { %7709 = vst [vmem:[#allocation36_spill] sm:$0xff] %v6222_v62  ;;  %7711 = vst [vmem:[#allocation37_spill] sm:$0xff] %v6230_v2  ;;  %v6238_v40 = vadd.f32 %v6170_v37, %v7714_v21  ;;  %v6242_v55 = vadd.f32 %v6170_v37, %v7716_v36  ;;  %v7718_v62 = vld [vmem:[#allocation81_spill] sm:$0xff]  ;;  %v7721_v2 = vld [vmem:[#allocation82_spill] sm:$0xff] }
 0x426   : > { %7713 = vst [vmem:[#allocation38_spill] sm:$0xff] %v6234_v3  ;;  %v6246_v38 = vadd.f32 %v6170_v37, %v7718_v62  ;;  %7720 = vst [vmem:[#allocation42_spill] sm:$0xff] %v6250_v45  ;;  %v6254_v33 = vadd.f32 %v6170_v37, %v7721_v2  ;;  %v7723_v3 = vld [vmem:[#allocation47_spill] sm:$0xff] }
 0x427   : > { %7715 = vst [vmem:[#allocation39_spill] sm:$0xff] %v6238_v40  ;;  %7717 = vst [vmem:[#allocation40_spill] sm:$0xff] %v6242_v55  ;;  %v6258_v21 = vadd.f32 %v6170_v37, %v7723_v3  ;;  %v7725_v40 = vld [vmem:[#allocation50_spill] sm:$0xff]  ;;  %v7727_v55 = vld [vmem:[#allocation51_spill] sm:$0xff] }
 0x428   : > { %7719 = vst [vmem:[#allocation41_spill] sm:$0xff] %v6246_v38  ;;  %7722 = vst [vmem:[#allocation43_spill] sm:$0xff] %v6254_v33  ;;  %v6262_v36 = vadd.f32 %v6170_v37, %v7725_v40  ;;  %v6266_v62 = vadd.f32 %v6170_v37, %v7727_v55  ;;  %v7729_v38 = vld [vmem:[#allocation54_spill] sm:$0xff]  ;;  %v7731_v45 = vld [vmem:[#allocation55_spill] sm:$0xff] }
 0x429   : > { %7724 = vst [vmem:[#allocation44_spill] sm:$0xff] %v6258_v21  ;;  %v6270_v15 = vadd.f32 %v6170_v37, %v7729_v38  ;;  %v6274_v2 = vadd.f32 %v6170_v37, %v7731_v45  ;;  %v7733_v33 = vld [vmem:[#allocation58_spill] sm:$0xff]  ;;  %v7735_v21 = vld [vmem:[#allocation59_spill] sm:$0xff] }
 0x42a   : > { %7726 = vst [vmem:[#allocation45_spill] sm:$0xff] %v6262_v36  ;;  %7728 = vst [vmem:[#allocation46_spill] sm:$0xff] %v6266_v62  ;;  %v6278_v3 = vadd.f32 %v6170_v37, %v7733_v33  ;;  %v6282_v40 = vadd.f32 %v6170_v37, %v7735_v21  ;;  %v7737_v36 = vld [vmem:[#allocation62_spill] sm:$0xff]  ;;  %v7739_v62 = vld [vmem:[#allocation63_spill] sm:$0xff] }
 0x42b   : > { %7730 = vst [vmem:[#allocation48_spill] sm:$0xff] %v6270_v15  ;;  %7732 = vst [vmem:[#allocation49_spill] sm:$0xff] %v6274_v2  ;;  %v6286_v55 = vadd.f32 %v6170_v37, %v7737_v36  ;;  %v6290_v38 = vadd.f32 %v6170_v37, %v7739_v62  ;;  %v7741_v15 = vld [vmem:[#allocation67_spill] sm:$0xff]  ;;  %v7743_v2 = vld [vmem:[#allocation68_spill] sm:$0xff] }
 0x42c   : > { %7734 = vst [vmem:[#allocation52_spill] sm:$0xff] %v6278_v3  ;;  %7736 = vst [vmem:[#allocation53_spill] sm:$0xff] %v6282_v40  ;;  %v6294_v45 = vadd.f32 %v6170_v37, %v7741_v15  ;;  %v6298_v33 = vadd.f32 %v6170_v37, %v7743_v2  ;;  %v7745_v3 = vld [vmem:[#allocation71_spill] sm:$0xff]  ;;  %v7747_v40 = vld [vmem:[#allocation72_spill] sm:$0xff] }
 0x42d   : > { %7738 = vst [vmem:[#allocation56_spill] sm:$0xff] %v6286_v55  ;;  %7740 = vst [vmem:[#allocation57_spill] sm:$0xff] %v6290_v38  ;;  %v6302_v21 = vadd.f32 %v6170_v37, %v7745_v3  ;;  %v6306_v36 = vadd.f32 %v6170_v37, %v7747_v40  ;;  %v7749_v55 = vld [vmem:[#allocation75_spill] sm:$0xff] }
 0x42e   : > { %7742 = vst [vmem:[#allocation60_spill] sm:$0xff] %v6294_v45  ;;  %7744 = vst [vmem:[#allocation61_spill] sm:$0xff] %v6298_v33  ;;  %v6310_v62 = vadd.f32 %v6170_v37, %v7749_v55  ;;  %v7751_v38 = vld [vmem:[#allocation79_spill] sm:$0xff]  ;;  %v7753_v45 = vld [vmem:[#allocation80_spill] sm:$0xff] }
 0x42f   : > { %7746 = vst [vmem:[#allocation64_spill] sm:$0xff] %v6302_v21  ;;  %7748 = vst [vmem:[#allocation65_spill] sm:$0xff] %v6306_v36  ;;  %v6314_v15 = vadd.f32 %v6170_v37, %v7751_v38  ;;  %v6318_v2 = vadd.f32 %v6170_v37, %v7753_v45  ;;  %v7755_v33 = vld [vmem:[#allocation84_spill] sm:$0xff]  ;;  %v7759_v36 = vld [vmem:[#allocation66_spill] sm:$0xff] }
 0x430   : > { %7750 = vst [vmem:[#allocation69_spill] sm:$0xff] %v6310_v62  ;;  %v6322_v3 = vadd.f32 %v6170_v37, %v7755_v33  ;;  %v7757_v21 = vld [vmem:[#allocation16_spill] sm:$0xff]  ;;  %v6330_v55 = vadd.f32 %v6170_v37, %v7759_v36 }
 0x431   : > { %7752 = vst [vmem:[#allocation70_spill] sm:$0xff] %v6314_v15  ;;  %7754 = vst [vmem:[#allocation73_spill] sm:$0xff] %v6318_v2  ;;  %v6326_v40 = vadd.f32 %v6170_v37, %v7757_v21  ;;  %v7761_v62 = vld [vmem:[#allocation12_spill] sm:$0xff]  ;;  %v7763_v15 = vld [vmem:[#allocation13_spill] sm:$0xff] }
 0x432   : > { %7756 = vst [vmem:[#allocation74_spill] sm:$0xff] %v6322_v3  ;;  %7760 = vst [vmem:[#allocation78_spill] sm:$0xff] %v6330_v55  ;;  %v6334_v38 = vadd.f32 %v6170_v37, %v7761_v62  ;;  %v6338_v45 = vadd.f32 %v6170_v37, %v7763_v15  ;;  %v7765_v2 = vld [vmem:[#allocation14_spill] sm:$0xff]  ;;  %v7767_v3 = vld [vmem:[#allocation15_spill] sm:$0xff] }
 0x433   : > { %7758 = vst [vmem:[#allocation77_spill] sm:$0xff] %v6326_v40  ;;  %v6342_v33 = vadd.f32 %v6170_v37, %v7765_v2  ;;  %v6346_v21 = vadd.f32 %v6170_v37, %v7767_v3  ;;  %v7769_v40 = vld [vmem:[#allocation17_spill] sm:$0xff]  ;;  %v7771_v55 = vld [vmem:[#allocation32_spill] sm:$0xff] }
 0x434   : > { %7762 = vst [vmem:[#allocation81_spill] sm:$0xff] %v6334_v38  ;;  %7764 = vst [vmem:[#allocation82_spill] sm:$0xff] %v6338_v45  ;;  %v6350_v36 = vadd.f32 %v6170_v37, %v7769_v40  ;;  %v6354_v62 = vadd.f32 %v6170_v37, %v7771_v55  ;;  %v7773_v38 = vld [vmem:[#allocation85_spill] sm:$0xff]  ;;  %v7774_v45 = vld [vmem:[#allocation86_spill] sm:$0xff] }
 0x435   : > { %7766 = vst [vmem:[#allocation47_spill] sm:$0xff] %v6342_v33  ;;  %7768 = vst [vmem:[#allocation50_spill] sm:$0xff] %v6346_v21  ;;  %v6358_v15 = vadd.f32 %v6170_v37, %v7773_v38  ;;  %v6362_v2 = vadd.f32 %v6170_v37, %v7774_v45  ;;  %v7775_v33 = vld [vmem:[#allocation89_spill] sm:$0xff]  ;;  %v7776_v21 = vld [vmem:[#allocation90_spill] sm:$0xff]  ;;  %v6382_v45 = vadd.f32 %v6170_v37, %v5928_v56 }
 0x436   : > { %7770 = vst [vmem:[#allocation51_spill] sm:$0xff] %v6350_v36  ;;  %7772 = vst [vmem:[#allocation54_spill] sm:$0xff] %v6354_v62  ;;  %v6366_v3 = vadd.f32 %v6170_v37, %v7775_v33  ;;  %v6370_v40 = vadd.f32 %v6170_v37, %v7776_v21  ;;  %v7777_v36 = vld [vmem:[#allocation91_spill] sm:$0xff]  ;;  %v7778_v62 = vld [vmem:[#allocation92_spill] sm:$0xff]  ;;  %v6386_v33 = vadd.f32 %v6170_v37, %v5932_v51 }
 0x437   : > { %v6374_v55 = vadd.f32 %v6170_v37, %v7777_v36  ;;  %v6378_v38 = vadd.f32 %v6170_v37, %v7778_v62  ;;  %v6390_v21 = vadd.f32 %v6170_v37, %v5936_v57  ;;  %v6394_v36 = vadd.f32 %v6170_v37, %v5940_v41 }
 0x438   : > { %v6398_v62 = vadd.f32 %v6170_v37, %v5944_v44  ;;  %v6402_v56 = vadd.f32 %v6170_v37, %v5948_v61  ;;  %v6406_v51 = vadd.f32 %v6170_v37, %v5952_v19  ;;  %v6410_v57 = vadd.f32 %v6170_v37, %v5956_v59 }
 0x439   : > { %v6414_v41 = vadd.f32 %v6170_v37, %v5960_v17  ;;  %v6418_v44 = vadd.f32 %v6170_v37, %v5964_v48  ;;  %v6422_v61 = vadd.f32 %v6170_v37, %v5968_v14  ;;  %v6426_v19 = vadd.f32 %v6170_v37, %v5972_v27 }
 0x43a   : > { %v6430_v59 = vadd.f32 %v6170_v37, %v5976_v9  ;;  %v6434_v17 = vadd.f32 %v6170_v37, %v5980_v5  ;;  %v6438_v48 = vadd.f32 %v6170_v37, %v5984_v63  ;;  %v6442_v14 = vadd.f32 %v6170_v37, %v5988_v8 }
 0x43b   : > { %v6446_v27 = vadd.f32 %v6170_v37, %v5992_v32  ;;  %v6450_v9 = vadd.f32 %v6170_v37, %v5996_v16  ;;  %v6454_v5 = vadd.f32 %v6170_v37, %v6000_v6  ;;  %v6458_v63 = vadd.f32 %v6170_v37, %v6004_v31 }
 0x43c   : > { %v6462_v8 = vadd.f32 %v6170_v37, %v6008_v10  ;;  %v6466_v32 = vadd.f32 %v6170_v37, %v6012_v52  ;;  %v6470_v16 = vadd.f32 %v6170_v37, %v6016_v39  ;;  %v6474_v6 = vadd.f32 %v6170_v37, %v6020_v30 }
 0x43d   : > { %v6478_v31 = vadd.f32 %v6170_v37, %v6024_v35  ;;  %v6482_v10 = vadd.f32 %v6170_v37, %v6028_v58  ;;  %v6486_v52 = vadd.f32 %v6170_v37, %v6032_v24  ;;  %v6490_v39 = vadd.f32 %v6170_v37, %v6036_v29 }
 0x43e   : > { %v6494_v30 = vadd.f32 %v6170_v37, %v6040_v47  ;;  %v6498_v35 = vadd.f32 %v6170_v37, %v6044_v50  ;;  %v6502_v58 = vadd.f32 %v6170_v37, %v6048_v4  ;;  %v6506_v24 = vadd.f32 %v6170_v37, %v6052_v7 }
 0x43f   : > { %v6510_v29 = vadd.f32 %v6170_v37, %v6056_v25  ;;  %v6514_v47 = vadd.f32 %v6170_v37, %v6060_v28  ;;  %v6518_v50 = vadd.f32 %v6170_v37, %v6064_v49  ;;  %v6522_v4 = vadd.f32 %v6170_v37, %v6068_v54 }
 0x440   : > { %v6526_v7 = vadd.f32 %v6170_v37, %v6072_v13  ;;  %v6530_v25 = vadd.f32 %v6170_v37, %v6076_v18  ;;  %v6534_v28 = vadd.f32 %v6170_v37, %v6080_v43 }
 0x441   : > { %7779 = vst [vmem:[#allocation55_spill] sm:$0xff] %v6514_v47  ;;  %7780 = vst [vmem:[#allocation58_spill] sm:$0xff] %v6518_v50  ;;  %v7785_v47 = vld [vmem:[#allocation93_spill] sm:$0xff]  ;;  %v7787_v50 = vld [vmem:[#allocation76_spill] sm:$0xff] }
 0x442   : > { %7781 = vst [vmem:[#allocation59_spill] sm:$0xff] %v6522_v4  ;;  %7782 = vst [vmem:[#allocation62_spill] sm:$0xff] %v6526_v7  ;;  %v6538_v49 = vadd.f32 %v6170_v37, %v7785_v47  ;;  %v6542_v54 = vadd.f32 %v6170_v37, %v7787_v50  ;;  %v7789_v4 = vld [vmem:[#allocation83_spill] sm:$0xff] }
 0x443   : > { %7783 = vst [vmem:[#allocation63_spill] sm:$0xff] %v6530_v25  ;;  %7784 = vst [vmem:[#allocation67_spill] sm:$0xff] %v6534_v28  ;;  %v6546_v13 = vadd.f32 %v6170_v37, %v7789_v4  ;;  %v7791_v7 = vld [vmem:[#allocation87_spill] sm:$0xff]  ;;  %v7793_v25 = vld [vmem:[#allocation88_spill] sm:$0xff] }
 0x444   : > { %7786 = vst [vmem:[#allocation68_spill] sm:$0xff] %v6538_v49  ;;  %7788 = vst [vmem:[#allocation71_spill] sm:$0xff] %v6542_v54  ;;  %v6550_v18 = vadd.f32 %v6170_v37, %v7791_v7  ;;  %v6554_v43 = vadd.f32 %v6170_v37, %v7793_v25  ;;  %v7795_v28 = vld [vmem:[#allocation18_spill] sm:$0xff]  ;;  %v7797_v49 = vld [vmem:[#allocation19_spill] sm:$0xff] }
 0x445   : > { %7790 = vst [vmem:[#allocation72_spill] sm:$0xff] %v6546_v13  ;;  %v6558_v47 = vadd.f32 %v6170_v37, %v7795_v28  ;;  %v6562_v50 = vadd.f32 %v6170_v37, %v7797_v49  ;;  %v7799_v54 = vld [vmem:[#allocation20_spill] sm:$0xff]  ;;  %v7801_v13 = vld [vmem:[#allocation21_spill] sm:$0xff] }
 0x446   : > { %7792 = vst [vmem:[#allocation75_spill] sm:$0xff] %v6550_v18  ;;  %7794 = vst [vmem:[#allocation79_spill] sm:$0xff] %v6554_v43  ;;  %v6566_v4 = vadd.f32 %v6170_v37, %v7799_v54  ;;  %v6570_v7 = vadd.f32 %v6170_v37, %v7801_v13  ;;  %v7803_v18 = vld [vmem:[#allocation22_spill] sm:$0xff]  ;;  %v7805_v43 = vld [vmem:[#allocation23_spill] sm:$0xff] }
 0x447   : > { %7796 = vst [vmem:[#allocation80_spill] sm:$0xff] %v6558_v47  ;;  %7798 = vst [vmem:[#allocation84_spill] sm:$0xff] %v6562_v50  ;;  %v6575_v25 = vadd.f32 %v6170_v37, %v7803_v18  ;;  %v6579_v28 = vadd.f32 %v6170_v37, %v7805_v43  ;;  %v7807_v47 = vld [vmem:[#allocation24_spill] sm:$0xff]  ;;  %v7809_v50 = vld [vmem:[#allocation25_spill] sm:$0xff] }
 0x448   : > { %7800 = vst [vmem:[#allocation16_spill] sm:$0xff] %v6566_v4  ;;  %7802 = vst [vmem:[#allocation66_spill] sm:$0xff] %v6570_v7  ;;  %v6583_v49 = vadd.f32 %v6170_v37, %v7807_v47  ;;  %v6587_v54 = vadd.f32 %v6170_v37, %v7809_v50  ;;  %v7810_v4 = vld [vmem:[#allocation26_spill] sm:$0xff]  ;;  %v7812_v7 = vld [vmem:[#allocation27_spill] sm:$0xff] }
 0x449   : > { %7804 = vst [vmem:[#allocation12_spill] sm:$0xff] %v6575_v25  ;;  %7806 = vst [vmem:[#allocation13_spill] sm:$0xff] %v6579_v28  ;;  %v6591_v13 = vadd.f32 %v6170_v37, %v7810_v4  ;;  %v6595_v18 = vadd.f32 %v6170_v37, %v7812_v7  ;;  %v7813_v25 = vld [vmem:[#allocation28_spill] sm:$0xff]  ;;  %v7814_v28 = vld [vmem:[#allocation29_spill] sm:$0xff]  ;;  %v6611_v4 = vadd.f32 %v6170_v37, %v6156_v26 }
 0x44a   : > { %7808 = vst [vmem:[#allocation14_spill] sm:$0xff] %v6583_v49  ;;  %v6599_v43 = vadd.f32 %v6170_v37, %v7813_v25  ;;  %v6603_v47 = vadd.f32 %v6170_v37, %v7814_v28  ;;  %v7815_v49 = vld [vmem:[#allocation30_spill] sm:$0xff]  ;;  %v6619_v25 = vadd.f32 %v6170_v37, %v6164_v0  ;;  %v6623_v28 = vadd.f32 %v6170_v37, %v6168_v22 }
 0x44b   : > { %7811 = vst [vmem:[#allocation15_spill] sm:$0xff] %v6591_v13  ;;  %v6607_v50 = vadd.f32 %v6170_v37, %v7815_v49  ;;  %7816 = vst [vmem:[#allocation17_spill] sm:$0xff] %v6611_v4  ;;  %v7817_v13 = vld [vmem:[#allocation31_spill] sm:$0xff]  ;;  %v6627_v49 = vadd.f32 %v6170_v37, %v6174_v42  ;;  %v6631_v26 = vadd.f32 %v6170_v37, %v6178_v12  ;;  %v7843_v4 = vld [vmem:[#allocation45_spill] sm:$0xff] }
 0x44c   : > { %v6615_v7 = vadd.f32 %v6170_v37, %v7817_v13  ;;  %7819 = vst [vmem:[#allocation85_spill] sm:$0xff] %v6619_v25  ;;  %7820 = vst [vmem:[#allocation86_spill] sm:$0xff] %v6623_v28  ;;  %v6635_v13 = vadd.f32 %v6170_v37, %v6182_v34  ;;  %v6644_v0 = vadd.f32 %v6170_v37, %v6186_v53  ;;  %v7838_v25 = vld [vmem:[#allocation40_spill] sm:$0xff] }
 0x44d   : > { %7821 = vst [vmem:[#allocation89_spill] sm:$0xff] %v6627_v49  ;;  %7822 = vst [vmem:[#allocation90_spill] sm:$0xff] %v6631_v26  ;;  %v6648_v42 = vadd.f32 %v6170_v37, %v6190_v60  ;;  %v6652_v22 = vadd.f32 %v6170_v37, %v6194_v46  ;;  %v6656_v34 = vadd.f32 %v6170_v37, %v6198_v23  ;;  %v7837_v49 = vld [vmem:[#allocation39_spill] sm:$0xff] }
 0x44e   : > { %7818 = vst [vmem:[#allocation32_spill] sm:$0xff] %v6615_v7  ;;  %7823 = vst [vmem:[#allocation91_spill] sm:$0xff] %v6635_v13  ;;  %v6660_v12 = vadd.f32 %v6170_v37, %v6202_v20  ;;  %v7829_v13 = vld [vmem:[#allocation33_spill] sm:$0xff]  ;;  %v6668_v60 = vadd.f32 %v6170_v37, %v6210_v11  ;;  %v2561_v20 = vmax.f32 %v6226_v1, 0.0  ;;  %v2564_v28 = vmax.f32 %v7837_v49, 0.0  ;;  %v7842_v7 = vld [vmem:[#allocation44_spill] sm:$0xff] }
 0x44f   : > { %7824 = vst [vmem:[#allocation92_spill] sm:$0xff] %v6644_v0  ;;  %7825 = vst [vmem:[#allocation93_spill] sm:$0xff] %v6648_v42  ;;  %v6664_v53 = vadd.f32 %v6170_v37, %v7829_v13  ;;  %v7832_v42 = vld [vmem:[#allocation34_spill] sm:$0xff]  ;;  %v2565_v37 = vmax.f32 %v7838_v25, 0.0  ;;  %v7839_v11 = vld [vmem:[#allocation41_spill] sm:$0xff] }
 0x450   : > { %7826 = vst [vmem:[#allocation76_spill] sm:$0xff] %v6652_v22  ;;  %7827 = vst [vmem:[#allocation83_spill] sm:$0xff] %v6656_v34  ;;  %v2558_v46 = vmax.f32 %v7832_v42, 0.0  ;;  %v7833_v22 = vld [vmem:[#allocation35_spill] sm:$0xff]  ;;  %v7834_v34 = vld [vmem:[#allocation36_spill] sm:$0xff]  ;;  %v2566_v42 = vmax.f32 %v7839_v11, 0.0 }
 0x451   : > { %7828 = vst [vmem:[#allocation87_spill] sm:$0xff] %v6660_v12  ;;  %7830 = vst [vmem:[#allocation88_spill] sm:$0xff] %v6664_v53  ;;  %v2559_v23 = vmax.f32 %v7833_v22, 0.0  ;;  %v2560_v0 = vmax.f32 %v7834_v34, 0.0  ;;  %v7835_v12 = vld [vmem:[#allocation37_spill] sm:$0xff]  ;;  %v7836_v13 = vld [vmem:[#allocation38_spill] sm:$0xff] }
 0x452   : > { %7831 = vst [vmem:[#allocation18_spill] sm:$0xff] %v6668_v60  ;;  %v2562_v26 = vmax.f32 %v7835_v12, 0.0  ;;  %v2563_v53 = vmax.f32 %v7836_v13, 0.0  ;;  %2671 = vst.msk [vmem:[%s6640_s19] sm:$0xff] %vm1351_vm4, %v2558_v46  ;;  %v7840_v22 = vld [vmem:[#allocation42_spill] sm:$0xff]  ;;  %v7841_v60 = vld [vmem:[#allocation43_spill] sm:$0xff] }
 0x453   : > { %v2567_v34 = vmax.f32 %v7840_v22, 0.0  ;;  %v2568_v1 = vmax.f32 %v7841_v60, 0.0  ;;  %v2569_v12 = vmax.f32 %v7842_v7, 0.0  ;;  %v2570_v13 = vmax.f32 %v7843_v4, 0.0  ;;  %2672 = vst.msk [vmem:[%s6640_s19 + $0x8] sm:$0xff] %vm1351_vm4, %v2559_v23  ;;  %2673 = vst.msk [vmem:[%s6640_s19 + $0x10] sm:$0xff] %vm1351_vm4, %v2560_v0 }
 0x454   : > { %2674 = vst.msk [vmem:[%s6640_s19 + $0x18] sm:$0xff] %vm1351_vm4, %v2561_v20  ;;  %2675 = vst.msk [vmem:[%s6640_s19 + $0x20] sm:$0xff] %vm1351_vm4, %v2562_v26  ;;  %v7844_v25 = vld [vmem:[#allocation46_spill] sm:$0xff]  ;;  %v7845_v46 = vld [vmem:[#allocation48_spill] sm:$0xff] }
 0x455   : > { %v2571_v49 = vmax.f32 %v7844_v25, 0.0  ;;  %v2572_v60 = vmax.f32 %v7845_v46, 0.0  ;;  %v7846_v11 = vld [vmem:[#allocation49_spill] sm:$0xff]  ;;  %v7847_v22 = vld [vmem:[#allocation52_spill] sm:$0xff]  ;;  %2676 = vst.msk [vmem:[%s6640_s19 + $0x28] sm:$0xff] %vm1351_vm4, %v2563_v53  ;;  %2677 = vst.msk [vmem:[%s6640_s19 + $0x30] sm:$0xff] %vm1351_vm4, %v2564_v28 }
 0x456   : > { %v2573_v7 = vmax.f32 %v7846_v11, 0.0  ;;  %v2574_v4 = vmax.f32 %v7847_v22, 0.0  ;;  %2678 = vst.msk [vmem:[%s6640_s19 + $0x38] sm:$0xff] %vm1351_vm4, %v2565_v37  ;;  %2679 = vst.msk [vmem:[%s6640_s19 + $0x40] sm:$0xff] %vm1351_vm4, %v2566_v42  ;;  %v7848_v26 = vld [vmem:[#allocation53_spill] sm:$0xff]  ;;  %v7849_v23 = vld [vmem:[#allocation56_spill] sm:$0xff] }
 0x457   : > { %v2575_v0 = vmax.f32 %v7848_v26, 0.0  ;;  %v2576_v20 = vmax.f32 %v7849_v23, 0.0  ;;  %v7850_v25 = vld [vmem:[#allocation57_spill] sm:$0xff]  ;;  %v7851_v11 = vld [vmem:[#allocation60_spill] sm:$0xff]  ;;  %2680 = vst.msk [vmem:[%s6640_s19 + $0x48] sm:$0xff] %vm1351_vm4, %v2567_v34  ;;  %2681 = vst.msk [vmem:[%s6640_s19 + $0x50] sm:$0xff] %vm1351_vm4, %v2568_v1 }
 0x458   : > { %v2577_v46 = vmax.f32 %v7850_v25, 0.0  ;;  %v2578_v22 = vmax.f32 %v7851_v11, 0.0  ;;  %2682 = vst.msk [vmem:[%s6640_s19 + $0x58] sm:$0xff] %vm1351_vm4, %v2569_v12  ;;  %2683 = vst.msk [vmem:[%s6640_s19 + $0x60] sm:$0xff] %vm1351_vm4, %v2570_v13  ;;  %v7852_v28 = vld [vmem:[#allocation61_spill] sm:$0xff]  ;;  %v7853_v37 = vld [vmem:[#allocation64_spill] sm:$0xff] }
 0x459   : > { %v2579_v53 = vmax.f32 %v7852_v28, 0.0  ;;  %v2580_v42 = vmax.f32 %v7853_v37, 0.0  ;;  %v7854_v26 = vld [vmem:[#allocation65_spill] sm:$0xff]  ;;  %2684 = vst.msk [vmem:[%s6640_s19 + $0x68] sm:$0xff] %vm1351_vm4, %v2571_v49  ;;  %2685 = vst.msk [vmem:[%s6640_s19 + $0x70] sm:$0xff] %vm1351_vm4, %v2572_v60  ;;  %v7856_v34 = vld [vmem:[#allocation70_spill] sm:$0xff] }
 0x45a   : > { %v2581_v23 = vmax.f32 %v7854_v26, 0.0  ;;  %v7855_v25 = vld [vmem:[#allocation69_spill] sm:$0xff]  ;;  %2686 = vst.msk [vmem:[%s6640_s19 + $0x78] sm:$0xff] %vm1351_vm4, %v2573_v7  ;;  %2687 = vst.msk [vmem:[%s6640_s19 + $0x80] sm:$0xff] %vm1351_vm4, %v2574_v4  ;;  %v2583_v1 = vmax.f32 %v7856_v34, 0.0  ;;  %v7858_v28 = vld [vmem:[#allocation74_spill] sm:$0xff] }
 0x45b   : > { %v2582_v11 = vmax.f32 %v7855_v25, 0.0  ;;  %v7857_v12 = vld [vmem:[#allocation73_spill] sm:$0xff]  ;;  %v2585_v37 = vmax.f32 %v7858_v28, 0.0  ;;  %2688 = vst.msk [vmem:[%s6640_s19 + $0x88] sm:$0xff] %vm1351_vm4, %v2575_v0  ;;  %2689 = vst.msk [vmem:[%s6640_s19 + $0x90] sm:$0xff] %vm1351_vm4, %v2576_v20  ;;  %v7860_v49 = vld [vmem:[#allocation78_spill] sm:$0xff] }
 0x45c   : > { %v2584_v13 = vmax.f32 %v7857_v12, 0.0  ;;  %v7859_v26 = vld [vmem:[#allocation77_spill] sm:$0xff]  ;;  %2690 = vst.msk [vmem:[%s6640_s19 + $0x98] sm:$0xff] %vm1351_vm4, %v2577_v46  ;;  %2691 = vst.msk [vmem:[%s6640_s19 + $0xa0] sm:$0xff] %vm1351_vm4, %v2578_v22  ;;  %v2587_v60 = vmax.f32 %v7860_v49, 0.0  ;;  %v7862_v34 = vld [vmem:[#allocation82_spill] sm:$0xff] }
 0x45d   : > { %v2586_v25 = vmax.f32 %v7859_v26, 0.0  ;;  %v7861_v7 = vld [vmem:[#allocation81_spill] sm:$0xff]  ;;  %v2589_v12 = vmax.f32 %v7862_v34, 0.0  ;;  %v7863_v28 = vld [vmem:[#allocation47_spill] sm:$0xff]  ;;  %2692 = vst.msk [vmem:[%s6640_s19 + $0xa8] sm:$0xff] %vm1351_vm4, %v2579_v53  ;;  %2693 = vst.msk [vmem:[%s6640_s19 + $0xb0] sm:$0xff] %vm1351_vm4, %v2580_v42 }
 0x45e   : > { %v2588_v4 = vmax.f32 %v7861_v7, 0.0  ;;  %v2590_v26 = vmax.f32 %v7863_v28, 0.0  ;;  %2694 = vst.msk [vmem:[%s6640_s19 + $0xb8] sm:$0xff] %vm1351_vm4, %v2581_v23  ;;  %2695 = vst.msk [vmem:[%s6640_s19 + $0xc0] sm:$0xff] %vm1351_vm4, %v2582_v11  ;;  %v7864_v0 = vld [vmem:[#allocation50_spill] sm:$0xff]  ;;  %v7865_v46 = vld [vmem:[#allocation51_spill] sm:$0xff] }
 0x45f   : > { %v2591_v20 = vmax.f32 %v7864_v0, 0.0  ;;  %v2592_v22 = vmax.f32 %v7865_v46, 0.0  ;;  %v7866_v49 = vld [vmem:[#allocation54_spill] sm:$0xff]  ;;  %v2594_v34 = vmax.f32 %v6358_v15, 0.0  ;;  %2696 = vst.msk [vmem:[%s6640_s19 + $0xc8] sm:$0xff] %vm1351_vm4, %v2583_v1  ;;  %2697 = vst.msk [vmem:[%s6640_s19 + $0xd0] sm:$0xff] %vm1351_vm4, %v2584_v13 }
 0x460   : > { %v2593_v7 = vmax.f32 %v7866_v49, 0.0  ;;  %2698 = vst.msk [vmem:[%s6640_s19 + $0xd8] sm:$0xff] %vm1351_vm4, %v2585_v37  ;;  %2699 = vst.msk [vmem:[%s6640_s19 + $0xe0] sm:$0xff] %vm1351_vm4, %v2586_v25  ;;  %v2595_v53 = vmax.f32 %v6362_v2, 0.0  ;;  %v2596_v42 = vmax.f32 %v6366_v3, 0.0  ;;  %v2597_v23 = vmax.f32 %v6370_v40, 0.0 }
 0x461   : > { %v2598_v15 = vmax.f32 %v6374_v55, 0.0  ;;  %2700 = vst.msk [vmem:[%s6640_s19 + $0xe8] sm:$0xff] %vm1351_vm4, %v2587_v60  ;;  %2701 = vst.msk [vmem:[%s6640_s19 + $0xf0] sm:$0xff] %vm1351_vm4, %v2588_v4  ;;  %v2599_v2 = vmax.f32 %v6378_v38, 0.0  ;;  %v2600_v3 = vmax.f32 %v6382_v45, 0.0  ;;  %v2601_v40 = vmax.f32 %v6386_v33, 0.0 }
 0x462   : > { %2702 = vst.msk [vmem:[%s6640_s19 + $0xf8] sm:$0xff] %vm1351_vm4, %v2589_v12  ;;  %2703 = vst.msk [vmem:[%s6640_s19 + $0x100] sm:$0xff] %vm1351_vm4, %v2590_v26  ;;  %v2602_v55 = vmax.f32 %v6390_v21, 0.0  ;;  %v2603_v38 = vmax.f32 %v6394_v36, 0.0  ;;  %v2604_v45 = vmax.f32 %v6398_v62, 0.0  ;;  %v2605_v33 = vmax.f32 %v6402_v56, 0.0 }
 0x463   : > { %2704 = vst.msk [vmem:[%s6640_s19 + $0x108] sm:$0xff] %vm1351_vm4, %v2591_v20  ;;  %2705 = vst.msk [vmem:[%s6640_s19 + $0x110] sm:$0xff] %vm1351_vm4, %v2592_v22  ;;  %v2606_v21 = vmax.f32 %v6406_v51, 0.0  ;;  %v2607_v36 = vmax.f32 %v6410_v57, 0.0  ;;  %v2608_v62 = vmax.f32 %v6414_v41, 0.0  ;;  %v2609_v56 = vmax.f32 %v6418_v44, 0.0 }
 0x464   : > { %2706 = vst.msk [vmem:[%s6640_s19 + $0x118] sm:$0xff] %vm1351_vm4, %v2593_v7  ;;  %2707 = vst.msk [vmem:[%s6640_s19 + $0x120] sm:$0xff] %vm1351_vm4, %v2594_v34  ;;  %v2610_v51 = vmax.f32 %v6422_v61, 0.0  ;;  %v2611_v57 = vmax.f32 %v6426_v19, 0.0  ;;  %v2612_v41 = vmax.f32 %v6430_v59, 0.0  ;;  %v2613_v44 = vmax.f32 %v6434_v17, 0.0 }
 0x465   : > { %2708 = vst.msk [vmem:[%s6640_s19 + $0x128] sm:$0xff] %vm1351_vm4, %v2595_v53  ;;  %2709 = vst.msk [vmem:[%s6640_s19 + $0x130] sm:$0xff] %vm1351_vm4, %v2596_v42  ;;  %v2614_v61 = vmax.f32 %v6438_v48, 0.0  ;;  %v2615_v19 = vmax.f32 %v6442_v14, 0.0  ;;  %v2616_v59 = vmax.f32 %v6446_v27, 0.0  ;;  %v2617_v17 = vmax.f32 %v6450_v9, 0.0 }
 0x466   : > { %2710 = vst.msk [vmem:[%s6640_s19 + $0x138] sm:$0xff] %vm1351_vm4, %v2597_v23  ;;  %2711 = vst.msk [vmem:[%s6640_s19 + $0x140] sm:$0xff] %vm1351_vm4, %v2598_v15  ;;  %v2618_v48 = vmax.f32 %v6454_v5, 0.0  ;;  %v2619_v14 = vmax.f32 %v6458_v63, 0.0  ;;  %v2620_v27 = vmax.f32 %v6462_v8, 0.0  ;;  %v2621_v9 = vmax.f32 %v6466_v32, 0.0 }
 0x467   : > { %2712 = vst.msk [vmem:[%s6640_s19 + $0x148] sm:$0xff] %vm1351_vm4, %v2599_v2  ;;  %2713 = vst.msk [vmem:[%s6640_s19 + $0x150] sm:$0xff] %vm1351_vm4, %v2600_v3  ;;  %v2622_v5 = vmax.f32 %v6470_v16, 0.0  ;;  %v2623_v63 = vmax.f32 %v6474_v6, 0.0  ;;  %v2624_v8 = vmax.f32 %v6478_v31, 0.0  ;;  %v2625_v32 = vmax.f32 %v6482_v10, 0.0 }
 0x468   : > { %2714 = vst.msk [vmem:[%s6640_s19 + $0x158] sm:$0xff] %vm1351_vm4, %v2601_v40  ;;  %2715 = vst.msk [vmem:[%s6640_s19 + $0x160] sm:$0xff] %vm1351_vm4, %v2602_v55  ;;  %v2626_v16 = vmax.f32 %v6486_v52, 0.0  ;;  %v2627_v6 = vmax.f32 %v6490_v39, 0.0  ;;  %v2628_v31 = vmax.f32 %v6494_v30, 0.0  ;;  %v2629_v10 = vmax.f32 %v6498_v35, 0.0 }
 0x469   : > { %2716 = vst.msk [vmem:[%s6640_s19 + $0x168] sm:$0xff] %vm1351_vm4, %v2603_v38  ;;  %2717 = vst.msk [vmem:[%s6640_s19 + $0x170] sm:$0xff] %vm1351_vm4, %v2604_v45  ;;  %v2630_v52 = vmax.f32 %v6502_v58, 0.0  ;;  %v2631_v39 = vmax.f32 %v6506_v24, 0.0  ;;  %v2632_v30 = vmax.f32 %v6510_v29, 0.0  ;;  %v7867_v11 = vld [vmem:[#allocation55_spill] sm:$0xff] }
 0x46a   : > { %2718 = vst.msk [vmem:[%s6640_s19 + $0x178] sm:$0xff] %vm1351_vm4, %v2605_v33  ;;  %2719 = vst.msk [vmem:[%s6640_s19 + $0x180] sm:$0xff] %vm1351_vm4, %v2606_v21  ;;  %v2633_v35 = vmax.f32 %v7867_v11, 0.0  ;;  %v7868_v1 = vld [vmem:[#allocation58_spill] sm:$0xff]  ;;  %v7869_v13 = vld [vmem:[#allocation59_spill] sm:$0xff] }
 0x46b   : > { %2720 = vst.msk [vmem:[%s6640_s19 + $0x188] sm:$0xff] %vm1351_vm4, %v2607_v36  ;;  %2721 = vst.msk [vmem:[%s6640_s19 + $0x190] sm:$0xff] %vm1351_vm4, %v2608_v62  ;;  %v2634_v58 = vmax.f32 %v7868_v1, 0.0  ;;  %v2635_v24 = vmax.f32 %v7869_v13, 0.0  ;;  %v7870_v37 = vld [vmem:[#allocation62_spill] sm:$0xff]  ;;  %v7871_v25 = vld [vmem:[#allocation63_spill] sm:$0xff] }
 0x46c   : > { %2722 = vst.msk [vmem:[%s6640_s19 + $0x198] sm:$0xff] %vm1351_vm4, %v2609_v56  ;;  %2723 = vst.msk [vmem:[%s6640_s19 + $0x1a0] sm:$0xff] %vm1351_vm4, %v2610_v51  ;;  %v2636_v29 = vmax.f32 %v7870_v37, 0.0  ;;  %v2637_v60 = vmax.f32 %v7871_v25, 0.0  ;;  %v7872_v4 = vld [vmem:[#allocation67_spill] sm:$0xff]  ;;  %v7873_v28 = vld [vmem:[#allocation68_spill] sm:$0xff] }
 0x46d   : > { %2724 = vst.msk [vmem:[%s6640_s19 + $0x1a8] sm:$0xff] %vm1351_vm4, %v2611_v57  ;;  %2725 = vst.msk [vmem:[%s6640_s19 + $0x1b0] sm:$0xff] %vm1351_vm4, %v2612_v41  ;;  %v2638_v12 = vmax.f32 %v7872_v4, 0.0  ;;  %v2639_v26 = vmax.f32 %v7873_v28, 0.0  ;;  %v7874_v0 = vld [vmem:[#allocation71_spill] sm:$0xff]  ;;  %v7875_v46 = vld [vmem:[#allocation72_spill] sm:$0xff] }
 0x46e   : > { %2726 = vst.msk [vmem:[%s6640_s19 + $0x1b8] sm:$0xff] %vm1351_vm4, %v2613_v44  ;;  %2727 = vst.msk [vmem:[%s6640_s19 + $0x1c0] sm:$0xff] %vm1351_vm4, %v2614_v61  ;;  %v2640_v20 = vmax.f32 %v7874_v0, 0.0  ;;  %v2641_v22 = vmax.f32 %v7875_v46, 0.0  ;;  %v7876_v49 = vld [vmem:[#allocation75_spill] sm:$0xff]  ;;  %v7878_v42 = vld [vmem:[#allocation80_spill] sm:$0xff] }
 0x46f   : > { %2728 = vst.msk [vmem:[%s6640_s19 + $0x1c8] sm:$0xff] %vm1351_vm4, %v2615_v19  ;;  %2729 = vst.msk [vmem:[%s6640_s19 + $0x1d0] sm:$0xff] %vm1351_vm4, %v2616_v59  ;;  %v2642_v7 = vmax.f32 %v7876_v49, 0.0  ;;  %v7877_v34 = vld [vmem:[#allocation79_spill] sm:$0xff]  ;;  %v2644_v23 = vmax.f32 %v7878_v42, 0.0  ;;  %v7879_v15 = vld [vmem:[#allocation84_spill] sm:$0xff] }
 0x470   : > { %2730 = vst.msk [vmem:[%s6640_s19 + $0x1d8] sm:$0xff] %vm1351_vm4, %v2617_v17  ;;  %2731 = vst.msk [vmem:[%s6640_s19 + $0x1e0] sm:$0xff] %vm1351_vm4, %v2618_v48  ;;  %v2643_v53 = vmax.f32 %v7877_v34, 0.0  ;;  %v2645_v2 = vmax.f32 %v7879_v15, 0.0  ;;  %v7880_v3 = vld [vmem:[#allocation16_spill] sm:$0xff]  ;;  %v7881_v55 = vld [vmem:[#allocation66_spill] sm:$0xff] }
 0x471   : > { %2732 = vst.msk [vmem:[%s6640_s19 + $0x1e8] sm:$0xff] %vm1351_vm4, %v2619_v14  ;;  %2733 = vst.msk [vmem:[%s6640_s19 + $0x1f0] sm:$0xff] %vm1351_vm4, %v2620_v27  ;;  %v2646_v40 = vmax.f32 %v7880_v3, 0.0  ;;  %v2647_v38 = vmax.f32 %v7881_v55, 0.0  ;;  %v7882_v45 = vld [vmem:[#allocation12_spill] sm:$0xff]  ;;  %v7883_v21 = vld [vmem:[#allocation13_spill] sm:$0xff] }
 0x472   : > { %2734 = vst.msk [vmem:[%s6640_s19 + $0x1f8] sm:$0xff] %vm1351_vm4, %v2621_v9  ;;  %2735 = vst.msk [vmem:[%s6640_s19 + $0x200] sm:$0xff] %vm1351_vm4, %v2622_v5  ;;  %v2648_v33 = vmax.f32 %v7882_v45, 0.0  ;;  %v2649_v36 = vmax.f32 %v7883_v21, 0.0  ;;  %v7884_v62 = vld [vmem:[#allocation14_spill] sm:$0xff]  ;;  %v2651_v51 = vmax.f32 %v6587_v54, 0.0 }
 0x473   : > { %2736 = vst.msk [vmem:[%s6640_s19 + $0x208] sm:$0xff] %vm1351_vm4, %v2623_v63  ;;  %2737 = vst.msk [vmem:[%s6640_s19 + $0x210] sm:$0xff] %vm1351_vm4, %v2624_v8  ;;  %v2650_v56 = vmax.f32 %v7884_v62, 0.0  ;;  %v7885_v57 = vld [vmem:[#allocation15_spill] sm:$0xff]  ;;  %v2653_v44 = vmax.f32 %v6595_v18, 0.0  ;;  %v2654_v61 = vmax.f32 %v6599_v43, 0.0 }
 0x474   : > { %2738 = vst.msk [vmem:[%s6640_s19 + $0x218] sm:$0xff] %vm1351_vm4, %v2625_v32  ;;  %2739 = vst.msk [vmem:[%s6640_s19 + $0x220] sm:$0xff] %vm1351_vm4, %v2626_v16  ;;  %v2652_v41 = vmax.f32 %v7885_v57, 0.0  ;;  %v2655_v54 = vmax.f32 %v6603_v47, 0.0  ;;  %v2656_v19 = vmax.f32 %v6607_v50, 0.0  ;;  %v7886_v59 = vld [vmem:[#allocation17_spill] sm:$0xff] }
 0x475   : > { %2740 = vst.msk [vmem:[%s6640_s19 + $0x228] sm:$0xff] %vm1351_vm4, %v2627_v6  ;;  %2741 = vst.msk [vmem:[%s6640_s19 + $0x230] sm:$0xff] %vm1351_vm4, %v2628_v31  ;;  %v2657_v18 = vmax.f32 %v7886_v59, 0.0  ;;  %v7887_v17 = vld [vmem:[#allocation32_spill] sm:$0xff]  ;;  %v7888_v48 = vld [vmem:[#allocation85_spill] sm:$0xff] }
 0x476   : > { %2742 = vst.msk [vmem:[%s6640_s19 + $0x238] sm:$0xff] %vm1351_vm4, %v2629_v10  ;;  %2743 = vst.msk [vmem:[%s6640_s19 + $0x240] sm:$0xff] %vm1351_vm4, %v2630_v52  ;;  %v2658_v43 = vmax.f32 %v7887_v17, 0.0  ;;  %v2659_v47 = vmax.f32 %v7888_v48, 0.0  ;;  %v7889_v14 = vld [vmem:[#allocation86_spill] sm:$0xff]  ;;  %v7890_v27 = vld [vmem:[#allocation89_spill] sm:$0xff] }
 0x477   : > { %2744 = vst.msk [vmem:[%s6640_s19 + $0x248] sm:$0xff] %vm1351_vm4, %v2631_v39  ;;  %2745 = vst.msk [vmem:[%s6640_s19 + $0x250] sm:$0xff] %vm1351_vm4, %v2632_v30  ;;  %v2660_v50 = vmax.f32 %v7889_v14, 0.0  ;;  %v2661_v9 = vmax.f32 %v7890_v27, 0.0  ;;  %v7891_v5 = vld [vmem:[#allocation90_spill] sm:$0xff]  ;;  %v7892_v8 = vld [vmem:[#allocation91_spill] sm:$0xff] }
 0x478   : > { %2746 = vst.msk [vmem:[%s6640_s19 + $0x258] sm:$0xff] %vm1351_vm4, %v2633_v35  ;;  %2747 = vst.msk [vmem:[%s6640_s19 + $0x260] sm:$0xff] %vm1351_vm4, %v2634_v58  ;;  %v2662_v63 = vmax.f32 %v7891_v5, 0.0  ;;  %v2663_v32 = vmax.f32 %v7892_v8, 0.0  ;;  %v7893_v16 = vld [vmem:[#allocation92_spill] sm:$0xff]  ;;  %v7894_v31 = vld [vmem:[#allocation93_spill] sm:$0xff] }
 0x479   : > { %2748 = vst.msk [vmem:[%s6640_s19 + $0x268] sm:$0xff] %vm1351_vm4, %v2635_v24  ;;  %2749 = vst.msk [vmem:[%s6640_s19 + $0x270] sm:$0xff] %vm1351_vm4, %v2636_v29  ;;  %v2664_v6 = vmax.f32 %v7893_v16, 0.0  ;;  %v2665_v10 = vmax.f32 %v7894_v31, 0.0  ;;  %v7895_v52 = vld [vmem:[#allocation76_spill] sm:$0xff]  ;;  %v7896_v30 = vld [vmem:[#allocation83_spill] sm:$0xff] }
 0x47a   : > { %2750 = vst.msk [vmem:[%s6640_s19 + $0x278] sm:$0xff] %vm1351_vm4, %v2637_v60  ;;  %2751 = vst.msk [vmem:[%s6640_s19 + $0x280] sm:$0xff] %vm1351_vm4, %v2638_v12  ;;  %v2666_v39 = vmax.f32 %v7895_v52, 0.0  ;;  %v2667_v11 = vmax.f32 %v7896_v30, 0.0  ;;  %v7897_v35 = vld [vmem:[#allocation87_spill] sm:$0xff]  ;;  %v7898_v58 = vld [vmem:[#allocation88_spill] sm:$0xff] }
 0x47b   : > { %2752 = vst.msk [vmem:[%s6640_s19 + $0x288] sm:$0xff] %vm1351_vm4, %v2639_v26  ;;  %2753 = vst.msk [vmem:[%s6640_s19 + $0x290] sm:$0xff] %vm1351_vm4, %v2640_v20  ;;  %v2668_v1 = vmax.f32 %v7897_v35, 0.0  ;;  %v2669_v13 = vmax.f32 %v7898_v58, 0.0  ;;  %v7899_v24 = vld [vmem:[#allocation18_spill] sm:$0xff] }
 0x47c   : > { %2754 = vst.msk [vmem:[%s6640_s19 + $0x298] sm:$0xff] %vm1351_vm4, %v2641_v22  ;;  %2755 = vst.msk [vmem:[%s6640_s19 + $0x2a0] sm:$0xff] %vm1351_vm4, %v2642_v7  ;;  %v2670_v37 = vmax.f32 %v7899_v24, 0.0 }
 0x47d   : > { %2756 = vst.msk [vmem:[%s6640_s19 + $0x2a8] sm:$0xff] %vm1351_vm4, %v2643_v53  ;;  %2757 = vst.msk [vmem:[%s6640_s19 + $0x2b0] sm:$0xff] %vm1351_vm4, %v2644_v23 }
 0x47e   : > { %2758 = vst.msk [vmem:[%s6640_s19 + $0x2b8] sm:$0xff] %vm1351_vm4, %v2645_v2  ;;  %2759 = vst.msk [vmem:[%s6640_s19 + $0x2c0] sm:$0xff] %vm1351_vm4, %v2646_v40 }
 0x47f   : > { %2760 = vst.msk [vmem:[%s6640_s19 + $0x2c8] sm:$0xff] %vm1351_vm4, %v2647_v38  ;;  %2761 = vst.msk [vmem:[%s6640_s19 + $0x2d0] sm:$0xff] %vm1351_vm4, %v2648_v33 }
 0x480   : > { %2762 = vst.msk [vmem:[%s6640_s19 + $0x2d8] sm:$0xff] %vm1351_vm4, %v2649_v36  ;;  %2763 = vst.msk [vmem:[%s6640_s19 + $0x2e0] sm:$0xff] %vm1351_vm4, %v2650_v56 }
 0x481   : > { %2764 = vst.msk [vmem:[%s6640_s19 + $0x2e8] sm:$0xff] %vm1351_vm4, %v2651_v51  ;;  %2765 = vst.msk [vmem:[%s6640_s19 + $0x2f0] sm:$0xff] %vm1351_vm4, %v2652_v41 }
 0x482   : > { %2766 = vst.msk [vmem:[%s6640_s19 + $0x2f8] sm:$0xff] %vm1351_vm4, %v2653_v44  ;;  %2767 = vst.msk [vmem:[%s6640_s19 + $0x300] sm:$0xff] %vm1351_vm4, %v2654_v61 }
 0x483   : > { %2768 = vst.msk [vmem:[%s6640_s19 + $0x308] sm:$0xff] %vm1351_vm4, %v2655_v54  ;;  %2769 = vst.msk [vmem:[%s6640_s19 + $0x310] sm:$0xff] %vm1351_vm4, %v2656_v19 }
 0x484   : > { %2770 = vst.msk [vmem:[%s6640_s19 + $0x318] sm:$0xff] %vm1351_vm4, %v2657_v18  ;;  %2771 = vst.msk [vmem:[%s6640_s19 + $0x320] sm:$0xff] %vm1351_vm4, %v2658_v43 }
 0x485   : > { %2772 = vst.msk [vmem:[%s6640_s19 + $0x328] sm:$0xff] %vm1351_vm4, %v2659_v47  ;;  %2773 = vst.msk [vmem:[%s6640_s19 + $0x330] sm:$0xff] %vm1351_vm4, %v2660_v50 }
 0x486   : > { %2774 = vst.msk [vmem:[%s6640_s19 + $0x338] sm:$0xff] %vm1351_vm4, %v2661_v9  ;;  %2775 = vst.msk [vmem:[%s6640_s19 + $0x340] sm:$0xff] %vm1351_vm4, %v2662_v63 }
 0x487   : > { %2776 = vst.msk [vmem:[%s6640_s19 + $0x348] sm:$0xff] %vm1351_vm4, %v2663_v32  ;;  %2777 = vst.msk [vmem:[%s6640_s19 + $0x350] sm:$0xff] %vm1351_vm4, %v2664_v6 }
 0x488   : > { %2778 = vst.msk [vmem:[%s6640_s19 + $0x358] sm:$0xff] %vm1351_vm4, %v2665_v10  ;;  %2779 = vst.msk [vmem:[%s6640_s19 + $0x360] sm:$0xff] %vm1351_vm4, %v2666_v39 }
 0x489   : > { %2780 = vst.msk [vmem:[%s6640_s19 + $0x368] sm:$0xff] %vm1351_vm4, %v2667_v11  ;;  %2781 = vst.msk [vmem:[%s6640_s19 + $0x370] sm:$0xff] %vm1351_vm4, %v2668_v1 }
 0x48a   : > { %2782 = vst.msk [vmem:[%s6640_s19 + $0x378] sm:$0xff] %vm1351_vm4, %v2669_v13 }
 0x48b   : > { %2783 = vst.msk [vmem:[%s6640_s19 + $0x380] sm:$0xf] %vm1575_vm5, %v2670_v37 }
 0x48c PF: > { %s18_s18 = sadd.s32 1, %s3599_s18  }
 0x48d   : > { %p15_p6 = scmp.ge.s32.totalorder %s18_s18, 4  }
 0x48f   :  { %17 = sbr.rel (!%p15_p6) target bundleno = 3 (0x3), region = 87 }
 0x496   :  { %2805 = vsyncpa [#allocation3], 1 }
 0x497   :  { %2807 = vsyncpa [#allocation3 + $0x1], 1 }
 0x498   :  { %2808 = vsyncpa [#allocation5], 1 }
 0x499   :  { %2809 = vsyncpa [#allocation8], 1 }

// kernel: vae_forward.6
= control target key start
LH: loop header
LB: loop body
LE: loop exit
PB: predicated region body
PF: predicated region fallthrough
CT: control target
= control target key end

     0   :  { %s1899_s18 = smov 0   ;;  %s2367_s0 = inlined_call_operand.vmem [shape: bf16[2,196,288], index: 0, kind: input, shape index: {}]   ;;  %s2368_s1 = inlined_call_operand.vmem [shape: bf16[288,64], index: 1, kind: input, shape index: {}]   ;;  %s2369_s2 = inlined_call_operand.vmem [shape: f32[1,64], index: 2, kind: input, shape index: {}]   ;;  %s2370_s3 = inlined_call_operand.vmem [shape: f32[1,64], index: 3, kind: input, shape index: {}]   ;;  %s2371_s4 = inlined_call_operand.vmem [shape: f32[64,64], index: 4, kind: input, shape index: {}]   ;;  %s2372_s5 = inlined_call_operand.vmem [shape: f32[2,196,64], index: 5, kind: output, shape index: {}]  }
   0x1 LB: > { %s1446_s19 = sadd.s32 4294967295, %s1864_s18   ;;  %p1450_p0 = scmp.ge.s32.totalorder %s1864_s18, 1  ;;  %s1864_s18 = sphi %s1899_s18, %s15_s18  }
   0x2   : > { %p187_p1 = scmp.lt.s32.totalorder %s1864_s18, 3 }
   0x4   : > { %p188_p2 = pnand %p1450_p0, %p187_p1 }
   0x5   : > { %v1787_v0 = vld [vmem:[%s2368_s1 + $0x40] sm:$0xff] (!%p188_p2)   ;;  %v1866_v2 = vmov (!%p188_p2), 0.0   ;;  %v1789_v3 = vld [vmem:[%s2368_s1 + $0x48] sm:$0xff] (!%p188_p2)   ;;  %vm1867_vm0 = vmmov (!%p188_p2), 0   ;;  %v1791_v5 = vld [vmem:[%s2368_s1 + $0x50] sm:$0xff] (!%p188_p2)   ;;  %p215_p3 = scmp.lt.s32.totalorder (!%p188_p2), %s1446_s19, 1 }
   0x6   : > { %191 = sbr.rel (%p188_p2) target bundleno = 647 (0x287), region = 40  ;;  %v1788_v1 = vld [vmem:[%s2368_s1] sm:$0xff] (!%p188_p2)   ;;  %1656 = vmatprep.subr.bf16.mxu1 (!%p188_p2), %v1866_v2  ;;  %1529 = vmatprep.subr.bf16.mxu0 (!%p188_p2), %v1787_v0  ;;  %v1790_v4 = vld [vmem:[%s2368_s1 + $0x8] sm:$0xff] (!%p188_p2)   ;;  %v1792_v6 = vld [vmem:[%s2368_s1 + $0x10] sm:$0xff] (!%p188_p2)   ;;  %vm610_vm1 = vcmask (!%p188_p2), 261120   ;;  %v1868_v61 = vmov (!%p188_p2), 0.0|0.0  }
   0x7   : > { %1530 = vmatpush3.bf16.msra.mxu0 (!%p188_p2), %v1788_v1  ;;  %1660 = vmatprep.mubr.msk.bf16.mxu1 (!%p188_p2), %vm1867_vm0, %v1866_v2  ;;  %v1793_v7 = vld [vmem:[%s2368_s1 + $0x58] sm:$0xff] (!%p188_p2)   ;;  %v1795_v9 = vld [vmem:[%s2368_s1 + $0x60] sm:$0xff] (!%p188_p2)   ;;  %v1797_v12 = vld [vmem:[%s2368_s1 + $0x68] sm:$0xff] (!%p188_p2)   ;;  %vm922_vm2 = vcmask (!%p188_p2), 523264   ;;  %vm970_vm3 = vcmask (!%p188_p2), 519168  }
   0x8   : > { %1531 = vmatprep.subr.bf16.mxu0 (!%p188_p2), %v1789_v3  ;;  %v1794_v8 = vld [vmem:[%s2368_s1 + $0x18] sm:$0xff] (!%p188_p2)   ;;  %v1801_v10 = vld [vmem:[%s2368_s1 + $0x80] sm:$0xff] (!%p188_p2)   ;;  %v1798_v13 = vld [vmem:[%s2368_s1 + $0x28] sm:$0xff] (!%p188_p2)  }
   0x9   : > { %v1796_v11 = vld [vmem:[%s2368_s1 + $0x20] sm:$0xff] (!%p188_p2)   ;;  %1657 = vmatpush3.bf16.msra.mxu1 (!%p188_p2), %v1801_v10  ;;  %v1804_v14 = vld [vmem:[%s2368_s1 + $0x88] sm:$0xff] (!%p188_p2)   ;;  %v1799_v15 = vld [vmem:[%s2368_s1 + $0x70] sm:$0xff] (!%p188_p2)  }
   0xa   : > { %1658 = vmatprep.subr.bf16.mxu1 (!%p188_p2), %v1866_v2  ;;  %v1800_v18 = vld [vmem:[%s2368_s1 + $0x30] sm:$0xff] (!%p188_p2)   ;;  %v1802_v19 = vld [vmem:[%s2368_s1 + $0x78] sm:$0xff] (!%p188_p2)   ;;  %v1059_v59 = vld [vmem:[%s2371_s4] sm:$0xff] (!%p188_p2) }
   0xb   : > { %1532 = vmatpush3.bf16.msra.mxu0 (!%p188_p2), %v1790_v4  ;;  %v1803_v20 = vld [vmem:[%s2368_s1 + $0x38] sm:$0xff] (!%p188_p2)   ;;  %v1060_v60 = vld [vmem:[%s2371_s4 + $0x8] sm:$0xff] (!%p188_p2)  ;;  %v1061_v63 = vld [vmem:[%s2371_s4 + $0x10] sm:$0xff] (!%p188_p2) }
   0xc   : > { %1533 = vmatprep.subr.bf16.mxu0 (!%p188_p2), %v1791_v5  ;;  %v2057_v62 = vpack.c.bf16 (!%p188_p2), %v1060_v60, %v1059_v59  ;;  %v1062_v0 = vld [vmem:[%s2371_s4 + $0x18] sm:$0xff] (!%p188_p2)  ;;  %v1063_v3 = vld [vmem:[%s2371_s4 + $0x20] sm:$0xff] (!%p188_p2)  ;;  %v1064_v4 = vld [vmem:[%s2371_s4 + $0x28] sm:$0xff] (!%p188_p2) }
   0xd   : > { %s2374_s19 = smov (!%p215_p3, %s1446_s19), 1  ;;  %1659 = vmatpush3.bf16.msra.mxu1 %v1804_v14  ;;  %v2067_v1 = vpack.c.bf16 %v1062_v0, %v1061_v63  ;;  %v2077_v5 = vpack.c.bf16 %v1064_v4, %v1063_v3 }
   0xe   : > { %s1774_s13 = smul.u32 300, %s2374_s19  ;;  %1750 = vmatprep.subr.bf16.mxu1 %v1868_v61 }
   0xf   : > { %1534 = vmatpush3.bf16.msra.mxu0 %v1792_v6  ;;  %v1065_v6 = vld [vmem:[%s2371_s4 + $0x30] sm:$0xff]  ;;  %s1775_s9 = smul.u32 200, %s2374_s19 }
  0x10   : > { %1535 = vmatprep.subr.bf16.mxu0 %v1793_v7  ;;  %s1952_s24 = scalar_lea.vmem %s2367_s0, %s1774_s13  ;;  %v1066_v7 = vld [vmem:[%s2371_s4 + $0x38] sm:$0xff] }
  0x11   : > { %v1807_v16 = vld [vmem:[%s1952_s24 + $0x4] ss:$12 sps:$4 sm:$0xff]   ;;  %v1808_v17 = vld [vmem:[%s1952_s24 + $0x8] ss:$12 sps:$4 sm:$0xff]   ;;  %v1812_v21 = vld [vmem:[%s1952_s24 + $0x20] ss:$12 sps:$4 sm:$0xff]   ;;  %s2312_s19 = scalar_lea.vmem %s2372_s5, %s1775_s9 }
  0x12   : > { %682 = vmatprep.mubr.bf16.mxu0 %v1807_v16  ;;  %1661 = vmatmul.mubr.msk.bf16.vlgmr.msra.gmra.mrb[0].mxu1 %vm610_vm1, %v1808_v17  ;;  %v1805_v22 = vld [vmem:[%s1952_s24] ss:$12 sps:$4 sm:$0xff]   ;;  %v1809_v23 = vld [vmem:[%s1952_s24 + $0x1c] ss:$12 sps:$4 sm:$0xff]   ;;  %v1816_v24 = vld [vmem:[%s1952_s24 + $0x38] ss:$12 sps:$4 sm:$0xff]  }
  0x13   : > { %1536 = vmatpush3.bf16.msra.mxu0 %v1794_v8  ;;  %1664 = vmatprep.mubr.msk.bf16.mxu1 %vm1867_vm0, %v1866_v2  ;;  %v1811_v25 = vld [vmem:[%s1952_s24 + $0x18] ss:$12 sps:$4 sm:$0xff]   ;;  %v1813_v26 = vld [vmem:[%s1952_s24 + $0x34] ss:$12 sps:$4 sm:$0xff]   ;;  %v1820_v27 = vld [vmem:[%s1952_s24 + $0x50] ss:$12 sps:$4 sm:$0xff]   ;;  %v2087_v8 = vpack.c.bf16 %v1066_v7, %v1065_v6 }
  0x14   : > { %1537 = vmatprep.subr.bf16.mxu0 %v1795_v9  ;;  %v1815_v28 = vld [vmem:[%s1952_s24 + $0x30] ss:$12 sps:$4 sm:$0xff]   ;;  %v1817_v29 = vld [vmem:[%s1952_s24 + $0x4c] ss:$12 sps:$4 sm:$0xff]   ;;  %v1824_v30 = vld [vmem:[%s1952_s24 + $0x68] ss:$12 sps:$4 sm:$0xff]   ;;  %1752 = vmatpush3.bf16.msra.mxu1 %v2057_v62 }
  0x15   : > { %v1819_v31 = vld [vmem:[%s1952_s24 + $0x48] ss:$12 sps:$4 sm:$0xff]   ;;  %v1821_v32 = vld [vmem:[%s1952_s24 + $0x64] ss:$12 sps:$4 sm:$0xff]   ;;  %v1828_v33 = vld [vmem:[%s1952_s24 + $0x80] ss:$12 sps:$4 sm:$0xff]   ;;  %1753 = vmatprep.subr.bf16.mxu1 %v1868_v61 }
  0x16   : > { %v1823_v34 = vld [vmem:[%s1952_s24 + $0x60] ss:$12 sps:$4 sm:$0xff]   ;;  %v1825_v35 = vld [vmem:[%s1952_s24 + $0x7c] ss:$12 sps:$4 sm:$0xff]   ;;  %v1832_v36 = vld [vmem:[%s1952_s24 + $0x98] ss:$12 sps:$4 sm:$0xff]  }
  0x17   : > { %1538 = vmatpush3.bf16.msra.mxu0 %v1796_v11  ;;  %v1827_v37 = vld [vmem:[%s1952_s24 + $0x78] ss:$12 sps:$4 sm:$0xff]   ;;  %v1829_v38 = vld [vmem:[%s1952_s24 + $0x94] ss:$12 sps:$4 sm:$0xff]   ;;  %v1836_v39 = vld [vmem:[%s1952_s24 + $0xb0] ss:$12 sps:$4 sm:$0xff]  }
  0x18   : > { %1539 = vmatprep.subr.bf16.mxu0 %v1797_v12  ;;  %v1831_v40 = vld [vmem:[%s1952_s24 + $0x90] ss:$12 sps:$4 sm:$0xff]   ;;  %v1833_v41 = vld [vmem:[%s1952_s24 + $0xac] ss:$12 sps:$4 sm:$0xff]   ;;  %v1840_v42 = vld [vmem:[%s1952_s24 + $0xc8] ss:$12 sps:$4 sm:$0xff]   ;;  %1755 = vmatpush3.bf16.msra.mxu1 %v2067_v1 }
  0x19   : > { %v1835_v43 = vld [vmem:[%s1952_s24 + $0xa8] ss:$12 sps:$4 sm:$0xff]   ;;  %v1837_v44 = vld [vmem:[%s1952_s24 + $0xc4] ss:$12 sps:$4 sm:$0xff]   ;;  %v1844_v45 = vld [vmem:[%s1952_s24 + $0xe0] ss:$12 sps:$4 sm:$0xff]   ;;  %1756 = vmatprep.subr.bf16.mxu1 %v1868_v61 }
  0x1a   : > { %1665 = vmatmul.mubr.msk.bf16.gmra.mrb[4].mxu1 %vm610_vm1, %v1812_v21  ;;  %v1839_v46 = vld [vmem:[%s1952_s24 + $0xc0] ss:$12 sps:$4 sm:$0xff]   ;;  %v1841_v47 = vld [vmem:[%s1952_s24 + $0xdc] ss:$12 sps:$4 sm:$0xff]   ;;  %v1848_v48 = vld [vmem:[%s1952_s24 + $0xf8] ss:$12 sps:$4 sm:$0xff]  }
  0x1b   : > { %1540 = vmatpush3.bf16.msra.mxu0 %v1798_v13  ;;  %1668 = vmatprep.mubr.msk.bf16.mxu1 %vm1867_vm0, %v1866_v2  ;;  %v1843_v49 = vld [vmem:[%s1952_s24 + $0xd8] ss:$12 sps:$4 sm:$0xff]   ;;  %v1845_v50 = vld [vmem:[%s1952_s24 + $0xf4] ss:$12 sps:$4 sm:$0xff]   ;;  %v1852_v51 = vld [vmem:[%s1952_s24 + $0x110] ss:$12 sps:$4 sm:$0xff]  }
  0x1c   : > { %1541 = vmatprep.subr.bf16.mxu0 %v1799_v15  ;;  %v1847_v52 = vld [vmem:[%s1952_s24 + $0xf0] ss:$12 sps:$4 sm:$0xff]   ;;  %v1849_v53 = vld [vmem:[%s1952_s24 + $0x10c] ss:$12 sps:$4 sm:$0xff]   ;;  %v274_v55 = vld [vmem:[%s1952_s24 + $0x120] sm:$0x33]  ;;  %1758 = vmatpush3.bf16.msra.mxu1 %v2077_v5 }
  0x1d   : > { %v1855_v54 = vld [vmem:[%s1952_s24 + $0x128] ss:$0 sps:$4 sm:$0x33]   ;;  %v1490_v57 = vcombine.high %v274_v55, %v274_v55  ;;  %v1489_v58 = vcombine.low %v274_v55, %v274_v55  ;;  %1759 = vmatprep.subr.bf16.mxu1 %v1868_v61 }
  0x1e   : > { %v1851_v56 = vld [vmem:[%s1952_s24 + $0x108] ss:$12 sps:$4 sm:$0xff]  }
  0x1f   : > { %1542 = vmatpush3.bf16.msra.mxu0 %v1800_v18 }
  0x20   : > { %1543 = vmatprep.subr.bf16.mxu0 %v1802_v19  ;;  %1761 = vmatpush3.bf16.msra.mxu1 %v2087_v8 }
  0x21   : > { %1762 = vmatprep.subr.bf16.mxu1 %v1868_v61 }
  0x22   : > { %1669 = vmatmul.mubr.msk.bf16.gmra.mrb[8].mxu1 %vm610_vm1, %v1816_v24 }
  0x23   : > { %1544 = vmatpush3.bf16.msra.mxu0 %v1803_v20  ;;  %1672 = vmatprep.mubr.msk.bf16.mxu1 %vm1867_vm0, %v1866_v2 }
  0x26   : > { %683 = vmatmul.mubr.bf16.vlgmr.msra.gmra.mrb[0].mxu0 %v1805_v22 }
  0x27   : > { %690 = vmatprep.mubr.bf16.mxu0 %v1809_v23 }
  0x2a   : > { %1673 = vmatmul.mubr.msk.bf16.gmra.mrb[12].mxu1 %vm610_vm1, %v1820_v27 }
  0x2b   : > { %1676 = vmatprep.mubr.msk.bf16.mxu1 %vm1867_vm0, %v1866_v2 }
  0x2e   : > { %691 = vmatmul.mubr.bf16.gmra.mrb[4].mxu0 %v1811_v25 }
  0x2f   : > { %698 = vmatprep.mubr.bf16.mxu0 %v1813_v26 }
  0x32   : > { %1677 = vmatmul.mubr.msk.bf16.gmra.mrb[16].mxu1 %vm610_vm1, %v1824_v30 }
  0x33   : > { %1680 = vmatprep.mubr.msk.bf16.mxu1 %vm1867_vm0, %v1866_v2 }
  0x36   : > { %699 = vmatmul.mubr.bf16.gmra.mrb[8].mxu0 %v1815_v28 }
  0x37   : > { %706 = vmatprep.mubr.bf16.mxu0 %v1817_v29 }
  0x3a   : > { %1681 = vmatmul.mubr.msk.bf16.gmra.mrb[20].mxu1 %vm610_vm1, %v1828_v33 }
  0x3b   : > { %1684 = vmatprep.mubr.msk.bf16.mxu1 %vm1867_vm0, %v1866_v2 }
  0x3e   : > { %707 = vmatmul.mubr.bf16.gmra.mrb[12].mxu0 %v1819_v31 }
  0x3f   : > { %714 = vmatprep.mubr.bf16.mxu0 %v1821_v32 }
  0x42   : > { %1685 = vmatmul.mubr.msk.bf16.gmra.mrb[24].mxu1 %vm610_vm1, %v1832_v36 }
  0x43   : > { %1688 = vmatprep.mubr.msk.bf16.mxu1 %vm1867_vm0, %v1866_v2 }
  0x46   : > { %715 = vmatmul.mubr.bf16.gmra.mrb[16].mxu0 %v1823_v34 }
  0x47   : > { %722 = vmatprep.mubr.bf16.mxu0 %v1825_v35 }
  0x4a   : > { %1689 = vmatmul.mubr.msk.bf16.gmra.mrb[28].mxu1 %vm610_vm1, %v1836_v39 }
  0x4b   : > { %1692 = vmatprep.mubr.msk.bf16.mxu1 %vm1867_vm0, %v1866_v2 }
  0x4e   : > { %723 = vmatmul.mubr.bf16.gmra.mrb[20].mxu0 %v1827_v37 }
  0x4f   : > { %730 = vmatprep.mubr.bf16.mxu0 %v1829_v38 }
  0x52   : > { %1693 = vmatmul.mubr.msk.bf16.gmra.mrb[32].mxu1 %vm610_vm1, %v1840_v42 }
  0x53   : > { %1696 = vmatprep.mubr.msk.bf16.mxu1 %vm1867_vm0, %v1866_v2 }
  0x56   : > { %731 = vmatmul.mubr.bf16.gmra.mrb[24].mxu0 %v1831_v40 }
  0x57   : > { %738 = vmatprep.mubr.bf16.mxu0 %v1833_v41 }
  0x5a   : > { %1697 = vmatmul.mubr.msk.bf16.gmra.mrb[36].mxu1 %vm610_vm1, %v1844_v45 }
  0x5b   : > { %1700 = vmatprep.mubr.msk.bf16.mxu1 %vm1867_vm0, %v1866_v2 }
  0x5e   : > { %739 = vmatmul.mubr.bf16.gmra.mrb[28].mxu0 %v1835_v43 }
  0x5f   : > { %746 = vmatprep.mubr.bf16.mxu0 %v1837_v44 }
  0x62   : > { %1701 = vmatmul.mubr.msk.bf16.gmra.mrb[40].mxu1 %vm610_vm1, %v1848_v48 }
  0x63   : > { %1704 = vmatprep.mubr.msk.bf16.mxu1 %vm1867_vm0, %v1866_v2 }
  0x66   : > { %747 = vmatmul.mubr.bf16.gmra.mrb[32].mxu0 %v1839_v46 }
  0x67   : > { %754 = vmatprep.mubr.bf16.mxu0 %v1841_v47 }
  0x6a   : > { %1705 = vmatmul.mubr.msk.bf16.gmra.mrb[44].mxu1 %vm610_vm1, %v1852_v51 }
  0x6b   : > { %1708 = vmatprep.mubr.msk.bf16.mxu1 %vm1867_vm0, %v1866_v2 }
  0x6e   : > { %755 = vmatmul.mubr.bf16.gmra.mrb[36].mxu0 %v1843_v49 }
  0x6f   : > { %762 = vmatprep.mubr.bf16.mxu0 %v1845_v50 }
  0x72   : > { %1709 = vmatmul.mubr.msk.bf16.gmra.mrb[48].mxu1 %vm610_vm1, %v1855_v54 }
  0x73   : > { %1728 = vmatprep.mubr.msk.f32.mxu1 %vm1867_vm0, %v1866_v2 }
  0x76   : > { %763 = vmatmul.mubr.bf16.gmra.mrb[40].mxu0 %v1847_v52 }
  0x77   : > { %770 = vmatprep.mubr.bf16.mxu0 %v1849_v53 }
  0x7e   : > { %771 = vmatmul.mubr.bf16.gmra.mrb[44].mxu0 %v1851_v56 }
  0x7f   : > { %778 = vmatprep.mubr.bf16.mxu0 %v1490_v57 }
  0x86   : > { %779 = vmatmul.mubr.bf16.gmra.mrb[48].mxu0 %v1489_v58 }
  0xe5   : > { %v820_v9 = vpop.f32.mrb[0].mxu1 }
  0xe6   : > { %v1662_v10 = vpop.f32.mrb[1].mxu1 }
  0xe7   : > { %v823_v11 = vpop.f32.mrb[2].mxu1 }
  0xe8   : > { %v1663_v12 = vpop.f32.mrb[3].mxu1 }
  0xed   : > { %v828_v13 = vpop.f32.mrb[4].mxu1 }
  0xee   : > { %v1666_v14 = vpop.f32.mrb[5].mxu1 }
  0xef   : > { %v831_v15 = vpop.f32.mrb[6].mxu1 }
  0xf0   : > { %v1667_v17 = vpop.f32.mrb[7].mxu1 }
  0xf5   : > { %v836_v24 = vpop.f32.mrb[8].mxu1 }
  0xf6   : > { %v1670_v26 = vpop.f32.mrb[9].mxu1 }
  0xf7   : > { %v839_v27 = vpop.f32.mrb[10].mxu1 }
  0xf8   : > { %v1671_v29 = vpop.f32.mrb[11].mxu1 }
  0xf9   : > { %v1545_v16 = vpop.f32.mrb[0].mxu0 }
  0xfa   : > { %v1546_v18 = vpop.f32.mrb[1].mxu0 }
  0xfb   : > { %v1547_v19 = vadd.f32 %v1546_v18, %v1545_v16  ;;  %v1548_v20 = vpop.f32.mrb[2].mxu0 }
  0xfc   : > { %v1549_v21 = vpop.f32.mrb[3].mxu0 }
  0xfd   : > { %v2091_v22 = vadd.f32 %v1547_v19, %v820_v9  ;;  %v1550_v23 = vadd.f32 %v1549_v21, %v1548_v20  ;;  %v844_v36 = vpop.f32.mrb[12].mxu1 }
  0xfe   : > { %v1674_v38 = vpop.f32.mrb[13].mxu1 }
  0xff   : > { %v2093_v25 = vadd.f32 %v1550_v23, %v823_v11  ;;  %v847_v39 = vpop.f32.mrb[14].mxu1  ;;  %v979_v10 = vmul.f32 %v2091_v22, %v2091_v22  ;;  %v923_v12 = vsel %vm922_vm2, %v2091_v22, 0.0 }
 0x100   : > { %v1675_v41 = vpop.f32.mrb[15].mxu1 }
 0x101   : > { %v1551_v28 = vpop.f32.mrb[4].mxu0  ;;  %v924_v4 = vsel %vm922_vm2, %v2093_v25, 0.0  ;;  %v980_v6 = vmul.f32 %v2093_v25, %v2093_v25  ;;  %v1004_v23 = vsel %vm922_vm2, %v979_v10, 0.0 }
 0x102   : > { %v1552_v30 = vpop.f32.mrb[5].mxu0  ;;  %v925_v17 = vadd.f32 %v924_v4, %v923_v12 }
 0x103   : > { %v1553_v31 = vadd.f32 %v1552_v30, %v1551_v28  ;;  %v1554_v32 = vpop.f32.mrb[6].mxu0  ;;  %v1005_v19 = vsel %vm922_vm2, %v980_v6, 0.0 }
 0x104   : > { %v1555_v33 = vpop.f32.mrb[7].mxu0 }
 0x105   : > { %v2095_v34 = vadd.f32 %v1553_v31, %v828_v13  ;;  %v1556_v35 = vadd.f32 %v1555_v33, %v1554_v32  ;;  %v852_v48 = vpop.f32.mrb[16].mxu1  ;;  %v1006_v32 = vadd.f32 %v1005_v19, %v1004_v23 }
 0x106   : > { %v1678_v50 = vpop.f32.mrb[17].mxu1 }
 0x107   : > { %v2097_v37 = vadd.f32 %v1556_v35, %v831_v15  ;;  %v855_v51 = vpop.f32.mrb[18].mxu1  ;;  %v926_v13 = vsel %vm922_vm2, %v2095_v34, 0.0  ;;  %v981_v14 = vmul.f32 %v2095_v34, %v2095_v34 }
 0x108   : > { %v1679_v53 = vpop.f32.mrb[19].mxu1 }
 0x109   : > { %v1557_v40 = vpop.f32.mrb[8].mxu0  ;;  %v928_v28 = vsel %vm922_vm2, %v2097_v37, 0.0  ;;  %v982_v29 = vmul.f32 %v2097_v37, %v2097_v37 }
 0x10a   : > { %v1558_v42 = vpop.f32.mrb[9].mxu0 }
 0x10b   : > { %v1559_v43 = vadd.f32 %v1558_v42, %v1557_v40  ;;  %v1560_v44 = vpop.f32.mrb[10].mxu0 }
 0x10c   : > { %v1561_v45 = vpop.f32.mrb[11].mxu0 }
 0x10d   : > { %v2099_v46 = vadd.f32 %v1559_v43, %v836_v24  ;;  %v1562_v47 = vadd.f32 %v1561_v45, %v1560_v44  ;;  %v860_v60 = vpop.f32.mrb[20].mxu1  ;;  %v927_v24 = vadd.f32 %v926_v13, %v925_v17  ;;  %v1009_v43 = vsel %vm922_vm2, %v982_v29, 0.0 }
 0x10e   : > { %v1682_v0 = vpop.f32.mrb[21].mxu1 }
 0x10f   : > { %v2101_v49 = vadd.f32 %v1562_v47, %v839_v27  ;;  %v863_v3 = vpop.f32.mrb[22].mxu1  ;;  %v1007_v27 = vsel %vm922_vm2, %v981_v14, 0.0  ;;  %v983_v33 = vmul.f32 %v2099_v46, %v2099_v46  ;;  %v929_v41 = vadd.f32 %v928_v28, %v927_v24 }
 0x110   : > { %v1683_v9 = vpop.f32.mrb[23].mxu1  ;;  %v1008_v40 = vadd.f32 %v1007_v27, %v1006_v32 }
 0x111   : > { %v1563_v52 = vpop.f32.mrb[12].mxu0 }
 0x112   : > { %v1564_v54 = vpop.f32.mrb[13].mxu0 }
 0x113   : > { %v1565_v55 = vadd.f32 %v1564_v54, %v1563_v52  ;;  %v1566_v56 = vpop.f32.mrb[14].mxu0  ;;  %v984_v52 = vmul.f32 %v2101_v49, %v2101_v49 }
 0x114   : > { %v1567_v57 = vpop.f32.mrb[15].mxu0 }
 0x115   : > { %v2103_v58 = vadd.f32 %v1565_v55, %v844_v36  ;;  %v1568_v59 = vadd.f32 %v1567_v57, %v1566_v56  ;;  %v868_v26 = vpop.f32.mrb[24].mxu1  ;;  %v930_v36 = vsel %vm922_vm2, %v2099_v46, 0.0  ;;  %v1010_v55 = vadd.f32 %v1009_v43, %v1008_v40 }
 0x116   : > { %v1686_v31 = vpop.f32.mrb[25].mxu1  ;;  %v931_v47 = vadd.f32 %v930_v36, %v929_v41  ;;  %v1013_v10 = vsel %vm922_vm2, %v984_v52, 0.0 }
 0x117   : > { %v2105_v63 = vadd.f32 %v1568_v59, %v847_v39  ;;  %v871_v35 = vpop.f32.mrb[26].mxu1  ;;  %v934_v57 = vsel %vm922_vm2, %v2103_v58, 0.0  ;;  %v985_v59 = vmul.f32 %v2103_v58, %v2103_v58 }
 0x118   : > { %v1687_v39 = vpop.f32.mrb[27].mxu1 }
 0x119   : > { %v1569_v7 = vpop.f32.mrb[16].mxu0  ;;  %v1015_v14 = vsel %vm922_vm2, %v985_v59, 0.0 }
 0x11a   : > { %v1570_v11 = vpop.f32.mrb[17].mxu0 }
 0x11b   : > { %v1571_v15 = vadd.f32 %v1570_v11, %v1569_v7  ;;  %v1572_v16 = vpop.f32.mrb[18].mxu0 }
 0x11c   : > { %v1573_v18 = vpop.f32.mrb[19].mxu0 }
 0x11d   : > { %v2120_v20 = vadd.f32 %v1571_v15, %v852_v48  ;;  %v1574_v21 = vadd.f32 %v1573_v18, %v1572_v16  ;;  %v1011_v48 = vsel %vm922_vm2, %v983_v33, 0.0  ;;  %v876_v56 = vpop.f32.mrb[28].mxu1  ;;  %v936_v15 = vsel %vm922_vm2, %v2105_v63, 0.0 }
 0x11e   : > { %v1690_v4 = vpop.f32.mrb[29].mxu1  ;;  %v1012_v6 = vadd.f32 %v1011_v48, %v1010_v55  ;;  %v986_v16 = vmul.f32 %v2105_v63, %v2105_v63 }
 0x11f   : > { %v2128_v30 = vadd.f32 %v1574_v21, %v855_v51  ;;  %v932_v51 = vsel %vm922_vm2, %v2101_v49, 0.0  ;;  %v879_v9 = vpop.f32.mrb[30].mxu1  ;;  %v938_v21 = vsel %vm922_vm2, %v2120_v20, 0.0  ;;  %v987_v23 = vmul.f32 %v2120_v20, %v2120_v20 }
 0x120   : > { %v933_v7 = vadd.f32 %v932_v51, %v931_v47  ;;  %v1014_v18 = vadd.f32 %v1013_v10, %v1012_v6  ;;  %v1017_v32 = vsel %vm922_vm2, %v986_v16, 0.0 }
 0x121   : > { %v1575_v38 = vpop.f32.mrb[20].mxu0  ;;  %v1019_v40 = vsel %vm922_vm2, %v987_v23, 0.0  ;;  %v940_v41 = vsel %vm922_vm2, %v2128_v30, 0.0 }
 0x122   : > { %v1576_v42 = vpop.f32.mrb[21].mxu0  ;;  %v935_v12 = vadd.f32 %v934_v57, %v933_v7  ;;  %v1016_v28 = vadd.f32 %v1015_v14, %v1014_v18 }
 0x123   : > { %v1577_v44 = vadd.f32 %v1576_v42, %v1575_v38  ;;  %v1578_v45 = vpop.f32.mrb[22].mxu0 }
 0x124   : > { %v1579_v50 = vpop.f32.mrb[23].mxu0  ;;  %v937_v29 = vadd.f32 %v936_v15, %v935_v12 }
 0x125   : > { %v2140_v53 = vadd.f32 %v1577_v44, %v860_v60  ;;  %v1580_v54 = vadd.f32 %v1579_v50, %v1578_v45  ;;  %v1691_v60 = vpop.f32.mrb[31].mxu1  ;;  %v1018_v44 = vadd.f32 %v1017_v32, %v1016_v28 }
 0x126   : > { %v884_v31 = vpop.f32.mrb[32].mxu1  ;;  %v939_v38 = vadd.f32 %v938_v21, %v937_v29 }
 0x127   : > { %v2146_v0 = vadd.f32 %v1580_v54, %v863_v3  ;;  %v1694_v36 = vpop.f32.mrb[33].mxu1  ;;  %v942_v47 = vsel %vm922_vm2, %v2140_v53, 0.0  ;;  %v1020_v51 = vadd.f32 %v1019_v40, %v1018_v44 }
 0x128   : > { %v887_v39 = vpop.f32.mrb[34].mxu1  ;;  %v941_v52 = vadd.f32 %v940_v41, %v939_v38 }
 0x129   : > { %v1581_v11 = vpop.f32.mrb[24].mxu0  ;;  %v1695_v43 = vpop.f32.mrb[35].mxu1  ;;  %v944_v10 = vsel %vm922_vm2, %v2146_v0, 0.0 }
 0x12a   : > { %v1582_v13 = vpop.f32.mrb[25].mxu0  ;;  %v943_v4 = vadd.f32 %v942_v47, %v941_v52 }
 0x12b   : > { %v1583_v3 = vadd.f32 %v1582_v13, %v1581_v11  ;;  %v1584_v17 = vpop.f32.mrb[26].mxu0  ;;  %v990_v11 = vmul.f32 %v2146_v0, %v2146_v0 }
 0x12c   : > { %v1585_v19 = vpop.f32.mrb[27].mxu0  ;;  %v945_v18 = vadd.f32 %v944_v10, %v943_v4 }
 0x12d   : > { %v2158_v24 = vadd.f32 %v1583_v3, %v868_v26  ;;  %v1586_v27 = vadd.f32 %v1585_v19, %v1584_v17  ;;  %v988_v26 = vmul.f32 %v2128_v30, %v2128_v30  ;;  %v892_v6 = vpop.f32.mrb[36].mxu1  ;;  %v1025_v21 = vsel %vm922_vm2, %v990_v11, 0.0 }
 0x12e   : > { %v1698_v12 = vpop.f32.mrb[37].mxu1 }
 0x12f   : > { %v2161_v33 = vadd.f32 %v1586_v27, %v871_v35  ;;  %v989_v35 = vmul.f32 %v2140_v53, %v2140_v53  ;;  %v1021_v55 = vsel %vm922_vm2, %v988_v26, 0.0  ;;  %v991_v14 = vmul.f32 %v2158_v24, %v2158_v24 }
 0x130   : > { %v1022_v13 = vadd.f32 %v1021_v55, %v1020_v51  ;;  %v946_v15 = vsel %vm922_vm2, %v2158_v24, 0.0 }
 0x131   : > { %v1587_v42 = vpop.f32.mrb[28].mxu0  ;;  %v1023_v7 = vsel %vm922_vm2, %v989_v35, 0.0  ;;  %v1027_v28 = vsel %vm922_vm2, %v991_v14, 0.0  ;;  %v948_v32 = vsel %vm922_vm2, %v2161_v33, 0.0  ;;  %v992_v36 = vmul.f32 %v2161_v33, %v2161_v33 }
 0x132   : > { %v1588_v45 = vpop.f32.mrb[29].mxu0  ;;  %v1024_v17 = vadd.f32 %v1023_v7, %v1022_v13 }
 0x133   : > { %v1589_v48 = vadd.f32 %v1588_v45, %v1587_v42  ;;  %v1590_v50 = vpop.f32.mrb[30].mxu0 }
 0x134   : > { %v1591_v54 = vpop.f32.mrb[31].mxu0  ;;  %v1026_v41 = vadd.f32 %v1025_v21, %v1024_v17 }
 0x135   : > { %v2173_v57 = vadd.f32 %v1589_v48, %v876_v56  ;;  %v1592_v59 = vadd.f32 %v1591_v54, %v1590_v50  ;;  %v895_v56 = vpop.f32.mrb[38].mxu1  ;;  %v1029_v50 = vsel %vm922_vm2, %v992_v36, 0.0 }
 0x136   : > { %v1699_v3 = vpop.f32.mrb[39].mxu1  ;;  %v1028_v47 = vadd.f32 %v1027_v28, %v1026_v41 }
 0x137   : > { %v2180_v60 = vadd.f32 %v1592_v59, %v879_v9  ;;  %v947_v9 = vadd.f32 %v946_v15, %v945_v18  ;;  %v900_v26 = vpop.f32.mrb[40].mxu1  ;;  %v950_v42 = vsel %vm922_vm2, %v2173_v57, 0.0  ;;  %v993_v43 = vmul.f32 %v2173_v57, %v2173_v57 }
 0x138   : > { %v1702_v45 = vpop.f32.mrb[41].mxu1  ;;  %v1030_v10 = vadd.f32 %v1029_v50, %v1028_v47 }
 0x139   : > { %v1593_v16 = vpop.f32.mrb[32].mxu0  ;;  %v949_v35 = vadd.f32 %v948_v32, %v947_v9  ;;  %v903_v48 = vpop.f32.mrb[42].mxu1  ;;  %v1031_v55 = vsel %vm922_vm2, %v993_v43, 0.0  ;;  %v952_v59 = vsel %vm922_vm2, %v2180_v60, 0.0  ;;  %v994_v4 = vmul.f32 %v2180_v60, %v2180_v60 }
 0x13a   : > { %v1594_v19 = vpop.f32.mrb[33].mxu0 }
 0x13b   : > { %v1595_v23 = vadd.f32 %v1594_v19, %v1593_v16  ;;  %v1596_v27 = vpop.f32.mrb[34].mxu0  ;;  %v951_v52 = vadd.f32 %v950_v42, %v949_v35  ;;  %v1032_v16 = vadd.f32 %v1031_v55, %v1030_v10  ;;  %v1033_v18 = vsel %vm922_vm2, %v994_v4, 0.0 }
 0x13c   : > { %v1597_v29 = vpop.f32.mrb[35].mxu0 }
 0x13d   : > { %v2192_v38 = vadd.f32 %v1595_v23, %v884_v31  ;;  %v1598_v40 = vadd.f32 %v1597_v29, %v1596_v27  ;;  %v1703_v31 = vpop.f32.mrb[43].mxu1  ;;  %v953_v3 = vadd.f32 %v952_v59, %v951_v52  ;;  %v1034_v36 = vadd.f32 %v1033_v18, %v1032_v16 }
 0x13e   : > { %v908_v17 = vpop.f32.mrb[44].mxu1 }
 0x13f   : > { %v2198_v44 = vadd.f32 %v1598_v40, %v887_v39  ;;  %v954_v12 = vsel %vm922_vm2, %v2192_v38, 0.0  ;;  %v995_v13 = vmul.f32 %v2192_v38, %v2192_v38  ;;  %v1706_v21 = vpop.f32.mrb[45].mxu1 }
 0x140   : > { %v955_v23 = vadd.f32 %v954_v12, %v953_v3  ;;  %v911_v27 = vpop.f32.mrb[46].mxu1 }
 0x141   : > { %v1599_v51 = vpop.f32.mrb[36].mxu0  ;;  %v1035_v9 = vsel %vm922_vm2, %v995_v13, 0.0  ;;  %v956_v28 = vsel %vm922_vm2, %v2198_v44, 0.0  ;;  %v1707_v32 = vpop.f32.mrb[47].mxu1 }
 0x142   : > { %v1600_v54 = vpop.f32.mrb[37].mxu0  ;;  %v1036_v45 = vadd.f32 %v1035_v9, %v1034_v36  ;;  %v957_v47 = vadd.f32 %v956_v28, %v955_v23 }
 0x143   : > { %v1601_v39 = vadd.f32 %v1600_v54, %v1599_v51  ;;  %v1602_v7 = vpop.f32.mrb[38].mxu0 }
 0x144   : > { %v1603_v11 = vpop.f32.mrb[39].mxu0 }
 0x145   : > { %v2210_v14 = vadd.f32 %v1601_v39, %v892_v6  ;;  %v1604_v15 = vadd.f32 %v1603_v11, %v1602_v7  ;;  %v996_v6 = vmul.f32 %v2198_v44, %v2198_v44  ;;  %v916_v54 = vpop.f32.mrb[48].mxu1 }
 0x146   : > { %v1710_v7 = vpop.f32.mrb[49].mxu1 }
 0x147   : > { %v2213_v19 = vadd.f32 %v1604_v15, %v895_v56  ;;  %v958_v41 = vsel %vm922_vm2, %v2210_v14, 0.0  ;;  %v997_v56 = vmul.f32 %v2210_v14, %v2210_v14  ;;  %v1037_v50 = vsel %vm922_vm2, %v996_v6, 0.0 }
 0x148   : > { %v959_v52 = vadd.f32 %v958_v41, %v957_v47  ;;  %v1038_v10 = vadd.f32 %v1037_v50, %v1036_v45 }
 0x149   : > { %v1605_v29 = vpop.f32.mrb[40].mxu0  ;;  %v1039_v55 = vsel %vm922_vm2, %v997_v56, 0.0  ;;  %v960_v59 = vsel %vm922_vm2, %v2213_v19, 0.0  ;;  %v998_v4 = vmul.f32 %v2213_v19, %v2213_v19 }
 0x14a   : > { %v1606_v40 = vpop.f32.mrb[41].mxu0  ;;  %v1040_v16 = vadd.f32 %v1039_v55, %v1038_v10  ;;  %v961_v3 = vadd.f32 %v960_v59, %v959_v52 }
 0x14b   : > { %v1607_v42 = vadd.f32 %v1606_v40, %v1605_v29  ;;  %v1608_v43 = vpop.f32.mrb[42].mxu0  ;;  %v1041_v21 = vsel %vm922_vm2, %v998_v4, 0.0 }
 0x14c   : > { %v1609_v35 = vpop.f32.mrb[43].mxu0  ;;  %v1042_v41 = vadd.f32 %v1041_v21, %v1040_v16 }
 0x14d   : > { %v2225_v51 = vadd.f32 %v1607_v42, %v900_v26  ;;  %v1610_v31 = vadd.f32 %v1609_v35, %v1608_v43  ;;  %v919_v26 = vpop.f32.mrb[50].mxu1 }
 0x14e   : > { %v1711_v15 = vpop.f32.mrb[51].mxu1 }
 0x14f   : > { %v2232_v39 = vadd.f32 %v1610_v31, %v903_v48  ;;  %v999_v11 = vmul.f32 %v2225_v51, %v2225_v51  ;;  %v962_v12 = vsel %vm922_vm2, %v2225_v51, 0.0 }
 0x150   : > { %v963_v48 = vadd.f32 %v962_v12, %v961_v3 }
 0x151   : > { %v1611_v13 = vpop.f32.mrb[44].mxu0  ;;  %v1043_v28 = vsel %vm922_vm2, %v999_v11, 0.0  ;;  %v964_v29 = vsel %vm922_vm2, %v2232_v39, 0.0  ;;  %v1000_v32 = vmul.f32 %v2232_v39, %v2232_v39 }
 0x152   : > { %v1612_v18 = vpop.f32.mrb[45].mxu0  ;;  %v1044_v45 = vadd.f32 %v1043_v28, %v1042_v41  ;;  %v965_v47 = vadd.f32 %v964_v29, %v963_v48 }
 0x153   : > { %v1613_v23 = vadd.f32 %v1612_v18, %v1611_v13  ;;  %v1614_v9 = vpop.f32.mrb[46].mxu0  ;;  %v1045_v35 = vsel %vm922_vm2, %v1000_v32, 0.0 }
 0x154   : > { %v1615_v6 = vpop.f32.mrb[47].mxu0  ;;  %v1046_v10 = vadd.f32 %v1045_v35, %v1044_v45  ;;  %v1217_v35 = vlaneseq }
 0x155   : > { %v2244_v36 = vadd.f32 %v1613_v23, %v908_v17  ;;  %v1616_v40 = vadd.f32 %v1615_v6, %v1614_v9 }
 0x157   : > { %v966_v56 = vsel %vm922_vm2, %v2244_v36, 0.0  ;;  %v1001_v42 = vmul.f32 %v2244_v36, %v2244_v36  ;;  %v2250_v43 = vadd.f32 %v1616_v40, %v911_v27 }
 0x158   : > { %v967_v31 = vadd.f32 %v966_v56, %v965_v47 }
 0x159   : > { %v1617_v50 = vpop.f32.mrb[48].mxu0  ;;  %v1047_v17 = vsel %vm922_vm2, %v1001_v42, 0.0  ;;  %v968_v55 = vsel %vm922_vm2, %v2250_v43, 0.0  ;;  %v1002_v59 = vmul.f32 %v2250_v43, %v2250_v43 }
 0x15a   : > { %v1618_v52 = vpop.f32.mrb[49].mxu0  ;;  %v1048_v26 = vadd.f32 %v1047_v17, %v1046_v10  ;;  %v969_v12 = vadd.f32 %v968_v55, %v967_v31 }
 0x15b   : > { %v1619_v4 = vadd.f32 %v1618_v52, %v1617_v50  ;;  %v1620_v7 = vpop.f32.mrb[50].mxu0  ;;  %v1049_v13 = vsel %vm922_vm2, %v1002_v59, 0.0 }
 0x15c   : > { %v1621_v27 = vpop.f32.mrb[51].mxu0  ;;  %v1050_v21 = vadd.f32 %v1049_v13, %v1048_v26 }
 0x15d   : > { %v2258_v11 = vadd.f32 %v1619_v4, %v916_v54 }
 0x15f   : > { %v971_v15 = vsel %vm970_vm3, %v2258_v11, 0.0  ;;  %v1003_v16 = vmul.f32 %v2258_v11, %v2258_v11 }
 0x160   : > { %v972_v3 = vadd.f32 %v971_v15, %v969_v12 }
 0x161   : > { %v1051_v18 = vsel %vm970_vm3, %v1003_v16, 0.0 }
 0x162   : > { %v973_v23 = vrot.slane %v972_v3, 4  ;;  %v1052_v48 = vadd.f32 %v1051_v18, %v1050_v21 }
 0x164   : > { %v974_v9 = vadd.f32 %v973_v23, %v972_v3  ;;  %v1053_v6 = vrot.slane %v1052_v48, 4 }
 0x166   : > { %v975_v28 = vrot.slane %v974_v9, 2  ;;  %v1054_v40 = vadd.f32 %v1053_v6, %v1052_v48 }
 0x168   : > { %v976_v54 = vadd.f32 %v975_v28, %v974_v9  ;;  %v1055_v41 = vrot.slane %v1054_v40, 2 }
 0x16a   : > { %v977_v29 = vrot.slane %v976_v54, 1  ;;  %v1056_v56 = vadd.f32 %v1055_v41, %v1054_v40 }
 0x16c   : > { %v978_v32 = vadd.f32 %v977_v29, %v976_v54  ;;  %v1057_v42 = vrot.slane %v1056_v56, 1 }
 0x16e   : > { %1729 = vmatmul.mubr.msk.f32.vlgmr.msra.gmra.mrb[52].mxu1 %vm922_vm2, %v978_v32  ;;  %v1058_v45 = vadd.f32 %v1057_v42, %v1056_v56 }
 0x16f   : > { %1764 = vmatpush3.bf16.msra.mxu1 %v2057_v62  ;;  %1747 = vmatprep.mubr.msk.f32.mxu1 %vm1867_vm0, %v1866_v2 }
 0x170   : > { %1765 = vmatprep.subr.bf16.mxu1 %v1868_v61 }
 0x173   : > { %1767 = vmatpush3.bf16.msra.mxu1 %v2067_v1  ;;  %v1218_v1 = vshrl.u32 %v1217_v35, 7 }
 0x174   : > { %1768 = vmatprep.subr.bf16.mxu1 %v1868_v61 }
 0x175   : > { %v1219_v59 = vsub.s32 0, %v1218_v1 }
 0x177   : > { %1770 = vmatpush3.bf16.msra.mxu1 %v2077_v5 }
 0x178   : > { %1771 = vmatprep.subr.bf16.mxu1 %v1868_v61 }
 0x17b   : > { %1773 = vmatpush3.bf16.msra.mxu1 %v2087_v8 }
 0x17e   : > { %1748 = vmatmul.mubr.msk.f32.vlgmr.msra.gmra.mrb[54].mxu1 %vm922_vm2, %v1058_v45 }
 0x241   : > { %v1136_v62 = vpop.f32.mrb[52].mxu1 }
 0x242   : > { %v1730_v2 = vpop.f32.mrb[53].mxu1  ;;  %v1140_v47 = vmul.f32 0.0025510204, %v1136_v62 }
 0x244   : > { %v1215_v31 = vmul.f32 %v1140_v47, %v1140_v47  ;;  %v1220_v61 = vrot.slane %v1140_v47, %v1219_v59 }
 0x246   : > { %v1221_v4 = vsub.f32 %v2091_v22, %v1220_v61  ;;  %v1222_v8 = vsub.f32 %v2093_v25, %v1220_v61  ;;  %v1223_v7 = vsub.f32 %v2095_v34, %v1220_v61  ;;  %v1224_v10 = vsub.f32 %v2097_v37, %v1220_v61 }
 0x247   : > { %v1225_v27 = vsub.f32 %v2099_v46, %v1220_v61  ;;  %v1226_v26 = vsub.f32 %v2101_v49, %v1220_v61  ;;  %v1227_v12 = vsub.f32 %v2103_v58, %v1220_v61  ;;  %v1228_v13 = vsub.f32 %v2105_v63, %v1220_v61 }
 0x248   : > { %v1229_v15 = vsub.f32 %v2120_v20, %v1220_v61  ;;  %v1230_v16 = vsub.f32 %v2128_v30, %v1220_v61  ;;  %v1231_v22 = vsub.f32 %v2140_v53, %v1220_v61  ;;  %v1232_v25 = vsub.f32 %v2146_v0, %v1220_v61 }
 0x249   : > { %v1233_v34 = vsub.f32 %v2158_v24, %v1220_v61  ;;  %v1234_v37 = vsub.f32 %v2161_v33, %v1220_v61  ;;  %v1235_v46 = vsub.f32 %v2173_v57, %v1220_v61  ;;  %v1236_v49 = vsub.f32 %v2180_v60, %v1220_v61 }
 0x24a   : > { %v1237_v58 = vsub.f32 %v2192_v38, %v1220_v61  ;;  %v1238_v63 = vsub.f32 %v2198_v44, %v1220_v61  ;;  %v1239_v20 = vsub.f32 %v2210_v14, %v1220_v61  ;;  %v1240_v30 = vsub.f32 %v2213_v19, %v1220_v61 }
 0x24b   : > { %v1241_v53 = vsub.f32 %v2225_v51, %v1220_v61  ;;  %v1242_v24 = vsub.f32 %v2232_v39, %v1220_v61  ;;  %v1243_v33 = vsub.f32 %v2244_v36, %v1220_v61  ;;  %v1244_v18 = vsub.f32 %v2250_v43, %v1220_v61  ;;  %v1525_v43 = vld [vmem:[%s2369_s2] ss:$0 sm:$0xff] }
 0x24c   : > { %v1245_v57 = vsub.f32 %v2258_v11, %v1220_v61 }
 0x251   : > { %v1210_v50 = vpop.f32.mrb[54].mxu1 }
 0x252   : > { %v1214_v52 = vmul.f32 0.0025510204, %v1210_v50  ;;  %v1749_v17 = vpop.f32.mrb[55].mxu1 }
 0x254   : > { %v1216_v55 = vsub.f32 %v1214_v52, %v1215_v31 }
 0x256   : > { %v1246_v5 = vadd.f32 1e-05, %v1216_v55 }
 0x258   : > { %1856 = vrsqrt.f32 %v1246_v5 }
 0x262   : > { %v1857_v3 = vpop.eup %1856 }
 0x263   : > { %v1251_v0 = vrot.slane %v1857_v3, %v1219_v59 }
 0x265   : > { %v1252_v60 = vmul.f32 %v1251_v0, %v1221_v4  ;;  %v1253_v21 = vmul.f32 %v1251_v0, %v1222_v8  ;;  %v1254_v38 = vmul.f32 %v1251_v0, %v1223_v7  ;;  %v1255_v23 = vmul.f32 %v1251_v0, %v1224_v10 }
 0x266   : > { %v1256_v44 = vmul.f32 %v1251_v0, %v1225_v27  ;;  %v1257_v9 = vmul.f32 %v1251_v0, %v1226_v26  ;;  %v1258_v14 = vmul.f32 %v1251_v0, %v1227_v12  ;;  %v1259_v48 = vmul.f32 %v1251_v0, %v1228_v13  ;;  %v1526_v27 = vld [vmem:[%s2370_s3] ss:$0 sm:$0xff] }
 0x267   : > { %v1260_v19 = vmul.f32 %v1251_v0, %v1229_v15  ;;  %v1261_v28 = vmul.f32 %v1251_v0, %v1230_v16  ;;  %v1262_v51 = vmul.f32 %v1251_v0, %v1231_v22  ;;  %v1263_v54 = vmul.f32 %v1251_v0, %v1232_v25 }
 0x268   : > { %v1264_v6 = vmul.f32 %v1251_v0, %v1233_v34  ;;  %v1265_v39 = vmul.f32 %v1251_v0, %v1234_v37  ;;  %v1266_v29 = vmul.f32 %v1251_v0, %v1235_v46  ;;  %v1267_v36 = vmul.f32 %v1251_v0, %v1236_v49 }
 0x269   : > { %v1268_v11 = vmul.f32 %v1251_v0, %v1237_v58  ;;  %v1269_v32 = vmul.f32 %v1251_v0, %v1238_v63  ;;  %v1270_v40 = vmul.f32 %v1251_v0, %v1239_v20  ;;  %v1271_v41 = vmul.f32 %v1251_v0, %v1240_v30 }
 0x26a   : > { %v1272_v56 = vmul.f32 %v1251_v0, %v1241_v53  ;;  %v1273_v42 = vmul.f32 %v1251_v0, %v1242_v24  ;;  %v1274_v45 = vmul.f32 %v1251_v0, %v1243_v33  ;;  %v1275_v62 = vmul.f32 %v1251_v0, %v1244_v18 }
 0x26b   : > { %v1276_v2 = vmul.f32 %v1251_v0, %v1245_v57  ;;  %v1284_v47 = vmul.f32 %v1525_v43, %v1252_v60  ;;  %v1285_v35 = vmul.f32 %v1525_v43, %v1253_v21  ;;  %v1286_v50 = vmul.f32 %v1525_v43, %v1254_v38 }
 0x26c   : > { %v1287_v31 = vmul.f32 %v1525_v43, %v1255_v23  ;;  %v1288_v1 = vmul.f32 %v1525_v43, %v1256_v44  ;;  %v1289_v52 = vmul.f32 %v1525_v43, %v1257_v9  ;;  %v1290_v17 = vmul.f32 %v1525_v43, %v1258_v14 }
 0x26d   : > { %v1291_v55 = vmul.f32 %v1525_v43, %v1259_v48  ;;  %v1292_v59 = vmul.f32 %v1525_v43, %v1260_v19  ;;  %v1293_v5 = vmul.f32 %v1525_v43, %v1261_v28  ;;  %v1294_v61 = vmul.f32 %v1525_v43, %v1262_v51 }
 0x26e   : > { %v1295_v4 = vmul.f32 %v1525_v43, %v1263_v54  ;;  %v1296_v8 = vmul.f32 %v1525_v43, %v1264_v6  ;;  %v1297_v7 = vmul.f32 %v1525_v43, %v1265_v39  ;;  %v1298_v10 = vmul.f32 %v1525_v43, %v1266_v29 }
 0x26f   : > { %v1299_v26 = vmul.f32 %v1525_v43, %v1267_v36  ;;  %v1300_v12 = vmul.f32 %v1525_v43, %v1268_v11  ;;  %v1301_v13 = vmul.f32 %v1525_v43, %v1269_v32  ;;  %v1302_v15 = vmul.f32 %v1525_v43, %v1270_v40 }
 0x270   : > { %v1303_v16 = vmul.f32 %v1525_v43, %v1271_v41  ;;  %v1304_v22 = vmul.f32 %v1525_v43, %v1272_v56  ;;  %v1305_v25 = vmul.f32 %v1525_v43, %v1273_v42  ;;  %v1306_v34 = vmul.f32 %v1525_v43, %v1274_v45 }
 0x271   : > { %v1307_v37 = vmul.f32 %v1525_v43, %v1275_v62  ;;  %v1308_v3 = vmul.f32 %v1525_v43, %v1276_v2  ;;  %v1316_v46 = vadd.f32 %v1526_v27, %v1284_v47  ;;  %v1317_v49 = vadd.f32 %v1526_v27, %v1285_v35 }
 0x272   : > { %v1318_v58 = vadd.f32 %v1526_v27, %v1286_v50  ;;  %v1319_v63 = vadd.f32 %v1526_v27, %v1287_v31  ;;  %v1320_v20 = vadd.f32 %v1526_v27, %v1288_v1  ;;  %v1321_v30 = vadd.f32 %v1526_v27, %v1289_v52 }
 0x273   : > { %v1322_v53 = vadd.f32 %v1526_v27, %v1290_v17  ;;  %v1323_v0 = vadd.f32 %v1526_v27, %v1291_v55  ;;  %v1324_v24 = vadd.f32 %v1526_v27, %v1292_v59  ;;  %v1325_v33 = vadd.f32 %v1526_v27, %v1293_v5 }
 0x274   : > { %v1326_v18 = vadd.f32 %v1526_v27, %v1294_v61  ;;  %v1327_v57 = vadd.f32 %v1526_v27, %v1295_v4  ;;  %v1328_v60 = vadd.f32 %v1526_v27, %v1296_v8  ;;  %v1329_v21 = vadd.f32 %v1526_v27, %v1297_v7 }
 0x275   : > { %v1330_v38 = vadd.f32 %v1526_v27, %v1298_v10  ;;  %v1331_v23 = vadd.f32 %v1526_v27, %v1299_v26  ;;  %v1332_v44 = vadd.f32 %v1526_v27, %v1300_v12  ;;  %v1333_v9 = vadd.f32 %v1526_v27, %v1301_v13 }
 0x276   : > { %v1334_v14 = vadd.f32 %v1526_v27, %v1302_v15  ;;  %v1335_v48 = vadd.f32 %v1526_v27, %v1303_v16  ;;  %v1336_v19 = vadd.f32 %v1526_v27, %v1304_v22  ;;  %v1337_v28 = vadd.f32 %v1526_v27, %v1305_v25 }
 0x277   : > { %v1338_v51 = vadd.f32 %v1526_v27, %v1306_v34  ;;  %v1339_v54 = vadd.f32 %v1526_v27, %v1307_v37  ;;  %v1340_v6 = vadd.f32 %v1526_v27, %v1308_v3  ;;  %v1341_v39 = vmax.f32 %v1316_v46, 0.0 }
 0x278   : > { %v1342_v29 = vmax.f32 %v1317_v49, 0.0  ;;  %v1343_v36 = vmax.f32 %v1318_v58, 0.0  ;;  %v1344_v43 = vmax.f32 %v1319_v63, 0.0  ;;  %v1345_v11 = vmax.f32 %v1320_v20, 0.0 }
 0x279   : > { %v1346_v32 = vmax.f32 %v1321_v30, 0.0  ;;  %v1347_v40 = vmax.f32 %v1322_v53, 0.0  ;;  %v1348_v41 = vmax.f32 %v1323_v0, 0.0  ;;  %v1349_v56 = vmax.f32 %v1324_v24, 0.0  ;;  %1366 = vst.msk [vmem:[%s2312_s19] sm:$0xff] %vm922_vm2, %v1341_v39 }
 0x27a   : > { %v1350_v42 = vmax.f32 %v1325_v33, 0.0  ;;  %v1351_v45 = vmax.f32 %v1326_v18, 0.0  ;;  %v1352_v62 = vmax.f32 %v1327_v57, 0.0  ;;  %v1353_v2 = vmax.f32 %v1328_v60, 0.0  ;;  %1367 = vst.msk [vmem:[%s2312_s19 + $0x8] sm:$0xff] %vm922_vm2, %v1342_v29  ;;  %1368 = vst.msk [vmem:[%s2312_s19 + $0x10] sm:$0xff] %vm922_vm2, %v1343_v36 }
 0x27b   : > { %1369 = vst.msk [vmem:[%s2312_s19 + $0x18] sm:$0xff] %vm922_vm2, %v1344_v43  ;;  %1370 = vst.msk [vmem:[%s2312_s19 + $0x20] sm:$0xff] %vm922_vm2, %v1345_v11  ;;  %v1354_v47 = vmax.f32 %v1329_v21, 0.0  ;;  %v1355_v35 = vmax.f32 %v1330_v38, 0.0  ;;  %v1356_v50 = vmax.f32 %v1331_v23, 0.0  ;;  %v1357_v31 = vmax.f32 %v1332_v44, 0.0 }
 0x27c   : > { %1371 = vst.msk [vmem:[%s2312_s19 + $0x28] sm:$0xff] %vm922_vm2, %v1346_v32  ;;  %1372 = vst.msk [vmem:[%s2312_s19 + $0x30] sm:$0xff] %vm922_vm2, %v1347_v40  ;;  %v1358_v1 = vmax.f32 %v1333_v9, 0.0  ;;  %v1359_v52 = vmax.f32 %v1334_v14, 0.0  ;;  %v1360_v17 = vmax.f32 %v1335_v48, 0.0  ;;  %v1361_v55 = vmax.f32 %v1336_v19, 0.0 }
 0x27d   : > { %1373 = vst.msk [vmem:[%s2312_s19 + $0x38] sm:$0xff] %vm922_vm2, %v1348_v41  ;;  %1374 = vst.msk [vmem:[%s2312_s19 + $0x40] sm:$0xff] %vm922_vm2, %v1349_v56  ;;  %v1362_v59 = vmax.f32 %v1337_v28, 0.0  ;;  %v1363_v5 = vmax.f32 %v1338_v51, 0.0  ;;  %v1364_v61 = vmax.f32 %v1339_v54, 0.0  ;;  %v1365_v4 = vmax.f32 %v1340_v6, 0.0 }
 0x27e   : > { %1375 = vst.msk [vmem:[%s2312_s19 + $0x48] sm:$0xff] %vm922_vm2, %v1350_v42  ;;  %1376 = vst.msk [vmem:[%s2312_s19 + $0x50] sm:$0xff] %vm922_vm2, %v1351_v45 }
 0x27f   : > { %1377 = vst.msk [vmem:[%s2312_s19 + $0x58] sm:$0xff] %vm922_vm2, %v1352_v62  ;;  %1378 = vst.msk [vmem:[%s2312_s19 + $0x60] sm:$0xff] %vm922_vm2, %v1353_v2 }
 0x280   : > { %1379 = vst.msk [vmem:[%s2312_s19 + $0x68] sm:$0xff] %vm922_vm2, %v1354_v47  ;;  %1380 = vst.msk [vmem:[%s2312_s19 + $0x70] sm:$0xff] %vm922_vm2, %v1355_v35 }
 0x281   : > { %1381 = vst.msk [vmem:[%s2312_s19 + $0x78] sm:$0xff] %vm922_vm2, %v1356_v50  ;;  %1382 = vst.msk [vmem:[%s2312_s19 + $0x80] sm:$0xff] %vm922_vm2, %v1357_v31 }
 0x282   : > { %1383 = vst.msk [vmem:[%s2312_s19 + $0x88] sm:$0xff] %vm922_vm2, %v1358_v1  ;;  %1384 = vst.msk [vmem:[%s2312_s19 + $0x90] sm:$0xff] %vm922_vm2, %v1359_v52 }
 0x283   : > { %1385 = vst.msk [vmem:[%s2312_s19 + $0x98] sm:$0xff] %vm922_vm2, %v1360_v17  ;;  %1386 = vst.msk [vmem:[%s2312_s19 + $0xa0] sm:$0xff] %vm922_vm2, %v1361_v55 }
 0x284   : > { %1387 = vst.msk [vmem:[%s2312_s19 + $0xa8] sm:$0xff] %vm922_vm2, %v1362_v59  ;;  %1388 = vst.msk [vmem:[%s2312_s19 + $0xb0] sm:$0xff] %vm922_vm2, %v1363_v5 }
 0x285   : > { %1389 = vst.msk [vmem:[%s2312_s19 + $0xb8] sm:$0xff] %vm922_vm2, %v1364_v61 }
 0x286   : > { %1390 = vst.msk [vmem:[%s2312_s19 + $0xc0] sm:$0xf] %vm970_vm3, %v1365_v4 }
 0x287 PF: > { %s15_s18 = sadd.s32 1, %s1864_s18  }
 0x288   : > { %p12_p4 = scmp.ge.s32.totalorder %s15_s18, 4  }
 0x28a   :  { %14 = sbr.rel (!%p12_p4) target bundleno = 1 (0x1), region = 70 }

// kernel: vae_forward.7
= control target key start
LH: loop header
LB: loop body
LE: loop exit
PB: predicated region body
PF: predicated region fallthrough
CT: control target
= control target key end

     0   :  { %s1494_s18 = smov 0   ;;  %s1714_s0 = inlined_call_operand.vmem [shape: bf16[2,36,576], index: 0, kind: input, shape index: {}]   ;;  %s1715_s1 = inlined_call_operand.vmem [shape: bf16[576,128], index: 1, kind: input, shape index: {}]   ;;  %s1716_s2 = inlined_call_operand.vmem [shape: f32[1,128], index: 2, kind: input, shape index: {}]   ;;  %s1717_s3 = inlined_call_operand.vmem [shape: f32[1,128], index: 3, kind: input, shape index: {}]   ;;  %s1718_s4 = inlined_call_operand.vmem [shape: f32[128,128], index: 4, kind: input, shape index: {}]   ;;  %s1719_s5 = inlined_call_operand.vmem [shape: f32[2,36,128], index: 5, kind: output, shape index: {}]  }
   0x1 LB: > { %s1071_s19 = sadd.s32 4294967295, %s1459_s18   ;;  %p1075_p0 = scmp.ge.s32.totalorder %s1459_s18, 1  ;;  %s1459_s18 = sphi %s1494_s18, %s15_s18  }
   0x2   : > { %p187_p1 = scmp.lt.s32.totalorder %s1459_s18, 3 }
   0x4   : > { %p188_p2 = pnand %p1075_p0, %p187_p1 }
   0x5   : > { %v1396_v0 = vld [vmem:[%s1715_s1 + $0x40] sm:$0xff] (!%p188_p2)   ;;  %v1400_v4 = vld [vmem:[%s1715_s1 + $0x48] sm:$0xff] (!%p188_p2)   ;;  %v1404_v8 = vld [vmem:[%s1715_s1 + $0x50] sm:$0xff] (!%p188_p2)   ;;  %p215_p3 = scmp.lt.s32.totalorder (!%p188_p2), %s1071_s19, 1  ;;  %v1461_v34 = vmov (!%p188_p2), 0.0   ;;  %vm1462_vm0 = vmmov (!%p188_p2), 0  }
   0x6   : > { %191 = sbr.rel (%p188_p2) target bundleno = 552 (0x228), region = 40  ;;  %v1397_v1 = vld [vmem:[%s1715_s1 + $0xc0] sm:$0xff] (!%p188_p2)   ;;  %1136 = vmatprep.subr.bf16.mxu0 (!%p188_p2), %v1396_v0  ;;  %v1401_v5 = vld [vmem:[%s1715_s1 + $0xc8] sm:$0xff] (!%p188_p2)   ;;  %v1405_v9 = vld [vmem:[%s1715_s1 + $0xd0] sm:$0xff] (!%p188_p2)   ;;  %vm596_vm1 = vcmask (!%p188_p2), 523264   ;;  %v1463_v57 = vmov (!%p188_p2), 0.0|0.0  }
   0x7   : > { %v1398_v2 = vld [vmem:[%s1715_s1] sm:$0xff] (!%p188_p2)   ;;  %1170 = vmatprep.subr.bf16.mxu1 (!%p188_p2), %v1397_v1  ;;  %v1402_v6 = vld [vmem:[%s1715_s1 + $0x8] sm:$0xff] (!%p188_p2)   ;;  %v1406_v10 = vld [vmem:[%s1715_s1 + $0x10] sm:$0xff] (!%p188_p2)   ;;  %vm777_vm2 = vcmask (!%p188_p2), 1043456  }
   0x8   : > { %v1399_v3 = vld [vmem:[%s1715_s1 + $0x80] sm:$0xff] (!%p188_p2)   ;;  %1137 = vmatpush3.bf16.msra.mxu0 (!%p188_p2), %v1398_v2  ;;  %v1403_v7 = vld [vmem:[%s1715_s1 + $0x88] sm:$0xff] (!%p188_p2)   ;;  %v1407_v11 = vld [vmem:[%s1715_s1 + $0x90] sm:$0xff] (!%p188_p2)  }
   0x9   : > { %1171 = vmatpush3.bf16.msra.mxu1 (!%p188_p2), %v1399_v3  ;;  %1138 = vmatprep.subr.bf16.mxu0 (!%p188_p2), %v1400_v4  ;;  %v1408_v12 = vld [vmem:[%s1715_s1 + $0x58] sm:$0xff] (!%p188_p2)   ;;  %v1412_v16 = vld [vmem:[%s1715_s1 + $0x60] sm:$0xff] (!%p188_p2)   ;;  %v1416_v20 = vld [vmem:[%s1715_s1 + $0x68] sm:$0xff] (!%p188_p2)  }
   0xa   : > { %1172 = vmatprep.subr.bf16.mxu1 (!%p188_p2), %v1401_v5  ;;  %v1409_v13 = vld [vmem:[%s1715_s1 + $0xd8] sm:$0xff] (!%p188_p2)   ;;  %v1413_v17 = vld [vmem:[%s1715_s1 + $0xe0] sm:$0xff] (!%p188_p2)   ;;  %v1417_v21 = vld [vmem:[%s1715_s1 + $0xe8] sm:$0xff] (!%p188_p2)  }
   0xb   : > { %v1410_v14 = vld [vmem:[%s1715_s1 + $0x18] sm:$0xff] (!%p188_p2)   ;;  %v1414_v18 = vld [vmem:[%s1715_s1 + $0x20] sm:$0xff] (!%p188_p2)   ;;  %v1418_v22 = vld [vmem:[%s1715_s1 + $0x28] sm:$0xff] (!%p188_p2)  }
   0xc   : > { %1139 = vmatpush3.bf16.msra.mxu0 (!%p188_p2), %v1402_v6  ;;  %v1411_v15 = vld [vmem:[%s1715_s1 + $0x98] sm:$0xff] (!%p188_p2)   ;;  %v1415_v19 = vld [vmem:[%s1715_s1 + $0xa0] sm:$0xff] (!%p188_p2)   ;;  %v1419_v23 = vld [vmem:[%s1715_s1 + $0xa8] sm:$0xff] (!%p188_p2)  }
   0xd   : > { %1173 = vmatpush3.bf16.msra.mxu1 %v1403_v7  ;;  %1140 = vmatprep.subr.bf16.mxu0 %v1404_v8  ;;  %s1721_s19 = smov (!%p215_p3, %s1071_s19), 1  ;;  %v1420_v24 = vld [vmem:[%s1715_s1 + $0x70] sm:$0xff]   ;;  %v1424_v28 = vld [vmem:[%s1715_s1 + $0x78] sm:$0xff]   ;;  %v1434_v37 = vld [vmem:[%s1715_s1 + $0x100] sm:$0xff]  }
   0xe   : > { %1174 = vmatprep.subr.bf16.mxu1 %v1405_v9  ;;  %v1421_v25 = vld [vmem:[%s1715_s1 + $0xf0] sm:$0xff]   ;;  %s1383_s26 = smul.u32 100, %s1721_s19  ;;  %v1425_v29 = vld [vmem:[%s1715_s1 + $0xf8] sm:$0xff]   ;;  %v1439_v40 = vld [vmem:[%s1715_s1 + $0x108] sm:$0xff]  }
   0xf   : > { %v1422_v26 = vld [vmem:[%s1715_s1 + $0x30] sm:$0xff]   ;;  %v1426_v30 = vld [vmem:[%s1715_s1 + $0x38] sm:$0xff]   ;;  %v802_v54 = vld [vmem:[%s1718_s4] sm:$0xff]  ;;  %s1384_s13 = smul.u32 40, %s1721_s19 }
  0x10   : > { %1141 = vmatpush3.bf16.msra.mxu0 %v1406_v10  ;;  %v1423_v27 = vld [vmem:[%s1715_s1 + $0xb0] sm:$0xff]   ;;  %s1602_s12 = scalar_lea.vmem %s1714_s0, %s1383_s26  ;;  %v1427_v31 = vld [vmem:[%s1715_s1 + $0xb8] sm:$0xff]   ;;  %v803_v55 = vld [vmem:[%s1718_s4 + $0x8] sm:$0xff] }
  0x11   : > { %1175 = vmatpush3.bf16.msra.mxu1 %v1407_v11  ;;  %1142 = vmatprep.subr.bf16.mxu0 %v1408_v12  ;;  %v1428_v32 = vld [vmem:[%s1602_s12] ss:$20 sps:$4 sm:$0xff]   ;;  %v1430_v33 = vld [vmem:[%s1602_s12 + $0x4] ss:$20 sps:$4 sm:$0xff]   ;;  %v1431_v35 = vld [vmem:[%s1602_s12 + $0x8] ss:$20 sps:$4 sm:$0xff]   ;;  %v1336_v56 = vpack.c.bf16 %v803_v55, %v802_v54  ;;  %s224_s20 = scalar_lea.vmem %s1719_s5, %s1384_s13 }
  0x12   : > { %1176 = vmatprep.subr.bf16.mxu1 %v1409_v13  ;;  %v1433_v36 = vld [vmem:[%s1602_s12 + $0xc] ss:$20 sps:$4 sm:$0xff]   ;;  %638 = vmatprep.mubr.bf16.mxu0 %v1430_v33  ;;  %v1437_v39 = vld [vmem:[%s1602_s12 + $0x34] ss:$20 sps:$4 sm:$0xff]   ;;  %v1441_v42 = vld [vmem:[%s1602_s12 + $0x30] ss:$20 sps:$4 sm:$0xff]  }
  0x13   : > { %694 = vmatprep.mubr.bf16.mxu1 %v1433_v36  ;;  %v1435_v38 = vld [vmem:[%s1602_s12 + $0x2c] ss:$20 sps:$4 sm:$0xff]   ;;  %v1440_v41 = vld [vmem:[%s1602_s12 + $0x28] ss:$20 sps:$4 sm:$0xff]   ;;  %v238_v43 = vld [vmem:[%s1602_s12 + $0x50] sm:$0x33] }
  0x14   : > { %1143 = vmatpush3.bf16.msra.mxu0 %v1410_v14  ;;  %v239_v44 = vld [vmem:[%s1602_s12 + $0x58] sm:$0x33]  ;;  %v1442_v45 = vld [vmem:[%s1715_s1 + $0x110] sm:$0xff]   ;;  %v1089_v46 = vcombine.high %v238_v43, %v238_v43  ;;  %v1088_v49 = vcombine.low %v238_v43, %v238_v43  ;;  %v1450_v53 = vld [vmem:[%s1602_s12 + $0x60] ss:$0 sps:$4 sm:$0x33]  }
  0x15   : > { %1177 = vmatpush3.bf16.msra.mxu1 %v1411_v15  ;;  %1144 = vmatprep.subr.bf16.mxu0 %v1412_v16  ;;  %v1091_v47 = vcombine.high %v239_v44, %v239_v44  ;;  %v1447_v48 = vld [vmem:[%s1715_s1 + $0x118] sm:$0xff]   ;;  %v1090_v50 = vcombine.low %v239_v44, %v239_v44  ;;  %v1448_v51 = vld [vmem:[%s1602_s12 + $0x10] ss:$20 sps:$4 sm:$0xff]   ;;  %v807_v62 = vld [vmem:[%s1718_s4 + $0x28] sm:$0xff] }
  0x16   : > { %1178 = vmatprep.subr.bf16.mxu1 %v1413_v17  ;;  %v1449_v52 = vld [vmem:[%s1602_s12 + $0x38] ss:$20 sps:$4 sm:$0xff]   ;;  %v804_v58 = vld [vmem:[%s1718_s4 + $0x10] sm:$0xff]  ;;  %v806_v61 = vld [vmem:[%s1718_s4 + $0x20] sm:$0xff] }
  0x17   : > { %v805_v59 = vld [vmem:[%s1718_s4 + $0x18] sm:$0xff]  ;;  %v1342_v63 = vpack.c.bf16 %v807_v62, %v806_v61  ;;  %v808_v0 = vld [vmem:[%s1718_s4 + $0x30] sm:$0xff]  ;;  %v810_v3 = vld [vmem:[%s1718_s4 + $0x40] sm:$0xff] }
  0x18   : > { %1145 = vmatpush3.bf16.msra.mxu0 %v1414_v18  ;;  %v1339_v60 = vpack.c.bf16 %v805_v59, %v804_v58  ;;  %v809_v1 = vld [vmem:[%s1718_s4 + $0x38] sm:$0xff]  ;;  %v811_v4 = vld [vmem:[%s1718_s4 + $0x48] sm:$0xff]  ;;  %v812_v6 = vld [vmem:[%s1718_s4 + $0x50] sm:$0xff] }
  0x19   : > { %1179 = vmatpush3.bf16.msra.mxu1 %v1415_v19  ;;  %1146 = vmatprep.subr.bf16.mxu0 %v1416_v20  ;;  %v1345_v2 = vpack.c.bf16 %v809_v1, %v808_v0  ;;  %v1348_v5 = vpack.c.bf16 %v811_v4, %v810_v3  ;;  %v813_v7 = vld [vmem:[%s1718_s4 + $0x58] sm:$0xff]  ;;  %v814_v9 = vld [vmem:[%s1718_s4 + $0x60] sm:$0xff]  ;;  %v815_v10 = vld [vmem:[%s1718_s4 + $0x68] sm:$0xff] }
  0x1a   : > { %1180 = vmatprep.subr.bf16.mxu1 %v1417_v21  ;;  %v1351_v8 = vpack.c.bf16 %v813_v7, %v812_v6  ;;  %v1354_v11 = vpack.c.bf16 %v815_v10, %v814_v9  ;;  %v816_v12 = vld [vmem:[%s1718_s4 + $0x70] sm:$0xff]  ;;  %v817_v13 = vld [vmem:[%s1718_s4 + $0x78] sm:$0xff] }
  0x1b   : > { %v1357_v14 = vpack.c.bf16 %v817_v13, %v816_v12 }
  0x1c   : > { %1147 = vmatpush3.bf16.msra.mxu0 %v1418_v22 }
  0x1d   : > { %1181 = vmatpush3.bf16.msra.mxu1 %v1419_v23  ;;  %1148 = vmatprep.subr.bf16.mxu0 %v1420_v24 }
  0x1e   : > { %1182 = vmatprep.subr.bf16.mxu1 %v1421_v25 }
  0x20   : > { %1149 = vmatpush3.bf16.msra.mxu0 %v1422_v26 }
  0x21   : > { %1183 = vmatpush3.bf16.msra.mxu1 %v1423_v27  ;;  %1150 = vmatprep.subr.bf16.mxu0 %v1424_v28 }
  0x22   : > { %1184 = vmatprep.subr.bf16.mxu1 %v1425_v29 }
  0x24   : > { %1151 = vmatpush3.bf16.msra.mxu0 %v1426_v30 }
  0x25   : > { %1185 = vmatpush3.bf16.msra.mxu1 %v1427_v31  ;;  %1245 = vmatprep.subr.bf16.mxu0 %v1461_v34 }
  0x26   : > { %1335 = vmatprep.subr.bf16.mxu1 %v1463_v57 }
  0x27   : > { %639 = vmatmul.mubr.bf16.vlgmr.msra.gmra.mrb[0].mxu0 %v1428_v32 }
  0x28   : > { %695 = vmatmul.mubr.bf16.vlgmr.msra.gmra.mrb[0].mxu1 %v1431_v35  ;;  %1246 = vmatpush3.bf16.msra.mxu0 %v1434_v37 }
  0x29   : > { %1247 = vmatprep.subr.bf16.mxu0 %v1461_v34  ;;  %646 = vmatprep.mubr.bf16.mxu0 %v1435_v38 }
  0x2a   : > { %702 = vmatprep.mubr.bf16.mxu1 %v1437_v39  ;;  %1337 = vmatpush3.bf16.msra.mxu1 %v1336_v56 }
  0x2b   : > { %1338 = vmatprep.subr.bf16.mxu1 %v1463_v57 }
  0x2c   : > { %1248 = vmatpush3.bf16.msra.mxu0 %v1439_v40 }
  0x2d   : > { %1249 = vmatprep.subr.bf16.mxu0 %v1461_v34 }
  0x2e   : > { %1340 = vmatpush3.bf16.msra.mxu1 %v1339_v60 }
  0x2f   : > { %647 = vmatmul.mubr.bf16.gmra.mrb[4].mxu0 %v1440_v41  ;;  %1341 = vmatprep.subr.bf16.mxu1 %v1463_v57 }
  0x30   : > { %703 = vmatmul.mubr.bf16.gmra.mrb[4].mxu1 %v1441_v42  ;;  %1250 = vmatpush3.bf16.msra.mxu0 %v1442_v45 }
  0x31   : > { %654 = vmatprep.mubr.bf16.mxu0 %v1089_v46  ;;  %710 = vmatprep.mubr.bf16.mxu1 %v1091_v47 }
  0x32   : > { %1251 = vmatprep.subr.bf16.mxu0 %v1461_v34  ;;  %1343 = vmatpush3.bf16.msra.mxu1 %v1342_v63 }
  0x33   : > { %1344 = vmatprep.subr.bf16.mxu1 %v1463_v57 }
  0x34   : > { %1252 = vmatpush3.bf16.msra.mxu0 %v1447_v48 }
  0x35   : > { %1359 = vmatprep.subr.bf16.mxu0 %v1463_v57 }
  0x36   : > { %1346 = vmatpush3.bf16.msra.mxu1 %v1345_v2 }
  0x37   : > { %655 = vmatmul.mubr.bf16.gmra.mrb[8].mxu0 %v1088_v49  ;;  %1347 = vmatprep.subr.bf16.mxu1 %v1463_v57 }
  0x38   : > { %711 = vmatmul.mubr.bf16.gmra.mrb[8].mxu1 %v1090_v50  ;;  %1253 = vmatprep.mubr.msk.bf16.mxu0 %vm1462_vm0, %v1461_v34 }
  0x39   : > { %1297 = vmatprep.mubr.msk.f32.mxu1 %vm1462_vm0, %v1461_v34 }
  0x3a   : > { %1349 = vmatpush3.bf16.msra.mxu1 %v1348_v5 }
  0x3b   : > { %1350 = vmatprep.subr.bf16.mxu1 %v1463_v57 }
  0x3e   : > { %1352 = vmatpush3.bf16.msra.mxu1 %v1351_v8 }
  0x3f   : > { %1254 = vmatmul.mubr.msk.bf16.vlgmr.msra.gmra.mrb[12].mxu0 %vm596_vm1, %v1448_v51  ;;  %1353 = vmatprep.subr.bf16.mxu1 %v1463_v57 }
  0x40   : > { %1257 = vmatprep.mubr.msk.bf16.mxu0 %vm1462_vm0, %v1461_v34  ;;  %1361 = vmatpush3.bf16.msra.mxu0 %v1336_v56 }
  0x41   : > { %1362 = vmatprep.subr.bf16.mxu0 %v1463_v57 }
  0x42   : > { %1355 = vmatpush3.bf16.msra.mxu1 %v1354_v11 }
  0x43   : > { %1356 = vmatprep.subr.bf16.mxu1 %v1463_v57 }
  0x44   : > { %1364 = vmatpush3.bf16.msra.mxu0 %v1339_v60 }
  0x45   : > { %1365 = vmatprep.subr.bf16.mxu0 %v1463_v57 }
  0x46   : > { %1358 = vmatpush3.bf16.msra.mxu1 %v1357_v14 }
  0x47   : > { %1258 = vmatmul.mubr.msk.bf16.gmra.mrb[16].mxu0 %vm596_vm1, %v1449_v52 }
  0x48   : > { %1261 = vmatprep.mubr.msk.bf16.mxu0 %vm1462_vm0, %v1461_v34  ;;  %1367 = vmatpush3.bf16.msra.mxu0 %v1342_v63 }
  0x49   : > { %1368 = vmatprep.subr.bf16.mxu0 %v1463_v57 }
  0x4c   : > { %1370 = vmatpush3.bf16.msra.mxu0 %v1345_v2 }
  0x4d   : > { %1371 = vmatprep.subr.bf16.mxu0 %v1463_v57 }
  0x4f   : > { %1262 = vmatmul.mubr.msk.bf16.gmra.mrb[20].mxu0 %vm596_vm1, %v1450_v53 }
  0x50   : > { %1332 = vmatprep.mubr.msk.f32.mxu0 %vm1462_vm0, %v1461_v34  ;;  %1373 = vmatpush3.bf16.msra.mxu0 %v1348_v5 }
  0x51   : > { %1374 = vmatprep.subr.bf16.mxu0 %v1463_v57 }
  0x54   : > { %1376 = vmatpush3.bf16.msra.mxu0 %v1351_v8 }
  0x55   : > { %1377 = vmatprep.subr.bf16.mxu0 %v1463_v57 }
  0x58   : > { %1379 = vmatpush3.bf16.msra.mxu0 %v1354_v11 }
  0x59   : > { %1380 = vmatprep.subr.bf16.mxu0 %v1463_v57 }
  0x5c   : > { %1382 = vmatpush3.bf16.msra.mxu0 %v1357_v14 }
  0xfa   : > { %v1152_v15 = vpop.f32.mrb[0].mxu0 }
  0xfb   : > { %v1186_v16 = vpop.f32.mrb[0].mxu1  ;;  %v1153_v17 = vpop.f32.mrb[1].mxu0 }
  0xfc   : > { %v1154_v18 = vadd.f32 %v1153_v17, %v1152_v15  ;;  %v1187_v19 = vpop.f32.mrb[1].mxu1  ;;  %v1155_v20 = vpop.f32.mrb[2].mxu0 }
  0xfd   : > { %v1188_v21 = vadd.f32 %v1187_v19, %v1186_v16  ;;  %v1189_v22 = vpop.f32.mrb[2].mxu1  ;;  %v1156_v23 = vpop.f32.mrb[3].mxu0 }
  0xfe   : > { %v1157_v24 = vadd.f32 %v1156_v23, %v1155_v20  ;;  %v1190_v25 = vpop.f32.mrb[3].mxu1 }
  0xff   : > { %v1191_v26 = vadd.f32 %v1190_v25, %v1189_v22  ;;  %v697_v27 = vadd.f32 %v1188_v21, %v1154_v18 }
 0x101   : > { %v700_v28 = vadd.f32 %v1191_v26, %v1157_v24 }
 0x102   : > { %v1158_v29 = vpop.f32.mrb[4].mxu0 }
 0x103   : > { %v1192_v30 = vpop.f32.mrb[4].mxu1  ;;  %v1159_v31 = vpop.f32.mrb[5].mxu0 }
 0x104   : > { %v1160_v32 = vadd.f32 %v1159_v31, %v1158_v29  ;;  %v1193_v33 = vpop.f32.mrb[5].mxu1  ;;  %v1161_v34 = vpop.f32.mrb[6].mxu0 }
 0x105   : > { %v1194_v35 = vadd.f32 %v1193_v33, %v1192_v30  ;;  %v1195_v36 = vpop.f32.mrb[6].mxu1  ;;  %v1162_v37 = vpop.f32.mrb[7].mxu0 }
 0x106   : > { %v1163_v38 = vadd.f32 %v1162_v37, %v1161_v34  ;;  %v1196_v39 = vpop.f32.mrb[7].mxu1 }
 0x107   : > { %v1197_v40 = vadd.f32 %v1196_v39, %v1195_v36  ;;  %v705_v41 = vadd.f32 %v1194_v35, %v1160_v32 }
 0x109   : > { %v708_v42 = vadd.f32 %v1197_v40, %v1163_v38 }
 0x10a   : > { %v1164_v43 = vpop.f32.mrb[8].mxu0 }
 0x10b   : > { %v1198_v44 = vpop.f32.mrb[8].mxu1  ;;  %v1165_v45 = vpop.f32.mrb[9].mxu0 }
 0x10c   : > { %v1166_v46 = vadd.f32 %v1165_v45, %v1164_v43  ;;  %v1199_v47 = vpop.f32.mrb[9].mxu1  ;;  %v1167_v48 = vpop.f32.mrb[10].mxu0 }
 0x10d   : > { %v1200_v49 = vadd.f32 %v1199_v47, %v1198_v44  ;;  %v1168_v50 = vpop.f32.mrb[11].mxu0  ;;  %v1201_v51 = vpop.f32.mrb[10].mxu1 }
 0x10e   : > { %v1202_v52 = vpop.f32.mrb[11].mxu1 }
 0x10f   : > { %v713_v53 = vadd.f32 %v1200_v49, %v1166_v46 }
 0x112   : > { %v752_v54 = vpop.f32.mrb[12].mxu0 }
 0x113   : > { %v1683_v55 = vadd.f32 %v752_v54, %v697_v27  ;;  %v1255_v56 = vpop.f32.mrb[13].mxu0  ;;  %v1132_v54 = vld [vmem:[%s1716_s2] ss:$0 sm:$0xff] }
 0x114   : > { %v755_v57 = vpop.f32.mrb[14].mxu0 }
 0x115   : > { %v1685_v58 = vadd.f32 %v755_v57, %v700_v28  ;;  %v1256_v59 = vpop.f32.mrb[15].mxu0  ;;  %v786_v3 = vmul.f32 %v1683_v55, %v1683_v55 }
 0x117   : > { %v787_v63 = vmul.f32 %v1685_v58, %v1685_v58  ;;  %v774_v4 = vadd.f32 %v1685_v58, %v1683_v55 }
 0x119   : > { %v791_v6 = vadd.f32 %v787_v63, %v786_v3 }
 0x11a   : > { %v760_v60 = vpop.f32.mrb[16].mxu0 }
 0x11b   : > { %v1687_v61 = vadd.f32 %v760_v60, %v705_v41  ;;  %v1259_v62 = vpop.f32.mrb[17].mxu0  ;;  %v962_v41 = vlaneseq }
 0x11c   : > { %v763_v0 = vpop.f32.mrb[18].mxu0 }
 0x11d   : > { %v764_v1 = vadd.f32 %v763_v0, %v708_v42  ;;  %v1260_v2 = vpop.f32.mrb[19].mxu0  ;;  %v788_v5 = vmul.f32 %v1687_v61, %v1687_v61  ;;  %v775_v7 = vadd.f32 %v774_v4, %v1687_v61  ;;  %v963_v43 = vshrl.u32 %v962_v41, 7 }
 0x11f   : > { %v792_v8 = vadd.f32 %v791_v6, %v788_v5  ;;  %v789_v9 = vmul.f32 %v764_v1, %v764_v1  ;;  %v776_v13 = vadd.f32 %v775_v7, %v764_v1  ;;  %v964_v45 = vsub.s32 0, %v963_v43 }
 0x121   : > { %v793_v18 = vadd.f32 %v792_v8, %v789_v9 }
 0x122   : > { %v768_v10 = vpop.f32.mrb[20].mxu0 }
 0x123   : > { %v769_v11 = vadd.f32 %v768_v10, %v713_v53  ;;  %v1263_v12 = vpop.f32.mrb[21].mxu0 }
 0x124   : > { %v771_v14 = vpop.f32.mrb[22].mxu0 }
 0x125   : > { %v778_v15 = vsel %vm777_vm2, %v769_v11, 0.0  ;;  %v790_v16 = vmul.f32 %v769_v11, %v769_v11  ;;  %v1264_v17 = vpop.f32.mrb[23].mxu0 }
 0x126   : > { %v779_v19 = vadd.f32 %v778_v15, %v776_v13 }
 0x127   : > { %v794_v20 = vsel %vm777_vm2, %v790_v16, 0.0 }
 0x128   : > { %v780_v21 = vrot.slane %v779_v19, 4  ;;  %v795_v22 = vadd.f32 %v794_v20, %v793_v18 }
 0x12a   : > { %v781_v23 = vadd.f32 %v780_v21, %v779_v19  ;;  %v796_v24 = vrot.slane %v795_v22, 4 }
 0x12c   : > { %v782_v25 = vrot.slane %v781_v23, 2  ;;  %v797_v26 = vadd.f32 %v796_v24, %v795_v22 }
 0x12e   : > { %v783_v27 = vadd.f32 %v782_v25, %v781_v23  ;;  %v798_v28 = vrot.slane %v797_v26, 2 }
 0x130   : > { %v784_v29 = vrot.slane %v783_v27, 1  ;;  %v799_v30 = vadd.f32 %v798_v28, %v797_v26 }
 0x132   : > { %v785_v31 = vadd.f32 %v784_v29, %v783_v27  ;;  %v800_v32 = vrot.slane %v799_v30, 1 }
 0x134   : > { %1298 = vmatmul.mubr.f32.vlgmr.msra.gmra.mrb[12].mxu1 %v785_v31  ;;  %v801_v33 = vadd.f32 %v800_v32, %v799_v30 }
 0x136   : > { %1333 = vmatmul.mubr.f32.vlgmr.msra.gmra.mrb[24].mxu0 %v801_v33 }
 0x207   : > { %v884_v34 = vpop.f32.mrb[12].mxu1 }
 0x208   : > { %v888_v35 = vmul.f32 0.0069444445, %v884_v34  ;;  %v1299_v36 = vpop.f32.mrb[13].mxu1 }
 0x209   : > { %v955_v37 = vpop.f32.mrb[24].mxu0 }
 0x20a   : > { %v960_v38 = vmul.f32 %v888_v35, %v888_v35  ;;  %v959_v39 = vmul.f32 0.0069444445, %v955_v37  ;;  %v1334_v40 = vpop.f32.mrb[25].mxu0  ;;  %v965_v46 = vrot.slane %v888_v35, %v964_v45 }
 0x20c   : > { %v961_v42 = vsub.f32 %v959_v39, %v960_v38  ;;  %v966_v48 = vsub.f32 %v1683_v55, %v965_v46  ;;  %v967_v49 = vsub.f32 %v1685_v58, %v965_v46  ;;  %v968_v50 = vsub.f32 %v1687_v61, %v965_v46  ;;  %v1133_v55 = vld [vmem:[%s1717_s3] ss:$0 sm:$0xff] }
 0x20d   : > { %v969_v51 = vsub.f32 %v764_v1, %v965_v46  ;;  %v970_v53 = vsub.f32 %v769_v11, %v965_v46 }
 0x20e   : > { %v971_v44 = vadd.f32 1e-05, %v961_v42 }
 0x210   : > { %1451 = vrsqrt.f32 %v971_v44 }
 0x21a   : > { %v1452_v47 = vpop.eup %1451 }
 0x21b   : > { %v976_v52 = vrot.slane %v1452_v47, %v964_v45 }
 0x21d   : > { %v977_v56 = vmul.f32 %v976_v52, %v966_v48  ;;  %v978_v57 = vmul.f32 %v976_v52, %v967_v49  ;;  %v979_v59 = vmul.f32 %v976_v52, %v968_v50  ;;  %v980_v60 = vmul.f32 %v976_v52, %v969_v51 }
 0x21e   : > { %v981_v62 = vmul.f32 %v976_v52, %v970_v53 }
 0x21f   : > { %v989_v58 = vmul.f32 %v1132_v54, %v977_v56  ;;  %v990_v63 = vmul.f32 %v1132_v54, %v978_v57  ;;  %v991_v61 = vmul.f32 %v1132_v54, %v979_v59  ;;  %v992_v0 = vmul.f32 %v1132_v54, %v980_v60 }
 0x220   : > { %v993_v1 = vmul.f32 %v1132_v54, %v981_v62 }
 0x221   : > { %v1001_v2 = vadd.f32 %v1133_v55, %v989_v58  ;;  %v1002_v3 = vadd.f32 %v1133_v55, %v990_v63  ;;  %v1003_v4 = vadd.f32 %v1133_v55, %v991_v61  ;;  %v1004_v5 = vadd.f32 %v1133_v55, %v992_v0 }
 0x222   : > { %v1005_v6 = vadd.f32 %v1133_v55, %v993_v1 }
 0x223   : > { %v1006_v7 = vmax.f32 %v1001_v2, 0.0  ;;  %v1007_v8 = vmax.f32 %v1002_v3, 0.0  ;;  %v1008_v9 = vmax.f32 %v1003_v4, 0.0  ;;  %v1009_v10 = vmax.f32 %v1004_v5, 0.0 }
 0x224   : > { %v1010_v11 = vmax.f32 %v1005_v6, 0.0 }
 0x225   : > { %1011 = vst [vmem:[%s224_s20] sm:$0xff] %v1006_v7  ;;  %1012 = vst [vmem:[%s224_s20 + $0x8] sm:$0xff] %v1007_v8 }
 0x226   : > { %1013 = vst [vmem:[%s224_s20 + $0x10] sm:$0xff] %v1008_v9  ;;  %1014 = vst [vmem:[%s224_s20 + $0x18] sm:$0xff] %v1009_v10 }
 0x227   : > { %1015 = vst [vmem:[%s224_s20 + $0x20] sm:$0xf] %v1010_v11 }
 0x228 PF: > { %s15_s18 = sadd.s32 1, %s1459_s18  }
 0x229   : > { %p12_p4 = scmp.ge.s32.totalorder %s15_s18, 4  }
 0x22b   :  { %14 = sbr.rel (!%p12_p4) target bundleno = 1 (0x1), region = 70 }

// kernel: vae_forward.8
= control target key start
LH: loop header
LB: loop body
LE: loop exit
PB: predicated region body
PF: predicated region fallthrough
CT: control target
= control target key end

     0   :  { %s2279_s18 = smov 0   ;;  %s3115_s0 = inlined_call_operand.vmem [shape: bf16[2,4,1152], index: 0, kind: input, shape index: {}]   ;;  %s3116_s1 = inlined_call_operand.vmem [shape: bf16[1152,256], index: 1, kind: input, shape index: {}]   ;;  %s3117_s2 = inlined_call_operand.vmem [shape: f32[1,256], index: 2, kind: input, shape index: {}]   ;;  %s3118_s3 = inlined_call_operand.vmem [shape: f32[1,256], index: 3, kind: input, shape index: {}]   ;;  %s3119_s4 = inlined_call_operand.vmem [shape: f32[256,256], index: 4, kind: input, shape index: {}]   ;;  %s3120_s5 = inlined_call_operand.vmem [shape: f32[2,4,256], index: 5, kind: output, shape index: {}]  }
   0x1 LB: > { %s1710_s19 = sadd.s32 4294967295, %s2245_s18   ;;  %p1714_p0 = scmp.ge.s32.totalorder %s2245_s18, 1  ;;  %s2245_s18 = sphi %s2279_s18, %s15_s18  }
   0x2   : > { %p187_p1 = scmp.lt.s32.totalorder %s2245_s18, 3 }
   0x4   : > { %p188_p2 = pnand %p1714_p0, %p187_p1 }
   0x5   : > { %v2017_v0 = vld [vmem:[%s3116_s1 + $0x104] ss:$8 sps:$4 sm:$0xff] (!%p188_p2)   ;;  %v2019_v1 = vld [vmem:[%s3116_s1 + $0x100] ss:$8 sps:$4 sm:$0xff] (!%p188_p2)   ;;  %v2020_v2 = vld [vmem:[%s3116_s1 + $0x114] ss:$8 sps:$4 sm:$0xff] (!%p188_p2)   ;;  %v380_v11 = vlaneseq (!%p188_p2) }
   0x6   : > { %191 = sbr.rel (%p188_p2) target bundleno = 736 (0x2e0), region = 40  ;;  %1187 = vmatprep.subr.bf16.mxu0 (!%p188_p2), %v2017_v0  ;;  %v2022_v3 = vld [vmem:[%s3116_s1 + $0x110] ss:$8 sps:$4 sm:$0xff] (!%p188_p2)   ;;  %v2023_v4 = vld [vmem:[%s3116_s1 + $0x124] ss:$8 sps:$4 sm:$0xff] (!%p188_p2)   ;;  %p215_p3 = scmp.lt.s32.totalorder (!%p188_p2), %s1710_s19, 1 }
   0x7   : > { %1188 = vmatpush1.bf16.msra.mxu0 (!%p188_p2), %v2019_v1  ;;  %v2025_v5 = vld [vmem:[%s3116_s1 + $0x120] ss:$8 sps:$4 sm:$0xff] (!%p188_p2)   ;;  %v2026_v6 = vld [vmem:[%s3116_s1 + $0x134] ss:$8 sps:$4 sm:$0xff] (!%p188_p2)   ;;  %v2028_v7 = vld [vmem:[%s3116_s1 + $0x130] ss:$8 sps:$4 sm:$0xff] (!%p188_p2)  }
   0x8   : > { %1189 = vmatprep.subr.bf16.mxu0 (!%p188_p2), %v2020_v2  ;;  %v2029_v8 = vld [vmem:[%s3116_s1 + $0x144] ss:$8 sps:$4 sm:$0xff] (!%p188_p2)   ;;  %v2247_v9 = vmov (!%p188_p2), 1983009808   ;;  %v2031_v12 = vld [vmem:[%s3116_s1 + $0x140] ss:$8 sps:$4 sm:$0xff] (!%p188_p2)  }
   0x9   : > { %v378_v10 = vunpack.c.l.s4 (!%p188_p2), %v2247_v9  ;;  %v2032_v13 = vld [vmem:[%s3116_s1 + $0x154] ss:$8 sps:$4 sm:$0xff] (!%p188_p2)   ;;  %v2323_v15 = vshrl.u32 (!%p188_p2), %v380_v11, 7  ;;  %v2034_v16 = vld [vmem:[%s3116_s1 + $0x150] ss:$8 sps:$4 sm:$0xff] (!%p188_p2)   ;;  %vm1351_vm0 = vcmask (!%p188_p2), 1043456  }
   0xa   : > { %v2035_v17 = vld [vmem:[%s3116_s1 + $0x164] ss:$8 sps:$4 sm:$0xff] (!%p188_p2)   ;;  %v2037_v21 = vld [vmem:[%s3116_s1 + $0x160] ss:$8 sps:$4 sm:$0xff] (!%p188_p2)   ;;  %v2038_v22 = vld [vmem:[%s3116_s1 + $0x174] ss:$8 sps:$4 sm:$0xff] (!%p188_p2)  }
   0xb   : > { %1190 = vmatpush1.bf16.msra.mxu0 (!%p188_p2), %v2022_v3  ;;  %v379_v14 = vunpack.c.0.s8 (!%p188_p2), %v378_v10  ;;  %v2040_v25 = vld [vmem:[%s3116_s1 + $0x170] ss:$8 sps:$4 sm:$0xff] (!%p188_p2)   ;;  %v2041_v26 = vld [vmem:[%s3116_s1 + $0x184] ss:$8 sps:$4 sm:$0xff] (!%p188_p2)   ;;  %v2043_v28 = vld [vmem:[%s3116_s1 + $0x180] ss:$8 sps:$4 sm:$0xff] (!%p188_p2)  }
   0xc   : > { %1191 = vmatprep.subr.bf16.mxu0 (!%p188_p2), %v2023_v4  ;;  %v2044_v30 = vld [vmem:[%s3116_s1 + $0x194] ss:$8 sps:$4 sm:$0xff] (!%p188_p2)   ;;  %v2090_v31 = vld [vmem:[%s3116_s1 + $0x4] ss:$8 sps:$4 sm:$0xff] (!%p188_p2)   ;;  %v2092_v32 = vld [vmem:[%s3116_s1] ss:$8 sps:$4 sm:$0xff] (!%p188_p2)  }
   0xd   : > { %s3122_s19 = smov (!%p215_p3, %s1710_s19), 1  ;;  %v2337_v18 = vsub.s32 %v379_v14, %v2323_v15  ;;  %v2046_v33 = vld [vmem:[%s3116_s1 + $0x190] ss:$8 sps:$4 sm:$0xff]   ;;  %v2047_v34 = vld [vmem:[%s3116_s1 + $0x1a4] ss:$8 sps:$4 sm:$0xff]   ;;  %1146 = vmatprep.subr.bf16.mxu1 %v2090_v31 }
   0xe   : > { %s2006_s13 = smul.u32 18, %s3122_s19  ;;  %1147 = vmatpush1.bf16.msra.mxu1 %v2092_v32  ;;  %v2096_v35 = vld [vmem:[%s3116_s1 + $0x14] ss:$8 sps:$4 sm:$0xff]   ;;  %v2098_v36 = vld [vmem:[%s3116_s1 + $0x10] ss:$8 sps:$4 sm:$0xff]   ;;  %s1865_s14 = sshll.u32 %s3122_s19, 3 }
   0xf   : > { %1192 = vmatpush1.bf16.msra.mxu0 %v2025_v5  ;;  %1148 = vmatprep.subr.bf16.mxu1 %v2096_v35  ;;  %v2102_v37 = vld [vmem:[%s3116_s1 + $0x24] ss:$8 sps:$4 sm:$0xff]   ;;  %v2049_v38 = vld [vmem:[%s3116_s1 + $0x1a0] ss:$8 sps:$4 sm:$0xff]   ;;  %v2050_v39 = vld [vmem:[%s3116_s1 + $0x1b4] ss:$8 sps:$4 sm:$0xff]   ;;  %s224_s17 = scalar_lea.vmem %s3120_s5, %s1865_s14 }
  0x10   : > { %1193 = vmatprep.subr.bf16.mxu0 %v2026_v6  ;;  %s2328_s22 = scalar_lea.vmem %s3115_s0, %s2006_s13  ;;  %v2104_v40 = vld [vmem:[%s3116_s1 + $0x20] ss:$8 sps:$4 sm:$0xff]   ;;  %v2108_v41 = vld [vmem:[%s3116_s1 + $0x34] ss:$8 sps:$4 sm:$0xff]   ;;  %v2052_v42 = vld [vmem:[%s3116_s1 + $0x1b0] ss:$8 sps:$4 sm:$0xff]  }
  0x11   : > { %v226_v19 = vld [vmem:[%s2328_s22] sm:$0xff]  ;;  %v2110_v44 = vld [vmem:[%s3116_s1 + $0x30] ss:$8 sps:$4 sm:$0xff]   ;;  %v2056_v47 = vld [vmem:[%s3116_s1 + $0x1d4] ss:$8 sps:$4 sm:$0xff]  }
  0x12   : > { %v376_v20 = vcombine.high %v226_v19, %v226_v19  ;;  %v2358_v27 = vrot.slane %v226_v19, %v2337_v18  ;;  %1149 = vmatpush1.bf16.msra.mxu1 %v2098_v36  ;;  %v2053_v43 = vld [vmem:[%s3116_s1 + $0x1c4] ss:$8 sps:$4 sm:$0xff]   ;;  %v2055_v46 = vld [vmem:[%s3116_s1 + $0x1c0] ss:$8 sps:$4 sm:$0xff]   ;;  %v2120_v49 = vld [vmem:[%s3116_s1 + $0x54] ss:$8 sps:$4 sm:$0xff]  }
  0x13   : > { %1194 = vmatpush1.bf16.msra.mxu0 %v2028_v7  ;;  %1150 = vmatprep.subr.bf16.mxu1 %v2102_v37  ;;  %v2114_v45 = vld [vmem:[%s3116_s1 + $0x44] ss:$8 sps:$4 sm:$0xff]   ;;  %v2116_v48 = vld [vmem:[%s3116_s1 + $0x40] ss:$8 sps:$4 sm:$0xff]   ;;  %v2058_v50 = vld [vmem:[%s3116_s1 + $0x1d0] ss:$8 sps:$4 sm:$0xff]  }
  0x14   : > { %1195 = vmatprep.subr.bf16.mxu0 %v2029_v8  ;;  %v2347_v23 = vrot.slane %v376_v20, %v2337_v18  ;;  %v391_v29 = vcombine.high %v2358_v27, %v2358_v27  ;;  %v2059_v51 = vld [vmem:[%s3116_s1 + $0x1e4] ss:$8 sps:$4 sm:$0xff]   ;;  %v2122_v52 = vld [vmem:[%s3116_s1 + $0x50] ss:$8 sps:$4 sm:$0xff]   ;;  %v2061_v54 = vld [vmem:[%s3116_s1 + $0x1e0] ss:$8 sps:$4 sm:$0xff]  }
  0x15   : > { %v2126_v53 = vld [vmem:[%s3116_s1 + $0x64] ss:$8 sps:$4 sm:$0xff]   ;;  %v2062_v55 = vld [vmem:[%s3116_s1 + $0x1f4] ss:$8 sps:$4 sm:$0xff]   ;;  %v2128_v56 = vld [vmem:[%s3116_s1 + $0x60] ss:$8 sps:$4 sm:$0xff]  }
  0x16   : > { %v392_v24 = vcombine.high %v2347_v23, %v2347_v23  ;;  %1178 = vmatprep.mubr.bf16.mxu1 %v391_v29  ;;  %1151 = vmatpush1.bf16.msra.mxu1 %v2104_v40  ;;  %v2447_v57 = vld [vmem:[%s2328_s22 + $0x8] sm:$0xff]  ;;  %v2132_v58 = vld [vmem:[%s3116_s1 + $0x74] ss:$8 sps:$4 sm:$0xff]   ;;  %v2064_v59 = vld [vmem:[%s3116_s1 + $0x1f0] ss:$8 sps:$4 sm:$0xff]  }
  0x17   : > { %1196 = vmatpush1.bf16.msra.mxu0 %v2031_v12  ;;  %1152 = vmatprep.subr.bf16.mxu1 %v2108_v41  ;;  %v2457_v60 = vrot.slane %v2447_v57, %v2337_v18  ;;  %v2068_v61 = vld [vmem:[%s3116_s1 + $0x204] ss:$8 sps:$4 sm:$0xff]   ;;  %v2134_v62 = vld [vmem:[%s3116_s1 + $0x70] ss:$8 sps:$4 sm:$0xff]   ;;  %v2066_v0 = vld [vmem:[%s3116_s1 + $0x200] ss:$8 sps:$4 sm:$0xff]  }
  0x18   : > { %1197 = vmatprep.subr.bf16.mxu0 %v2032_v13  ;;  %1219 = vmatprep.mubr.bf16.mxu0 %v392_v24  ;;  %v2138_v63 = vld [vmem:[%s3116_s1 + $0x84] ss:$8 sps:$4 sm:$0xff]   ;;  %v2071_v2 = vld [vmem:[%s3116_s1 + $0x214] ss:$8 sps:$4 sm:$0xff]   ;;  %v2140_v3 = vld [vmem:[%s3116_s1 + $0x80] ss:$8 sps:$4 sm:$0xff]  }
  0x19   : > { %v408_v1 = vcombine.high %v2457_v60, %v2457_v60  ;;  %v2144_v4 = vld [vmem:[%s3116_s1 + $0x94] ss:$8 sps:$4 sm:$0xff]   ;;  %v2069_v5 = vld [vmem:[%s3116_s1 + $0x210] ss:$8 sps:$4 sm:$0xff]   ;;  %v2074_v6 = vld [vmem:[%s3116_s1 + $0x224] ss:$8 sps:$4 sm:$0xff]  }
  0x1a   : > { %1153 = vmatpush1.bf16.msra.mxu1 %v2110_v44  ;;  %v2146_v7 = vld [vmem:[%s3116_s1 + $0x90] ss:$8 sps:$4 sm:$0xff]   ;;  %v2150_v8 = vld [vmem:[%s3116_s1 + $0xa4] ss:$8 sps:$4 sm:$0xff]   ;;  %v2072_v9 = vld [vmem:[%s3116_s1 + $0x220] ss:$8 sps:$4 sm:$0xff]  }
  0x1b   : > { %1198 = vmatpush1.bf16.msra.mxu0 %v2034_v16  ;;  %1154 = vmatprep.subr.bf16.mxu1 %v2114_v45  ;;  %v2077_v10 = vld [vmem:[%s3116_s1 + $0x234] ss:$8 sps:$4 sm:$0xff]   ;;  %v2152_v11 = vld [vmem:[%s3116_s1 + $0xa0] ss:$8 sps:$4 sm:$0xff]   ;;  %v2075_v13 = vld [vmem:[%s3116_s1 + $0x230] ss:$8 sps:$4 sm:$0xff]  }
  0x1c   : > { %1199 = vmatprep.subr.bf16.mxu0 %v2035_v17  ;;  %v2156_v12 = vld [vmem:[%s3116_s1 + $0xb4] ss:$8 sps:$4 sm:$0xff]   ;;  %v2080_v14 = vld [vmem:[%s3116_s1 + $0x244] ss:$8 sps:$4 sm:$0xff]   ;;  %v2158_v16 = vld [vmem:[%s3116_s1 + $0xb0] ss:$8 sps:$4 sm:$0xff]  }
  0x1d   : > { %v2162_v17 = vld [vmem:[%s3116_s1 + $0xc4] ss:$8 sps:$4 sm:$0xff]   ;;  %v2078_v19 = vld [vmem:[%s3116_s1 + $0x240] ss:$8 sps:$4 sm:$0xff]   ;;  %v2083_v20 = vld [vmem:[%s3116_s1 + $0x254] ss:$8 sps:$4 sm:$0xff]  }
  0x1e   : > { %1155 = vmatpush1.bf16.msra.mxu1 %v2116_v48  ;;  %v2086_v24 = vld [vmem:[%s3116_s1 + $0x264] ss:$8 sps:$4 sm:$0xff]   ;;  %v2089_v29 = vld [vmem:[%s3116_s1 + $0x274] ss:$8 sps:$4 sm:$0xff]   ;;  %v2087_v32 = vld [vmem:[%s3116_s1 + $0x270] ss:$8 sps:$4 sm:$0xff]  }
  0x1f   : > { %1200 = vmatpush1.bf16.msra.mxu0 %v2037_v21  ;;  %1156 = vmatprep.subr.bf16.mxu1 %v2120_v49  ;;  %v2164_v21 = vld [vmem:[%s3116_s1 + $0xc0] ss:$8 sps:$4 sm:$0xff]   ;;  %v2180_v31 = vld [vmem:[%s3116_s1 + $0xf4] ss:$8 sps:$4 sm:$0xff]   ;;  %v2188_v35 = vld [vmem:[%s3116_s1 + $0x404] ss:$8 sps:$4 sm:$0xff]  }
  0x20   : > { %1201 = vmatprep.subr.bf16.mxu0 %v2038_v22  ;;  %v2168_v22 = vld [vmem:[%s3116_s1 + $0xd4] ss:$8 sps:$4 sm:$0xff]   ;;  %v2093_v36 = vld [vmem:[%s3116_s1 + $0x280] ss:$8 sps:$4 sm:$0xff]   ;;  %v2099_v40 = vld [vmem:[%s3116_s1 + $0x290] ss:$8 sps:$4 sm:$0xff]  }
  0x21   : > { %v2101_v37 = vld [vmem:[%s3116_s1 + $0x294] ss:$8 sps:$4 sm:$0xff]   ;;  %v2107_v41 = vld [vmem:[%s3116_s1 + $0x2a4] ss:$8 sps:$4 sm:$0xff]   ;;  %v2248_v44 = vmov 0  }
  0x22   : > { %1157 = vmatpush1.bf16.msra.mxu1 %v2122_v52  ;;  %v2113_v45 = vld [vmem:[%s3116_s1 + $0x2b4] ss:$8 sps:$4 sm:$0xff]   ;;  %v2111_v48 = vld [vmem:[%s3116_s1 + $0x2b0] ss:$8 sps:$4 sm:$0xff]   ;;  %v2119_v49 = vld [vmem:[%s3116_s1 + $0x2c4] ss:$8 sps:$4 sm:$0xff]  }
  0x23   : > { %1202 = vmatpush1.bf16.msra.mxu0 %v2040_v25  ;;  %1158 = vmatprep.subr.bf16.mxu1 %v2126_v53  ;;  %v2170_v25 = vld [vmem:[%s3116_s1 + $0xd0] ss:$8 sps:$4 sm:$0xff]   ;;  %v2117_v52 = vld [vmem:[%s3116_s1 + $0x2c0] ss:$8 sps:$4 sm:$0xff]   ;;  %v2125_v53 = vld [vmem:[%s3116_s1 + $0x2d4] ss:$8 sps:$4 sm:$0xff]  }
  0x24   : > { %1203 = vmatprep.subr.bf16.mxu0 %v2041_v26  ;;  %v2174_v26 = vld [vmem:[%s3116_s1 + $0xe4] ss:$8 sps:$4 sm:$0xff]  }
  0x26   : > { %1159 = vmatpush1.bf16.msra.mxu1 %v2128_v56  ;;  %v2123_v56 = vld [vmem:[%s3116_s1 + $0x2d0] ss:$8 sps:$4 sm:$0xff]  }
  0x27   : > { %1204 = vmatpush1.bf16.msra.mxu0 %v2043_v28  ;;  %1160 = vmatprep.subr.bf16.mxu1 %v2132_v58  ;;  %v2084_v28 = vld [vmem:[%s3116_s1 + $0x260] ss:$8 sps:$4 sm:$0xff]   ;;  %v2131_v58 = vld [vmem:[%s3116_s1 + $0x2e4] ss:$8 sps:$4 sm:$0xff]  }
  0x28   : > { %1205 = vmatprep.subr.bf16.mxu0 %v2044_v30  ;;  %v2176_v30 = vld [vmem:[%s3116_s1 + $0xe0] ss:$8 sps:$4 sm:$0xff]  }
  0x2a   : > { %1161 = vmatpush1.bf16.msra.mxu1 %v2134_v62  ;;  %v2129_v62 = vld [vmem:[%s3116_s1 + $0x2e0] ss:$8 sps:$4 sm:$0xff]  }
  0x2b   : > { %1206 = vmatpush1.bf16.msra.mxu0 %v2046_v33  ;;  %1162 = vmatprep.subr.bf16.mxu1 %v2138_v63  ;;  %v2095_v33 = vld [vmem:[%s3116_s1 + $0x284] ss:$8 sps:$4 sm:$0xff]   ;;  %v393_v63 = vcombine.high %v2447_v57, %v2447_v57  ;;  %v1385_v57 = vld [vmem:[%s3119_s4 + $0x18] sm:$0xff] }
  0x2c   : > { %1207 = vmatprep.subr.bf16.mxu0 %v2047_v34  ;;  %v2182_v34 = vld [vmem:[%s3116_s1 + $0xf0] ss:$8 sps:$4 sm:$0xff]  }
  0x2e   : > { %1163 = vmatpush1.bf16.msra.mxu1 %v2140_v3  ;;  %v1383_v3 = vld [vmem:[%s3119_s4 + $0x8] sm:$0xff] }
  0x2f   : > { %1208 = vmatpush1.bf16.msra.mxu0 %v2049_v38  ;;  %1164 = vmatprep.subr.bf16.mxu1 %v2144_v4  ;;  %v2186_v38 = vld [vmem:[%s3116_s1 + $0x400] ss:$8 sps:$4 sm:$0xff]   ;;  %v2135_v4 = vld [vmem:[%s3116_s1 + $0x2f0] ss:$8 sps:$4 sm:$0xff]  }
  0x30   : > { %1209 = vmatprep.subr.bf16.mxu0 %v2050_v39  ;;  %v2194_v39 = vld [vmem:[%s3116_s1 + $0x414] ss:$8 sps:$4 sm:$0xff]  }
  0x32   : > { %1165 = vmatpush1.bf16.msra.mxu1 %v2146_v7  ;;  %v2228_v7 = vld [vmem:[%s3116_s1 + $0x470] ss:$8 sps:$4 sm:$0xff]  }
  0x33   : > { %1210 = vmatpush1.bf16.msra.mxu0 %v2052_v42  ;;  %1166 = vmatprep.subr.bf16.mxu1 %v2150_v8  ;;  %v2192_v42 = vld [vmem:[%s3116_s1 + $0x410] ss:$8 sps:$4 sm:$0xff]   ;;  %v2672_v8 = vpack.c.bf16 %v1385_v57, %v1383_v3  ;;  %v1398_v3 = vld [vmem:[%s3119_s4 + $0x80] sm:$0xff] }
  0x34   : > { %1211 = vmatprep.subr.bf16.mxu0 %v2053_v43  ;;  %v2200_v43 = vld [vmem:[%s3116_s1 + $0x424] ss:$8 sps:$4 sm:$0xff]  }
  0x36   : > { %1167 = vmatpush1.bf16.msra.mxu1 %v2152_v11 }
  0x37   : > { %1212 = vmatpush1.bf16.msra.mxu0 %v2055_v46  ;;  %1168 = vmatprep.subr.bf16.mxu1 %v2156_v12  ;;  %v2198_v46 = vld [vmem:[%s3116_s1 + $0x420] ss:$8 sps:$4 sm:$0xff]  }
  0x38   : > { %1213 = vmatprep.subr.bf16.mxu0 %v2056_v47  ;;  %v2206_v47 = vld [vmem:[%s3116_s1 + $0x434] ss:$8 sps:$4 sm:$0xff]   ;;  %v1387_v12 = vld [vmem:[%s3119_s4 + $0x28] sm:$0xff] }
  0x3a   : > { %1169 = vmatpush1.bf16.msra.mxu1 %v2158_v16  ;;  %v1718_v16 = vld.sshfl [vmem:[%s2328_s22 + $0x10] sm:$0x3 pattern:$0x76325410] }
  0x3b   : > { %1214 = vmatpush1.bf16.msra.mxu0 %v2058_v50  ;;  %1170 = vmatprep.subr.bf16.mxu1 %v2162_v17  ;;  %v2204_v50 = vld [vmem:[%s3116_s1 + $0x430] ss:$8 sps:$4 sm:$0xff]  }
  0x3c   : > { %1215 = vmatprep.subr.bf16.mxu0 %v2059_v51  ;;  %v2212_v51 = vld [vmem:[%s3116_s1 + $0x444] ss:$8 sps:$4 sm:$0xff]  }
  0x3e   : > { %1171 = vmatpush1.bf16.msra.mxu1 %v2164_v21  ;;  %v1388_v21 = vld [vmem:[%s3119_s4 + $0x30] sm:$0xff] }
  0x3f   : > { %1216 = vmatpush1.bf16.msra.mxu0 %v2061_v54  ;;  %1172 = vmatprep.subr.bf16.mxu1 %v2168_v22  ;;  %v2210_v54 = vld [vmem:[%s3116_s1 + $0x440] ss:$8 sps:$4 sm:$0xff]   ;;  %v2147_v22 = vld [vmem:[%s3116_s1 + $0x310] ss:$8 sps:$4 sm:$0xff]  }
  0x40   : > { %1217 = vmatprep.subr.bf16.mxu0 %v2062_v55  ;;  %v2218_v55 = vld [vmem:[%s3116_s1 + $0x454] ss:$8 sps:$4 sm:$0xff]  }
  0x42   : > { %1173 = vmatpush1.bf16.msra.mxu1 %v2170_v25 }
  0x43   : > { %1218 = vmatpush1.bf16.msra.mxu0 %v2064_v59  ;;  %1174 = vmatprep.subr.bf16.mxu1 %v2174_v26  ;;  %v2216_v59 = vld [vmem:[%s3116_s1 + $0x450] ss:$8 sps:$4 sm:$0xff]  }
  0x44   : > { %1228 = vmatprep.subr.bf16.mxu0 %v2068_v61  ;;  %v2224_v61 = vld [vmem:[%s3116_s1 + $0x464] ss:$8 sps:$4 sm:$0xff]  }
  0x46   : > { %1220 = vmatmul.mubr.bf16.vlgmr.msra.gmra.mrb[0].mxu0 %v2347_v23  ;;  %v2081_v23 = vld [vmem:[%s3116_s1 + $0x250] ss:$8 sps:$4 sm:$0xff]   ;;  %1175 = vmatpush1.bf16.msra.mxu1 %v2176_v30  ;;  %v2153_v30 = vld [vmem:[%s3116_s1 + $0x320] ss:$8 sps:$4 sm:$0xff]  }
  0x47   : > { %1229 = vmatpush1.bf16.msra.mxu0 %v2066_v0  ;;  %1260 = vmatprep.mubr.bf16.mxu0 %v408_v1  ;;  %v2137_v0 = vld [vmem:[%s3116_s1 + $0x2f4] ss:$8 sps:$4 sm:$0xff]   ;;  %v2222_v1 = vld [vmem:[%s3116_s1 + $0x460] ss:$8 sps:$4 sm:$0xff]  }
  0x48   : > { %1230 = vmatprep.subr.bf16.mxu0 %v2071_v2  ;;  %1176 = vmatprep.subr.bf16.mxu1 %v2180_v31  ;;  %v2230_v2 = vld [vmem:[%s3116_s1 + $0x474] ss:$8 sps:$4 sm:$0xff]   ;;  %v1395_v31 = vld [vmem:[%s3119_s4 + $0x68] sm:$0xff] }
  0x4a   : > { %1177 = vmatpush1.bf16.msra.mxu1 %v2182_v34 }
  0x4b   : > { %1231 = vmatpush1.bf16.msra.mxu0 %v2069_v5  ;;  %1310 = vmatprep.subr.bf16.mxu1 %v2188_v35  ;;  %v2664_v5 = vrot.slane %v393_v63, %v2337_v18  ;;  %v1384_v18 = vld [vmem:[%s3119_s4 + $0x10] sm:$0xff] }
  0x4c   : > { %1232 = vmatprep.subr.bf16.mxu0 %v2074_v6  ;;  %v2143_v6 = vld [vmem:[%s3116_s1 + $0x304] ss:$8 sps:$4 sm:$0xff]   ;;  %v2233_v63 = vld [vmem:[%s3116_s1 + $0x3f4] ss:$8 sps:$4 sm:$0xff]  }
  0x4d   : > { %1179 = vmatmul.mubr.bf16.vlgmr.msra.gmra.mrb[0].mxu1 %v2358_v27  ;;  %v2105_v27 = vld [vmem:[%s3116_s1 + $0x2a0] ss:$8 sps:$4 sm:$0xff]   ;;  %v409_v11 = vcombine.high %v2664_v5, %v2664_v5 }
  0x4e   : > { %1311 = vmatpush1.bf16.msra.mxu1 %v2186_v38  ;;  %1342 = vmatprep.mubr.bf16.mxu1 %v2248_v44  ;;  %v2165_v38 = vld [vmem:[%s3116_s1 + $0x340] ss:$8 sps:$4 sm:$0xff]   ;;  %v2183_v44 = vld [vmem:[%s3116_s1 + $0x370] ss:$8 sps:$4 sm:$0xff]  }
  0x4f   : > { %1233 = vmatpush1.bf16.msra.mxu0 %v2072_v9  ;;  %1312 = vmatprep.subr.bf16.mxu1 %v2194_v39  ;;  %v1382_v9 = vld [vmem:[%s3119_s4] sm:$0xff]  ;;  %v2173_v39 = vld [vmem:[%s3116_s1 + $0x354] ss:$8 sps:$4 sm:$0xff]  }
  0x50   : > { %1234 = vmatprep.subr.bf16.mxu0 %v2077_v10  ;;  %v2141_v10 = vld [vmem:[%s3116_s1 + $0x300] ss:$8 sps:$4 sm:$0xff]   ;;  %v2696_v17 = vpack.c.bf16 %v1384_v18, %v1382_v9 }
  0x52   : > { %1313 = vmatpush1.bf16.msra.mxu1 %v2192_v42  ;;  %v2177_v42 = vld [vmem:[%s3116_s1 + $0x360] ss:$8 sps:$4 sm:$0xff]  }
  0x53   : > { %1235 = vmatpush1.bf16.msra.mxu0 %v2075_v13  ;;  %1314 = vmatprep.subr.bf16.mxu1 %v2200_v43  ;;  %v1389_v13 = vld [vmem:[%s3119_s4 + $0x38] sm:$0xff] }
  0x54   : > { %1236 = vmatprep.subr.bf16.mxu0 %v2080_v14  ;;  %v2149_v14 = vld [vmem:[%s3116_s1 + $0x314] ss:$8 sps:$4 sm:$0xff]  }
  0x55   : > { %v2185_v43 = vld [vmem:[%s3116_s1 + $0x374] ss:$8 sps:$4 sm:$0xff]  }
  0x56   : > { %1315 = vmatpush1.bf16.msra.mxu1 %v2198_v46  ;;  %v2197_v46 = vld [vmem:[%s3116_s1 + $0x394] ss:$8 sps:$4 sm:$0xff]  }
  0x57   : > { %1237 = vmatpush1.bf16.msra.mxu0 %v2078_v19  ;;  %1316 = vmatprep.subr.bf16.mxu1 %v2206_v47  ;;  %v2699_v19 = vpack.c.bf16 %v1389_v13, %v1387_v12  ;;  %v2195_v47 = vld [vmem:[%s3116_s1 + $0x390] ss:$8 sps:$4 sm:$0xff]   ;;  %v1407_v12 = vld [vmem:[%s3119_s4 + $0xc8] sm:$0xff] }
  0x58   : > { %1238 = vmatprep.subr.bf16.mxu0 %v2083_v20  ;;  %v1386_v20 = vld [vmem:[%s3119_s4 + $0x20] sm:$0xff]  ;;  %v1409_v13 = vld [vmem:[%s3119_s4 + $0xd8] sm:$0xff] }
  0x59   : > { %v2720_v25 = vpack.c.bf16 %v1388_v21, %v1386_v20  ;;  %v1406_v20 = vld [vmem:[%s3119_s4 + $0xc0] sm:$0xff]  ;;  %v1408_v21 = vld [vmem:[%s3119_s4 + $0xd0] sm:$0xff] }
  0x5a   : > { %1317 = vmatpush1.bf16.msra.mxu1 %v2204_v50  ;;  %v2209_v50 = vld [vmem:[%s3116_s1 + $0x3b4] ss:$8 sps:$4 sm:$0xff]  }
  0x5b   : > { %1239 = vmatpush1.bf16.msra.mxu0 %v2081_v23  ;;  %1318 = vmatprep.subr.bf16.mxu1 %v2212_v51  ;;  %v1393_v23 = vld [vmem:[%s3119_s4 + $0x58] sm:$0xff] }
  0x5c   : > { %1240 = vmatprep.subr.bf16.mxu0 %v2086_v24  ;;  %v2155_v24 = vld [vmem:[%s3116_s1 + $0x324] ss:$8 sps:$4 sm:$0xff]   ;;  %v2207_v51 = vld [vmem:[%s3116_s1 + $0x3b0] ss:$8 sps:$4 sm:$0xff]  }
  0x5e   : > { %1319 = vmatpush1.bf16.msra.mxu1 %v2210_v54  ;;  %v2221_v54 = vld [vmem:[%s3116_s1 + $0x3d4] ss:$8 sps:$4 sm:$0xff]  }
  0x5f   : > { %1241 = vmatpush1.bf16.msra.mxu0 %v2084_v28  ;;  %1320 = vmatprep.subr.bf16.mxu1 %v2218_v55  ;;  %v1390_v28 = vld [vmem:[%s3119_s4 + $0x40] sm:$0xff]  ;;  %v2219_v55 = vld [vmem:[%s3116_s1 + $0x3d0] ss:$8 sps:$4 sm:$0xff]  }
  0x60   : > { %1242 = vmatprep.subr.bf16.mxu0 %v2089_v29  ;;  %v1392_v29 = vld [vmem:[%s3119_s4 + $0x50] sm:$0xff] }
  0x61   : > { %v2744_v34 = vpack.c.bf16 %v1392_v29, %v1390_v28  ;;  %v1410_v28 = vld [vmem:[%s3119_s4 + $0xe0] sm:$0xff]  ;;  %v1412_v29 = vld [vmem:[%s3119_s4 + $0xf0] sm:$0xff] }
  0x62   : > { %1321 = vmatpush1.bf16.msra.mxu1 %v2216_v59  ;;  %v1396_v59 = vld [vmem:[%s3119_s4 + $0x70] sm:$0xff] }
  0x63   : > { %1243 = vmatpush1.bf16.msra.mxu0 %v2087_v32  ;;  %1322 = vmatprep.subr.bf16.mxu1 %v2224_v61  ;;  %v1397_v32 = vld [vmem:[%s3119_s4 + $0x78] sm:$0xff]  ;;  %v2225_v61 = vld [vmem:[%s3116_s1 + $0x3e0] ss:$8 sps:$4 sm:$0xff]  }
  0x64   : > { %1244 = vmatprep.subr.bf16.mxu0 %v2095_v33  ;;  %v2161_v33 = vld [vmem:[%s3116_s1 + $0x334] ss:$8 sps:$4 sm:$0xff]   ;;  %v2747_v35 = vpack.c.bf16 %v1397_v32, %v1395_v31  ;;  %v2910_v31 = vpack.c.bf16 %v1412_v29, %v1410_v28 }
  0x65   : > { %v1444_v29 = vld [vmem:[%s3119_s4 + $0x1f0] sm:$0xff] }
  0x66   : > { %1323 = vmatpush1.bf16.msra.mxu1 %v2222_v1  ;;  %v1399_v1 = vld [vmem:[%s3119_s4 + $0x88] sm:$0xff] }
  0x67   : > { %1245 = vmatpush1.bf16.msra.mxu0 %v2093_v36  ;;  %1324 = vmatprep.subr.bf16.mxu1 %v2230_v2  ;;  %v2159_v36 = vld [vmem:[%s3116_s1 + $0x330] ss:$8 sps:$4 sm:$0xff]  }
  0x68   : > { %1246 = vmatprep.subr.bf16.mxu0 %v2101_v37  ;;  %v2167_v37 = vld [vmem:[%s3116_s1 + $0x344] ss:$8 sps:$4 sm:$0xff]   ;;  %v1401_v2 = vld [vmem:[%s3119_s4 + $0x98] sm:$0xff] }
  0x69   : > { %v2844_v57 = vpack.c.bf16 %v1401_v2, %v1399_v1  ;;  %v1437_v1 = vld [vmem:[%s3119_s4 + $0x1b8] sm:$0xff] }
  0x6a   : > { %1325 = vmatpush1.bf16.msra.mxu1 %v2228_v7  ;;  %v1405_v7 = vld [vmem:[%s3119_s4 + $0xb8] sm:$0xff] }
  0x6b   : > { %1247 = vmatpush1.bf16.msra.mxu0 %v2099_v40  ;;  %1867 = vmatprep.subr.bf16.mxu1 %v2672_v8  ;;  %v2171_v40 = vld [vmem:[%s3116_s1 + $0x350] ss:$8 sps:$4 sm:$0xff]  }
  0x6c   : > { %1248 = vmatprep.subr.bf16.mxu0 %v2107_v41  ;;  %v2179_v41 = vld [vmem:[%s3116_s1 + $0x364] ss:$8 sps:$4 sm:$0xff]  }
  0x6d   : > { %1343 = vmatmul.mubr.bf16.vlgmr.msra.gmra.mrb[4].mxu1 %v1718_v16  ;;  %v2876_v16 = vpack.c.bf16 %v1409_v13, %v1407_v12  ;;  %v1438_v12 = vld [vmem:[%s3119_s4 + $0x1c0] sm:$0xff]  ;;  %v1440_v13 = vld [vmem:[%s3119_s4 + $0x1d0] sm:$0xff] }
  0x6e   : > { %1869 = vmatpush1.bf16.msra.mxu1 %v2696_v17 }
  0x6f   : > { %1249 = vmatpush1.bf16.msra.mxu0 %v2105_v27  ;;  %1871 = vmatprep.subr.bf16.mxu1 %v2699_v19  ;;  %v2191_v27 = vld [vmem:[%s3116_s1 + $0x384] ss:$8 sps:$4 sm:$0xff]  }
  0x70   : > { %1250 = vmatprep.subr.bf16.mxu0 %v2113_v45  ;;  %v2189_v45 = vld [vmem:[%s3116_s1 + $0x380] ss:$8 sps:$4 sm:$0xff]  }
  0x72   : > { %1873 = vmatpush1.bf16.msra.mxu1 %v2720_v25 }
  0x73   : > { %1251 = vmatpush1.bf16.msra.mxu0 %v2111_v48  ;;  %v2203_v48 = vld [vmem:[%s3116_s1 + $0x3a4] ss:$8 sps:$4 sm:$0xff]  }
  0x74   : > { %1252 = vmatprep.subr.bf16.mxu0 %v2119_v49  ;;  %v2201_v49 = vld [vmem:[%s3116_s1 + $0x3a0] ss:$8 sps:$4 sm:$0xff]  }
  0x77   : > { %1253 = vmatpush1.bf16.msra.mxu0 %v2117_v52  ;;  %v2215_v52 = vld [vmem:[%s3116_s1 + $0x3c4] ss:$8 sps:$4 sm:$0xff]  }
  0x78   : > { %1254 = vmatprep.subr.bf16.mxu0 %v2125_v53  ;;  %v2213_v53 = vld [vmem:[%s3116_s1 + $0x3c0] ss:$8 sps:$4 sm:$0xff]  }
  0x7b   : > { %1255 = vmatpush1.bf16.msra.mxu0 %v2123_v56  ;;  %v2227_v56 = vld [vmem:[%s3116_s1 + $0x3e4] ss:$8 sps:$4 sm:$0xff]  }
  0x7c   : > { %1256 = vmatprep.subr.bf16.mxu0 %v2131_v58  ;;  %v1394_v58 = vld [vmem:[%s3119_s4 + $0x60] sm:$0xff] }
  0x7f   : > { %1257 = vmatpush1.bf16.msra.mxu0 %v2129_v62  ;;  %v2826_v62 = vpack.c.bf16 %v1396_v59, %v1394_v58  ;;  %v1430_v59 = vld [vmem:[%s3119_s4 + $0x180] sm:$0xff] }
  0x80   : > { %1258 = vmatprep.subr.bf16.mxu0 %v2137_v0  ;;  %v2231_v0 = vld [vmem:[%s3116_s1 + $0x3f0] ss:$8 sps:$4 sm:$0xff]  }
  0x83   : > { %1259 = vmatpush1.bf16.msra.mxu0 %v2135_v4  ;;  %v1400_v4 = vld [vmem:[%s3119_s4 + $0x90] sm:$0xff] }
  0x84   : > { %1269 = vmatprep.subr.bf16.mxu0 %v2143_v6  ;;  %v1403_v6 = vld [vmem:[%s3119_s4 + $0xa8] sm:$0xff]  ;;  %v2855_v9 = vpack.c.bf16 %v1400_v4, %v1398_v3  ;;  %v1434_v3 = vld [vmem:[%s3119_s4 + $0x1a0] sm:$0xff]  ;;  %v1436_v4 = vld [vmem:[%s3119_s4 + $0x1b0] sm:$0xff] }
  0x85   : > { %v2857_v18 = vpack.c.bf16 %v1405_v7, %v1403_v6  ;;  %v3012_v6 = vpack.c.bf16 %v1436_v4, %v1434_v3  ;;  %v1439_v7 = vld [vmem:[%s3119_s4 + $0x1c8] sm:$0xff] }
  0x86   : > { %1261 = vmatmul.mubr.bf16.vlgmr.msra.gmra.mrb[0].mxu0 %v2457_v60  ;;  %v1391_v60 = vld [vmem:[%s3119_s4 + $0x48] sm:$0xff] }
  0x87   : > { %1270 = vmatpush1.bf16.msra.mxu0 %v2141_v10  ;;  %1301 = vmatprep.mubr.bf16.mxu0 %v409_v11  ;;  %v2723_v26 = vpack.c.bf16 %v1393_v23, %v1391_v60  ;;  %v1402_v10 = vld [vmem:[%s3119_s4 + $0xa0] sm:$0xff]  ;;  %v1404_v11 = vld [vmem:[%s3119_s4 + $0xb0] sm:$0xff]  ;;  %v1413_v60 = vld [vmem:[%s3119_s4 + $0xf8] sm:$0xff]  ;;  %v2891_v23 = vpack.c.bf16 %v1408_v21, %v1406_v20  ;;  %v3030_v20 = vpack.c.bf16 %v1440_v13, %v1438_v12 }
  0x88   : > { %1271 = vmatprep.subr.bf16.mxu0 %v2149_v14  ;;  %v2873_v14 = vpack.c.bf16 %v1404_v11, %v1402_v10  ;;  %v1441_v10 = vld [vmem:[%s3119_s4 + $0x1d8] sm:$0xff]  ;;  %v1443_v21 = vld [vmem:[%s3119_s4 + $0x1e8] sm:$0xff] }
  0x89   : > { %1875 = vmatprep.subr.bf16.mxu1 %v2723_v26  ;;  %v3022_v11 = vpack.c.bf16 %v1441_v10, %v1439_v7 }
  0x8a   : > { %1877 = vmatpush1.bf16.msra.mxu1 %v2744_v34 }
  0x8b   : > { %1272 = vmatpush1.bf16.msra.mxu0 %v2147_v22  ;;  %1879 = vmatprep.subr.bf16.mxu1 %v2747_v35  ;;  %v1411_v22 = vld [vmem:[%s3119_s4 + $0xe8] sm:$0xff] }
  0x8c   : > { %1273 = vmatprep.subr.bf16.mxu0 %v2155_v24  ;;  %v2895_v24 = vpack.c.bf16 %v1413_v60, %v1411_v22  ;;  %v1445_v22 = vld [vmem:[%s3119_s4 + $0x1f8] sm:$0xff]  ;;  %v1442_v60 = vld [vmem:[%s3119_s4 + $0x1e0] sm:$0xff] }
  0x8d   : > { %v3042_v28 = vpack.c.bf16 %v1445_v22, %v1443_v21 }
  0x8e   : > { %1881 = vmatpush1.bf16.msra.mxu1 %v2826_v62 }
  0x8f   : > { %1274 = vmatpush1.bf16.msra.mxu0 %v2153_v30  ;;  %1883 = vmatprep.subr.bf16.mxu1 %v2844_v57  ;;  %v1415_v30 = vld [vmem:[%s3119_s4 + $0x108] sm:$0xff] }
  0x90   : > { %1275 = vmatprep.subr.bf16.mxu0 %v2161_v33  ;;  %v1414_v33 = vld [vmem:[%s3119_s4 + $0x100] sm:$0xff] }
  0x92   : > { %1885 = vmatpush1.bf16.msra.mxu1 %v2855_v9 }
  0x93   : > { %1276 = vmatpush1.bf16.msra.mxu0 %v2159_v36  ;;  %1887 = vmatprep.subr.bf16.mxu1 %v2857_v18  ;;  %v1416_v36 = vld [vmem:[%s3119_s4 + $0x110] sm:$0xff] }
  0x94   : > { %1277 = vmatprep.subr.bf16.mxu0 %v2167_v37  ;;  %v1419_v37 = vld [vmem:[%s3119_s4 + $0x128] sm:$0xff] }
  0x96   : > { %1889 = vmatpush1.bf16.msra.mxu1 %v2873_v14 }
  0x97   : > { %1278 = vmatpush1.bf16.msra.mxu0 %v2165_v38  ;;  %1891 = vmatprep.subr.bf16.mxu1 %v2876_v16  ;;  %v1421_v38 = vld [vmem:[%s3119_s4 + $0x138] sm:$0xff] }
  0x98   : > { %1279 = vmatprep.subr.bf16.mxu0 %v2173_v39  ;;  %v2928_v39 = vpack.c.bf16 %v1416_v36, %v1414_v33 }
  0x9a   : > { %1893 = vmatpush1.bf16.msra.mxu1 %v2891_v23 }
  0x9b   : > { %1280 = vmatpush1.bf16.msra.mxu0 %v2171_v40  ;;  %1895 = vmatprep.subr.bf16.mxu1 %v2895_v24  ;;  %v2931_v40 = vpack.c.bf16 %v1421_v38, %v1419_v37 }
  0x9c   : > { %1281 = vmatprep.subr.bf16.mxu0 %v2179_v41  ;;  %v1418_v41 = vld [vmem:[%s3119_s4 + $0x120] sm:$0xff] }
  0x9e   : > { %1897 = vmatpush1.bf16.msra.mxu1 %v2910_v31 }
  0x9f   : > { %1282 = vmatpush1.bf16.msra.mxu0 %v2177_v42  ;;  %v1420_v42 = vld [vmem:[%s3119_s4 + $0x130] sm:$0xff] }
  0xa0   : > { %1283 = vmatprep.subr.bf16.mxu0 %v2185_v43  ;;  %v1423_v43 = vld [vmem:[%s3119_s4 + $0x148] sm:$0xff] }
  0xa3   : > { %1284 = vmatpush1.bf16.msra.mxu0 %v2183_v44  ;;  %v1425_v44 = vld [vmem:[%s3119_s4 + $0x158] sm:$0xff] }
  0xa4   : > { %1285 = vmatprep.subr.bf16.mxu0 %v2191_v27  ;;  %v2946_v27 = vpack.c.bf16 %v1420_v42, %v1418_v41 }
  0xa7   : > { %1286 = vmatpush1.bf16.msra.mxu0 %v2189_v45  ;;  %v2949_v45 = vpack.c.bf16 %v1425_v44, %v1423_v43 }
  0xa8   : > { %1287 = vmatprep.subr.bf16.mxu0 %v2197_v46  ;;  %v1422_v46 = vld [vmem:[%s3119_s4 + $0x140] sm:$0xff] }
  0xab   : > { %1288 = vmatpush1.bf16.msra.mxu0 %v2195_v47  ;;  %v1424_v47 = vld [vmem:[%s3119_s4 + $0x150] sm:$0xff] }
  0xac   : > { %1289 = vmatprep.subr.bf16.mxu0 %v2203_v48  ;;  %v2958_v48 = vpack.c.bf16 %v1424_v47, %v1422_v46 }
  0xaf   : > { %1290 = vmatpush1.bf16.msra.mxu0 %v2201_v49  ;;  %v1427_v49 = vld [vmem:[%s3119_s4 + $0x168] sm:$0xff] }
  0xb0   : > { %1291 = vmatprep.subr.bf16.mxu0 %v2209_v50  ;;  %v1429_v50 = vld [vmem:[%s3119_s4 + $0x178] sm:$0xff] }
  0xb3   : > { %1292 = vmatpush1.bf16.msra.mxu0 %v2207_v51  ;;  %v2968_v51 = vpack.c.bf16 %v1429_v50, %v1427_v49 }
  0xb4   : > { %1293 = vmatprep.subr.bf16.mxu0 %v2215_v52  ;;  %v1426_v52 = vld [vmem:[%s3119_s4 + $0x160] sm:$0xff] }
  0xb7   : > { %1294 = vmatpush1.bf16.msra.mxu0 %v2213_v53  ;;  %v1428_v53 = vld [vmem:[%s3119_s4 + $0x170] sm:$0xff] }
  0xb8   : > { %1295 = vmatprep.subr.bf16.mxu0 %v2221_v54  ;;  %v2977_v54 = vpack.c.bf16 %v1428_v53, %v1426_v52 }
  0xbb   : > { %1296 = vmatpush1.bf16.msra.mxu0 %v2219_v55  ;;  %v1431_v55 = vld [vmem:[%s3119_s4 + $0x188] sm:$0xff] }
  0xbc   : > { %1297 = vmatprep.subr.bf16.mxu0 %v2227_v56  ;;  %v1433_v56 = vld [vmem:[%s3119_s4 + $0x198] sm:$0xff] }
  0xbd   : > { %v2986_v58 = vpack.c.bf16 %v1433_v56, %v1431_v55 }
  0xbf   : > { %1298 = vmatpush1.bf16.msra.mxu0 %v2225_v61  ;;  %v1432_v61 = vld [vmem:[%s3119_s4 + $0x190] sm:$0xff] }
  0xc0   : > { %1299 = vmatprep.subr.bf16.mxu0 %v2233_v63  ;;  %v2994_v63 = vpack.c.bf16 %v1432_v61, %v1430_v59 }
  0xc3   : > { %1300 = vmatpush1.bf16.msra.mxu0 %v2231_v0  ;;  %v1435_v0 = vld [vmem:[%s3119_s4 + $0x1a8] sm:$0xff] }
  0xc4   : > { %v3004_v2 = vpack.c.bf16 %v1437_v1, %v1435_v0 }
  0xc6   : > { %1302 = vmatmul.mubr.bf16.vlgmr.msra.gmra.mrb[0].mxu0 %v2664_v5  ;;  %v1417_v5 = vld [vmem:[%s3119_s4 + $0x118] sm:$0xff] }
  0xc7   : > { %v2913_v32 = vpack.c.bf16 %v1417_v5, %v1415_v30  ;;  %v3048_v30 = vpack.c.bf16 %v1444_v29, %v1442_v60 }
  0xc9   : > { %1899 = vmatprep.subr.bf16.mxu1 %v2913_v32 }
  0xca   : > { %1901 = vmatpush1.bf16.msra.mxu1 %v2928_v39 }
  0xcb   : > { %1903 = vmatprep.subr.bf16.mxu1 %v2931_v40 }
  0xce   : > { %1905 = vmatpush1.bf16.msra.mxu1 %v2946_v27 }
  0xcf   : > { %1907 = vmatprep.subr.bf16.mxu1 %v2949_v45 }
  0xd2   : > { %1909 = vmatpush1.bf16.msra.mxu1 %v2958_v48 }
  0xd3   : > { %1911 = vmatprep.subr.bf16.mxu1 %v2968_v51 }
  0xd6   : > { %1913 = vmatpush1.bf16.msra.mxu1 %v2977_v54 }
  0xd7   : > { %1915 = vmatprep.subr.bf16.mxu1 %v2986_v58 }
  0xda   : > { %1917 = vmatpush1.bf16.msra.mxu1 %v2994_v63 }
  0xdb   : > { %1919 = vmatprep.subr.bf16.mxu1 %v3004_v2 }
  0xde   : > { %1921 = vmatpush1.bf16.msra.mxu1 %v3012_v6 }
  0xdf   : > { %1923 = vmatprep.subr.bf16.mxu1 %v3022_v11 }
  0xe2   : > { %1925 = vmatpush1.bf16.msra.mxu1 %v3030_v20 }
  0xe3   : > { %1927 = vmatprep.subr.bf16.mxu1 %v3042_v28 }
  0xe6   : > { %1929 = vmatpush1.bf16.msra.mxu1 %v3048_v30 }
  0xe7   : > { %1931 = vmatprep.subr.bf16.mxu1 %v2672_v8 }
 0x120   : > { %v1180_v5 = vpop.f32.mrb[0].mxu1 }
 0x121   : > { %v1182_v33 = vpop.f32.mrb[1].mxu1 }
 0x122   : > { %v1184_v36 = vpop.f32.mrb[2].mxu1 }
 0x123   : > { %v1185_v37 = vpop.f32.mrb[3].mxu1 }
 0x140   : > { %v1344_v38 = vpop.f32.mrb[4].mxu1 }
 0x141   : > { %v1346_v41 = vpop.f32.mrb[5].mxu1 }
 0x142   : > { %v1348_v42 = vpop.f32.mrb[6].mxu1 }
 0x143   : > { %v1349_v43 = vpop.f32.mrb[7].mxu1 }
 0x199   : > { %v1303_v44 = vpop.f32.mrb[0].mxu0 }
 0x19a   : > { %v1994_v46 = vadd.f32 %v1303_v44, %v1180_v5  ;;  %v1305_v47 = vpop.f32.mrb[1].mxu0 }
 0x19b   : > { %v1996_v49 = vadd.f32 %v1305_v47, %v1182_v33  ;;  %v1307_v50 = vpop.f32.mrb[2].mxu0 }
 0x19c   : > { %v3053_v52 = vadd.f32 %v1994_v46, %v1344_v38  ;;  %v1308_v53 = vpop.f32.mrb[3].mxu0 }
 0x19d   : > { %v3055_v55 = vadd.f32 %v1996_v49, %v1346_v41 }
 0x19e   : > { %v1352_v8 = vsel %vm1351_vm0, %v3053_v52, 0.0 }
 0x19f   : > { %v1353_v56 = vrot.slane %v1352_v8, 4  ;;  %v1359_v59 = vsel %vm1351_vm0, %v3055_v55, 0.0  ;;  %v1367_v61 = vmul.f32 %v3055_v55, %v3055_v55 }
 0x1a0   : > { %v1360_v0 = vrot.slane %v1359_v59, 4 }
 0x1a1   : > { %v1354_v1 = vadd.f32 %v1353_v56, %v1352_v8  ;;  %v1375_v3 = vsel %vm1351_vm0, %v1367_v61, 0.0 }
 0x1a2   : > { %v1361_v4 = vadd.f32 %v1360_v0, %v1359_v59  ;;  %v1376_v7 = vrot.slane %v1375_v3, 4 }
 0x1a3   : > { %v1355_v10 = vrot.slane %v1354_v1, 2 }
 0x1a4   : > { %v1362_v12 = vrot.slane %v1361_v4, 2  ;;  %v1377_v13 = vadd.f32 %v1376_v7, %v1375_v3 }
 0x1a5   : > { %v1356_v21 = vadd.f32 %v1355_v10, %v1354_v1 }
 0x1a6   : > { %v1363_v22 = vadd.f32 %v1362_v12, %v1361_v4  ;;  %v1378_v60 = vrot.slane %v1377_v13, 2 }
 0x1a7   : > { %v1357_v29 = vrot.slane %v1356_v21, 1 }
 0x1a8   : > { %v1364_v5 = vrot.slane %v1363_v22, 1  ;;  %v1379_v33 = vadd.f32 %v1378_v60, %v1377_v13 }
 0x1a9   : > { %v1358_v38 = vadd.f32 %v1357_v29, %v1356_v21 }
 0x1aa   : > { %v1365_v36 = vadd.f32 %v1364_v5, %v1363_v22  ;;  %v1380_v37 = vrot.slane %v1379_v33, 1 }
 0x1ac   : > { %1510 = vmatprep.mubr.f32.mxu1 %v1365_v36  ;;  %v1381_v41 = vadd.f32 %v1380_v37, %v1379_v33 }
 0x1ad   : > { %1511 = vmatmul.mubr.f32.vlgmr.msra.gmra.mrb[8].mxu1 %v1358_v38 }
 0x1ae   : > { %1933 = vmatpush1.bf16.msra.mxu1 %v2696_v17  ;;  %1583 = vmatprep.mubr.f32.mxu1 %v1381_v41  ;;  %v1366_v17 = vmul.f32 %v3053_v52, %v3053_v52 }
 0x1af   : > { %1935 = vmatprep.subr.bf16.mxu1 %v2699_v19 }
 0x1b0   : > { %v1368_v19 = vsel %vm1351_vm0, %v1366_v17, 0.0 }
 0x1b2   : > { %1937 = vmatpush1.bf16.msra.mxu1 %v2720_v25  ;;  %v1369_v25 = vrot.slane %v1368_v19, 4 }
 0x1b3   : > { %1939 = vmatprep.subr.bf16.mxu1 %v2723_v26 }
 0x1b4   : > { %v1370_v26 = vadd.f32 %v1369_v25, %v1368_v19 }
 0x1b6   : > { %1941 = vmatpush1.bf16.msra.mxu1 %v2744_v34  ;;  %v1371_v34 = vrot.slane %v1370_v26, 2 }
 0x1b7   : > { %1943 = vmatprep.subr.bf16.mxu1 %v2747_v35 }
 0x1b8   : > { %v1372_v35 = vadd.f32 %v1371_v34, %v1370_v26 }
 0x1ba   : > { %1945 = vmatpush1.bf16.msra.mxu1 %v2826_v62  ;;  %v1373_v62 = vrot.slane %v1372_v35, 1 }
 0x1bb   : > { %1947 = vmatprep.subr.bf16.mxu1 %v2844_v57 }
 0x1bc   : > { %v1374_v57 = vadd.f32 %v1373_v62, %v1372_v35 }
 0x1be   : > { %1949 = vmatpush1.bf16.msra.mxu1 %v2855_v9  ;;  %v1598_v9 = vsub.s32 0, %v2323_v15 }
 0x1bf   : > { %1951 = vmatprep.subr.bf16.mxu1 %v2857_v18 }
 0x1c2   : > { %1953 = vmatpush1.bf16.msra.mxu1 %v2873_v14 }
 0x1c3   : > { %1955 = vmatprep.subr.bf16.mxu1 %v2876_v16 }
 0x1c6   : > { %1957 = vmatpush1.bf16.msra.mxu1 %v2891_v23 }
 0x1c7   : > { %1959 = vmatprep.subr.bf16.mxu1 %v2895_v24 }
 0x1ca   : > { %1961 = vmatpush1.bf16.msra.mxu1 %v2910_v31 }
 0x1cb   : > { %1963 = vmatprep.subr.bf16.mxu1 %v2913_v32 }
 0x1ce   : > { %1965 = vmatpush1.bf16.msra.mxu1 %v2928_v39 }
 0x1cf   : > { %1967 = vmatprep.subr.bf16.mxu1 %v2931_v40 }
 0x1d2   : > { %1969 = vmatpush1.bf16.msra.mxu1 %v2946_v27 }
 0x1d3   : > { %1971 = vmatprep.subr.bf16.mxu1 %v2949_v45 }
 0x1d6   : > { %1973 = vmatpush1.bf16.msra.mxu1 %v2958_v48 }
 0x1d7   : > { %1975 = vmatprep.subr.bf16.mxu1 %v2968_v51 }
 0x1da   : > { %1977 = vmatpush1.bf16.msra.mxu1 %v2977_v54 }
 0x1db   : > { %1979 = vmatprep.subr.bf16.mxu1 %v2986_v58 }
 0x1de   : > { %1981 = vmatpush1.bf16.msra.mxu1 %v2994_v63 }
 0x1df   : > { %1983 = vmatprep.subr.bf16.mxu1 %v3004_v2  ;;  %v1628_v2 = vsub.s32 1, %v2323_v15 }
 0x1e2   : > { %1985 = vmatpush1.bf16.msra.mxu1 %v3012_v6  ;;  %v1620_v6 = vld [vmem:[%s3117_s2] sm:$0x3] }
 0x1e3   : > { %1987 = vmatprep.subr.bf16.mxu1 %v3022_v11  ;;  %v1625_v43 = vrot.slane %v1620_v6, %v1598_v9  ;;  %v1629_v47 = vrot.slane %v1620_v6, %v1628_v2 }
 0x1e6   : > { %1989 = vmatpush1.bf16.msra.mxu1 %v3030_v20  ;;  %v1634_v20 = vld [vmem:[%s3118_s3] sm:$0x3] }
 0x1e7   : > { %1991 = vmatprep.subr.bf16.mxu1 %v3042_v28  ;;  %v1639_v49 = vrot.slane %v1634_v20, %v1598_v9  ;;  %v1643_v50 = vrot.slane %v1634_v20, %v1628_v2 }
 0x1ea   : > { %1993 = vmatpush1.bf16.msra.mxu1 %v3048_v30 }
 0x1ed   : > { %1584 = vmatmul.mubr.f32.vlgmr.msra.gmra.mrb[10].mxu1 %v1374_v57 }
 0x280   : > { %v1512_v18 = vpop.f32.mrb[8].mxu1 }
 0x281   : > { %v1517_v14 = vmul.f32 0.03125, %v1512_v18  ;;  %v1514_v16 = vpop.f32.mrb[9].mxu1 }
 0x282   : > { %v1518_v23 = vmul.f32 0.03125, %v1514_v16 }
 0x283   : > { %v1599_v24 = vrot.slane %v1517_v14, %v1598_v9  ;;  %v1592_v39 = vmul.f32 %v1517_v14, %v1517_v14 }
 0x284   : > { %v1603_v31 = vrot.slane %v1518_v23, %v1598_v9  ;;  %v1593_v45 = vmul.f32 %v1518_v23, %v1518_v23 }
 0x285   : > { %v1604_v30 = vsub.f32 %v3053_v52, %v1599_v24 }
 0x286   : > { %v1605_v44 = vsub.f32 %v3055_v55, %v1603_v31 }
 0x2c0   : > { %v1585_v32 = vpop.f32.mrb[10].mxu1 }
 0x2c1   : > { %v1590_v40 = vmul.f32 0.03125, %v1585_v32  ;;  %v1587_v27 = vpop.f32.mrb[11].mxu1 }
 0x2c2   : > { %v1591_v48 = vmul.f32 0.03125, %v1587_v27 }
 0x2c3   : > { %v1594_v51 = vsub.f32 %v1590_v40, %v1592_v39 }
 0x2c4   : > { %v1595_v54 = vsub.f32 %v1591_v48, %v1593_v45 }
 0x2c5   : > { %v1606_v58 = vadd.f32 1e-05, %v1594_v51 }
 0x2c6   : > { %v1607_v63 = vadd.f32 1e-05, %v1595_v54 }
 0x2c7   : > { %2235 = vrsqrt.f32 %v1606_v58 }
 0x2c8   : > { %2237 = vrsqrt.f32 %v1607_v63 }
 0x2d1   : > { %v2236_v11 = vpop.eup %2235 }
 0x2d2   : > { %v2238_v28 = vpop.eup %2237  ;;  %v1613_v42 = vrot.slane %v2236_v11, %v1598_v9 }
 0x2d3   : > { %v1617_v46 = vrot.slane %v2238_v28, %v1598_v9 }
 0x2d4   : > { %v1618_v15 = vmul.f32 %v1613_v42, %v1604_v30 }
 0x2d5   : > { %v1619_v53 = vmul.f32 %v1617_v46, %v1605_v44 }
 0x2d6   : > { %v1632_v8 = vmul.f32 %v1625_v43, %v1618_v15 }
 0x2d7   : > { %v1633_v56 = vmul.f32 %v1629_v47, %v1619_v53 }
 0x2d8   : > { %v1646_v59 = vadd.f32 %v1639_v49, %v1632_v8 }
 0x2d9   : > { %v1647_v61 = vadd.f32 %v1643_v50, %v1633_v56 }
 0x2da   : > { %v1648_v0 = vmax.f32 %v1646_v59, 0.0 }
 0x2db   : > { %v1649_v1 = vmax.f32 %v1647_v61, 0.0 }
 0x2dd   : > { %v1652_v52 = vcombine.low %v1648_v0, %v1649_v1 }
 0x2df   : > { %1654 = vst [vmem:[%s224_s17] sm:$0xff] %v1652_v52 }
 0x2e0 PF: > { %s15_s18 = sadd.s32 1, %s2245_s18  }
 0x2e1   : > { %p12_p4 = scmp.ge.s32.totalorder %s15_s18, 4  }
 0x2e3   :  { %14 = sbr.rel (!%p12_p4) target bundleno = 1 (0x1), region = 70 }

// kernel: vae_forward.9
= control target key start
LH: loop header
LB: loop body
LE: loop exit
PB: predicated region body
PF: predicated region fallthrough
CT: control target
= control target key end

     0   :  { %s9745_s0 = inlined_call_operand.vmem [shape: f32[2,1024], index: 0, kind: input, shape index: {}]   ;;  %s9746_s1 = inlined_call_operand.vmem [shape: bf16[1024,512], index: 1, kind: input, shape index: {}]   ;;  %s9747_s2 = inlined_call_operand.vmem [shape: f32[1,512], index: 2, kind: input, shape index: {}]   ;;  %s9748_s3 = inlined_call_operand.vmem [shape: bf16[512,256], index: 3, kind: input, shape index: {}]   ;;  %s9749_s4 = inlined_call_operand.vmem [shape: f32[1,256], index: 4, kind: input, shape index: {}]   ;;  %s9750_s5 = inlined_call_operand.vmem [shape: bf16[256,128], index: 5, kind: input, shape index: {}]   ;;  %s9751_s6 = inlined_call_operand.vmem [shape: f32[1,128], index: 6, kind: input, shape index: {}]   ;;  %s9752_s7 = inlined_call_operand.vmem [shape: bf16[128,256], index: 7, kind: input, shape index: {}]   ;;  %s9753_s8 = inlined_call_operand.vmem [shape: f32[1,256], index: 8, kind: input, shape index: {}]   ;;  %s9754_s9 = inlined_call_operand.vmem [shape: f32[2,128], index: 9, kind: input, shape index: {}]   ;;  %s9755_s10 = inlined_call_operand.vmem [shape: bf16[128,128], index: 10, kind: input, shape index: {}]   ;;  %s9756_s11 = inlined_call_operand.vmem [shape: f32[1,128], index: 11, kind: input, shape index: {}]   ;;  %s9757_s12 = inlined_call_operand.vmem [shape: bf16[128,256], index: 12, kind: input, shape index: {}]   ;;  %s9758_s13 = inlined_call_operand.vmem [shape: f32[1,256], index: 13, kind: input, shape index: {}]   ;;  %s9759_s14 = inlined_call_operand.vmem [shape: bf16[256,512], index: 14, kind: input, shape index: {}]   ;;  %s9760_s15 = inlined_call_operand.vmem [shape: f32[1,512], index: 15, kind: input, shape index: {}]   ;;  %s9761_s16 = inlined_call_operand.vmem [shape: bf16[512,1024], index: 16, kind: input, shape index: {}]   ;;  %s9762_s17 = inlined_call_operand.vmem [shape: f32[1,1024], index: 17, kind: input, shape index: {}]   ;;  %s9763_s18 = inlined_call_operand.hbm [shape: f32[2,1024], index: 18, kind: output, shape index: {}]  }
   0x1   :  { %9766 = sst [smem:[#allocation5_spill]] %s9745_s0 }
   0x2   :  { %9767 = sst [smem:[#allocation6_spill]] %s9746_s1 }
   0x3   :  { %9768 = sst [smem:[#allocation7_spill]] %s9747_s2 }
   0x4   :  { %s9769_s29 = sld [smem:[#allocation6_spill]]  ;;  %v7355_v36 = vmov 1983009808   ;;  %v69_v38 = vlaneseq  ;;  %s9770_s23 = sld [smem:[#allocation5_spill]] }
   0x5   :  { %v67_v37 = vunpack.c.l.s4 %v7355_v36 }
   0x6   :  { %v7572_v43 = vshrl.u32 %v69_v38, 7 }
   0x7   :  { %v68_v42 = vunpack.c.0.s8 %v67_v37 }
   0x9   :  { %v7590_v49 = vsub.s32 %v68_v42, %v7572_v43 }
   0xa   :  { %v6591_v0 = vld [vmem:[%s9769_s29 + $0x4] ss:$16 sps:$4 sm:$0xff]   ;;  %v6593_v1 = vld [vmem:[%s9769_s29 + $0xc] ss:$16 sps:$4 sm:$0xff]   ;;  %v6595_v2 = vld [vmem:[%s9769_s29] ss:$16 sps:$4 sm:$0xff]  }
   0xb   :  { %1673 = vmatprep.subr.bf16.mxu0 %v6591_v0  ;;  %v6596_v3 = vld [vmem:[%s9769_s29 + $0x8] ss:$16 sps:$4 sm:$0xff]   ;;  %1837 = vmatprep.subr.bf16.mxu1 %v6593_v1  ;;  %v6597_v4 = vld [vmem:[%s9769_s29 + $0x24] ss:$16 sps:$4 sm:$0xff]   ;;  %v6599_v5 = vld [vmem:[%s9769_s29 + $0x2c] ss:$16 sps:$4 sm:$0xff]  }
   0xc   :  { %1674 = vmatpush1.bf16.msra.mxu0 %v6595_v2  ;;  %1838 = vmatpush1.bf16.msra.mxu1 %v6596_v3  ;;  %v6601_v6 = vld [vmem:[%s9769_s29 + $0x20] ss:$16 sps:$4 sm:$0xff]   ;;  %v6602_v7 = vld [vmem:[%s9769_s29 + $0x28] ss:$16 sps:$4 sm:$0xff]   ;;  %v6603_v8 = vld [vmem:[%s9769_s29 + $0x44] ss:$16 sps:$4 sm:$0xff]  }
   0xd   :  { %1675 = vmatprep.subr.bf16.mxu0 %v6597_v4  ;;  %1839 = vmatprep.subr.bf16.mxu1 %v6599_v5  ;;  %v6605_v9 = vld [vmem:[%s9769_s29 + $0x4c] ss:$16 sps:$4 sm:$0xff]   ;;  %v6607_v10 = vld [vmem:[%s9769_s29 + $0x40] ss:$16 sps:$4 sm:$0xff]   ;;  %v6608_v11 = vld [vmem:[%s9769_s29 + $0x48] ss:$16 sps:$4 sm:$0xff]  }
   0xe   :  { %v6609_v12 = vld [vmem:[%s9769_s29 + $0x64] ss:$16 sps:$4 sm:$0xff]   ;;  %v6611_v13 = vld [vmem:[%s9769_s29 + $0x6c] ss:$16 sps:$4 sm:$0xff]   ;;  %v6613_v14 = vld [vmem:[%s9769_s29 + $0x60] ss:$16 sps:$4 sm:$0xff]  }
   0xf   :  { %v6614_v15 = vld [vmem:[%s9769_s29 + $0x68] ss:$16 sps:$4 sm:$0xff]   ;;  %v6615_v16 = vld [vmem:[%s9769_s29 + $0x84] ss:$16 sps:$4 sm:$0xff]   ;;  %v6617_v17 = vld [vmem:[%s9769_s29 + $0x8c] ss:$16 sps:$4 sm:$0xff]  }
  0x10   :  { %1676 = vmatpush1.bf16.msra.mxu0 %v6601_v6  ;;  %1840 = vmatpush1.bf16.msra.mxu1 %v6602_v7  ;;  %v6619_v18 = vld [vmem:[%s9769_s29 + $0x80] ss:$16 sps:$4 sm:$0xff]   ;;  %v6620_v19 = vld [vmem:[%s9769_s29 + $0x88] ss:$16 sps:$4 sm:$0xff]   ;;  %v6621_v20 = vld [vmem:[%s9769_s29 + $0xa4] ss:$16 sps:$4 sm:$0xff]  }
  0x11   :  { %1677 = vmatprep.subr.bf16.mxu0 %v6603_v8  ;;  %1841 = vmatprep.subr.bf16.mxu1 %v6605_v9  ;;  %v6623_v21 = vld [vmem:[%s9769_s29 + $0xac] ss:$16 sps:$4 sm:$0xff]   ;;  %v6625_v22 = vld [vmem:[%s9769_s29 + $0xa0] ss:$16 sps:$4 sm:$0xff]   ;;  %v6626_v23 = vld [vmem:[%s9769_s29 + $0xa8] ss:$16 sps:$4 sm:$0xff]  }
  0x12   :  { %v6627_v24 = vld [vmem:[%s9769_s29 + $0xc4] ss:$16 sps:$4 sm:$0xff]   ;;  %v6629_v25 = vld [vmem:[%s9769_s29 + $0xcc] ss:$16 sps:$4 sm:$0xff]   ;;  %v6631_v26 = vld [vmem:[%s9769_s29 + $0xc0] ss:$16 sps:$4 sm:$0xff]  }
  0x13   :  { %v6632_v27 = vld [vmem:[%s9769_s29 + $0xc8] ss:$16 sps:$4 sm:$0xff]   ;;  %v6633_v28 = vld [vmem:[%s9769_s29 + $0xe4] ss:$16 sps:$4 sm:$0xff]   ;;  %v6635_v29 = vld [vmem:[%s9769_s29 + $0xec] ss:$16 sps:$4 sm:$0xff]  }
  0x14   :  { %1678 = vmatpush1.bf16.msra.mxu0 %v6607_v10  ;;  %1842 = vmatpush1.bf16.msra.mxu1 %v6608_v11  ;;  %v6637_v30 = vld [vmem:[%s9769_s29 + $0xe0] ss:$16 sps:$4 sm:$0xff]   ;;  %v6638_v31 = vld [vmem:[%s9769_s29 + $0xe8] ss:$16 sps:$4 sm:$0xff]   ;;  %v6639_v32 = vld [vmem:[%s9769_s29 + $0x104] ss:$16 sps:$4 sm:$0xff]  }
  0x15   :  { %1679 = vmatprep.subr.bf16.mxu0 %v6609_v12  ;;  %1843 = vmatprep.subr.bf16.mxu1 %v6611_v13  ;;  %v6641_v33 = vld [vmem:[%s9769_s29 + $0x10c] ss:$16 sps:$4 sm:$0xff]   ;;  %v6643_v34 = vld [vmem:[%s9769_s29 + $0x100] ss:$16 sps:$4 sm:$0xff]   ;;  %v6644_v35 = vld [vmem:[%s9769_s29 + $0x108] ss:$16 sps:$4 sm:$0xff]  }
  0x16   :  { %v6645_v39 = vld [vmem:[%s9769_s29 + $0x124] ss:$16 sps:$4 sm:$0xff]   ;;  %v6647_v40 = vld [vmem:[%s9769_s29 + $0x12c] ss:$16 sps:$4 sm:$0xff]   ;;  %v6649_v41 = vld [vmem:[%s9769_s29 + $0x120] ss:$16 sps:$4 sm:$0xff]  }
  0x17   :  { %v6650_v44 = vld [vmem:[%s9769_s29 + $0x128] ss:$16 sps:$4 sm:$0xff]   ;;  %v6651_v45 = vld [vmem:[%s9769_s29 + $0x144] ss:$16 sps:$4 sm:$0xff]   ;;  %v6653_v46 = vld [vmem:[%s9769_s29 + $0x14c] ss:$16 sps:$4 sm:$0xff]  }
  0x18   :  { %1680 = vmatpush1.bf16.msra.mxu0 %v6613_v14  ;;  %1844 = vmatpush1.bf16.msra.mxu1 %v6614_v15  ;;  %v6655_v47 = vld [vmem:[%s9769_s29 + $0x140] ss:$16 sps:$4 sm:$0xff]   ;;  %v6656_v48 = vld [vmem:[%s9769_s29 + $0x148] ss:$16 sps:$4 sm:$0xff]   ;;  %v6657_v50 = vld [vmem:[%s9769_s29 + $0x164] ss:$16 sps:$4 sm:$0xff]  }
  0x19   :  { %1681 = vmatprep.subr.bf16.mxu0 %v6615_v16  ;;  %1845 = vmatprep.subr.bf16.mxu1 %v6617_v17  ;;  %v6659_v51 = vld [vmem:[%s9769_s29 + $0x16c] ss:$16 sps:$4 sm:$0xff]   ;;  %v61_v52 = vld [vmem:[%s9770_s23] sm:$0xff]  ;;  %v6662_v55 = vld [vmem:[%s9769_s29 + $0x168] ss:$16 sps:$4 sm:$0xff]  }
  0x1a   :  { %v6661_v53 = vld [vmem:[%s9769_s29 + $0x160] ss:$16 sps:$4 sm:$0xff]   ;;  %v72_v54 = vrot.slane %v61_v52, %v7590_v49  ;;  %v6663_v56 = vld [vmem:[%s9769_s29 + $0x184] ss:$16 sps:$4 sm:$0xff]   ;;  %v6665_v57 = vld [vmem:[%s9769_s29 + $0x18c] ss:$16 sps:$4 sm:$0xff]   ;;  %v65_v4 = vcombine.high %v61_v52, %v61_v52 }
  0x1b   :  { %v6667_v59 = vld [vmem:[%s9769_s29 + $0x180] ss:$16 sps:$4 sm:$0xff]   ;;  %v6668_v61 = vld [vmem:[%s9769_s29 + $0x188] ss:$16 sps:$4 sm:$0xff]   ;;  %v6669_v62 = vld [vmem:[%s9769_s29 + $0x1a4] ss:$16 sps:$4 sm:$0xff]  }
  0x1c   :  { %1682 = vmatpush1.bf16.msra.mxu0 %v6619_v18  ;;  %1846 = vmatpush1.bf16.msra.mxu1 %v6620_v19  ;;  %v80_v58 = vcombine.high %v72_v54, %v72_v54  ;;  %v6671_v63 = vld [vmem:[%s9769_s29 + $0x1ac] ss:$16 sps:$4 sm:$0xff]   ;;  %v6673_v0 = vld [vmem:[%s9769_s29 + $0x1a0] ss:$16 sps:$4 sm:$0xff]   ;;  %v6674_v1 = vld [vmem:[%s9769_s29 + $0x1a8] ss:$16 sps:$4 sm:$0xff]   ;;  %v7651_v9 = vrot.slane %v65_v4, %v7590_v49  ;;  %v107_v16 = vpack.c.bf16 %v72_v54, %v72_v54 }
  0x1d   :  { %1683 = vmatprep.subr.bf16.mxu0 %v6621_v20  ;;  %1847 = vmatprep.subr.bf16.mxu1 %v6623_v21  ;;  %v6675_v2 = vld [vmem:[%s9769_s29 + $0x1c4] ss:$16 sps:$4 sm:$0xff]   ;;  %v6677_v3 = vld [vmem:[%s9769_s29 + $0x1cc] ss:$16 sps:$4 sm:$0xff]   ;;  %v6679_v5 = vld [vmem:[%s9769_s29 + $0x1c0] ss:$16 sps:$4 sm:$0xff]  }
  0x1e   :  { %v108_v60 = vpack.c.bf16 %v80_v58, %v80_v58  ;;  %v6680_v6 = vld [vmem:[%s9769_s29 + $0x1c8] ss:$16 sps:$4 sm:$0xff]   ;;  %v6681_v7 = vld [vmem:[%s9769_s29 + $0x1e4] ss:$16 sps:$4 sm:$0xff]   ;;  %v6683_v8 = vld [vmem:[%s9769_s29 + $0x1ec] ss:$16 sps:$4 sm:$0xff]   ;;  %v81_v14 = vcombine.high %v7651_v9, %v7651_v9 }
  0x1f   :  { %v6685_v10 = vld [vmem:[%s9769_s29 + $0x1e0] ss:$16 sps:$4 sm:$0xff]   ;;  %v6686_v11 = vld [vmem:[%s9769_s29 + $0x1e8] ss:$16 sps:$4 sm:$0xff]   ;;  %v6690_v12 = vld [vmem:[%s9769_s29 + $0x204] ss:$16 sps:$4 sm:$0xff]  }
  0x20   :  { %1684 = vmatpush1.bf16.msra.mxu0 %v6625_v22  ;;  %1848 = vmatpush1.bf16.msra.mxu1 %v6626_v23  ;;  %v6693_v13 = vld [vmem:[%s9769_s29 + $0x20c] ss:$16 sps:$4 sm:$0xff]   ;;  %v6688_v15 = vld [vmem:[%s9769_s29 + $0x200] ss:$16 sps:$4 sm:$0xff]   ;;  %v6691_v17 = vld [vmem:[%s9769_s29 + $0x208] ss:$16 sps:$4 sm:$0xff]   ;;  %v110_v20 = vpack.c.bf16 %v81_v14, %v81_v14 }
  0x21   :  { %1685 = vmatprep.subr.bf16.mxu0 %v6627_v24  ;;  %1849 = vmatprep.subr.bf16.mxu1 %v6629_v25  ;;  %v6696_v18 = vld [vmem:[%s9769_s29 + $0x224] ss:$16 sps:$4 sm:$0xff]   ;;  %v6699_v19 = vld [vmem:[%s9769_s29 + $0x22c] ss:$16 sps:$4 sm:$0xff]   ;;  %v6694_v21 = vld [vmem:[%s9769_s29 + $0x220] ss:$16 sps:$4 sm:$0xff]  }
  0x22   :  { %1705 = vmatprep.mubr.bf16.mxu0 %v108_v60  ;;  %1869 = vmatprep.mubr.bf16.mxu1 %v108_v60  ;;  %v6697_v22 = vld [vmem:[%s9769_s29 + $0x228] ss:$16 sps:$4 sm:$0xff]   ;;  %v6702_v23 = vld [vmem:[%s9769_s29 + $0x244] ss:$16 sps:$4 sm:$0xff]   ;;  %v6705_v24 = vld [vmem:[%s9769_s29 + $0x24c] ss:$16 sps:$4 sm:$0xff]  }
  0x23   :  { %v6700_v25 = vld [vmem:[%s9769_s29 + $0x240] ss:$16 sps:$4 sm:$0xff]   ;;  %v6723_v36 = vld [vmem:[%s9769_s29 + $0x2ac] ss:$16 sps:$4 sm:$0xff]   ;;  %v6721_v38 = vld [vmem:[%s9769_s29 + $0x2a8] ss:$16 sps:$4 sm:$0xff]  }
  0x24   :  { %1686 = vmatpush1.bf16.msra.mxu0 %v6631_v26  ;;  %1850 = vmatpush1.bf16.msra.mxu1 %v6632_v27  ;;  %v6703_v26 = vld [vmem:[%s9769_s29 + $0x248] ss:$16 sps:$4 sm:$0xff]   ;;  %v6708_v27 = vld [vmem:[%s9769_s29 + $0x264] ss:$16 sps:$4 sm:$0xff]   ;;  %v6718_v37 = vld [vmem:[%s9769_s29 + $0x2a0] ss:$16 sps:$4 sm:$0xff]  }
  0x25   :  { %1687 = vmatprep.subr.bf16.mxu0 %v6633_v28  ;;  %1851 = vmatprep.subr.bf16.mxu1 %v6635_v29  ;;  %v6711_v28 = vld [vmem:[%s9769_s29 + $0x26c] ss:$16 sps:$4 sm:$0xff]   ;;  %v6706_v29 = vld [vmem:[%s9769_s29 + $0x260] ss:$16 sps:$4 sm:$0xff]   ;;  %v6727_v42 = vld [vmem:[%s9769_s29 + $0x2c8] ss:$16 sps:$4 sm:$0xff]  }
  0x26   :  { %v6739_v52 = vld [vmem:[%s9769_s29 + $0x308] ss:$16 sps:$4 sm:$0xff]   ;;  %v6747_v54 = vld [vmem:[%s9769_s29 + $0x32c] ss:$16 sps:$4 sm:$0xff]   ;;  %v6780_v14 = vld [vmem:[%s9769_s29 + $0x3e4] ss:$16 sps:$4 sm:$0xff]  }
  0x27   :  { %v6753_v58 = vld [vmem:[%s9769_s29 + $0x34c] ss:$16 sps:$4 sm:$0xff]   ;;  %v6751_v60 = vld [vmem:[%s9769_s29 + $0x348] ss:$16 sps:$4 sm:$0xff]  }
  0x28   :  { %1688 = vmatpush1.bf16.msra.mxu0 %v6637_v30  ;;  %1852 = vmatpush1.bf16.msra.mxu1 %v6638_v31  ;;  %v6709_v30 = vld [vmem:[%s9769_s29 + $0x268] ss:$16 sps:$4 sm:$0xff]   ;;  %v6714_v31 = vld [vmem:[%s9769_s29 + $0x284] ss:$16 sps:$4 sm:$0xff]  }
  0x29   :  { %1689 = vmatprep.subr.bf16.mxu0 %v6639_v32  ;;  %1853 = vmatprep.subr.bf16.mxu1 %v6641_v33  ;;  %v6717_v32 = vld [vmem:[%s9769_s29 + $0x28c] ss:$16 sps:$4 sm:$0xff]   ;;  %v6712_v33 = vld [vmem:[%s9769_s29 + $0x280] ss:$16 sps:$4 sm:$0xff]   ;;  %v6763_v4 = vld [vmem:[%s9769_s29 + $0x388] ss:$16 sps:$4 sm:$0xff]  }
  0x2c   :  { %1690 = vmatpush1.bf16.msra.mxu0 %v6643_v34  ;;  %1854 = vmatpush1.bf16.msra.mxu1 %v6644_v35  ;;  %v6715_v34 = vld [vmem:[%s9769_s29 + $0x288] ss:$16 sps:$4 sm:$0xff]   ;;  %v6720_v35 = vld [vmem:[%s9769_s29 + $0x2a4] ss:$16 sps:$4 sm:$0xff]  }
  0x2d   :  { %1691 = vmatprep.subr.bf16.mxu0 %v6645_v39  ;;  %1855 = vmatprep.subr.bf16.mxu1 %v6647_v40  ;;  %v6726_v39 = vld [vmem:[%s9769_s29 + $0x2c4] ss:$16 sps:$4 sm:$0xff]   ;;  %v6729_v40 = vld [vmem:[%s9769_s29 + $0x2cc] ss:$16 sps:$4 sm:$0xff]  }
  0x30   :  { %1692 = vmatpush1.bf16.msra.mxu0 %v6649_v41  ;;  %1856 = vmatpush1.bf16.msra.mxu1 %v6650_v44  ;;  %v6724_v41 = vld [vmem:[%s9769_s29 + $0x2c0] ss:$16 sps:$4 sm:$0xff]   ;;  %v6732_v44 = vld [vmem:[%s9769_s29 + $0x2e4] ss:$16 sps:$4 sm:$0xff]  }
  0x31   :  { %1693 = vmatprep.subr.bf16.mxu0 %v6651_v45  ;;  %1857 = vmatprep.subr.bf16.mxu1 %v6653_v46  ;;  %v6735_v45 = vld [vmem:[%s9769_s29 + $0x2ec] ss:$16 sps:$4 sm:$0xff]   ;;  %v6730_v46 = vld [vmem:[%s9769_s29 + $0x2e0] ss:$16 sps:$4 sm:$0xff]  }
  0x34   :  { %1694 = vmatpush1.bf16.msra.mxu0 %v6655_v47  ;;  %1858 = vmatpush1.bf16.msra.mxu1 %v6656_v48  ;;  %v6733_v47 = vld [vmem:[%s9769_s29 + $0x2e8] ss:$16 sps:$4 sm:$0xff]   ;;  %v6738_v48 = vld [vmem:[%s9769_s29 + $0x304] ss:$16 sps:$4 sm:$0xff]  }
  0x35   :  { %1695 = vmatprep.subr.bf16.mxu0 %v6657_v50  ;;  %1859 = vmatprep.subr.bf16.mxu1 %v6659_v51  ;;  %v6741_v50 = vld [vmem:[%s9769_s29 + $0x30c] ss:$16 sps:$4 sm:$0xff]   ;;  %v6736_v51 = vld [vmem:[%s9769_s29 + $0x300] ss:$16 sps:$4 sm:$0xff]  }
  0x38   :  { %1696 = vmatpush1.bf16.msra.mxu0 %v6661_v53  ;;  %1860 = vmatpush1.bf16.msra.mxu1 %v6662_v55  ;;  %v6744_v53 = vld [vmem:[%s9769_s29 + $0x324] ss:$16 sps:$4 sm:$0xff]   ;;  %v6742_v55 = vld [vmem:[%s9769_s29 + $0x320] ss:$16 sps:$4 sm:$0xff]  }
  0x39   :  { %1697 = vmatprep.subr.bf16.mxu0 %v6663_v56  ;;  %1861 = vmatprep.subr.bf16.mxu1 %v6665_v57  ;;  %v6745_v56 = vld [vmem:[%s9769_s29 + $0x328] ss:$16 sps:$4 sm:$0xff]   ;;  %v6750_v57 = vld [vmem:[%s9769_s29 + $0x344] ss:$16 sps:$4 sm:$0xff]  }
  0x3c   :  { %1698 = vmatpush1.bf16.msra.mxu0 %v6667_v59  ;;  %1862 = vmatpush1.bf16.msra.mxu1 %v6668_v61  ;;  %v6748_v59 = vld [vmem:[%s9769_s29 + $0x340] ss:$16 sps:$4 sm:$0xff]   ;;  %v6756_v61 = vld [vmem:[%s9769_s29 + $0x364] ss:$16 sps:$4 sm:$0xff]  }
  0x3d   :  { %1699 = vmatprep.subr.bf16.mxu0 %v6669_v62  ;;  %1863 = vmatprep.subr.bf16.mxu1 %v6671_v63  ;;  %v6759_v62 = vld [vmem:[%s9769_s29 + $0x36c] ss:$16 sps:$4 sm:$0xff]   ;;  %v6754_v63 = vld [vmem:[%s9769_s29 + $0x360] ss:$16 sps:$4 sm:$0xff]  }
  0x40   :  { %1700 = vmatpush1.bf16.msra.mxu0 %v6673_v0  ;;  %1864 = vmatpush1.bf16.msra.mxu1 %v6674_v1  ;;  %v6757_v0 = vld [vmem:[%s9769_s29 + $0x368] ss:$16 sps:$4 sm:$0xff]   ;;  %v6762_v1 = vld [vmem:[%s9769_s29 + $0x384] ss:$16 sps:$4 sm:$0xff]  }
  0x41   :  { %1701 = vmatprep.subr.bf16.mxu0 %v6675_v2  ;;  %1865 = vmatprep.subr.bf16.mxu1 %v6677_v3  ;;  %v6765_v2 = vld [vmem:[%s9769_s29 + $0x38c] ss:$16 sps:$4 sm:$0xff]   ;;  %v6760_v3 = vld [vmem:[%s9769_s29 + $0x380] ss:$16 sps:$4 sm:$0xff]  }
  0x44   :  { %1702 = vmatpush1.bf16.msra.mxu0 %v6679_v5  ;;  %1866 = vmatpush1.bf16.msra.mxu1 %v6680_v6  ;;  %v6768_v5 = vld [vmem:[%s9769_s29 + $0x3a4] ss:$16 sps:$4 sm:$0xff]   ;;  %v6771_v6 = vld [vmem:[%s9769_s29 + $0x3ac] ss:$16 sps:$4 sm:$0xff]  }
  0x45   :  { %1703 = vmatprep.subr.bf16.mxu0 %v6681_v7  ;;  %1867 = vmatprep.subr.bf16.mxu1 %v6683_v8  ;;  %v6766_v7 = vld [vmem:[%s9769_s29 + $0x3a0] ss:$16 sps:$4 sm:$0xff]   ;;  %v6769_v8 = vld [vmem:[%s9769_s29 + $0x3a8] ss:$16 sps:$4 sm:$0xff]  }
  0x48   :  { %1704 = vmatpush1.bf16.msra.mxu0 %v6685_v10  ;;  %1868 = vmatpush1.bf16.msra.mxu1 %v6686_v11  ;;  %v6774_v10 = vld [vmem:[%s9769_s29 + $0x3c4] ss:$16 sps:$4 sm:$0xff]   ;;  %v6777_v11 = vld [vmem:[%s9769_s29 + $0x3cc] ss:$16 sps:$4 sm:$0xff]  }
  0x49   :  { %1714 = vmatprep.subr.bf16.mxu0 %v6690_v12  ;;  %1878 = vmatprep.subr.bf16.mxu1 %v6693_v13  ;;  %v6772_v12 = vld [vmem:[%s9769_s29 + $0x3c0] ss:$16 sps:$4 sm:$0xff]   ;;  %v6775_v13 = vld [vmem:[%s9769_s29 + $0x3c8] ss:$16 sps:$4 sm:$0xff]  }
  0x4b   :  { %1706 = vmatmul.mubr.bf16.vlgmr.msra.gmra.mrb[0].mxu0 %v107_v16  ;;  %1870 = vmatmul.mubr.bf16.vlgmr.msra.gmra.mrb[0].mxu1 %v107_v16  ;;  %v6778_v16 = vld [vmem:[%s9769_s29 + $0x3e0] ss:$16 sps:$4 sm:$0xff]  }
  0x4c   :  { %1715 = vmatpush1.bf16.msra.mxu0 %v6688_v15  ;;  %1879 = vmatpush1.bf16.msra.mxu1 %v6691_v17  ;;  %v6783_v15 = vld [vmem:[%s9769_s29 + $0x3ec] ss:$16 sps:$4 sm:$0xff]   ;;  %v6781_v17 = vld [vmem:[%s9769_s29 + $0x3e8] ss:$16 sps:$4 sm:$0xff]  }
  0x4d   :  { %1716 = vmatprep.subr.bf16.mxu0 %v6696_v18  ;;  %1880 = vmatprep.subr.bf16.mxu1 %v6699_v19  ;;  %v6786_v18 = vld [vmem:[%s9769_s29 + $0x404] ss:$16 sps:$4 sm:$0xff]   ;;  %v6789_v19 = vld [vmem:[%s9769_s29 + $0x40c] ss:$16 sps:$4 sm:$0xff]  }
  0x4e   :  { %1746 = vmatprep.mubr.bf16.mxu0 %v110_v20  ;;  %1910 = vmatprep.mubr.bf16.mxu1 %v110_v20  ;;  %v6784_v20 = vld [vmem:[%s9769_s29 + $0x400] ss:$16 sps:$4 sm:$0xff]  }
  0x50   :  { %1717 = vmatpush1.bf16.msra.mxu0 %v6694_v21  ;;  %1881 = vmatpush1.bf16.msra.mxu1 %v6697_v22  ;;  %v109_v21 = vpack.c.bf16 %v7651_v9, %v7651_v9  ;;  %v6787_v22 = vld [vmem:[%s9769_s29 + $0x408] ss:$16 sps:$4 sm:$0xff]   ;;  %v6795_v9 = vld [vmem:[%s9769_s29 + $0x42c] ss:$16 sps:$4 sm:$0xff]  }
  0x51   :  { %1718 = vmatprep.subr.bf16.mxu0 %v6702_v23  ;;  %1882 = vmatprep.subr.bf16.mxu1 %v6705_v24  ;;  %v7870_v23 = vld [vmem:[%s9770_s23 + $0x8] sm:$0xff]  ;;  %v6792_v24 = vld [vmem:[%s9769_s29 + $0x424] ss:$16 sps:$4 sm:$0xff]  }
  0x54   :  { %1719 = vmatpush1.bf16.msra.mxu0 %v6700_v25  ;;  %1883 = vmatpush1.bf16.msra.mxu1 %v6703_v26  ;;  %v7880_v25 = vrot.slane %v7870_v23, %v7590_v49 }
  0x55   :  { %1720 = vmatprep.subr.bf16.mxu0 %v6708_v27  ;;  %1884 = vmatprep.subr.bf16.mxu1 %v6711_v28  ;;  %v6790_v27 = vld [vmem:[%s9769_s29 + $0x420] ss:$16 sps:$4 sm:$0xff]   ;;  %v6793_v28 = vld [vmem:[%s9769_s29 + $0x428] ss:$16 sps:$4 sm:$0xff]  }
  0x56   :  { %v97_v26 = vcombine.high %v7880_v25, %v7880_v25 }
  0x58   :  { %1721 = vmatpush1.bf16.msra.mxu0 %v6706_v29  ;;  %1885 = vmatpush1.bf16.msra.mxu1 %v6709_v30  ;;  %v6798_v29 = vld [vmem:[%s9769_s29 + $0x444] ss:$16 sps:$4 sm:$0xff]   ;;  %v6801_v30 = vld [vmem:[%s9769_s29 + $0x44c] ss:$16 sps:$4 sm:$0xff]  }
  0x59   :  { %1722 = vmatprep.subr.bf16.mxu0 %v6714_v31  ;;  %1886 = vmatprep.subr.bf16.mxu1 %v6717_v32  ;;  %v112_v31 = vpack.c.bf16 %v97_v26, %v97_v26  ;;  %v6796_v32 = vld [vmem:[%s9769_s29 + $0x440] ss:$16 sps:$4 sm:$0xff]  }
  0x5c   :  { %1723 = vmatpush1.bf16.msra.mxu0 %v6712_v33  ;;  %1887 = vmatpush1.bf16.msra.mxu1 %v6715_v34  ;;  %v6799_v33 = vld [vmem:[%s9769_s29 + $0x448] ss:$16 sps:$4 sm:$0xff]   ;;  %v6804_v34 = vld [vmem:[%s9769_s29 + $0x464] ss:$16 sps:$4 sm:$0xff]  }
  0x5d   :  { %1724 = vmatprep.subr.bf16.mxu0 %v6720_v35  ;;  %1888 = vmatprep.subr.bf16.mxu1 %v6723_v36  ;;  %v6807_v35 = vld [vmem:[%s9769_s29 + $0x46c] ss:$16 sps:$4 sm:$0xff]   ;;  %v6802_v36 = vld [vmem:[%s9769_s29 + $0x460] ss:$16 sps:$4 sm:$0xff]  }
  0x60   :  { %1725 = vmatpush1.bf16.msra.mxu0 %v6718_v37  ;;  %1889 = vmatpush1.bf16.msra.mxu1 %v6721_v38  ;;  %v6805_v37 = vld [vmem:[%s9769_s29 + $0x468] ss:$16 sps:$4 sm:$0xff]   ;;  %v6810_v38 = vld [vmem:[%s9769_s29 + $0x484] ss:$16 sps:$4 sm:$0xff]  }
  0x61   :  { %1726 = vmatprep.subr.bf16.mxu0 %v6726_v39  ;;  %1890 = vmatprep.subr.bf16.mxu1 %v6729_v40  ;;  %v6813_v39 = vld [vmem:[%s9769_s29 + $0x48c] ss:$16 sps:$4 sm:$0xff]   ;;  %v6808_v40 = vld [vmem:[%s9769_s29 + $0x480] ss:$16 sps:$4 sm:$0xff]  }
  0x64   :  { %1727 = vmatpush1.bf16.msra.mxu0 %v6724_v41  ;;  %1891 = vmatpush1.bf16.msra.mxu1 %v6727_v42  ;;  %v6811_v41 = vld [vmem:[%s9769_s29 + $0x488] ss:$16 sps:$4 sm:$0xff]   ;;  %v6816_v42 = vld [vmem:[%s9769_s29 + $0x4a4] ss:$16 sps:$4 sm:$0xff]  }
  0x65   :  { %1728 = vmatprep.subr.bf16.mxu0 %v6732_v44  ;;  %1892 = vmatprep.subr.bf16.mxu1 %v6735_v45  ;;  %v6819_v44 = vld [vmem:[%s9769_s29 + $0x4ac] ss:$16 sps:$4 sm:$0xff]   ;;  %v6814_v45 = vld [vmem:[%s9769_s29 + $0x4a0] ss:$16 sps:$4 sm:$0xff]  }
  0x68   :  { %1729 = vmatpush1.bf16.msra.mxu0 %v6730_v46  ;;  %1893 = vmatpush1.bf16.msra.mxu1 %v6733_v47  ;;  %v6817_v46 = vld [vmem:[%s9769_s29 + $0x4a8] ss:$16 sps:$4 sm:$0xff]   ;;  %v6822_v47 = vld [vmem:[%s9769_s29 + $0x4c4] ss:$16 sps:$4 sm:$0xff]  }
  0x69   :  { %1730 = vmatprep.subr.bf16.mxu0 %v6738_v48  ;;  %1894 = vmatprep.subr.bf16.mxu1 %v6741_v50  ;;  %v6825_v48 = vld [vmem:[%s9769_s29 + $0x4cc] ss:$16 sps:$4 sm:$0xff]   ;;  %v6820_v50 = vld [vmem:[%s9769_s29 + $0x4c0] ss:$16 sps:$4 sm:$0xff]  }
  0x6c   :  { %1731 = vmatpush1.bf16.msra.mxu0 %v6736_v51  ;;  %1895 = vmatpush1.bf16.msra.mxu1 %v6739_v52  ;;  %v6823_v51 = vld [vmem:[%s9769_s29 + $0x4c8] ss:$16 sps:$4 sm:$0xff]   ;;  %v6828_v52 = vld [vmem:[%s9769_s29 + $0x4e4] ss:$16 sps:$4 sm:$0xff]  }
  0x6d   :  { %1732 = vmatprep.subr.bf16.mxu0 %v6744_v53  ;;  %1896 = vmatprep.subr.bf16.mxu1 %v6747_v54  ;;  %v6831_v53 = vld [vmem:[%s9769_s29 + $0x4ec] ss:$16 sps:$4 sm:$0xff]   ;;  %v6826_v54 = vld [vmem:[%s9769_s29 + $0x4e0] ss:$16 sps:$4 sm:$0xff]  }
  0x70   :  { %1733 = vmatpush1.bf16.msra.mxu0 %v6742_v55  ;;  %1897 = vmatpush1.bf16.msra.mxu1 %v6745_v56  ;;  %v6829_v55 = vld [vmem:[%s9769_s29 + $0x4e8] ss:$16 sps:$4 sm:$0xff]   ;;  %v6834_v56 = vld [vmem:[%s9769_s29 + $0x504] ss:$16 sps:$4 sm:$0xff]  }
  0x71   :  { %1734 = vmatprep.subr.bf16.mxu0 %v6750_v57  ;;  %1898 = vmatprep.subr.bf16.mxu1 %v6753_v58  ;;  %v6837_v57 = vld [vmem:[%s9769_s29 + $0x50c] ss:$16 sps:$4 sm:$0xff]   ;;  %v6832_v58 = vld [vmem:[%s9769_s29 + $0x500] ss:$16 sps:$4 sm:$0xff]  }
  0x74   :  { %1735 = vmatpush1.bf16.msra.mxu0 %v6748_v59  ;;  %1899 = vmatpush1.bf16.msra.mxu1 %v6751_v60  ;;  %v6835_v59 = vld [vmem:[%s9769_s29 + $0x508] ss:$16 sps:$4 sm:$0xff]   ;;  %v6840_v60 = vld [vmem:[%s9769_s29 + $0x524] ss:$16 sps:$4 sm:$0xff]  }
  0x75   :  { %1736 = vmatprep.subr.bf16.mxu0 %v6756_v61  ;;  %1900 = vmatprep.subr.bf16.mxu1 %v6759_v62  ;;  %v6843_v61 = vld [vmem:[%s9769_s29 + $0x52c] ss:$16 sps:$4 sm:$0xff]   ;;  %v6838_v62 = vld [vmem:[%s9769_s29 + $0x520] ss:$16 sps:$4 sm:$0xff]  }
  0x78   :  { %1737 = vmatpush1.bf16.msra.mxu0 %v6754_v63  ;;  %1901 = vmatpush1.bf16.msra.mxu1 %v6757_v0  ;;  %v6841_v63 = vld [vmem:[%s9769_s29 + $0x528] ss:$16 sps:$4 sm:$0xff]   ;;  %v6846_v0 = vld [vmem:[%s9769_s29 + $0x544] ss:$16 sps:$4 sm:$0xff]  }
  0x79   :  { %1738 = vmatprep.subr.bf16.mxu0 %v6762_v1  ;;  %1902 = vmatprep.subr.bf16.mxu1 %v6765_v2  ;;  %v6849_v1 = vld [vmem:[%s9769_s29 + $0x54c] ss:$16 sps:$4 sm:$0xff]   ;;  %v6844_v2 = vld [vmem:[%s9769_s29 + $0x540] ss:$16 sps:$4 sm:$0xff]  }
  0x7c   :  { %1739 = vmatpush1.bf16.msra.mxu0 %v6760_v3  ;;  %1903 = vmatpush1.bf16.msra.mxu1 %v6763_v4  ;;  %v6847_v3 = vld [vmem:[%s9769_s29 + $0x548] ss:$16 sps:$4 sm:$0xff]   ;;  %v6852_v4 = vld [vmem:[%s9769_s29 + $0x564] ss:$16 sps:$4 sm:$0xff]  }
  0x7d   :  { %1740 = vmatprep.subr.bf16.mxu0 %v6768_v5  ;;  %1904 = vmatprep.subr.bf16.mxu1 %v6771_v6  ;;  %v6855_v5 = vld [vmem:[%s9769_s29 + $0x56c] ss:$16 sps:$4 sm:$0xff]   ;;  %v6850_v6 = vld [vmem:[%s9769_s29 + $0x560] ss:$16 sps:$4 sm:$0xff]  }
  0x80   :  { %1741 = vmatpush1.bf16.msra.mxu0 %v6766_v7  ;;  %1905 = vmatpush1.bf16.msra.mxu1 %v6769_v8  ;;  %v6853_v7 = vld [vmem:[%s9769_s29 + $0x568] ss:$16 sps:$4 sm:$0xff]   ;;  %v6858_v8 = vld [vmem:[%s9769_s29 + $0x584] ss:$16 sps:$4 sm:$0xff]  }
  0x81   :  { %1742 = vmatprep.subr.bf16.mxu0 %v6774_v10  ;;  %1906 = vmatprep.subr.bf16.mxu1 %v6777_v11  ;;  %v6861_v10 = vld [vmem:[%s9769_s29 + $0x58c] ss:$16 sps:$4 sm:$0xff]   ;;  %v6856_v11 = vld [vmem:[%s9769_s29 + $0x580] ss:$16 sps:$4 sm:$0xff]  }
  0x84   :  { %1743 = vmatpush1.bf16.msra.mxu0 %v6772_v12  ;;  %1907 = vmatpush1.bf16.msra.mxu1 %v6775_v13  ;;  %v6859_v12 = vld [vmem:[%s9769_s29 + $0x588] ss:$16 sps:$4 sm:$0xff]   ;;  %v6864_v13 = vld [vmem:[%s9769_s29 + $0x5a4] ss:$16 sps:$4 sm:$0xff]  }
  0x85   :  { %1744 = vmatprep.subr.bf16.mxu0 %v6780_v14  ;;  %1908 = vmatprep.subr.bf16.mxu1 %v6783_v15  ;;  %v6867_v14 = vld [vmem:[%s9769_s29 + $0x5ac] ss:$16 sps:$4 sm:$0xff]   ;;  %v6862_v15 = vld [vmem:[%s9769_s29 + $0x5a0] ss:$16 sps:$4 sm:$0xff]  }
  0x88   :  { %1745 = vmatpush1.bf16.msra.mxu0 %v6778_v16  ;;  %1909 = vmatpush1.bf16.msra.mxu1 %v6781_v17  ;;  %v6865_v16 = vld [vmem:[%s9769_s29 + $0x5a8] ss:$16 sps:$4 sm:$0xff]   ;;  %v6870_v17 = vld [vmem:[%s9769_s29 + $0x5c4] ss:$16 sps:$4 sm:$0xff]  }
  0x89   :  { %1755 = vmatprep.subr.bf16.mxu0 %v6786_v18  ;;  %1919 = vmatprep.subr.bf16.mxu1 %v6789_v19  ;;  %v6873_v18 = vld [vmem:[%s9769_s29 + $0x5cc] ss:$16 sps:$4 sm:$0xff]   ;;  %v6868_v19 = vld [vmem:[%s9769_s29 + $0x5c0] ss:$16 sps:$4 sm:$0xff]  }
  0x8b   :  { %1747 = vmatmul.mubr.bf16.vlgmr.msra.gmra.mrb[0].mxu0 %v109_v21  ;;  %1911 = vmatmul.mubr.bf16.vlgmr.msra.gmra.mrb[0].mxu1 %v109_v21  ;;  %v82_v21 = vcombine.high %v7870_v23, %v7870_v23  ;;  %v6877_v23 = vld [vmem:[%s9769_s29 + $0x5e8] ss:$16 sps:$4 sm:$0xff]  }
  0x8c   :  { %1756 = vmatpush1.bf16.msra.mxu0 %v6784_v20  ;;  %1920 = vmatpush1.bf16.msra.mxu1 %v6787_v22  ;;  %v6871_v20 = vld [vmem:[%s9769_s29 + $0x5c8] ss:$16 sps:$4 sm:$0xff]   ;;  %v6876_v22 = vld [vmem:[%s9769_s29 + $0x5e4] ss:$16 sps:$4 sm:$0xff]  }
  0x8d   :  { %1757 = vmatprep.subr.bf16.mxu0 %v6792_v24  ;;  %1921 = vmatprep.subr.bf16.mxu1 %v6795_v9  ;;  %v6879_v24 = vld [vmem:[%s9769_s29 + $0x5ec] ss:$16 sps:$4 sm:$0xff]   ;;  %v6874_v9 = vld [vmem:[%s9769_s29 + $0x5e0] ss:$16 sps:$4 sm:$0xff]   ;;  %v8061_v26 = vrot.slane %v82_v21, %v7590_v49 }
  0x8e   :  { %1787 = vmatprep.mubr.bf16.mxu0 %v112_v31  ;;  %1951 = vmatprep.mubr.bf16.mxu1 %v112_v31  ;;  %v6963_v21 = vld [vmem:[%s9769_s29 + $0x7ac] ss:$16 sps:$4 sm:$0xff]  }
  0x8f   :  { %v98_v31 = vcombine.high %v8061_v26, %v8061_v26 }
  0x90   :  { %1758 = vmatpush1.bf16.msra.mxu0 %v6790_v27  ;;  %1922 = vmatpush1.bf16.msra.mxu1 %v6793_v28  ;;  %v6882_v27 = vld [vmem:[%s9769_s29 + $0x604] ss:$16 sps:$4 sm:$0xff]   ;;  %v6885_v28 = vld [vmem:[%s9769_s29 + $0x60c] ss:$16 sps:$4 sm:$0xff]  }
  0x91   :  { %1759 = vmatprep.subr.bf16.mxu0 %v6798_v29  ;;  %1923 = vmatprep.subr.bf16.mxu1 %v6801_v30  ;;  %v6880_v29 = vld [vmem:[%s9769_s29 + $0x600] ss:$16 sps:$4 sm:$0xff]   ;;  %v6883_v30 = vld [vmem:[%s9769_s29 + $0x608] ss:$16 sps:$4 sm:$0xff]  }
  0x94   :  { %1760 = vmatpush1.bf16.msra.mxu0 %v6796_v32  ;;  %1924 = vmatpush1.bf16.msra.mxu1 %v6799_v33  ;;  %v111_v32 = vpack.c.bf16 %v7880_v25, %v7880_v25  ;;  %v6888_v33 = vld [vmem:[%s9769_s29 + $0x624] ss:$16 sps:$4 sm:$0xff]   ;;  %v6889_v25 = vld [vmem:[%s9769_s29 + $0x628] ss:$16 sps:$4 sm:$0xff]  }
  0x95   :  { %1761 = vmatprep.subr.bf16.mxu0 %v6804_v34  ;;  %1925 = vmatprep.subr.bf16.mxu1 %v6807_v35  ;;  %v6891_v34 = vld [vmem:[%s9769_s29 + $0x62c] ss:$16 sps:$4 sm:$0xff]   ;;  %v6886_v35 = vld [vmem:[%s9769_s29 + $0x620] ss:$16 sps:$4 sm:$0xff]  }
  0x98   :  { %1762 = vmatpush1.bf16.msra.mxu0 %v6802_v36  ;;  %1926 = vmatpush1.bf16.msra.mxu1 %v6805_v37  ;;  %v114_v36 = vpack.c.bf16 %v98_v31, %v98_v31  ;;  %v6894_v37 = vld [vmem:[%s9769_s29 + $0x644] ss:$16 sps:$4 sm:$0xff]  }
  0x99   :  { %1763 = vmatprep.subr.bf16.mxu0 %v6810_v38  ;;  %1927 = vmatprep.subr.bf16.mxu1 %v6813_v39  ;;  %v6897_v38 = vld [vmem:[%s9769_s29 + $0x64c] ss:$16 sps:$4 sm:$0xff]   ;;  %v6892_v39 = vld [vmem:[%s9769_s29 + $0x640] ss:$16 sps:$4 sm:$0xff]  }
  0x9c   :  { %1764 = vmatpush1.bf16.msra.mxu0 %v6808_v40  ;;  %1928 = vmatpush1.bf16.msra.mxu1 %v6811_v41  ;;  %v6895_v40 = vld [vmem:[%s9769_s29 + $0x648] ss:$16 sps:$4 sm:$0xff]   ;;  %v6900_v41 = vld [vmem:[%s9769_s29 + $0x664] ss:$16 sps:$4 sm:$0xff]  }
  0x9d   :  { %1765 = vmatprep.subr.bf16.mxu0 %v6816_v42  ;;  %1929 = vmatprep.subr.bf16.mxu1 %v6819_v44  ;;  %v6903_v42 = vld [vmem:[%s9769_s29 + $0x66c] ss:$16 sps:$4 sm:$0xff]   ;;  %v6898_v44 = vld [vmem:[%s9769_s29 + $0x660] ss:$16 sps:$4 sm:$0xff]  }
  0xa0   :  { %1766 = vmatpush1.bf16.msra.mxu0 %v6814_v45  ;;  %1930 = vmatpush1.bf16.msra.mxu1 %v6817_v46  ;;  %v6901_v45 = vld [vmem:[%s9769_s29 + $0x668] ss:$16 sps:$4 sm:$0xff]   ;;  %v6906_v46 = vld [vmem:[%s9769_s29 + $0x684] ss:$16 sps:$4 sm:$0xff]  }
  0xa1   :  { %1767 = vmatprep.subr.bf16.mxu0 %v6822_v47  ;;  %1931 = vmatprep.subr.bf16.mxu1 %v6825_v48  ;;  %v6909_v47 = vld [vmem:[%s9769_s29 + $0x68c] ss:$16 sps:$4 sm:$0xff]   ;;  %v6904_v48 = vld [vmem:[%s9769_s29 + $0x680] ss:$16 sps:$4 sm:$0xff]  }
  0xa4   :  { %1768 = vmatpush1.bf16.msra.mxu0 %v6820_v50  ;;  %1932 = vmatpush1.bf16.msra.mxu1 %v6823_v51  ;;  %v6907_v50 = vld [vmem:[%s9769_s29 + $0x688] ss:$16 sps:$4 sm:$0xff]   ;;  %v6912_v51 = vld [vmem:[%s9769_s29 + $0x6a4] ss:$16 sps:$4 sm:$0xff]  }
  0xa5   :  { %1769 = vmatprep.subr.bf16.mxu0 %v6828_v52  ;;  %1933 = vmatprep.subr.bf16.mxu1 %v6831_v53  ;;  %v6915_v52 = vld [vmem:[%s9769_s29 + $0x6ac] ss:$16 sps:$4 sm:$0xff]   ;;  %v6910_v53 = vld [vmem:[%s9769_s29 + $0x6a0] ss:$16 sps:$4 sm:$0xff]  }
  0xa8   :  { %1770 = vmatpush1.bf16.msra.mxu0 %v6826_v54  ;;  %1934 = vmatpush1.bf16.msra.mxu1 %v6829_v55  ;;  %v6913_v54 = vld [vmem:[%s9769_s29 + $0x6a8] ss:$16 sps:$4 sm:$0xff]   ;;  %v6918_v55 = vld [vmem:[%s9769_s29 + $0x6c4] ss:$16 sps:$4 sm:$0xff]  }
  0xa9   :  { %1771 = vmatprep.subr.bf16.mxu0 %v6834_v56  ;;  %1935 = vmatprep.subr.bf16.mxu1 %v6837_v57  ;;  %v6921_v56 = vld [vmem:[%s9769_s29 + $0x6cc] ss:$16 sps:$4 sm:$0xff]   ;;  %v6916_v57 = vld [vmem:[%s9769_s29 + $0x6c0] ss:$16 sps:$4 sm:$0xff]  }
  0xac   :  { %1772 = vmatpush1.bf16.msra.mxu0 %v6832_v58  ;;  %1936 = vmatpush1.bf16.msra.mxu1 %v6835_v59  ;;  %v6919_v58 = vld [vmem:[%s9769_s29 + $0x6c8] ss:$16 sps:$4 sm:$0xff]   ;;  %v6924_v59 = vld [vmem:[%s9769_s29 + $0x6e4] ss:$16 sps:$4 sm:$0xff]  }
  0xad   :  { %1773 = vmatprep.subr.bf16.mxu0 %v6840_v60  ;;  %1937 = vmatprep.subr.bf16.mxu1 %v6843_v61  ;;  %v6927_v60 = vld [vmem:[%s9769_s29 + $0x6ec] ss:$16 sps:$4 sm:$0xff]   ;;  %v6922_v61 = vld [vmem:[%s9769_s29 + $0x6e0] ss:$16 sps:$4 sm:$0xff]  }
  0xb0   :  { %1774 = vmatpush1.bf16.msra.mxu0 %v6838_v62  ;;  %1938 = vmatpush1.bf16.msra.mxu1 %v6841_v63  ;;  %v6925_v62 = vld [vmem:[%s9769_s29 + $0x6e8] ss:$16 sps:$4 sm:$0xff]   ;;  %v6930_v63 = vld [vmem:[%s9769_s29 + $0x704] ss:$16 sps:$4 sm:$0xff]  }
  0xb1   :  { %1775 = vmatprep.subr.bf16.mxu0 %v6846_v0  ;;  %1939 = vmatprep.subr.bf16.mxu1 %v6849_v1  ;;  %v6933_v0 = vld [vmem:[%s9769_s29 + $0x70c] ss:$16 sps:$4 sm:$0xff]   ;;  %v6928_v1 = vld [vmem:[%s9769_s29 + $0x700] ss:$16 sps:$4 sm:$0xff]  }
  0xb4   :  { %1776 = vmatpush1.bf16.msra.mxu0 %v6844_v2  ;;  %1940 = vmatpush1.bf16.msra.mxu1 %v6847_v3  ;;  %v6931_v2 = vld [vmem:[%s9769_s29 + $0x708] ss:$16 sps:$4 sm:$0xff]   ;;  %v6936_v3 = vld [vmem:[%s9769_s29 + $0x724] ss:$16 sps:$4 sm:$0xff]  }
  0xb5   :  { %1777 = vmatprep.subr.bf16.mxu0 %v6852_v4  ;;  %1941 = vmatprep.subr.bf16.mxu1 %v6855_v5  ;;  %v6939_v4 = vld [vmem:[%s9769_s29 + $0x72c] ss:$16 sps:$4 sm:$0xff]   ;;  %v6934_v5 = vld [vmem:[%s9769_s29 + $0x720] ss:$16 sps:$4 sm:$0xff]  }
  0xb8   :  { %1778 = vmatpush1.bf16.msra.mxu0 %v6850_v6  ;;  %1942 = vmatpush1.bf16.msra.mxu1 %v6853_v7  ;;  %v6937_v6 = vld [vmem:[%s9769_s29 + $0x728] ss:$16 sps:$4 sm:$0xff]   ;;  %v6942_v7 = vld [vmem:[%s9769_s29 + $0x744] ss:$16 sps:$4 sm:$0xff]  }
  0xb9   :  { %1779 = vmatprep.subr.bf16.mxu0 %v6858_v8  ;;  %1943 = vmatprep.subr.bf16.mxu1 %v6861_v10  ;;  %v6945_v8 = vld [vmem:[%s9769_s29 + $0x74c] ss:$16 sps:$4 sm:$0xff]   ;;  %v6940_v10 = vld [vmem:[%s9769_s29 + $0x740] ss:$16 sps:$4 sm:$0xff]  }
  0xbc   :  { %1780 = vmatpush1.bf16.msra.mxu0 %v6856_v11  ;;  %1944 = vmatpush1.bf16.msra.mxu1 %v6859_v12  ;;  %v6943_v11 = vld [vmem:[%s9769_s29 + $0x748] ss:$16 sps:$4 sm:$0xff]   ;;  %v6948_v12 = vld [vmem:[%s9769_s29 + $0x764] ss:$16 sps:$4 sm:$0xff]  }
  0xbd   :  { %1781 = vmatprep.subr.bf16.mxu0 %v6864_v13  ;;  %1945 = vmatprep.subr.bf16.mxu1 %v6867_v14  ;;  %v6951_v13 = vld [vmem:[%s9769_s29 + $0x76c] ss:$16 sps:$4 sm:$0xff]   ;;  %v6946_v14 = vld [vmem:[%s9769_s29 + $0x760] ss:$16 sps:$4 sm:$0xff]  }
  0xc0   :  { %1782 = vmatpush1.bf16.msra.mxu0 %v6862_v15  ;;  %1946 = vmatpush1.bf16.msra.mxu1 %v6865_v16  ;;  %v6949_v15 = vld [vmem:[%s9769_s29 + $0x768] ss:$16 sps:$4 sm:$0xff]   ;;  %v6954_v16 = vld [vmem:[%s9769_s29 + $0x784] ss:$16 sps:$4 sm:$0xff]  }
  0xc1   :  { %1783 = vmatprep.subr.bf16.mxu0 %v6870_v17  ;;  %1947 = vmatprep.subr.bf16.mxu1 %v6873_v18  ;;  %v6957_v17 = vld [vmem:[%s9769_s29 + $0x78c] ss:$16 sps:$4 sm:$0xff]   ;;  %v6952_v18 = vld [vmem:[%s9769_s29 + $0x780] ss:$16 sps:$4 sm:$0xff]  }
  0xc4   :  { %1784 = vmatpush1.bf16.msra.mxu0 %v6868_v19  ;;  %1948 = vmatpush1.bf16.msra.mxu1 %v6871_v20  ;;  %v6955_v19 = vld [vmem:[%s9769_s29 + $0x788] ss:$16 sps:$4 sm:$0xff]   ;;  %v6960_v20 = vld [vmem:[%s9769_s29 + $0x7a4] ss:$16 sps:$4 sm:$0xff]  }
  0xc5   :  { %1785 = vmatprep.subr.bf16.mxu0 %v6876_v22  ;;  %1949 = vmatprep.subr.bf16.mxu1 %v6879_v24  ;;  %v6958_v22 = vld [vmem:[%s9769_s29 + $0x7a0] ss:$16 sps:$4 sm:$0xff]   ;;  %v6961_v24 = vld [vmem:[%s9769_s29 + $0x7a8] ss:$16 sps:$4 sm:$0xff]  }
  0xc8   :  { %1786 = vmatpush1.bf16.msra.mxu0 %v6874_v9  ;;  %1950 = vmatpush1.bf16.msra.mxu1 %v6877_v23  ;;  %v6966_v9 = vld [vmem:[%s9769_s29 + $0x7c4] ss:$16 sps:$4 sm:$0xff]   ;;  %v6969_v23 = vld [vmem:[%s9769_s29 + $0x7cc] ss:$16 sps:$4 sm:$0xff]  }
  0xc9   :  { %1796 = vmatprep.subr.bf16.mxu0 %v6882_v27  ;;  %1960 = vmatprep.subr.bf16.mxu1 %v6885_v28 }
  0xcb   :  { %1788 = vmatmul.mubr.bf16.vlgmr.msra.gmra.mrb[0].mxu0 %v111_v32  ;;  %1952 = vmatmul.mubr.bf16.vlgmr.msra.gmra.mrb[0].mxu1 %v111_v32 }
  0xcc   :  { %1797 = vmatpush1.bf16.msra.mxu0 %v6880_v29  ;;  %1961 = vmatpush1.bf16.msra.mxu1 %v6883_v30 }
  0xcd   :  { %1798 = vmatprep.subr.bf16.mxu0 %v6888_v33  ;;  %1962 = vmatprep.subr.bf16.mxu1 %v6891_v34 }
  0xce   :  { %1828 = vmatprep.mubr.bf16.mxu0 %v114_v36  ;;  %1992 = vmatprep.mubr.bf16.mxu1 %v114_v36 }
  0xd0   :  { %1799 = vmatpush1.bf16.msra.mxu0 %v6886_v35  ;;  %1963 = vmatpush1.bf16.msra.mxu1 %v6889_v25 }
  0xd1   :  { %1800 = vmatprep.subr.bf16.mxu0 %v6894_v37  ;;  %1964 = vmatprep.subr.bf16.mxu1 %v6897_v38 }
  0xd4   :  { %1801 = vmatpush1.bf16.msra.mxu0 %v6892_v39  ;;  %1965 = vmatpush1.bf16.msra.mxu1 %v6895_v40 }
  0xd5   :  { %1802 = vmatprep.subr.bf16.mxu0 %v6900_v41  ;;  %1966 = vmatprep.subr.bf16.mxu1 %v6903_v42 }
  0xd8   :  { %1803 = vmatpush1.bf16.msra.mxu0 %v6898_v44  ;;  %1967 = vmatpush1.bf16.msra.mxu1 %v6901_v45 }
  0xd9   :  { %1804 = vmatprep.subr.bf16.mxu0 %v6906_v46  ;;  %1968 = vmatprep.subr.bf16.mxu1 %v6909_v47 }
  0xdc   :  { %1805 = vmatpush1.bf16.msra.mxu0 %v6904_v48  ;;  %1969 = vmatpush1.bf16.msra.mxu1 %v6907_v50 }
  0xdd   :  { %1806 = vmatprep.subr.bf16.mxu0 %v6912_v51  ;;  %1970 = vmatprep.subr.bf16.mxu1 %v6915_v52 }
  0xe0   :  { %1807 = vmatpush1.bf16.msra.mxu0 %v6910_v53  ;;  %1971 = vmatpush1.bf16.msra.mxu1 %v6913_v54 }
  0xe1   :  { %1808 = vmatprep.subr.bf16.mxu0 %v6918_v55  ;;  %1972 = vmatprep.subr.bf16.mxu1 %v6921_v56 }
  0xe4   :  { %1809 = vmatpush1.bf16.msra.mxu0 %v6916_v57  ;;  %1973 = vmatpush1.bf16.msra.mxu1 %v6919_v58 }
  0xe5   :  { %1810 = vmatprep.subr.bf16.mxu0 %v6924_v59  ;;  %1974 = vmatprep.subr.bf16.mxu1 %v6927_v60 }
  0xe8   :  { %1811 = vmatpush1.bf16.msra.mxu0 %v6922_v61  ;;  %1975 = vmatpush1.bf16.msra.mxu1 %v6925_v62 }
  0xe9   :  { %1812 = vmatprep.subr.bf16.mxu0 %v6930_v63  ;;  %1976 = vmatprep.subr.bf16.mxu1 %v6933_v0 }
  0xec   :  { %1813 = vmatpush1.bf16.msra.mxu0 %v6928_v1  ;;  %1977 = vmatpush1.bf16.msra.mxu1 %v6931_v2 }
  0xed   :  { %1814 = vmatprep.subr.bf16.mxu0 %v6936_v3  ;;  %1978 = vmatprep.subr.bf16.mxu1 %v6939_v4 }
  0xf0   :  { %1815 = vmatpush1.bf16.msra.mxu0 %v6934_v5  ;;  %1979 = vmatpush1.bf16.msra.mxu1 %v6937_v6 }
  0xf1   :  { %1816 = vmatprep.subr.bf16.mxu0 %v6942_v7  ;;  %1980 = vmatprep.subr.bf16.mxu1 %v6945_v8 }
  0xf4   :  { %1817 = vmatpush1.bf16.msra.mxu0 %v6940_v10  ;;  %1981 = vmatpush1.bf16.msra.mxu1 %v6943_v11 }
  0xf5   :  { %1818 = vmatprep.subr.bf16.mxu0 %v6948_v12  ;;  %1982 = vmatprep.subr.bf16.mxu1 %v6951_v13 }
  0xf8   :  { %1819 = vmatpush1.bf16.msra.mxu0 %v6946_v14  ;;  %1983 = vmatpush1.bf16.msra.mxu1 %v6949_v15 }
  0xf9   :  { %1820 = vmatprep.subr.bf16.mxu0 %v6954_v16  ;;  %1984 = vmatprep.subr.bf16.mxu1 %v6957_v17 }
  0xfc   :  { %1821 = vmatpush1.bf16.msra.mxu0 %v6952_v18  ;;  %1985 = vmatpush1.bf16.msra.mxu1 %v6955_v19 }
  0xfd   :  { %1822 = vmatprep.subr.bf16.mxu0 %v6960_v20  ;;  %1986 = vmatprep.subr.bf16.mxu1 %v6963_v21 }
  0xfe   :  { %23 = vsyncpa [#allocation3], 0  ;;  %v6964_v27 = vld [vmem:[%s9769_s29 + $0x7c0] ss:$16 sps:$4 sm:$0xff]   ;;  %v6967_v28 = vld [vmem:[%s9769_s29 + $0x7c8] ss:$16 sps:$4 sm:$0xff]   ;;  %v113_v34 = vpack.c.bf16 %v8061_v26, %v8061_v26 }
  0xff   :  { %v6972_v29 = vld [vmem:[%s9769_s29 + $0x7e4] ss:$16 sps:$4 sm:$0xff]   ;;  %v6975_v30 = vld [vmem:[%s9769_s29 + $0x7ec] ss:$16 sps:$4 sm:$0xff]   ;;  %v6970_v31 = vld [vmem:[%s9769_s29 + $0x7e0] ss:$16 sps:$4 sm:$0xff]  }
 0x100   :  { %1823 = vmatpush1.bf16.msra.mxu0 %v6958_v22  ;;  %1987 = vmatpush1.bf16.msra.mxu1 %v6961_v24  ;;  %v6973_v32 = vld [vmem:[%s9769_s29 + $0x7e8] ss:$16 sps:$4 sm:$0xff]   ;;  %v6979_v33 = vld [vmem:[%s9748_s3 + $0x4] ss:$8 sps:$4 sm:$0xff]   ;;  %v6982_v25 = vld [vmem:[%s9748_s3 + $0x14] ss:$8 sps:$4 sm:$0xff]  }
 0x101   :  { %1824 = vmatprep.subr.bf16.mxu0 %v6966_v9  ;;  %1988 = vmatprep.subr.bf16.mxu1 %v6969_v23  ;;  %v6977_v35 = vld [vmem:[%s9748_s3] ss:$8 sps:$4 sm:$0xff]   ;;  %v6980_v36 = vld [vmem:[%s9748_s3 + $0x10] ss:$8 sps:$4 sm:$0xff]   ;;  %v6985_v26 = vld [vmem:[%s9748_s3 + $0x24] ss:$8 sps:$4 sm:$0xff]  }
 0x102   :  { %v6983_v37 = vld [vmem:[%s9748_s3 + $0x20] ss:$8 sps:$4 sm:$0xff]   ;;  %v6988_v38 = vld [vmem:[%s9748_s3 + $0x34] ss:$8 sps:$4 sm:$0xff]   ;;  %v6986_v39 = vld [vmem:[%s9748_s3 + $0x30] ss:$8 sps:$4 sm:$0xff]  }
 0x103   :  { %v6991_v40 = vld [vmem:[%s9748_s3 + $0x44] ss:$8 sps:$4 sm:$0xff]   ;;  %v6989_v41 = vld [vmem:[%s9748_s3 + $0x40] ss:$8 sps:$4 sm:$0xff]   ;;  %v6994_v42 = vld [vmem:[%s9748_s3 + $0x54] ss:$8 sps:$4 sm:$0xff]  }
 0x104   :  { %1825 = vmatpush1.bf16.msra.mxu0 %v6964_v27  ;;  %1989 = vmatpush1.bf16.msra.mxu1 %v6967_v28  ;;  %v6992_v44 = vld [vmem:[%s9748_s3 + $0x50] ss:$8 sps:$4 sm:$0xff]   ;;  %v6997_v45 = vld [vmem:[%s9748_s3 + $0x64] ss:$8 sps:$4 sm:$0xff]   ;;  %v6995_v46 = vld [vmem:[%s9748_s3 + $0x60] ss:$8 sps:$4 sm:$0xff]  }
 0x105   :  { %1826 = vmatprep.subr.bf16.mxu0 %v6972_v29  ;;  %1990 = vmatprep.subr.bf16.mxu1 %v6975_v30  ;;  %v7000_v47 = vld [vmem:[%s9748_s3 + $0x74] ss:$8 sps:$4 sm:$0xff]   ;;  %v6998_v48 = vld [vmem:[%s9748_s3 + $0x70] ss:$8 sps:$4 sm:$0xff]   ;;  %v7003_v50 = vld [vmem:[%s9748_s3 + $0x84] ss:$8 sps:$4 sm:$0xff]  }
 0x106   :  { %v7001_v51 = vld [vmem:[%s9748_s3 + $0x80] ss:$8 sps:$4 sm:$0xff]   ;;  %v7006_v52 = vld [vmem:[%s9748_s3 + $0x94] ss:$8 sps:$4 sm:$0xff]   ;;  %v7004_v53 = vld [vmem:[%s9748_s3 + $0x90] ss:$8 sps:$4 sm:$0xff]  }
 0x107   :  { %v7009_v54 = vld [vmem:[%s9748_s3 + $0xa4] ss:$8 sps:$4 sm:$0xff]   ;;  %v7007_v55 = vld [vmem:[%s9748_s3 + $0xa0] ss:$8 sps:$4 sm:$0xff]   ;;  %v7012_v56 = vld [vmem:[%s9748_s3 + $0xb4] ss:$8 sps:$4 sm:$0xff]  }
 0x108   :  { %1827 = vmatpush1.bf16.msra.mxu0 %v6970_v31  ;;  %1991 = vmatpush1.bf16.msra.mxu1 %v6973_v32  ;;  %v7010_v57 = vld [vmem:[%s9748_s3 + $0xb0] ss:$8 sps:$4 sm:$0xff]   ;;  %v7015_v58 = vld [vmem:[%s9748_s3 + $0xc4] ss:$8 sps:$4 sm:$0xff]   ;;  %v7013_v59 = vld [vmem:[%s9748_s3 + $0xc0] ss:$8 sps:$4 sm:$0xff]  }
 0x109   :  { %2445 = vmatprep.subr.bf16.mxu0 %v6979_v33  ;;  %v7018_v60 = vld [vmem:[%s9748_s3 + $0xd4] ss:$8 sps:$4 sm:$0xff]   ;;  %v7016_v61 = vld [vmem:[%s9748_s3 + $0xd0] ss:$8 sps:$4 sm:$0xff]   ;;  %v7021_v62 = vld [vmem:[%s9748_s3 + $0xe4] ss:$8 sps:$4 sm:$0xff]  }
 0x10a   :  { %v7019_v63 = vld [vmem:[%s9748_s3 + $0xe0] ss:$8 sps:$4 sm:$0xff]   ;;  %v7024_v0 = vld [vmem:[%s9748_s3 + $0xf4] ss:$8 sps:$4 sm:$0xff]   ;;  %v7022_v1 = vld [vmem:[%s9748_s3 + $0xf0] ss:$8 sps:$4 sm:$0xff]  }
 0x10b   :  { %1829 = vmatmul.mubr.bf16.vlgmr.msra.gmra.mrb[0].mxu0 %v113_v34  ;;  %1993 = vmatmul.mubr.bf16.vlgmr.msra.gmra.mrb[0].mxu1 %v113_v34  ;;  %v7027_v2 = vld [vmem:[%s9748_s3 + $0x104] ss:$8 sps:$4 sm:$0xff]   ;;  %v8361_v3 = vsub.s32 0, %v7572_v43  ;;  %s9771_s1 = sld [smem:[#allocation7_spill]]  ;;  %v8369_v5 = vsub.s32 1, %v7572_v43  ;;  %v8372_v6 = vsub.s32 3, %v7572_v43 }
 0x10c   :  { %2446 = vmatpush1.bf16.msra.mxu0 %v6977_v35  ;;  %vm7358_vm7 = vmmov 0  }
 0x10d   :  { %2447 = vmatprep.subr.bf16.mxu0 %v6982_v25 }
 0x110   :  { %2448 = vmatpush1.bf16.msra.mxu0 %v6980_v36 }
 0x111   :  { %2449 = vmatprep.subr.bf16.mxu0 %v6985_v26  ;;  %v8366_v4 = vld [vmem:[%s9771_s1] sm:$0xf] }
 0x112   :  { %v376_v7 = vrot.slane %v8366_v4, %v8361_v3  ;;  %v380_v8 = vrot.slane %v8366_v4, %v8369_v5  ;;  %v388_v10 = vrot.slane %v8366_v4, %v8372_v6 }
 0x114   :  { %2450 = vmatpush1.bf16.msra.mxu0 %v6983_v37 }
 0x115   :  { %2451 = vmatprep.subr.bf16.mxu0 %v6988_v38 }
 0x118   :  { %2452 = vmatpush1.bf16.msra.mxu0 %v6986_v39 }
 0x119   :  { %2453 = vmatprep.subr.bf16.mxu0 %v6991_v40 }
 0x11c   :  { %2454 = vmatpush1.bf16.msra.mxu0 %v6989_v41 }
 0x11d   :  { %2455 = vmatprep.subr.bf16.mxu0 %v6994_v42 }
 0x120   :  { %2456 = vmatpush1.bf16.msra.mxu0 %v6992_v44 }
 0x121   :  { %2457 = vmatprep.subr.bf16.mxu0 %v6997_v45 }
 0x124   :  { %2458 = vmatpush1.bf16.msra.mxu0 %v6995_v46 }
 0x125   :  { %2459 = vmatprep.subr.bf16.mxu0 %v7000_v47 }
 0x128   :  { %2460 = vmatpush1.bf16.msra.mxu0 %v6998_v48 }
 0x129   :  { %2461 = vmatprep.subr.bf16.mxu0 %v7003_v50  ;;  %v8381_v50 = vsub.s32 2, %v7572_v43 }
 0x12c   :  { %2462 = vmatpush1.bf16.msra.mxu0 %v7001_v51 }
 0x12d   :  { %2463 = vmatprep.subr.bf16.mxu0 %v7006_v52  ;;  %v7025_v52 = vld [vmem:[%s9748_s3 + $0x100] ss:$8 sps:$4 sm:$0xff]  }
 0x130   :  { %2464 = vmatpush1.bf16.msra.mxu0 %v7004_v53 }
 0x131   :  { %2465 = vmatprep.subr.bf16.mxu0 %v7009_v54  ;;  %v7030_v54 = vld [vmem:[%s9748_s3 + $0x114] ss:$8 sps:$4 sm:$0xff]  }
 0x134   :  { %2466 = vmatpush1.bf16.msra.mxu0 %v7007_v55 }
 0x135   :  { %2467 = vmatprep.subr.bf16.mxu0 %v7012_v56  ;;  %v384_v56 = vrot.slane %v8366_v4, %v8381_v50  ;;  %v7042_v4 = vld [vmem:[%s9748_s3 + $0x154] ss:$8 sps:$4 sm:$0xff]  }
 0x138   :  { %2468 = vmatpush1.bf16.msra.mxu0 %v7010_v57  ;;  %v7028_v57 = vld [vmem:[%s9748_s3 + $0x110] ss:$8 sps:$4 sm:$0xff]  }
 0x139   :  { %2469 = vmatprep.subr.bf16.mxu0 %v7015_v58  ;;  %v7033_v58 = vld [vmem:[%s9748_s3 + $0x124] ss:$8 sps:$4 sm:$0xff]  }
 0x13c   :  { %2470 = vmatpush1.bf16.msra.mxu0 %v7013_v59 }
 0x13d   :  { %2471 = vmatprep.subr.bf16.mxu0 %v7018_v60  ;;  %v7031_v60 = vld [vmem:[%s9748_s3 + $0x120] ss:$8 sps:$4 sm:$0xff]  }
 0x140   :  { %2472 = vmatpush1.bf16.msra.mxu0 %v7016_v61  ;;  %v7036_v61 = vld [vmem:[%s9748_s3 + $0x134] ss:$8 sps:$4 sm:$0xff]  }
 0x141   :  { %2473 = vmatprep.subr.bf16.mxu0 %v7021_v62 }
 0x144   :  { %2474 = vmatpush1.bf16.msra.mxu0 %v7019_v63  ;;  %v7034_v63 = vld [vmem:[%s9748_s3 + $0x130] ss:$8 sps:$4 sm:$0xff]  }
 0x145   :  { %2475 = vmatprep.subr.bf16.mxu0 %v7024_v0  ;;  %v7039_v0 = vld [vmem:[%s9748_s3 + $0x144] ss:$8 sps:$4 sm:$0xff]  }
 0x148   :  { %2476 = vmatpush1.bf16.msra.mxu0 %v7022_v1 }
 0x149   :  { %2486 = vmatprep.subr.bf16.mxu0 %v7027_v2  ;;  %v7037_v2 = vld [vmem:[%s9748_s3 + $0x140] ss:$8 sps:$4 sm:$0xff]  }
 0x1de   :  { %v1830_v11 = vpop.f32.mrb[0].mxu0  ;;  %v1994_v12 = vpop.f32.mrb[0].mxu1 }
 0x1df   :  { %v6528_v13 = vadd.f32 %v1830_v11, %v376_v7  ;;  %v1832_v14 = vpop.f32.mrb[1].mxu0  ;;  %v1996_v15 = vpop.f32.mrb[1].mxu1  ;;  %v8397_v59 = vadd.f32 %v1994_v12, %v384_v56  ;;  %v7043_v11 = vld [vmem:[%s9748_s3 + $0x160] ss:$8 sps:$4 sm:$0xff]   ;;  %v7048_v12 = vld [vmem:[%s9748_s3 + $0x174] ss:$8 sps:$4 sm:$0xff]  }
 0x1e0   :  { %v6529_v16 = vadd.f32 %v1832_v14, %v380_v8  ;;  %v6531_v17 = vadd.f32 %v1996_v15, %v388_v10  ;;  %v1834_v18 = vpop.f32.mrb[2].mxu0  ;;  %v1998_v19 = vpop.f32.mrb[2].mxu1  ;;  %v7040_v8 = vld [vmem:[%s9748_s3 + $0x150] ss:$8 sps:$4 sm:$0xff]   ;;  %v7045_v10 = vld [vmem:[%s9748_s3 + $0x164] ss:$8 sps:$4 sm:$0xff]  }
 0x1e1   :  { %v2001_v20 = vand.u32 2147483647, %v6528_v13  ;;  %v1835_v9 = vpop.f32.mrb[3].mxu0  ;;  %v1999_v23 = vpop.f32.mrb[3].mxu1  ;;  %vm2017_vm0 = vcmp.ge.f32.partialorder %v6528_v13, 0.0  ;;  %vm2019_vm3 = vcmp.ge.f32.partialorder %v8397_v59, 0.0 }
 0x1e2   :  { %v2002_v21 = vand.u32 2147483647, %v6529_v16  ;;  %v2004_v22 = vand.u32 2147483647, %v6531_v17  ;;  %vm2018_vm1 = vcmp.ge.f32.partialorder %v6529_v16, 0.0  ;;  %vm2020_vm2 = vcmp.ge.f32.partialorder %v6531_v17, 0.0 }
 0x1e3   :  { %v2005_v24 = vsub.f32 0.0, %v2001_v20  ;;  %v2003_v62 = vand.u32 2147483647, %v8397_v59  ;;  %v7051_v14 = vld [vmem:[%s9748_s3 + $0x184] ss:$8 sps:$4 sm:$0xff]  }
 0x1e4   :  { %v2006_v27 = vsub.f32 0.0, %v2002_v21  ;;  %v2008_v28 = vsub.f32 0.0, %v2004_v22  ;;  %v7049_v15 = vld [vmem:[%s9748_s3 + $0x180] ss:$8 sps:$4 sm:$0xff]   ;;  %v7052_v18 = vld [vmem:[%s9748_s3 + $0x190] ss:$8 sps:$4 sm:$0xff]  }
 0x1e5   :  { %v2009_v29 = vmul.f32 1.442695, %v2005_v24  ;;  %v2007_v1 = vsub.f32 0.0, %v2003_v62  ;;  %v7057_v20 = vld [vmem:[%s9748_s3 + $0x1a4] ss:$8 sps:$4 sm:$0xff]  }
 0x1e6   :  { %v2011_v30 = vmul.f32 1.442695, %v2006_v27  ;;  %v2015_v31 = vmul.f32 1.442695, %v2008_v28  ;;  %v7055_v21 = vld [vmem:[%s9748_s3 + $0x1a0] ss:$8 sps:$4 sm:$0xff]  }
 0x1e7   :  { %7241 = vpow2.f32 %v2009_v29  ;;  %v2013_v7 = vmul.f32 1.442695, %v2007_v1  ;;  %v7060_v22 = vld [vmem:[%s9748_s3 + $0x1b4] ss:$8 sps:$4 sm:$0xff]   ;;  %v7058_v24 = vld [vmem:[%s9748_s3 + $0x1b0] ss:$8 sps:$4 sm:$0xff]  }
 0x1e8   :  { %7243 = vpow2.f32 %v2011_v30  ;;  %v7063_v9 = vld [vmem:[%s9748_s3 + $0x1c4] ss:$8 sps:$4 sm:$0xff]   ;;  %v7061_v23 = vld [vmem:[%s9748_s3 + $0x1c0] ss:$8 sps:$4 sm:$0xff]   ;;  %v7066_v27 = vld [vmem:[%s9748_s3 + $0x1d4] ss:$8 sps:$4 sm:$0xff]  }
 0x1e9   :  { %7245 = vpow2.f32 %v2015_v31  ;;  %v7064_v29 = vld [vmem:[%s9748_s3 + $0x1d0] ss:$8 sps:$4 sm:$0xff]   ;;  %v7069_v30 = vld [vmem:[%s9748_s3 + $0x1e4] ss:$8 sps:$4 sm:$0xff]  }
 0x1f1   :  { %v7242_v32 = vpop.eup %7241 }
 0x1f2   :  { %v2021_v33 = vadd.f32 1.0, %v7242_v32  ;;  %v7244_v34 = vpop.eup %7243 }
 0x1f3   :  { %v7246_v35 = vpop.eup %7245  ;;  %v2022_v25 = vadd.f32 1.0, %v7244_v34 }
 0x1f4   :  { %7247 = vrcp.f32 %v2021_v33  ;;  %v2024_v36 = vadd.f32 1.0, %v7246_v35  ;;  %v7072_v33 = vld [vmem:[%s9748_s3 + $0x1f4] ss:$8 sps:$4 sm:$0xff]  }
 0x1f5   :  { %7249 = vrcp.f32 %v2022_v25 }
 0x1f6   :  { %7251 = vrcp.f32 %v2024_v36 }
 0x1f7   :  { %7253 = vpow2.f32 %v2013_v7 }
 0x1fe   :  { %v7248_v26 = vpop.eup %7247 }
 0x1ff   :  { %v2033_v37 = vmul.f32 %v7248_v26, %v7242_v32  ;;  %v7250_v38 = vpop.eup %7249  ;;  %v7067_v32 = vld [vmem:[%s9748_s3 + $0x1e0] ss:$8 sps:$4 sm:$0xff]  }
 0x200   :  { %v7252_v39 = vpop.eup %7251  ;;  %v2034_v41 = vmul.f32 %v7250_v38, %v7244_v34 }
 0x201   :  { %v2037_v40 = vsel %vm2017_vm0, %v7248_v26, %v2033_v37  ;;  %v2036_v42 = vmul.f32 %v7252_v39, %v7246_v35  ;;  %v7070_v35 = vld [vmem:[%s9748_s3 + $0x1f0] ss:$8 sps:$4 sm:$0xff]   ;;  %v7073_v26 = vld [vmem:[%s9750_s5 + $0x40] sm:$0xff]  }
 0x202   :  { %v2041_v44 = vmul.f32 %v6528_v13, %v2037_v40  ;;  %v2038_v45 = vsel %vm2018_vm1, %v7250_v38, %v2034_v41  ;;  %v7046_v13 = vld [vmem:[%s9748_s3 + $0x170] ss:$8 sps:$4 sm:$0xff]   ;;  %v7074_v37 = vld [vmem:[%s9750_s5] sm:$0xff]   ;;  %6477 = vmatprep.subr.bf16.mxu1 %v7073_v26  ;;  %v7075_v38 = vld [vmem:[%s9750_s5 + $0x48] sm:$0xff]  }
 0x203   :  { %v2042_v46 = vmul.f32 %v6529_v16, %v2038_v45  ;;  %v2040_v47 = vsel %vm2020_vm2, %v7252_v39, %v2036_v42  ;;  %v7054_v16 = vld [vmem:[%s9748_s3 + $0x194] ss:$8 sps:$4 sm:$0xff]   ;;  %6478 = vmatpush3.bf16.msra.mxu1 %v7074_v37  ;;  %v7076_v39 = vld [vmem:[%s9750_s5 + $0x8] sm:$0xff]   ;;  %v7081_v45 = vld [vmem:[%s9750_s5 + $0x60] sm:$0xff]  }
 0x204   :  { %v2044_v48 = vmul.f32 %v6531_v17, %v2040_v47  ;;  %v2045_v53 = vpack.c.bf16 %v2041_v44, %v2041_v44  ;;  %v7254_v17 = vpop.eup %7253  ;;  %6479 = vmatprep.subr.bf16.mxu1 %v7075_v38  ;;  %v7077_v40 = vld [vmem:[%s9750_s5 + $0x50] sm:$0xff]   ;;  %v7079_v42 = vld [vmem:[%s9750_s5 + $0x58] sm:$0xff]   ;;  %v7083_v47 = vld [vmem:[%s9750_s5 + $0x68] sm:$0xff]  }
 0x205   :  { %v2046_v51 = vpack.c.bf16 %v2042_v46, %v2042_v46  ;;  %v2023_v19 = vadd.f32 1.0, %v7254_v17  ;;  %v7078_v41 = vld [vmem:[%s9750_s5 + $0x10] sm:$0xff]   ;;  %v7080_v44 = vld [vmem:[%s9750_s5 + $0x18] sm:$0xff]   ;;  %v7082_v46 = vld [vmem:[%s9750_s5 + $0x20] sm:$0xff]  }
 0x206   :  { %v2048_v55 = vpack.c.bf16 %v2044_v48, %v2044_v48  ;;  %v7084_v48 = vld [vmem:[%s9750_s5 + $0x28] sm:$0xff]   ;;  %v7112_v37 = vld [vmem:[%s9752_s7 + $0x74] ss:$8 sps:$4 sm:$0xff]   ;;  %v7110_v38 = vld [vmem:[%s9752_s7 + $0x70] ss:$8 sps:$4 sm:$0xff]  }
 0x207   :  { %2477 = vmatprep.mubr.bf16.mxu0 %v2046_v51  ;;  %7255 = vrcp.f32 %v2023_v19  ;;  %6480 = vmatpush3.bf16.msra.mxu1 %v7076_v39  ;;  %v7085_v51 = vld [vmem:[%s9750_s5 + $0x70] sm:$0xff]   ;;  %v7107_v26 = vld [vmem:[%s9752_s7 + $0x60] ss:$8 sps:$4 sm:$0xff]   ;;  %v7356_v39 = vmov 0  }
 0x208   :  { %2478 = vmatmul.mubr.bf16.vlgmr.msra.gmra.mrb[4].mxu0 %v2045_v53  ;;  %6481 = vmatprep.subr.bf16.mxu1 %v7077_v40  ;;  %v7087_v53 = vld [vmem:[%s9750_s5 + $0x78] sm:$0xff]   ;;  %v7357_v40 = vmov 0.0  }
 0x209   :  { %2487 = vmatpush1.bf16.msra.mxu0 %v7025_v52  ;;  %2518 = vmatprep.mubr.bf16.mxu0 %v2048_v55  ;;  %v7086_v52 = vld [vmem:[%s9750_s5 + $0x30] sm:$0xff]   ;;  %v2113_v55 = vld [vmem:[%s9749_s4] sm:$0x3] }
 0x20a   :  { %2488 = vmatprep.subr.bf16.mxu0 %v7030_v54  ;;  %v7088_v54 = vld [vmem:[%s9750_s5 + $0x38] sm:$0xff]   ;;  %v2118_v56 = vrot.slane %v2113_v55, %v8361_v3 }
 0x20b   :  { %6482 = vmatpush3.bf16.msra.mxu1 %v7078_v41 }
 0x20c   :  { %6483 = vmatprep.subr.bf16.mxu1 %v7079_v42  ;;  %v6099_v42 = vld [vmem:[%s9751_s6] ss:$0 sm:$0xff] }
 0x20d   :  { %2489 = vmatpush1.bf16.msra.mxu0 %v7028_v57  ;;  %v2122_v57 = vrot.slane %v2113_v55, %v8369_v5 }
 0x20e   :  { %2490 = vmatprep.subr.bf16.mxu0 %v7033_v58 }
 0x20f   :  { %6484 = vmatpush3.bf16.msra.mxu1 %v7080_v44 }
 0x210   :  { %6485 = vmatprep.subr.bf16.mxu1 %v7081_v45 }
 0x211   :  { %2491 = vmatpush1.bf16.msra.mxu0 %v7031_v60  ;;  %v7256_v28 = vpop.eup %7255 }
 0x212   :  { %2492 = vmatprep.subr.bf16.mxu0 %v7036_v61  ;;  %v2035_v31 = vmul.f32 %v7256_v28, %v7254_v17 }
 0x213   :  { %6486 = vmatpush3.bf16.msra.mxu1 %v7082_v46 }
 0x214   :  { %v2039_v34 = vsel %vm2019_vm3, %v7256_v28, %v2035_v31  ;;  %6487 = vmatprep.subr.bf16.mxu1 %v7083_v47  ;;  %v7092_v28 = vld [vmem:[%s9752_s7 + $0x10] ss:$8 sps:$4 sm:$0xff]   ;;  %v7100_v31 = vld [vmem:[%s9752_s7 + $0x34] ss:$8 sps:$4 sm:$0xff]  }
 0x215   :  { %2493 = vmatpush1.bf16.msra.mxu0 %v7034_v63  ;;  %v2043_v25 = vmul.f32 %v8397_v59, %v2039_v34  ;;  %v7101_v34 = vld [vmem:[%s9752_s7 + $0x40] ss:$8 sps:$4 sm:$0xff]  }
 0x216   :  { %2494 = vmatprep.subr.bf16.mxu0 %v7039_v0 }
 0x217   :  { %v2047_v36 = vpack.c.bf16 %v2043_v25, %v2043_v25  ;;  %6488 = vmatpush3.bf16.msra.mxu1 %v7084_v48  ;;  %v7104_v25 = vld [vmem:[%s9752_s7 + $0x50] ss:$8 sps:$4 sm:$0xff]  }
 0x218   :  { %6489 = vmatprep.subr.bf16.mxu1 %v7085_v51 }
 0x219   :  { %2495 = vmatpush1.bf16.msra.mxu0 %v7037_v2 }
 0x21a   :  { %2496 = vmatprep.subr.bf16.mxu0 %v7042_v4 }
 0x21b   :  { %6490 = vmatpush3.bf16.msra.mxu1 %v7086_v52 }
 0x21c   :  { %6491 = vmatprep.subr.bf16.mxu1 %v7087_v53 }
 0x21d   :  { %2497 = vmatpush1.bf16.msra.mxu0 %v7040_v8 }
 0x21e   :  { %2498 = vmatprep.subr.bf16.mxu0 %v7045_v10 }
 0x21f   :  { %6492 = vmatpush3.bf16.msra.mxu1 %v7088_v54 }
 0x221   :  { %2499 = vmatpush1.bf16.msra.mxu0 %v7043_v11 }
 0x222   :  { %2500 = vmatprep.subr.bf16.mxu0 %v7048_v12 }
 0x225   :  { %2501 = vmatpush1.bf16.msra.mxu0 %v7046_v13 }
 0x226   :  { %2502 = vmatprep.subr.bf16.mxu0 %v7051_v14 }
 0x229   :  { %2503 = vmatpush1.bf16.msra.mxu0 %v7049_v15 }
 0x22a   :  { %2504 = vmatprep.subr.bf16.mxu0 %v7054_v16 }
 0x22d   :  { %2505 = vmatpush1.bf16.msra.mxu0 %v7052_v18 }
 0x22e   :  { %2506 = vmatprep.subr.bf16.mxu0 %v7057_v20 }
 0x231   :  { %2507 = vmatpush1.bf16.msra.mxu0 %v7055_v21 }
 0x232   :  { %2508 = vmatprep.subr.bf16.mxu0 %v7060_v22 }
 0x235   :  { %2509 = vmatpush1.bf16.msra.mxu0 %v7058_v24 }
 0x236   :  { %2510 = vmatprep.subr.bf16.mxu0 %v7063_v9  ;;  %v7091_v9 = vld [vmem:[%s9752_s7 + $0x4] ss:$8 sps:$4 sm:$0xff]  }
 0x237   :  { %2846 = vmatprep.subr.bf16.mxu1 %v7091_v9  ;;  %v7123_v9 = vld [vmem:[%s9757_s12 + $0x4] ss:$8 sps:$4 sm:$0xff]  }
 0x239   :  { %2511 = vmatpush1.bf16.msra.mxu0 %v7061_v23  ;;  %v7089_v23 = vld [vmem:[%s9752_s7] ss:$8 sps:$4 sm:$0xff]  }
 0x23a   :  { %2512 = vmatprep.subr.bf16.mxu0 %v7066_v27  ;;  %v7094_v27 = vld [vmem:[%s9752_s7 + $0x14] ss:$8 sps:$4 sm:$0xff]  }
 0x23d   :  { %2513 = vmatpush1.bf16.msra.mxu0 %v7064_v29  ;;  %v7097_v29 = vld [vmem:[%s9752_s7 + $0x24] ss:$8 sps:$4 sm:$0xff]  }
 0x23e   :  { %2514 = vmatprep.subr.bf16.mxu0 %v7069_v30  ;;  %v7095_v30 = vld [vmem:[%s9752_s7 + $0x20] ss:$8 sps:$4 sm:$0xff]  }
 0x241   :  { %2515 = vmatpush1.bf16.msra.mxu0 %v7067_v32  ;;  %v7098_v32 = vld [vmem:[%s9752_s7 + $0x30] ss:$8 sps:$4 sm:$0xff]  }
 0x242   :  { %2516 = vmatprep.subr.bf16.mxu0 %v7072_v33  ;;  %v7103_v33 = vld [vmem:[%s9752_s7 + $0x44] ss:$8 sps:$4 sm:$0xff]  }
 0x245   :  { %2517 = vmatpush1.bf16.msra.mxu0 %v7070_v35  ;;  %v7106_v35 = vld [vmem:[%s9752_s7 + $0x54] ss:$8 sps:$4 sm:$0xff]  }
 0x248   :  { %2519 = vmatmul.mubr.bf16.vlgmr.msra.gmra.mrb[4].mxu0 %v2047_v36  ;;  %v7109_v36 = vld [vmem:[%s9752_s7 + $0x64] ss:$8 sps:$4 sm:$0xff]  }
 0x31b   :  { %v2520_v58 = vpop.f32.mrb[4].mxu0 }
 0x31c   :  { %v6532_v59 = vadd.f32 %v2520_v58, %v2118_v56  ;;  %v2522_v60 = vpop.f32.mrb[5].mxu0 }
 0x31d   :  { %v6533_v61 = vadd.f32 %v2522_v60, %v2122_v57  ;;  %v2524_v62 = vpop.f32.mrb[6].mxu0  ;;  %v7113_v60 = vld [vmem:[%s9755_s10] sm:$0xff]  }
 0x31e   :  { %v2527_v63 = vand.u32 2147483647, %v6532_v59  ;;  %v2525_v0 = vpop.f32.mrb[7].mxu0  ;;  %vm2535_vm4 = vcmp.ge.f32.partialorder %v6532_v59, 0.0  ;;  %v7114_v62 = vld [vmem:[%s9755_s10 + $0x8] sm:$0xff]  }
 0x31f   :  { %v2528_v1 = vand.u32 2147483647, %v6533_v61  ;;  %vm2536_vm5 = vcmp.ge.f32.partialorder %v6533_v61, 0.0  ;;  %v7116_v0 = vld [vmem:[%s9755_s10 + $0x18] sm:$0xff]  }
 0x320   :  { %v2529_v2 = vsub.f32 0.0, %v2527_v63  ;;  %v7115_v63 = vld [vmem:[%s9755_s10 + $0x10] sm:$0xff]  }
 0x321   :  { %v2530_v4 = vsub.f32 0.0, %v2528_v1  ;;  %v7117_v1 = vld [vmem:[%s9755_s10 + $0x20] sm:$0xff]  }
 0x322   :  { %v2531_v7 = vmul.f32 1.442695, %v2529_v2  ;;  %v7118_v2 = vld [vmem:[%s9755_s10 + $0x28] sm:$0xff]  }
 0x323   :  { %v2533_v8 = vmul.f32 1.442695, %v2530_v4  ;;  %v7119_v4 = vld [vmem:[%s9755_s10 + $0x30] sm:$0xff]  }
 0x324   :  { %7257 = vpow2.f32 %v2531_v7  ;;  %v7120_v7 = vld [vmem:[%s9755_s10 + $0x38] sm:$0xff]  }
 0x325   :  { %7259 = vpow2.f32 %v2533_v8  ;;  %v2754_v8 = vld [vmem:[%s9753_s8] sm:$0x3] }
 0x32e   :  { %v7258_v10 = vpop.eup %7257 }
 0x32f   :  { %v7260_v11 = vpop.eup %7259  ;;  %v2537_v12 = vadd.f32 1.0, %v7258_v10 }
 0x330   :  { %v2538_v13 = vadd.f32 1.0, %v7260_v11 }
 0x331   :  { %7261 = vrcp.f32 %v2537_v12 }
 0x332   :  { %7263 = vrcp.f32 %v2538_v13 }
 0x33b   :  { %v7262_v14 = vpop.eup %7261 }
 0x33c   :  { %v7264_v15 = vpop.eup %7263  ;;  %v2543_v16 = vmul.f32 %v7262_v14, %v7258_v10  ;;  %v2763_v10 = vrot.slane %v2754_v8, %v8369_v5 }
 0x33d   :  { %v2544_v17 = vmul.f32 %v7264_v15, %v7260_v11 }
 0x33e   :  { %v2545_v18 = vsel %vm2535_vm4, %v7262_v14, %v2543_v16 }
 0x33f   :  { %v2547_v19 = vmul.f32 %v6532_v59, %v2545_v18  ;;  %v2546_v20 = vsel %vm2536_vm5, %v7264_v15, %v2544_v17  ;;  %v2759_v17 = vrot.slane %v2754_v8, %v8361_v3  ;;  %v2889_v18 = vld [vmem:[%s9754_s9] sm:$0x3] }
 0x340   :  { %v2548_v21 = vmul.f32 %v6533_v61, %v2546_v20 }
 0x341   :  { %v2549_v24 = vpack.c.bf16 %v2547_v19, %v2547_v19 }
 0x342   :  { %v2550_v22 = vpack.c.bf16 %v2548_v21, %v2548_v21 }
 0x344   :  { %2718 = vmatprep.mubr.bf16.mxu1 %v2550_v22 }
 0x345   :  { %2719 = vmatmul.mubr.bf16.vlgmr.msra.gmra.mrb[4].mxu1 %v2549_v24 }
 0x346   :  { %2847 = vmatpush1.bf16.msra.mxu1 %v7089_v23  ;;  %2878 = vmatprep.mubr.bf16.mxu1 %v7356_v39  ;;  %v7121_v23 = vld [vmem:[%s9757_s12] ss:$8 sps:$4 sm:$0xff]  }
 0x347   :  { %2848 = vmatprep.subr.bf16.mxu1 %v7094_v27  ;;  %v7126_v27 = vld [vmem:[%s9757_s12 + $0x14] ss:$8 sps:$4 sm:$0xff]  }
 0x34a   :  { %2849 = vmatpush1.bf16.msra.mxu1 %v7092_v28  ;;  %v7124_v28 = vld [vmem:[%s9757_s12 + $0x10] ss:$8 sps:$4 sm:$0xff]  }
 0x34b   :  { %2850 = vmatprep.subr.bf16.mxu1 %v7097_v29  ;;  %v7129_v29 = vld [vmem:[%s9757_s12 + $0x24] ss:$8 sps:$4 sm:$0xff]  }
 0x34e   :  { %2851 = vmatpush1.bf16.msra.mxu1 %v7095_v30  ;;  %v7127_v30 = vld [vmem:[%s9757_s12 + $0x20] ss:$8 sps:$4 sm:$0xff]  }
 0x34f   :  { %2852 = vmatprep.subr.bf16.mxu1 %v7100_v31  ;;  %v7132_v31 = vld [vmem:[%s9757_s12 + $0x34] ss:$8 sps:$4 sm:$0xff]  }
 0x352   :  { %2853 = vmatpush1.bf16.msra.mxu1 %v7098_v32  ;;  %v7130_v32 = vld [vmem:[%s9757_s12 + $0x30] ss:$8 sps:$4 sm:$0xff]  }
 0x353   :  { %2854 = vmatprep.subr.bf16.mxu1 %v7103_v33  ;;  %v7135_v33 = vld [vmem:[%s9757_s12 + $0x44] ss:$8 sps:$4 sm:$0xff]  }
 0x356   :  { %2855 = vmatpush1.bf16.msra.mxu1 %v7101_v34  ;;  %v7133_v34 = vld [vmem:[%s9757_s12 + $0x40] ss:$8 sps:$4 sm:$0xff]  }
 0x357   :  { %2856 = vmatprep.subr.bf16.mxu1 %v7106_v35  ;;  %v7138_v35 = vld [vmem:[%s9757_s12 + $0x54] ss:$8 sps:$4 sm:$0xff]  }
 0x35a   :  { %2857 = vmatpush1.bf16.msra.mxu1 %v7104_v25  ;;  %v7136_v25 = vld [vmem:[%s9757_s12 + $0x50] ss:$8 sps:$4 sm:$0xff]  }
 0x35b   :  { %2858 = vmatprep.subr.bf16.mxu1 %v7109_v36  ;;  %v7141_v36 = vld [vmem:[%s9757_s12 + $0x64] ss:$8 sps:$4 sm:$0xff]  }
 0x35e   :  { %2859 = vmatpush1.bf16.msra.mxu1 %v7107_v26  ;;  %v7139_v26 = vld [vmem:[%s9757_s12 + $0x60] ss:$8 sps:$4 sm:$0xff]  }
 0x35f   :  { %2860 = vmatprep.subr.bf16.mxu1 %v7112_v37  ;;  %v7144_v37 = vld [vmem:[%s9757_s12 + $0x74] ss:$8 sps:$4 sm:$0xff]  }
 0x362   :  { %2861 = vmatpush1.bf16.msra.mxu1 %v7110_v38  ;;  %v7142_v38 = vld [vmem:[%s9757_s12 + $0x70] ss:$8 sps:$4 sm:$0xff]  }
 0x363   :  { %6508 = vmatprep.subr.bf16.mxu1 %v7357_v40 }
 0x418   :  { %v6493_v41 = vpop.f32.mrb[4].mxu1 }
 0x419   :  { %v6494_v44 = vpop.f32.mrb[5].mxu1 }
 0x41a   :  { %v6495_v45 = vadd.f32 %v6494_v44, %v6493_v41  ;;  %v6496_v46 = vpop.f32.mrb[6].mxu1  ;;  %v7150_v41 = vld [vmem:[%s9759_s14 + $0xc] ss:$16 sps:$4 sm:$0xff]   ;;  %v7151_v44 = vld [vmem:[%s9759_s14 + $0x20] ss:$16 sps:$4 sm:$0xff]  }
 0x41b   :  { %v6497_v47 = vpop.f32.mrb[7].mxu1  ;;  %v7157_v46 = vld [vmem:[%s9759_s14 + $0x40] ss:$16 sps:$4 sm:$0xff]  }
 0x41c   :  { %v2721_v48 = vadd.f32 %v6495_v45, %v6099_v42  ;;  %v7153_v42 = vld [vmem:[%s9759_s14 + $0x24] ss:$16 sps:$4 sm:$0xff]  }
 0x41d   :  { %v7159_v45 = vld [vmem:[%s9759_s14 + $0x44] ss:$16 sps:$4 sm:$0xff]  }
 0x41e   :  { %v2726_v51 = vand.u32 2147483647, %v2721_v48  ;;  %vm2730_vm6 = vcmp.ge.f32.partialorder %v2721_v48, 0.0  ;;  %v7165_v47 = vld [vmem:[%s9759_s14 + $0x64] ss:$16 sps:$4 sm:$0xff]  }
 0x420   :  { %v2727_v52 = vsub.f32 0.0, %v2726_v51  ;;  %v7171_v51 = vld [vmem:[%s9759_s14 + $0x84] ss:$16 sps:$4 sm:$0xff]  }
 0x422   :  { %v2728_v53 = vmul.f32 1.442695, %v2727_v52  ;;  %v7169_v52 = vld [vmem:[%s9759_s14 + $0x80] ss:$16 sps:$4 sm:$0xff]  }
 0x424   :  { %7265 = vpow2.f32 %v2728_v53  ;;  %v7177_v53 = vld [vmem:[%s9759_s14 + $0xa4] ss:$16 sps:$4 sm:$0xff]  }
 0x42e   :  { %v7266_v54 = vpop.eup %7265 }
 0x42f   :  { %v2731_v55 = vadd.f32 1.0, %v7266_v54 }
 0x431   :  { %7267 = vrcp.f32 %v2731_v55  ;;  %v6132_v55 = vld [vmem:[%s9756_s11] ss:$0 sm:$0xff] }
 0x43b   :  { %v7268_v56 = vpop.eup %7267 }
 0x43c   :  { %v2734_v57 = vmul.f32 %v7268_v56, %v7266_v54  ;;  %v7175_v54 = vld [vmem:[%s9759_s14 + $0xa0] ss:$16 sps:$4 sm:$0xff]  }
 0x43e   :  { %v2735_v58 = vsel %vm2730_vm6, %v7268_v56, %v2734_v57 }
 0x43f   :  { %v2736_v59 = vmul.f32 %v2735_v58, %v2721_v48  ;;  %v7163_v48 = vld [vmem:[%s9759_s14 + $0x60] ss:$16 sps:$4 sm:$0xff]  }
 0x441   :  { %v2737_v61 = vpack.c.bf16 %v2736_v59, %v2736_v59 }
 0x443   :  { %2879 = vmatmul.mubr.bf16.vlgmr.msra.gmra.mrb[8].mxu1 %v2737_v61 }
 0x444   :  { %6509 = vmatpush3.bf16.msra.mxu1 %v7113_v60  ;;  %6524 = vmatprep.mubr.msk.bf16.mxu1 %vm7358_vm7, %v7357_v40 }
 0x445   :  { %6510 = vmatprep.subr.bf16.mxu1 %v7357_v40 }
 0x448   :  { %6511 = vmatpush3.bf16.msra.mxu1 %v7114_v62 }
 0x449   :  { %6512 = vmatprep.subr.bf16.mxu1 %v7357_v40 }
 0x44c   :  { %6513 = vmatpush3.bf16.msra.mxu1 %v7115_v63 }
 0x44d   :  { %6514 = vmatprep.subr.bf16.mxu1 %v7357_v40 }
 0x450   :  { %6515 = vmatpush3.bf16.msra.mxu1 %v7116_v0 }
 0x451   :  { %6516 = vmatprep.subr.bf16.mxu1 %v7357_v40 }
 0x454   :  { %6517 = vmatpush3.bf16.msra.mxu1 %v7117_v1 }
 0x455   :  { %6518 = vmatprep.subr.bf16.mxu1 %v7357_v40 }
 0x458   :  { %6519 = vmatpush3.bf16.msra.mxu1 %v7118_v2 }
 0x459   :  { %6520 = vmatprep.subr.bf16.mxu1 %v7357_v40 }
 0x45c   :  { %6521 = vmatpush3.bf16.msra.mxu1 %v7119_v4 }
 0x45d   :  { %6522 = vmatprep.subr.bf16.mxu1 %v7357_v40  ;;  %v7147_v40 = vld [vmem:[%s9759_s14 + $0x4] ss:$16 sps:$4 sm:$0xff]  }
 0x45e   :  { %3595 = vmatprep.subr.bf16.mxu0 %v7147_v40  ;;  %v7208_v40 = vld [vmem:[%s9759_s14 + $0x148] ss:$16 sps:$4 sm:$0xff]  }
 0x460   :  { %6523 = vmatpush3.bf16.msra.mxu1 %v7120_v7 }
 0x461   :  { %3124 = vmatprep.subr.bf16.mxu1 %v7123_v9  ;;  %v7181_v9 = vld [vmem:[%s9759_s14 + $0xc0] ss:$16 sps:$4 sm:$0xff]  }
 0x516   :  { %v2880_v11 = vpop.f32.mrb[8].mxu1 }
 0x517   :  { %v2882_v12 = vpop.f32.mrb[9].mxu1  ;;  %v2881_v20 = vadd.f32 %v2880_v11, %v2759_v17  ;;  %v7166_v17 = vld [vmem:[%s9759_s14 + $0x68] ss:$16 sps:$4 sm:$0xff]  }
 0x518   :  { %v2883_v13 = vadd.f32 %v2882_v12, %v2763_v10  ;;  %v2884_v14 = vpop.f32.mrb[10].mxu1  ;;  %v7148_v10 = vld [vmem:[%s9759_s14 + $0x8] ss:$16 sps:$4 sm:$0xff]   ;;  %v7156_v12 = vld [vmem:[%s9759_s14 + $0x2c] ss:$16 sps:$4 sm:$0xff]  }
 0x519   :  { %v2885_v15 = vpop.f32.mrb[11].mxu1  ;;  %v7162_v14 = vld [vmem:[%s9759_s14 + $0x4c] ss:$16 sps:$4 sm:$0xff]  }
 0x51a   :  { %v2887_v16 = vmul.f32 1.442695, %v2883_v13  ;;  %v7154_v13 = vld [vmem:[%s9759_s14 + $0x28] ss:$16 sps:$4 sm:$0xff]  }
 0x51b   :  { %v7160_v15 = vld [vmem:[%s9759_s14 + $0x48] ss:$16 sps:$4 sm:$0xff]  }
 0x51c   :  { %7269 = vpow2.f32 %v2887_v16  ;;  %v7168_v16 = vld [vmem:[%s9759_s14 + $0x6c] ss:$16 sps:$4 sm:$0xff]  }
 0x526   :  { %v7270_v19 = vpop.eup %7269 }
 0x527   :  { %v2890_v21 = vmul.f32 %v7270_v19, %v2889_v18  ;;  %v7174_v18 = vld [vmem:[%s9759_s14 + $0x8c] ss:$16 sps:$4 sm:$0xff]   ;;  %v7172_v19 = vld [vmem:[%s9759_s14 + $0x88] ss:$16 sps:$4 sm:$0xff]  }
 0x529   :  { %v2891_v22 = vadd.f32 %v2890_v21, %v2881_v20  ;;  %v7180_v20 = vld [vmem:[%s9759_s14 + $0xac] ss:$16 sps:$4 sm:$0xff]   ;;  %v7178_v21 = vld [vmem:[%s9759_s14 + $0xa8] ss:$16 sps:$4 sm:$0xff]  }
 0x52b   :  { %v2892_v24 = vpack.c.bf16 %v2891_v22, %v2891_v22  ;;  %v7183_v22 = vld [vmem:[%s9759_s14 + $0xc4] ss:$16 sps:$4 sm:$0xff]  }
 0x52d   :  { %6525 = vmatmul.mubr.bf16.vlgmr.msra.gmra.mrb[12].mxu1 %v2892_v24  ;;  %v7186_v24 = vld [vmem:[%s9759_s14 + $0xcc] ss:$16 sps:$4 sm:$0xff]  }
 0x52e   :  { %3156 = vmatprep.mubr.bf16.mxu1 %v7356_v39  ;;  %3125 = vmatpush1.bf16.msra.mxu1 %v7121_v23  ;;  %v7145_v39 = vld [vmem:[%s9759_s14] ss:$16 sps:$4 sm:$0xff]   ;;  %v7184_v23 = vld [vmem:[%s9759_s14 + $0xc8] ss:$16 sps:$4 sm:$0xff]  }
 0x52f   :  { %3126 = vmatprep.subr.bf16.mxu1 %v7126_v27  ;;  %3596 = vmatpush1.bf16.msra.mxu0 %v7145_v39  ;;  %v7189_v27 = vld [vmem:[%s9759_s14 + $0xe4] ss:$16 sps:$4 sm:$0xff]   ;;  %v7205_v39 = vld [vmem:[%s9759_s14 + $0x140] ss:$16 sps:$4 sm:$0xff]  }
 0x530   :  { %3597 = vmatprep.subr.bf16.mxu0 %v7153_v42  ;;  %v7216_v42 = vld [vmem:[%s9759_s14 + $0x16c] ss:$16 sps:$4 sm:$0xff]  }
 0x532   :  { %3127 = vmatpush1.bf16.msra.mxu1 %v7124_v28  ;;  %v7192_v28 = vld [vmem:[%s9759_s14 + $0xec] ss:$16 sps:$4 sm:$0xff]  }
 0x533   :  { %3128 = vmatprep.subr.bf16.mxu1 %v7129_v29  ;;  %3598 = vmatpush1.bf16.msra.mxu0 %v7151_v44  ;;  %v7187_v29 = vld [vmem:[%s9759_s14 + $0xe0] ss:$16 sps:$4 sm:$0xff]  }
 0x534   :  { %3599 = vmatprep.subr.bf16.mxu0 %v7159_v45  ;;  %v7211_v44 = vld [vmem:[%s9759_s14 + $0x160] ss:$16 sps:$4 sm:$0xff]   ;;  %v7214_v45 = vld [vmem:[%s9759_s14 + $0x168] ss:$16 sps:$4 sm:$0xff]  }
 0x536   :  { %3129 = vmatpush1.bf16.msra.mxu1 %v7127_v30  ;;  %v7190_v30 = vld [vmem:[%s9759_s14 + $0xe8] ss:$16 sps:$4 sm:$0xff]  }
 0x537   :  { %3130 = vmatprep.subr.bf16.mxu1 %v7132_v31  ;;  %3600 = vmatpush1.bf16.msra.mxu0 %v7157_v46  ;;  %v7195_v31 = vld [vmem:[%s9759_s14 + $0x104] ss:$16 sps:$4 sm:$0xff]  }
 0x538   :  { %3601 = vmatprep.subr.bf16.mxu0 %v7165_v47  ;;  %v7219_v46 = vld [vmem:[%s9759_s14 + $0x184] ss:$16 sps:$4 sm:$0xff]   ;;  %v7222_v47 = vld [vmem:[%s9759_s14 + $0x18c] ss:$16 sps:$4 sm:$0xff]  }
 0x53a   :  { %3131 = vmatpush1.bf16.msra.mxu1 %v7130_v32  ;;  %v7198_v32 = vld [vmem:[%s9759_s14 + $0x10c] ss:$16 sps:$4 sm:$0xff]  }
 0x53b   :  { %3132 = vmatprep.subr.bf16.mxu1 %v7135_v33  ;;  %3602 = vmatpush1.bf16.msra.mxu0 %v7163_v48  ;;  %v7193_v33 = vld [vmem:[%s9759_s14 + $0x100] ss:$16 sps:$4 sm:$0xff]  }
 0x53c   :  { %3603 = vmatprep.subr.bf16.mxu0 %v7171_v51  ;;  %v7217_v48 = vld [vmem:[%s9759_s14 + $0x180] ss:$16 sps:$4 sm:$0xff]   ;;  %v7220_v51 = vld [vmem:[%s9759_s14 + $0x188] ss:$16 sps:$4 sm:$0xff]  }
 0x53e   :  { %3133 = vmatpush1.bf16.msra.mxu1 %v7133_v34  ;;  %v7196_v34 = vld [vmem:[%s9759_s14 + $0x108] ss:$16 sps:$4 sm:$0xff]  }
 0x53f   :  { %3134 = vmatprep.subr.bf16.mxu1 %v7138_v35  ;;  %3604 = vmatpush1.bf16.msra.mxu0 %v7169_v52  ;;  %v7201_v35 = vld [vmem:[%s9759_s14 + $0x124] ss:$16 sps:$4 sm:$0xff]  }
 0x540   :  { %3605 = vmatprep.subr.bf16.mxu0 %v7177_v53  ;;  %v7225_v52 = vld [vmem:[%s9759_s14 + $0x1a4] ss:$16 sps:$4 sm:$0xff]   ;;  %v7228_v53 = vld [vmem:[%s9759_s14 + $0x1ac] ss:$16 sps:$4 sm:$0xff]  }
 0x542   :  { %3135 = vmatpush1.bf16.msra.mxu1 %v7136_v25  ;;  %v7204_v25 = vld [vmem:[%s9759_s14 + $0x12c] ss:$16 sps:$4 sm:$0xff]  }
 0x543   :  { %3136 = vmatprep.subr.bf16.mxu1 %v7141_v36  ;;  %3606 = vmatpush1.bf16.msra.mxu0 %v7175_v54  ;;  %v7199_v36 = vld [vmem:[%s9759_s14 + $0x120] ss:$16 sps:$4 sm:$0xff]  }
 0x544   :  { %3607 = vmatprep.subr.bf16.mxu0 %v7183_v22  ;;  %v7223_v54 = vld [vmem:[%s9759_s14 + $0x1a0] ss:$16 sps:$4 sm:$0xff]  }
 0x546   :  { %3137 = vmatpush1.bf16.msra.mxu1 %v7139_v26  ;;  %v7202_v26 = vld [vmem:[%s9759_s14 + $0x128] ss:$16 sps:$4 sm:$0xff]  }
 0x547   :  { %3138 = vmatprep.subr.bf16.mxu1 %v7144_v37  ;;  %3608 = vmatpush1.bf16.msra.mxu0 %v7181_v9  ;;  %v7207_v37 = vld [vmem:[%s9759_s14 + $0x144] ss:$16 sps:$4 sm:$0xff]  }
 0x548   :  { %3609 = vmatprep.subr.bf16.mxu0 %v7189_v27 }
 0x54a   :  { %3139 = vmatpush1.bf16.msra.mxu1 %v7142_v38  ;;  %v7210_v38 = vld [vmem:[%s9759_s14 + $0x14c] ss:$16 sps:$4 sm:$0xff]  }
 0x54b   :  { %3636 = vmatprep.subr.bf16.mxu1 %v7150_v41  ;;  %3610 = vmatpush1.bf16.msra.mxu0 %v7187_v29  ;;  %v7213_v41 = vld [vmem:[%s9759_s14 + $0x164] ss:$16 sps:$4 sm:$0xff]  }
 0x54c   :  { %3611 = vmatprep.subr.bf16.mxu0 %v7195_v31 }
 0x54f   :  { %3612 = vmatpush1.bf16.msra.mxu0 %v7193_v33 }
 0x550   :  { %3613 = vmatprep.subr.bf16.mxu0 %v7201_v35 }
 0x553   :  { %3614 = vmatpush1.bf16.msra.mxu0 %v7199_v36 }
 0x554   :  { %3615 = vmatprep.subr.bf16.mxu0 %v7207_v37  ;;  %v3733_v37 = vld [vmem:[%s9761_s16 + $0x40] sm:$0xff] }
 0x557   :  { %3616 = vmatpush1.bf16.msra.mxu0 %v7205_v39  ;;  %v3737_v39 = vld [vmem:[%s9761_s16 + $0x60] sm:$0xff] }
 0x558   :  { %3617 = vmatprep.subr.bf16.mxu0 %v7213_v41  ;;  %v3738_v41 = vld [vmem:[%s9761_s16 + $0x68] sm:$0xff] }
 0x55b   :  { %3618 = vmatpush1.bf16.msra.mxu0 %v7211_v44 }
 0x55c   :  { %3619 = vmatprep.subr.bf16.mxu0 %v7219_v46 }
 0x55f   :  { %3620 = vmatpush1.bf16.msra.mxu0 %v7217_v48  ;;  %v3745_v48 = vld [vmem:[%s9761_s16 + $0xa0] sm:$0xff] }
 0x560   :  { %3621 = vmatprep.subr.bf16.mxu0 %v7225_v52  ;;  %v3746_v52 = vld [vmem:[%s9761_s16 + $0xa8] sm:$0xff] }
 0x563   :  { %3622 = vmatpush1.bf16.msra.mxu0 %v7223_v54 }
 0x600   :  { %v2998_v56 = vpop.f32.mrb[12].mxu1 }
 0x601   :  { %v2999_v57 = vadd.f32 %v6132_v55, %v2998_v56  ;;  %v6526_v58 = vpop.f32.mrb[13].mxu1  ;;  %v7226_v55 = vld [vmem:[%s9759_s14 + $0x1a8] ss:$16 sps:$4 sm:$0xff]   ;;  %v7231_v56 = vld [vmem:[%s9759_s14 + $0x1c4] ss:$16 sps:$4 sm:$0xff]  }
 0x602   :  { %v3001_v59 = vpop.f32.mrb[14].mxu1  ;;  %v7229_v58 = vld [vmem:[%s9759_s14 + $0x1c0] ss:$16 sps:$4 sm:$0xff]   ;;  %3623 = vmatprep.subr.bf16.mxu0 %v7231_v56 }
 0x603   :  { %v3004_v60 = vand.u32 2147483647, %v2999_v57  ;;  %v6527_v61 = vpop.f32.mrb[15].mxu1  ;;  %vm3008_vm8 = vcmp.ge.f32.partialorder %v2999_v57, 0.0  ;;  %v7232_v59 = vld [vmem:[%s9759_s14 + $0x1c8] ss:$16 sps:$4 sm:$0xff]   ;;  %3624 = vmatpush1.bf16.msra.mxu0 %v7229_v58 }
 0x604   :  { %v7240_v61 = vld [vmem:[%s9759_s14 + $0x1ec] ss:$16 sps:$4 sm:$0xff]   ;;  %v3753_v58 = vld [vmem:[%s9761_s16 + $0xe0] sm:$0xff] }
 0x605   :  { %v3005_v62 = vsub.f32 0.0, %v3004_v60  ;;  %v7237_v60 = vld [vmem:[%s9759_s14 + $0x1e4] ss:$16 sps:$4 sm:$0xff]  }
 0x606   :  { %3625 = vmatprep.subr.bf16.mxu0 %v7237_v60  ;;  %v3754_v60 = vld [vmem:[%s9761_s16 + $0xe8] sm:$0xff] }
 0x607   :  { %v3006_v63 = vmul.f32 1.442695, %v3005_v62  ;;  %v7235_v62 = vld [vmem:[%s9759_s14 + $0x1e0] ss:$16 sps:$4 sm:$0xff]  }
 0x608   :  { %3626 = vmatpush1.bf16.msra.mxu0 %v7235_v62 }
 0x609   :  { %7271 = vpow2.f32 %v3006_v63  ;;  %v7238_v63 = vld [vmem:[%s9759_s14 + $0x1e8] ss:$16 sps:$4 sm:$0xff]  }
 0x613   :  { %v7272_v0 = vpop.eup %7271 }
 0x614   :  { %v3009_v1 = vadd.f32 1.0, %v7272_v0 }
 0x616   :  { %7273 = vrcp.f32 %v3009_v1  ;;  %v3729_v1 = vld [vmem:[%s9761_s16 + $0x20] sm:$0xff] }
 0x620   :  { %v7274_v2 = vpop.eup %7273 }
 0x621   :  { %v3012_v4 = vmul.f32 %v7274_v2, %v7272_v0  ;;  %v3725_v0 = vld [vmem:[%s9761_s16] sm:$0xff] }
 0x623   :  { %v3013_v7 = vsel %vm3008_vm8, %v7274_v2, %v3012_v4  ;;  %v3726_v2 = vld [vmem:[%s9761_s16 + $0x8] sm:$0xff]  ;;  %v6221_v4 = vcombine.low %v3725_v0, %v3729_v1 }
 0x624   :  { %v3014_v8 = vmul.f32 %v3013_v7, %v2999_v57  ;;  %v7234_v57 = vld [vmem:[%s9759_s14 + $0x1cc] ss:$16 sps:$4 sm:$0xff]   ;;  %v6222_v7 = vcombine.high %v3725_v0, %v3729_v1  ;;  %v3757_v1 = vld [vmem:[%s9761_s16 + $0x100] sm:$0xff] }
 0x626   :  { %v3015_v11 = vpack.c.bf16 %v3014_v8, %v3014_v8  ;;  %v3730_v8 = vld [vmem:[%s9761_s16 + $0x28] sm:$0xff]  ;;  %5303 = vmatprep.subr.bf16.mxu0 %v6222_v7 }
 0x627   :  { %v3762_v7 = vld [vmem:[%s9761_s16 + $0x128] sm:$0xff] }
 0x628   :  { %3157 = vmatmul.mubr.bf16.vlgmr.msra.gmra.mrb[16].mxu1 %v3015_v11  ;;  %v6224_v11 = vcombine.high %v3726_v2, %v3730_v8 }
 0x629   :  { %3637 = vmatpush1.bf16.msra.mxu1 %v7148_v10  ;;  %v6223_v10 = vcombine.low %v3726_v2, %v3730_v8  ;;  %v3761_v2 = vld [vmem:[%s9761_s16 + $0x120] sm:$0xff] }
 0x62a   :  { %3638 = vmatprep.subr.bf16.mxu1 %v7156_v12  ;;  %v3032_v12 = vld [vmem:[%s9758_s13] sm:$0x3] }
 0x62d   :  { %3639 = vmatpush1.bf16.msra.mxu1 %v7154_v13  ;;  %v3037_v13 = vrot.slane %v3032_v12, %v8361_v3 }
 0x62e   :  { %3640 = vmatprep.subr.bf16.mxu1 %v7162_v14  ;;  %v3041_v14 = vrot.slane %v3032_v12, %v8369_v5 }
 0x631   :  { %3641 = vmatpush1.bf16.msra.mxu1 %v7160_v15 }
 0x632   :  { %3642 = vmatprep.subr.bf16.mxu1 %v7168_v16 }
 0x635   :  { %3643 = vmatpush1.bf16.msra.mxu1 %v7166_v17 }
 0x636   :  { %3644 = vmatprep.subr.bf16.mxu1 %v7174_v18 }
 0x639   :  { %3645 = vmatpush1.bf16.msra.mxu1 %v7172_v19 }
 0x63a   :  { %3646 = vmatprep.subr.bf16.mxu1 %v7180_v20 }
 0x63d   :  { %3647 = vmatpush1.bf16.msra.mxu1 %v7178_v21 }
 0x63e   :  { %3648 = vmatprep.subr.bf16.mxu1 %v7186_v24 }
 0x641   :  { %3649 = vmatpush1.bf16.msra.mxu1 %v7184_v23 }
 0x642   :  { %3650 = vmatprep.subr.bf16.mxu1 %v7192_v28 }
 0x645   :  { %3651 = vmatpush1.bf16.msra.mxu1 %v7190_v30 }
 0x646   :  { %3652 = vmatprep.subr.bf16.mxu1 %v7198_v32 }
 0x649   :  { %3653 = vmatpush1.bf16.msra.mxu1 %v7196_v34 }
 0x64a   :  { %3654 = vmatprep.subr.bf16.mxu1 %v7204_v25 }
 0x64d   :  { %3655 = vmatpush1.bf16.msra.mxu1 %v7202_v26 }
 0x64e   :  { %3656 = vmatprep.subr.bf16.mxu1 %v7210_v38 }
 0x651   :  { %3657 = vmatpush1.bf16.msra.mxu1 %v7208_v40  ;;  %v3734_v40 = vld [vmem:[%s9761_s16 + $0x48] sm:$0xff] }
 0x652   :  { %3658 = vmatprep.subr.bf16.mxu1 %v7216_v42  ;;  %v6232_v46 = vcombine.high %v3734_v40, %v3738_v41  ;;  %v6231_v54 = vcombine.low %v3734_v40, %v3738_v41  ;;  %v3790_v40 = vld [vmem:[%s9761_s16 + $0x208] sm:$0xff] }
 0x655   :  { %3659 = vmatpush1.bf16.msra.mxu1 %v7214_v45  ;;  %v6230_v45 = vcombine.high %v3733_v37, %v3737_v39 }
 0x656   :  { %3660 = vmatprep.subr.bf16.mxu1 %v7222_v47  ;;  %v3741_v47 = vld [vmem:[%s9761_s16 + $0x80] sm:$0xff] }
 0x659   :  { %3661 = vmatpush1.bf16.msra.mxu1 %v7220_v51  ;;  %v3742_v51 = vld [vmem:[%s9761_s16 + $0x88] sm:$0xff] }
 0x65a   :  { %3662 = vmatprep.subr.bf16.mxu1 %v7228_v53  ;;  %v6229_v53 = vcombine.low %v3733_v37, %v3737_v39  ;;  %v6240_v56 = vcombine.high %v3742_v51, %v3746_v52  ;;  %v6239_v62 = vcombine.low %v3742_v51, %v3746_v52  ;;  %v3793_v39 = vld [vmem:[%s9761_s16 + $0x220] sm:$0xff]  ;;  %v3798_v51 = vld [vmem:[%s9761_s16 + $0x248] sm:$0xff] }
 0x65d   :  { %3663 = vmatpush1.bf16.msra.mxu1 %v7226_v55  ;;  %v6238_v55 = vcombine.high %v3741_v47, %v3745_v48 }
 0x65e   :  { %3664 = vmatprep.subr.bf16.mxu1 %v7234_v57  ;;  %v3749_v57 = vld [vmem:[%s9761_s16 + $0xc0] sm:$0xff] }
 0x65f   :  { %v6245_v8 = vcombine.low %v3749_v57, %v3753_v58 }
 0x661   :  { %3665 = vmatpush1.bf16.msra.mxu1 %v7232_v59  ;;  %v3750_v59 = vld [vmem:[%s9761_s16 + $0xc8] sm:$0xff] }
 0x662   :  { %3666 = vmatprep.subr.bf16.mxu1 %v7240_v61  ;;  %v6237_v61 = vcombine.low %v3741_v47, %v3745_v48  ;;  %v6248_v0 = vcombine.high %v3750_v59, %v3754_v60  ;;  %v3797_v47 = vld [vmem:[%s9761_s16 + $0x240] sm:$0xff] }
 0x663   :  { %v3801_v48 = vld [vmem:[%s9761_s16 + $0x260] sm:$0xff] }
 0x664   :  { %v6294_v52 = vcombine.high %v3797_v47, %v3801_v48 }
 0x665   :  { %3667 = vmatpush1.bf16.msra.mxu1 %v7238_v63  ;;  %v6246_v63 = vcombine.high %v3749_v57, %v3753_v58  ;;  %v3805_v57 = vld [vmem:[%s9761_s16 + $0x280] sm:$0xff] }
 0x666   :  { %5385 = vmatprep.subr.bf16.mxu1 %v6224_v11  ;;  %v6254_v11 = vcombine.high %v3757_v1, %v3761_v2  ;;  %v3809_v58 = vld [vmem:[%s9761_s16 + $0x2a0] sm:$0xff] }
 0x6fb   :  { %v3158_v15 = vpop.f32.mrb[16].mxu1 }
 0x6fc   :  { %v3159_v16 = vadd.f32 %v3158_v15, %v3037_v13  ;;  %v3160_v17 = vpop.f32.mrb[17].mxu1  ;;  %v3765_v13 = vld [vmem:[%s9761_s16 + $0x140] sm:$0xff]  ;;  %v3766_v15 = vld [vmem:[%s9761_s16 + $0x148] sm:$0xff] }
 0x6fd   :  { %v3161_v18 = vadd.f32 %v3160_v17, %v3041_v14  ;;  %v3162_v19 = vpop.f32.mrb[18].mxu1  ;;  %v3769_v14 = vld [vmem:[%s9761_s16 + $0x160] sm:$0xff]  ;;  %v6253_v17 = vcombine.low %v3757_v1, %v3761_v2 }
 0x6fe   :  { %v3165_v20 = vand.u32 2147483647, %v3159_v16  ;;  %v3163_v21 = vpop.f32.mrb[19].mxu1  ;;  %vm3173_vm9 = vcmp.ge.f32.partialorder %v3159_v16, 0.0  ;;  %v6262_v19 = vcombine.high %v3765_v13, %v3769_v14  ;;  %v3813_v1 = vld [vmem:[%s9761_s16 + $0x2c0] sm:$0xff] }
 0x6ff   :  { %v3166_v22 = vand.u32 2147483647, %v3161_v18  ;;  %vm3174_vm10 = vcmp.ge.f32.partialorder %v3161_v18, 0.0  ;;  %v6261_v21 = vcombine.low %v3765_v13, %v3769_v14  ;;  %v3817_v2 = vld [vmem:[%s9761_s16 + $0x2e0] sm:$0xff] }
 0x700   :  { %v3167_v24 = vsub.f32 0.0, %v3165_v20  ;;  %v3821_v13 = vld [vmem:[%s9761_s16 + $0x300] sm:$0xff] }
 0x701   :  { %v3168_v9 = vsub.f32 0.0, %v3166_v22  ;;  %v3825_v14 = vld [vmem:[%s9761_s16 + $0x320] sm:$0xff] }
 0x702   :  { %v3169_v23 = vmul.f32 1.442695, %v3167_v24  ;;  %v3773_v24 = vld [vmem:[%s9761_s16 + $0x180] sm:$0xff] }
 0x703   :  { %v3171_v27 = vmul.f32 1.442695, %v3168_v9  ;;  %v3777_v9 = vld [vmem:[%s9761_s16 + $0x1a0] sm:$0xff] }
 0x704   :  { %7275 = vpow2.f32 %v3169_v23  ;;  %v3774_v23 = vld [vmem:[%s9761_s16 + $0x188] sm:$0xff] }
 0x705   :  { %7277 = vpow2.f32 %v3171_v27  ;;  %v6270_v27 = vcombine.high %v3773_v24, %v3777_v9 }
 0x70e   :  { %v7276_v28 = vpop.eup %7275 }
 0x70f   :  { %v7278_v29 = vpop.eup %7277  ;;  %v3175_v30 = vadd.f32 1.0, %v7276_v28 }
 0x710   :  { %v3176_v31 = vadd.f32 1.0, %v7278_v29 }
 0x711   :  { %7279 = vrcp.f32 %v3175_v30 }
 0x712   :  { %7281 = vrcp.f32 %v3176_v31 }
 0x71b   :  { %v7280_v32 = vpop.eup %7279 }
 0x71c   :  { %v7282_v33 = vpop.eup %7281  ;;  %v3181_v34 = vmul.f32 %v7280_v32, %v7276_v28  ;;  %v3778_v28 = vld [vmem:[%s9761_s16 + $0x1a8] sm:$0xff] }
 0x71d   :  { %v3182_v35 = vmul.f32 %v7282_v33, %v7278_v29  ;;  %v6269_v29 = vcombine.low %v3773_v24, %v3777_v9  ;;  %v6271_v30 = vcombine.low %v3774_v23, %v3778_v28  ;;  %v6272_v31 = vcombine.high %v3774_v23, %v3778_v28  ;;  %v3830_v24 = vld [vmem:[%s9761_s16 + $0x348] sm:$0xff] }
 0x71e   :  { %v3183_v25 = vsel %vm3173_vm9, %v7280_v32, %v3181_v34  ;;  %v3781_v32 = vld [vmem:[%s9761_s16 + $0x1c0] sm:$0xff]  ;;  %v3782_v34 = vld [vmem:[%s9761_s16 + $0x1c8] sm:$0xff] }
 0x71f   :  { %v3185_v36 = vmul.f32 %v3183_v25, %v3159_v16  ;;  %v3184_v26 = vsel %vm3174_vm10, %v7282_v33, %v3182_v35  ;;  %v3770_v16 = vld [vmem:[%s9761_s16 + $0x168] sm:$0xff]  ;;  %v3785_v33 = vld [vmem:[%s9761_s16 + $0x1e0] sm:$0xff] }
 0x720   :  { %v3186_v38 = vmul.f32 %v3184_v26, %v3161_v18  ;;  %v6264_v20 = vcombine.high %v3766_v15, %v3770_v16  ;;  %v6263_v22 = vcombine.low %v3766_v15, %v3770_v16  ;;  %v6278_v35 = vcombine.high %v3781_v32, %v3785_v33  ;;  %v3786_v25 = vld [vmem:[%s9761_s16 + $0x1e8] sm:$0xff] }
 0x721   :  { %v3187_v44 = vpack.c.bf16 %v3185_v36, %v3185_v36  ;;  %v6277_v36 = vcombine.low %v3781_v32, %v3785_v33  ;;  %v6279_v26 = vcombine.low %v3782_v34, %v3786_v25  ;;  %v6280_v37 = vcombine.high %v3782_v34, %v3786_v25  ;;  %v3822_v15 = vld [vmem:[%s9761_s16 + $0x308] sm:$0xff] }
 0x722   :  { %v3188_v42 = vpack.c.bf16 %v3186_v38, %v3186_v38  ;;  %v3789_v38 = vld [vmem:[%s9761_s16 + $0x200] sm:$0xff]  ;;  %v6318_v16 = vcombine.high %v3821_v13, %v3825_v14  ;;  %v3834_v23 = vld [vmem:[%s9761_s16 + $0x368] sm:$0xff] }
 0x723   :  { %v6286_v41 = vcombine.high %v3789_v38, %v3793_v39  ;;  %v6327_v28 = vcombine.low %v3830_v24, %v3834_v23  ;;  %v3838_v32 = vld [vmem:[%s9761_s16 + $0x388] sm:$0xff] }
 0x724   :  { %3627 = vmatprep.mubr.bf16.mxu0 %v3188_v42  ;;  %3668 = vmatprep.mubr.bf16.mxu1 %v3188_v42  ;;  %v3794_v42 = vld [vmem:[%s9761_s16 + $0x228] sm:$0xff] }
 0x725   :  { %3628 = vmatmul.mubr.bf16.vlgmr.msra.gmra.mrb[8].mxu0 %v3187_v44  ;;  %3669 = vmatmul.mubr.bf16.vlgmr.msra.gmra.mrb[20].mxu1 %v3187_v44  ;;  %v6285_v44 = vcombine.low %v3789_v38, %v3793_v39  ;;  %v3842_v34 = vld [vmem:[%s9761_s16 + $0x3a8] sm:$0xff] }
 0x726   :  { %5304 = vmatpush1.bf16.msra.mxu0 %v6221_v4  ;;  %5386 = vmatpush1.bf16.msra.mxu1 %v6223_v10  ;;  %v3758_v4 = vld [vmem:[%s9761_s16 + $0x108] sm:$0xff]  ;;  %v6247_v10 = vcombine.low %v3750_v59, %v3754_v60  ;;  %v6302_v60 = vcombine.high %v3805_v57, %v3809_v58  ;;  %v6335_v25 = vcombine.low %v3838_v32, %v3842_v34 }
 0x727   :  { %5305 = vmatprep.subr.bf16.mxu0 %v6230_v45  ;;  %5387 = vmatprep.subr.bf16.mxu1 %v6232_v46  ;;  %v6256_v12 = vcombine.high %v3758_v4, %v3762_v7  ;;  %v6255_v18 = vcombine.low %v3758_v4, %v3762_v7  ;;  %v6287_v45 = vcombine.low %v3790_v40, %v3794_v42  ;;  %v3806_v59 = vld [vmem:[%s9761_s16 + $0x288] sm:$0xff] }
 0x728   :  { %v6288_v46 = vcombine.high %v3790_v40, %v3794_v42  ;;  %v3814_v4 = vld [vmem:[%s9761_s16 + $0x2c8] sm:$0xff]  ;;  %v6310_v7 = vcombine.high %v3813_v1, %v3817_v2 }
 0x729   :  { %v3846_v38 = vld [vmem:[%s9761_s16 + $0x3c8] sm:$0xff] }
 0x72a   :  { %5306 = vmatpush1.bf16.msra.mxu0 %v6229_v53  ;;  %5388 = vmatpush1.bf16.msra.mxu1 %v6231_v54  ;;  %v3802_v53 = vld [vmem:[%s9761_s16 + $0x268] sm:$0xff]  ;;  %v6293_v54 = vcombine.low %v3797_v47, %v3801_v48 }
 0x72b   :  { %5307 = vmatprep.subr.bf16.mxu0 %v6238_v55  ;;  %5389 = vmatprep.subr.bf16.mxu1 %v6240_v56  ;;  %v6295_v55 = vcombine.low %v3798_v51, %v3802_v53  ;;  %v6296_v56 = vcombine.high %v3798_v51, %v3802_v53  ;;  %v3850_v40 = vld [vmem:[%s9761_s16 + $0x3e8] sm:$0xff] }
 0x72c   :  { %v6343_v42 = vcombine.low %v3846_v38, %v3850_v40  ;;  %v9074_v47 = vld [vmem:[%s9761_s16 + $0x408] sm:$0xff] }
 0x72d   :  { %v9081_v51 = vld [vmem:[%s9761_s16 + $0x428] sm:$0xff] }
 0x72e   :  { %5308 = vmatpush1.bf16.msra.mxu0 %v6237_v61  ;;  %5390 = vmatpush1.bf16.msra.mxu1 %v6239_v62  ;;  %v3810_v61 = vld [vmem:[%s9761_s16 + $0x2a8] sm:$0xff]  ;;  %v6301_v62 = vcombine.low %v3805_v57, %v3809_v58  ;;  %v6351_v53 = vcombine.low %v9074_v47, %v9081_v51 }
 0x72f   :  { %5309 = vmatprep.subr.bf16.mxu0 %v6246_v63  ;;  %5391 = vmatprep.subr.bf16.mxu1 %v6248_v0  ;;  %v6303_v63 = vcombine.low %v3806_v59, %v3810_v61  ;;  %v6304_v0 = vcombine.high %v3806_v59, %v3810_v61 }
 0x732   :  { %5310 = vmatpush1.bf16.msra.mxu0 %v6245_v8  ;;  %5392 = vmatpush1.bf16.msra.mxu1 %v6247_v10  ;;  %v3818_v8 = vld [vmem:[%s9761_s16 + $0x2e8] sm:$0xff]  ;;  %v6309_v10 = vcombine.low %v3813_v1, %v3817_v2 }
 0x733   :  { %5311 = vmatprep.subr.bf16.mxu0 %v6254_v11  ;;  %5393 = vmatprep.subr.bf16.mxu1 %v6256_v12  ;;  %v6311_v11 = vcombine.low %v3814_v4, %v3818_v8  ;;  %v6312_v12 = vcombine.high %v3814_v4, %v3818_v8 }
 0x736   :  { %5312 = vmatpush1.bf16.msra.mxu0 %v6253_v17  ;;  %5394 = vmatpush1.bf16.msra.mxu1 %v6255_v18  ;;  %v3826_v17 = vld [vmem:[%s9761_s16 + $0x328] sm:$0xff]  ;;  %v6317_v18 = vcombine.low %v3821_v13, %v3825_v14 }
 0x737   :  { %5313 = vmatprep.subr.bf16.mxu0 %v6262_v19  ;;  %5395 = vmatprep.subr.bf16.mxu1 %v6264_v20  ;;  %v6319_v19 = vcombine.low %v3822_v15, %v3826_v17  ;;  %v6320_v20 = vcombine.high %v3822_v15, %v3826_v17 }
 0x73a   :  { %5314 = vmatpush1.bf16.msra.mxu0 %v6261_v21  ;;  %5396 = vmatpush1.bf16.msra.mxu1 %v6263_v22  ;;  %v3829_v21 = vld [vmem:[%s9761_s16 + $0x340] sm:$0xff] }
 0x73b   :  { %5315 = vmatprep.subr.bf16.mxu0 %v6270_v27  ;;  %5397 = vmatprep.subr.bf16.mxu1 %v6272_v31  ;;  %v3833_v22 = vld [vmem:[%s9761_s16 + $0x360] sm:$0xff] }
 0x73c   :  { %v6326_v9 = vcombine.high %v3829_v21, %v3833_v22  ;;  %v6325_v27 = vcombine.low %v3829_v21, %v3833_v22  ;;  %v3841_v31 = vld [vmem:[%s9761_s16 + $0x3a0] sm:$0xff] }
 0x73e   :  { %5316 = vmatpush1.bf16.msra.mxu0 %v6269_v29  ;;  %5398 = vmatpush1.bf16.msra.mxu1 %v6271_v30  ;;  %v6328_v29 = vcombine.high %v3830_v24, %v3834_v23  ;;  %v3837_v30 = vld [vmem:[%s9761_s16 + $0x380] sm:$0xff] }
 0x73f   :  { %5317 = vmatprep.subr.bf16.mxu0 %v6278_v35  ;;  %5399 = vmatprep.subr.bf16.mxu1 %v6280_v37  ;;  %v6334_v33 = vcombine.high %v3837_v30, %v3841_v31  ;;  %v6333_v35 = vcombine.low %v3837_v30, %v3841_v31  ;;  %v3849_v37 = vld [vmem:[%s9761_s16 + $0x3e0] sm:$0xff] }
 0x742   :  { %5318 = vmatpush1.bf16.msra.mxu0 %v6277_v36  ;;  %5400 = vmatpush1.bf16.msra.mxu1 %v6279_v26  ;;  %v6336_v36 = vcombine.high %v3838_v32, %v3842_v34  ;;  %v3845_v26 = vld [vmem:[%s9761_s16 + $0x3c0] sm:$0xff] }
 0x743   :  { %5319 = vmatprep.subr.bf16.mxu0 %v6286_v41  ;;  %5401 = vmatprep.subr.bf16.mxu1 %v6288_v46  ;;  %v6342_v39 = vcombine.high %v3845_v26, %v3849_v37  ;;  %v6341_v41 = vcombine.low %v3845_v26, %v3849_v37  ;;  %v9069_v46 = vld [vmem:[%s9761_s16 + $0x420] sm:$0xff] }
 0x744   :  { %v3865_v37 = vld [vmem:[%s9761_s16 + $0x460] sm:$0xff] }
 0x746   :  { %5320 = vmatpush1.bf16.msra.mxu0 %v6285_v44  ;;  %5402 = vmatpush1.bf16.msra.mxu1 %v6287_v45  ;;  %v6344_v44 = vcombine.high %v3846_v38, %v3850_v40  ;;  %v9064_v45 = vld [vmem:[%s9761_s16 + $0x400] sm:$0xff]  ;;  %v3862_v38 = vld [vmem:[%s9761_s16 + $0x448] sm:$0xff] }
 0x747   :  { %5321 = vmatprep.subr.bf16.mxu0 %v6294_v52  ;;  %5403 = vmatprep.subr.bf16.mxu1 %v6296_v56  ;;  %v6350_v48 = vcombine.high %v9064_v45, %v9069_v46  ;;  %v6349_v52 = vcombine.low %v9064_v45, %v9069_v46  ;;  %v3881_v45 = vld [vmem:[%s9761_s16 + $0x4e0] sm:$0xff]  ;;  %v3878_v46 = vld [vmem:[%s9761_s16 + $0x4c8] sm:$0xff] }
 0x74a   :  { %5322 = vmatpush1.bf16.msra.mxu0 %v6293_v54  ;;  %5404 = vmatpush1.bf16.msra.mxu1 %v6295_v55  ;;  %v6352_v54 = vcombine.high %v9074_v47, %v9081_v51  ;;  %v9092_v55 = vld [vmem:[%s9760_s15] sm:$0xf]  ;;  %v3882_v47 = vld [vmem:[%s9761_s16 + $0x4e8] sm:$0xff] }
 0x74b   :  { %5323 = vmatprep.subr.bf16.mxu0 %v6302_v60  ;;  %5405 = vmatprep.subr.bf16.mxu1 %v6304_v0  ;;  %v3258_v56 = vrot.slane %v9092_v55, %v8361_v3  ;;  %v3262_v57 = vrot.slane %v9092_v55, %v8369_v5  ;;  %v3270_v58 = vrot.slane %v9092_v55, %v8372_v6 }
 0x74e   :  { %5324 = vmatpush1.bf16.msra.mxu0 %v6301_v62  ;;  %5406 = vmatpush1.bf16.msra.mxu1 %v6303_v63 }
 0x74f   :  { %5325 = vmatprep.subr.bf16.mxu0 %v6310_v7  ;;  %5407 = vmatprep.subr.bf16.mxu1 %v6312_v12 }
 0x752   :  { %5326 = vmatpush1.bf16.msra.mxu0 %v6309_v10  ;;  %5408 = vmatpush1.bf16.msra.mxu1 %v6311_v11 }
 0x753   :  { %5327 = vmatprep.subr.bf16.mxu0 %v6318_v16  ;;  %5409 = vmatprep.subr.bf16.mxu1 %v6320_v20 }
 0x756   :  { %5328 = vmatpush1.bf16.msra.mxu0 %v6317_v18  ;;  %5410 = vmatpush1.bf16.msra.mxu1 %v6319_v19 }
 0x757   :  { %5329 = vmatprep.subr.bf16.mxu0 %v6326_v9  ;;  %5411 = vmatprep.subr.bf16.mxu1 %v6328_v29 }
 0x75a   :  { %5330 = vmatpush1.bf16.msra.mxu0 %v6325_v27  ;;  %5412 = vmatpush1.bf16.msra.mxu1 %v6327_v28 }
 0x75b   :  { %5331 = vmatprep.subr.bf16.mxu0 %v6334_v33  ;;  %5413 = vmatprep.subr.bf16.mxu1 %v6336_v36  ;;  %v3861_v36 = vld [vmem:[%s9761_s16 + $0x440] sm:$0xff] }
 0x75e   :  { %5332 = vmatpush1.bf16.msra.mxu0 %v6333_v35  ;;  %5414 = vmatpush1.bf16.msra.mxu1 %v6335_v25 }
 0x75f   :  { %5333 = vmatprep.subr.bf16.mxu0 %v6342_v39  ;;  %5415 = vmatprep.subr.bf16.mxu1 %v6344_v44  ;;  %v3866_v39 = vld [vmem:[%s9761_s16 + $0x468] sm:$0xff]  ;;  %v6358_v44 = vcombine.high %v3861_v36, %v3865_v37 }
 0x762   :  { %5334 = vmatpush1.bf16.msra.mxu0 %v6341_v41  ;;  %5416 = vmatpush1.bf16.msra.mxu1 %v6343_v42  ;;  %v3869_v42 = vld [vmem:[%s9761_s16 + $0x480] sm:$0xff] }
 0x763   :  { %5344 = vmatprep.subr.bf16.mxu0 %v6350_v48  ;;  %5426 = vmatprep.subr.bf16.mxu1 %v6352_v54  ;;  %v6360_v48 = vcombine.high %v3862_v38, %v3866_v39  ;;  %v3873_v54 = vld [vmem:[%s9761_s16 + $0x4a0] sm:$0xff] }
 0x7f8   :  { %v3629_v59 = vpop.f32.mrb[8].mxu0  ;;  %v9100_v60 = vpop.f32.mrb[20].mxu1 }
 0x7f9   :  { %v3630_v61 = vadd.f32 %v3629_v59, %v3258_v56  ;;  %v3631_v62 = vpop.f32.mrb[9].mxu0  ;;  %v3672_v63 = vpop.f32.mrb[21].mxu1  ;;  %v3870_v56 = vld [vmem:[%s9761_s16 + $0x488] sm:$0xff]  ;;  %v3266_v59 = vrot.slane %v9092_v55, %v8381_v50  ;;  %v3877_v55 = vld [vmem:[%s9761_s16 + $0x4c0] sm:$0xff] }
 0x7fa   :  { %v3632_v0 = vadd.f32 %v3631_v62, %v3262_v57  ;;  %v3673_v1 = vadd.f32 %v3672_v63, %v3270_v58  ;;  %v3633_v2 = vpop.f32.mrb[10].mxu0  ;;  %v3674_v4 = vpop.f32.mrb[22].mxu1  ;;  %v3874_v57 = vld [vmem:[%s9761_s16 + $0x4a8] sm:$0xff]  ;;  %v6359_v62 = vcombine.low %v3862_v38, %v3866_v39  ;;  %v6366_v63 = vcombine.high %v3869_v42, %v3873_v54 }
 0x7fb   :  { %v3677_v7 = vand.u32 2147483647, %v3630_v61  ;;  %v3634_v12 = vpop.f32.mrb[11].mxu0  ;;  %v3675_v13 = vpop.f32.mrb[23].mxu1  ;;  %vm3693_vm11 = vcmp.ge.f32.partialorder %v3630_v61, 0.0  ;;  %v9159_v51 = vadd.f32 %v9100_v60, %v3266_v59  ;;  %v6376_v2 = vcombine.high %v3878_v46, %v3882_v47  ;;  %v3885_v4 = vld [vmem:[%s9761_s16 + $0x500] sm:$0xff] }
 0x7fc   :  { %v3678_v8 = vand.u32 2147483647, %v3632_v0  ;;  %v3680_v10 = vand.u32 2147483647, %v3673_v1  ;;  %vm3694_vm12 = vcmp.ge.f32.partialorder %v3632_v0, 0.0  ;;  %vm3696_vm13 = vcmp.ge.f32.partialorder %v3673_v1, 0.0 }
 0x7fd   :  { %v3681_v11 = vsub.f32 0.0, %v3677_v7  ;;  %v3889_v7 = vld [vmem:[%s9761_s16 + $0x520] sm:$0xff]  ;;  %v3886_v60 = vld [vmem:[%s9761_s16 + $0x508] sm:$0xff]  ;;  %v6375_v12 = vcombine.low %v3878_v46, %v3882_v47  ;;  %vm3695_vm14 = vcmp.ge.f32.partialorder %v9159_v51, 0.0 }
 0x7fe   :  { %v3682_v14 = vsub.f32 0.0, %v3678_v8  ;;  %v3684_v15 = vsub.f32 0.0, %v3680_v10  ;;  %v3890_v8 = vld [vmem:[%s9761_s16 + $0x528] sm:$0xff]  ;;  %v3679_v10 = vand.u32 2147483647, %v9159_v51  ;;  %v6382_v13 = vcombine.high %v3885_v4, %v3889_v7 }
 0x7ff   :  { %v3685_v16 = vmul.f32 1.442695, %v3681_v11  ;;  %v6373_v11 = vcombine.low %v3877_v55, %v3881_v45 }
 0x800   :  { %v3687_v17 = vmul.f32 1.442695, %v3682_v14  ;;  %v3691_v18 = vmul.f32 1.442695, %v3684_v15  ;;  %v6384_v14 = vcombine.high %v3886_v60, %v3890_v8  ;;  %v3893_v15 = vld [vmem:[%s9761_s16 + $0x540] sm:$0xff] }
 0x801   :  { %7283 = vpow2.f32 %v3685_v16  ;;  %v3897_v16 = vld [vmem:[%s9761_s16 + $0x560] sm:$0xff] }
 0x802   :  { %7285 = vpow2.f32 %v3687_v17  ;;  %v3894_v17 = vld [vmem:[%s9761_s16 + $0x548] sm:$0xff] }
 0x803   :  { %7287 = vpow2.f32 %v3691_v18  ;;  %v3898_v18 = vld [vmem:[%s9761_s16 + $0x568] sm:$0xff] }
 0x80b   :  { %v7284_v19 = vpop.eup %7283 }
 0x80c   :  { %v3697_v20 = vadd.f32 1.0, %v7284_v19  ;;  %v7286_v21 = vpop.eup %7285 }
 0x80d   :  { %v7288_v22 = vpop.eup %7287  ;;  %v3698_v24 = vadd.f32 1.0, %v7286_v21 }
 0x80e   :  { %7289 = vrcp.f32 %v3697_v20  ;;  %v3700_v9 = vadd.f32 1.0, %v7288_v22  ;;  %v6381_v20 = vcombine.low %v3885_v4, %v3889_v7  ;;  %v3934_v4 = vld [vmem:[%s9761_s16 + $0x688] sm:$0xff] }
 0x80f   :  { %7291 = vrcp.f32 %v3698_v24  ;;  %v6392_v24 = vcombine.high %v3894_v17, %v3898_v18  ;;  %v3938_v7 = vld [vmem:[%s9761_s16 + $0x6a8] sm:$0xff] }
 0x810   :  { %7293 = vrcp.f32 %v3700_v9  ;;  %v3901_v9 = vld [vmem:[%s9761_s16 + $0x580] sm:$0xff] }
 0x818   :  { %v7290_v23 = vpop.eup %7289 }
 0x819   :  { %v3709_v27 = vmul.f32 %v7290_v23, %v7284_v19  ;;  %v7292_v28 = vpop.eup %7291  ;;  %v3683_v19 = vsub.f32 0.0, %v3679_v10 }
 0x81a   :  { %v7294_v29 = vpop.eup %7293  ;;  %v3710_v31 = vmul.f32 %v7292_v28, %v7286_v21  ;;  %v6383_v21 = vcombine.low %v3886_v60, %v3890_v8 }
 0x81b   :  { %v3713_v30 = vsel %vm3693_vm11, %v7290_v23, %v3709_v27  ;;  %v3712_v32 = vmul.f32 %v7294_v29, %v7288_v22  ;;  %v6390_v22 = vcombine.high %v3893_v15, %v3897_v16  ;;  %v3905_v23 = vld [vmem:[%s9761_s16 + $0x5a0] sm:$0xff]  ;;  %v3902_v27 = vld [vmem:[%s9761_s16 + $0x588] sm:$0xff] }
 0x81c   :  { %v3717_v33 = vmul.f32 %v3713_v30, %v3630_v61  ;;  %v3714_v34 = vsel %vm3694_vm12, %v7292_v28, %v3710_v31  ;;  %v6357_v61 = vcombine.low %v3861_v36, %v3865_v37  ;;  %v3906_v28 = vld [vmem:[%s9761_s16 + $0x5a8] sm:$0xff]  ;;  %v6389_v30 = vcombine.low %v3893_v15, %v3897_v16 }
 0x81d   :  { %v3718_v35 = vmul.f32 %v3714_v34, %v3632_v0  ;;  %v3716_v25 = vsel %vm3696_vm13, %v7294_v29, %v3712_v32  ;;  %v6368_v0 = vcombine.high %v3870_v56, %v3874_v57  ;;  %v3689_v29 = vmul.f32 1.442695, %v3683_v19  ;;  %v3909_v34 = vld [vmem:[%s9761_s16 + $0x5c0] sm:$0xff]  ;;  %v3914_v36 = vld [vmem:[%s9761_s16 + $0x5e8] sm:$0xff] }
 0x81e   :  { %v3720_v26 = vmul.f32 %v3716_v25, %v3673_v1  ;;  %v9116_v41 = vpack.c.bf16 %v3717_v33, %v3717_v33  ;;  %v6374_v1 = vcombine.high %v3877_v55, %v3881_v45  ;;  %v6391_v31 = vcombine.low %v3894_v17, %v3898_v18  ;;  %v3910_v25 = vld [vmem:[%s9761_s16 + $0x5c8] sm:$0xff] }
 0x81f   :  { %v9114_v40 = vpack.c.bf16 %v3718_v35, %v3718_v35  ;;  %v6398_v32 = vcombine.high %v3901_v9, %v3905_v23  ;;  %v6400_v33 = vcombine.high %v3902_v27, %v3906_v28  ;;  %v3913_v35 = vld [vmem:[%s9761_s16 + $0x5e0] sm:$0xff]  ;;  %7295 = vpow2.f32 %v3689_v29  ;;  %v3930_v55 = vld [vmem:[%s9761_s16 + $0x668] sm:$0xff] }
 0x820   :  { %v9132_v58 = vpack.c.bf16 %v3720_v26, %v3720_v26  ;;  %v6397_v26 = vcombine.low %v3901_v9, %v3905_v23  ;;  %v6399_v37 = vcombine.low %v3902_v27, %v3906_v28  ;;  %v6406_v38 = vcombine.high %v3909_v34, %v3913_v35  ;;  %v3942_v15 = vld [vmem:[%s9761_s16 + $0x6c8] sm:$0xff] }
 0x821   :  { %5335 = vmatprep.mubr.bf16.mxu0 %v9114_v40  ;;  %5417 = vmatprep.mubr.bf16.mxu1 %v9114_v40  ;;  %v6408_v39 = vcombine.high %v3910_v25, %v3914_v36  ;;  %v3946_v16 = vld [vmem:[%s9761_s16 + $0x6e8] sm:$0xff]  ;;  %v6431_v18 = vcombine.low %v3934_v4, %v3938_v7 }
 0x822   :  { %5336 = vmatmul.mubr.bf16.vlgmr.msra.gmra.mrb[12].mxu0 %v9116_v41  ;;  %5418 = vmatmul.mubr.bf16.vlgmr.msra.gmra.mrb[24].mxu1 %v9116_v41  ;;  %v3954_v9 = vld [vmem:[%s9761_s16 + $0x728] sm:$0xff]  ;;  %v6439_v27 = vcombine.low %v3942_v15, %v3946_v16 }
 0x823   :  { %5345 = vmatpush1.bf16.msra.mxu0 %v6349_v52  ;;  %5427 = vmatpush1.bf16.msra.mxu1 %v6351_v53  ;;  %v6365_v52 = vcombine.low %v3869_v42, %v3873_v54  ;;  %v6367_v53 = vcombine.low %v3870_v56, %v3874_v57  ;;  %v3917_v42 = vld [vmem:[%s9761_s16 + $0x600] sm:$0xff]  ;;  %v3922_v54 = vld [vmem:[%s9761_s16 + $0x628] sm:$0xff]  ;;  %v6405_v56 = vcombine.low %v3909_v34, %v3913_v35 }
 0x824   :  { %5376 = vmatprep.mubr.bf16.mxu0 %v9132_v58  ;;  %5458 = vmatprep.mubr.bf16.mxu1 %v9132_v58  ;;  %v6407_v57 = vcombine.low %v3910_v25, %v3914_v36 }
 0x825   :  { %5346 = vmatprep.subr.bf16.mxu0 %v6358_v44  ;;  %5428 = vmatprep.subr.bf16.mxu1 %v6360_v48  ;;  %v3921_v44 = vld [vmem:[%s9761_s16 + $0x620] sm:$0xff]  ;;  %v3918_v48 = vld [vmem:[%s9761_s16 + $0x608] sm:$0xff] }
 0x826   :  { %v6414_v59 = vcombine.high %v3917_v42, %v3921_v44  ;;  %v6413_v45 = vcombine.low %v3917_v42, %v3921_v44  ;;  %v6415_v46 = vcombine.low %v3918_v48, %v3922_v54 }
 0x827   :  { %5347 = vmatpush1.bf16.msra.mxu0 %v6357_v61  ;;  %5429 = vmatpush1.bf16.msra.mxu1 %v6359_v62  ;;  %v6416_v61 = vcombine.high %v3918_v48, %v3922_v54  ;;  %v3925_v62 = vld [vmem:[%s9761_s16 + $0x640] sm:$0xff] }
 0x828   :  { %5348 = vmatprep.subr.bf16.mxu0 %v6366_v63  ;;  %5430 = vmatprep.subr.bf16.mxu1 %v6368_v0  ;;  %v3929_v63 = vld [vmem:[%s9761_s16 + $0x660] sm:$0xff]  ;;  %v3926_v0 = vld [vmem:[%s9761_s16 + $0x648] sm:$0xff] }
 0x829   :  { %v6422_v47 = vcombine.high %v3925_v62, %v3929_v63  ;;  %v6421_v60 = vcombine.low %v3925_v62, %v3929_v63  ;;  %v6423_v8 = vcombine.low %v3926_v0, %v3930_v55  ;;  %v3974_v62 = vld [vmem:[%s9761_s16 + $0x7c8] sm:$0xff] }
 0x82a   :  { %v3978_v63 = vld [vmem:[%s9761_s16 + $0x7e8] sm:$0xff] }
 0x82b   :  { %5349 = vmatpush1.bf16.msra.mxu0 %v6365_v52  ;;  %5431 = vmatpush1.bf16.msra.mxu1 %v6367_v53  ;;  %v6424_v52 = vcombine.high %v3926_v0, %v3930_v55  ;;  %v3933_v53 = vld [vmem:[%s9761_s16 + $0x680] sm:$0xff] }
 0x82c   :  { %5350 = vmatprep.subr.bf16.mxu0 %v6374_v1  ;;  %5432 = vmatprep.subr.bf16.mxu1 %v6376_v2  ;;  %v9237_v1 = vpop.eup %7295  ;;  %v3937_v2 = vld [vmem:[%s9761_s16 + $0x6a0] sm:$0xff] }
 0x82d   :  { %v3699_v10 = vadd.f32 1.0, %v9237_v1  ;;  %v6429_v17 = vcombine.low %v3933_v53, %v3937_v2 }
 0x82f   :  { %5351 = vmatpush1.bf16.msra.mxu0 %v6373_v11  ;;  %5433 = vmatpush1.bf16.msra.mxu1 %v6375_v12  ;;  %v6430_v11 = vcombine.high %v3933_v53, %v3937_v2  ;;  %v6432_v12 = vcombine.high %v3934_v4, %v3938_v7  ;;  %7297 = vrcp.f32 %v3699_v10  ;;  %v3731_v53 = vld [vmem:[%s9761_s16 + $0x30] sm:$0xff]  ;;  %v3732_v2 = vld [vmem:[%s9761_s16 + $0x38] sm:$0xff]  ;;  %v6471_v7 = vcombine.low %v3974_v62, %v3978_v63 }
 0x830   :  { %5352 = vmatprep.subr.bf16.mxu0 %v6382_v13  ;;  %5434 = vmatprep.subr.bf16.mxu1 %v6384_v14  ;;  %v3941_v13 = vld [vmem:[%s9761_s16 + $0x6c0] sm:$0xff] }
 0x831   :  { %v3945_v14 = vld [vmem:[%s9761_s16 + $0x6e0] sm:$0xff] }
 0x832   :  { %v6438_v19 = vcombine.high %v3941_v13, %v3945_v14  ;;  %v6437_v23 = vcombine.low %v3941_v13, %v3945_v14  ;;  %v3736_v13 = vld [vmem:[%s9761_s16 + $0x58] sm:$0xff] }
 0x833   :  { %5353 = vmatpush1.bf16.msra.mxu0 %v6381_v20  ;;  %5435 = vmatpush1.bf16.msra.mxu1 %v6383_v21  ;;  %v6440_v20 = vcombine.high %v3942_v15, %v3946_v16  ;;  %v3949_v21 = vld [vmem:[%s9761_s16 + $0x700] sm:$0xff] }
 0x834   :  { %5354 = vmatprep.subr.bf16.mxu0 %v6390_v22  ;;  %5436 = vmatprep.subr.bf16.mxu1 %v6392_v24  ;;  %v3953_v22 = vld [vmem:[%s9761_s16 + $0x720] sm:$0xff]  ;;  %v3950_v24 = vld [vmem:[%s9761_s16 + $0x708] sm:$0xff] }
 0x835   :  { %v6446_v28 = vcombine.high %v3949_v21, %v3953_v22  ;;  %v6448_v29 = vcombine.high %v3950_v24, %v3954_v9  ;;  %v6445_v34 = vcombine.low %v3949_v21, %v3953_v22  ;;  %v6447_v35 = vcombine.low %v3950_v24, %v3954_v9  ;;  %v3744_v21 = vld [vmem:[%s9761_s16 + $0x98] sm:$0xff] }
 0x836   :  { %v3748_v22 = vld [vmem:[%s9761_s16 + $0xb8] sm:$0xff] }
 0x837   :  { %5355 = vmatpush1.bf16.msra.mxu0 %v6389_v30  ;;  %5437 = vmatpush1.bf16.msra.mxu1 %v6391_v31  ;;  %v3957_v30 = vld [vmem:[%s9761_s16 + $0x740] sm:$0xff] }
 0x838   :  { %5356 = vmatprep.subr.bf16.mxu0 %v6398_v32  ;;  %5438 = vmatprep.subr.bf16.mxu1 %v6400_v33  ;;  %v3961_v31 = vld [vmem:[%s9761_s16 + $0x760] sm:$0xff]  ;;  %v3958_v32 = vld [vmem:[%s9761_s16 + $0x748] sm:$0xff] }
 0x839   :  { %v3962_v33 = vld [vmem:[%s9761_s16 + $0x768] sm:$0xff]  ;;  %v6454_v25 = vcombine.high %v3957_v30, %v3961_v31  ;;  %v7298_v42 = vpop.eup %7297  ;;  %v6453_v44 = vcombine.low %v3957_v30, %v3961_v31  ;;  %v3752_v30 = vld [vmem:[%s9761_s16 + $0xd8] sm:$0xff] }
 0x83a   :  { %v6456_v36 = vcombine.high %v3958_v32, %v3962_v33  ;;  %v6455_v48 = vcombine.low %v3958_v32, %v3962_v33  ;;  %v6243_v32 = vcombine.low %v3744_v21, %v3748_v22 }
 0x83b   :  { %5357 = vmatpush1.bf16.msra.mxu0 %v6397_v26  ;;  %5439 = vmatpush1.bf16.msra.mxu1 %v6399_v37  ;;  %v3965_v26 = vld [vmem:[%s9761_s16 + $0x780] sm:$0xff] }
 0x83c   :  { %5358 = vmatprep.subr.bf16.mxu0 %v6406_v38  ;;  %5440 = vmatprep.subr.bf16.mxu1 %v6408_v39  ;;  %v3969_v37 = vld [vmem:[%s9761_s16 + $0x7a0] sm:$0xff]  ;;  %v3966_v38 = vld [vmem:[%s9761_s16 + $0x788] sm:$0xff] }
 0x83d   :  { %v3970_v39 = vld [vmem:[%s9761_s16 + $0x7a8] sm:$0xff]  ;;  %v6462_v54 = vcombine.high %v3965_v26, %v3969_v37  ;;  %v6461_v0 = vcombine.low %v3965_v26, %v3969_v37  ;;  %v3764_v26 = vld [vmem:[%s9761_s16 + $0x138] sm:$0xff] }
 0x83e   :  { %v6463_v55 = vcombine.low %v3966_v38, %v3970_v39 }
 0x83f   :  { %5359 = vmatpush1.bf16.msra.mxu0 %v6405_v56  ;;  %5441 = vmatpush1.bf16.msra.mxu1 %v6407_v57  ;;  %v6464_v56 = vcombine.high %v3966_v38, %v3970_v39  ;;  %v3973_v57 = vld [vmem:[%s9761_s16 + $0x7c0] sm:$0xff] }
 0x840   :  { %5360 = vmatprep.subr.bf16.mxu0 %v6414_v59  ;;  %5442 = vmatprep.subr.bf16.mxu1 %v6416_v61  ;;  %v3711_v59 = vmul.f32 %v7298_v42, %v9237_v1  ;;  %v3977_v61 = vld [vmem:[%s9761_s16 + $0x7e0] sm:$0xff]  ;;  %v3728_v1 = vld [vmem:[%s9761_s16 + $0x18] sm:$0xff] }
 0x841   :  { %v6469_v4 = vcombine.low %v3973_v57, %v3977_v61  ;;  %v6228_v10 = vcombine.high %v3728_v1, %v3732_v2  ;;  %v6227_v16 = vcombine.low %v3728_v1, %v3732_v2  ;;  %v3783_v1 = vld [vmem:[%s9761_s16 + $0x1d0] sm:$0xff] }
 0x842   :  { %v3787_v2 = vld [vmem:[%s9761_s16 + $0x1f0] sm:$0xff] }
 0x843   :  { %5361 = vmatpush1.bf16.msra.mxu0 %v6413_v45  ;;  %5443 = vmatpush1.bf16.msra.mxu1 %v6415_v46  ;;  %v6470_v45 = vcombine.high %v3973_v57, %v3977_v61  ;;  %v6472_v46 = vcombine.high %v3974_v62, %v3978_v63  ;;  %v3775_v63 = vld [vmem:[%s9761_s16 + $0x190] sm:$0xff] }
 0x844   :  { %5362 = vmatprep.subr.bf16.mxu0 %v6422_v47  ;;  %5444 = vmatprep.subr.bf16.mxu1 %v6424_v52  ;;  %v3727_v47 = vld [vmem:[%s9761_s16 + $0x10] sm:$0xff]  ;;  %v3715_v52 = vsel %vm3695_vm14, %v7298_v42, %v3711_v59 }
 0x845   :  { %v6225_v14 = vcombine.low %v3727_v47, %v3731_v53 }
 0x847   :  { %5363 = vmatpush1.bf16.msra.mxu0 %v6421_v60  ;;  %5445 = vmatpush1.bf16.msra.mxu1 %v6423_v8  ;;  %v3719_v60 = vmul.f32 %v3715_v52, %v9159_v51  ;;  %v6226_v8 = vcombine.high %v3727_v47, %v3731_v53  ;;  %v3740_v51 = vld [vmem:[%s9761_s16 + $0x78] sm:$0xff] }
 0x848   :  { %5364 = vmatprep.subr.bf16.mxu0 %v6430_v11  ;;  %5446 = vmatprep.subr.bf16.mxu1 %v6432_v12  ;;  %v3735_v11 = vld [vmem:[%s9761_s16 + $0x50] sm:$0xff]  ;;  %v6235_v9 = vcombine.low %v3736_v13, %v3740_v51 }
 0x849   :  { %v3739_v12 = vld [vmem:[%s9761_s16 + $0x70] sm:$0xff]  ;;  %v9336_v15 = vpack.c.bf16 %v3719_v60, %v3719_v60 }
 0x84a   :  { %v6233_v24 = vcombine.low %v3735_v11, %v3739_v12 }
 0x84b   :  { %5365 = vmatpush1.bf16.msra.mxu0 %v6429_v17  ;;  %5447 = vmatpush1.bf16.msra.mxu1 %v6431_v18  ;;  %v6234_v17 = vcombine.high %v3735_v11, %v3739_v12  ;;  %v6236_v18 = vcombine.high %v3736_v13, %v3740_v51  ;;  %v3791_v12 = vld [vmem:[%s9761_s16 + $0x210] sm:$0xff]  ;;  %v3792_v51 = vld [vmem:[%s9761_s16 + $0x218] sm:$0xff] }
 0x84c   :  { %5366 = vmatprep.subr.bf16.mxu0 %v6438_v19  ;;  %5448 = vmatprep.subr.bf16.mxu1 %v6440_v20  ;;  %v3743_v19 = vld [vmem:[%s9761_s16 + $0x90] sm:$0xff] }
 0x84d   :  { %v3747_v20 = vld [vmem:[%s9761_s16 + $0xb0] sm:$0xff] }
 0x84e   :  { %v6241_v31 = vcombine.low %v3743_v19, %v3747_v20  ;;  %v3795_v13 = vld [vmem:[%s9761_s16 + $0x230] sm:$0xff] }
 0x84f   :  { %5367 = vmatpush1.bf16.msra.mxu0 %v6437_v23  ;;  %5449 = vmatpush1.bf16.msra.mxu1 %v6439_v27  ;;  %v6242_v23 = vcombine.high %v3743_v19, %v3747_v20  ;;  %v6244_v27 = vcombine.high %v3744_v21, %v3748_v22  ;;  %v3799_v20 = vld [vmem:[%s9761_s16 + $0x250] sm:$0xff]  ;;  %v3800_v22 = vld [vmem:[%s9761_s16 + $0x258] sm:$0xff] }
 0x850   :  { %5368 = vmatprep.subr.bf16.mxu0 %v6446_v28  ;;  %5450 = vmatprep.subr.bf16.mxu1 %v6448_v29  ;;  %v3751_v28 = vld [vmem:[%s9761_s16 + $0xd0] sm:$0xff] }
 0x851   :  { %v3755_v29 = vld [vmem:[%s9761_s16 + $0xf0] sm:$0xff] }
 0x852   :  { %v6250_v33 = vcombine.high %v3751_v28, %v3755_v29  ;;  %v6249_v37 = vcombine.low %v3751_v28, %v3755_v29  ;;  %v3803_v21 = vld [vmem:[%s9761_s16 + $0x270] sm:$0xff] }
 0x853   :  { %5369 = vmatpush1.bf16.msra.mxu0 %v6445_v34  ;;  %5451 = vmatpush1.bf16.msra.mxu1 %v6447_v35  ;;  %v3759_v35 = vld [vmem:[%s9761_s16 + $0x110] sm:$0xff] }
 0x854   :  { %5370 = vmatprep.subr.bf16.mxu0 %v6454_v25  ;;  %5452 = vmatprep.subr.bf16.mxu1 %v6456_v36  ;;  %v3763_v25 = vld [vmem:[%s9761_s16 + $0x130] sm:$0xff]  ;;  %v3760_v36 = vld [vmem:[%s9761_s16 + $0x118] sm:$0xff] }
 0x855   :  { %v6258_v39 = vcombine.high %v3759_v35, %v3763_v25  ;;  %v6260_v42 = vcombine.high %v3760_v36, %v3764_v26  ;;  %v6257_v57 = vcombine.low %v3759_v35, %v3763_v25  ;;  %v6259_v59 = vcombine.low %v3760_v36, %v3764_v26  ;;  %v3807_v29 = vld [vmem:[%s9761_s16 + $0x290] sm:$0xff]  ;;  %v3816_v26 = vld [vmem:[%s9761_s16 + $0x2d8] sm:$0xff] }
 0x856   :  { %v3815_v25 = vld [vmem:[%s9761_s16 + $0x2d0] sm:$0xff] }
 0x857   :  { %5371 = vmatpush1.bf16.msra.mxu0 %v6453_v44  ;;  %5453 = vmatpush1.bf16.msra.mxu1 %v6455_v48  ;;  %v3767_v44 = vld [vmem:[%s9761_s16 + $0x150] sm:$0xff] }
 0x858   :  { %5372 = vmatprep.subr.bf16.mxu0 %v6462_v54  ;;  %5454 = vmatprep.subr.bf16.mxu1 %v6464_v56  ;;  %v3771_v48 = vld [vmem:[%s9761_s16 + $0x170] sm:$0xff]  ;;  %v3768_v54 = vld [vmem:[%s9761_s16 + $0x158] sm:$0xff] }
 0x859   :  { %v3772_v56 = vld [vmem:[%s9761_s16 + $0x178] sm:$0xff]  ;;  %v6266_v61 = vcombine.high %v3767_v44, %v3771_v48  ;;  %v3819_v36 = vld [vmem:[%s9761_s16 + $0x2f0] sm:$0xff] }
 0x85a   :  { %v6268_v62 = vcombine.high %v3768_v54, %v3772_v56  ;;  %v6267_v47 = vcombine.low %v3768_v54, %v3772_v56  ;;  %v3827_v54 = vld [vmem:[%s9761_s16 + $0x330] sm:$0xff]  ;;  %v3824_v56 = vld [vmem:[%s9761_s16 + $0x318] sm:$0xff] }
 0x85b   :  { %5373 = vmatpush1.bf16.msra.mxu0 %v6461_v0  ;;  %5455 = vmatpush1.bf16.msra.mxu1 %v6463_v55  ;;  %v3779_v0 = vld [vmem:[%s9761_s16 + $0x1b0] sm:$0xff]  ;;  %v3776_v55 = vld [vmem:[%s9761_s16 + $0x198] sm:$0xff] }
 0x85c   :  { %5374 = vmatprep.subr.bf16.mxu0 %v6470_v45  ;;  %5456 = vmatprep.subr.bf16.mxu1 %v6472_v46  ;;  %v3780_v45 = vld [vmem:[%s9761_s16 + $0x1b8] sm:$0xff]  ;;  %v6265_v46 = vcombine.low %v3767_v44, %v3771_v48  ;;  %v6274_v52 = vcombine.high %v3775_v63, %v3779_v0  ;;  %v6273_v60 = vcombine.low %v3775_v63, %v3779_v0  ;;  %v3823_v48 = vld [vmem:[%s9761_s16 + $0x310] sm:$0xff] }
 0x85d   :  { %v6276_v53 = vcombine.high %v3776_v55, %v3780_v45  ;;  %v3831_v0 = vld [vmem:[%s9761_s16 + $0x350] sm:$0xff] }
 0x85f   :  { %5375 = vmatpush1.bf16.msra.mxu0 %v6469_v4  ;;  %5457 = vmatpush1.bf16.msra.mxu1 %v6471_v7  ;;  %v3784_v4 = vld [vmem:[%s9761_s16 + $0x1d8] sm:$0xff] }
 0x860   :  { %5467 = vmatprep.subr.bf16.mxu0 %v6226_v8  ;;  %5549 = vmatprep.subr.bf16.mxu1 %v6228_v10  ;;  %v3788_v7 = vld [vmem:[%s9761_s16 + $0x1f8] sm:$0xff]  ;;  %v6275_v8 = vcombine.low %v3776_v55, %v3780_v45  ;;  %v6282_v10 = vcombine.high %v3783_v1, %v3787_v2  ;;  %v3835_v55 = vld [vmem:[%s9761_s16 + $0x370] sm:$0xff] }
 0x861   :  { %v6284_v11 = vcombine.high %v3784_v4, %v3788_v7  ;;  %v3832_v45 = vld [vmem:[%s9761_s16 + $0x358] sm:$0xff] }
 0x862   :  { %5377 = vmatmul.mubr.bf16.vlgmr.msra.gmra.mrb[12].mxu0 %v9336_v15  ;;  %5459 = vmatmul.mubr.bf16.vlgmr.msra.gmra.mrb[24].mxu1 %v9336_v15 }
 0x863   :  { %5468 = vmatpush1.bf16.msra.mxu0 %v6225_v14  ;;  %5499 = vmatprep.mubr.bf16.mxu0 %v9114_v40  ;;  %v3796_v14 = vld [vmem:[%s9761_s16 + $0x238] sm:$0xff] }
 0x864   :  { %5550 = vmatpush1.bf16.msra.mxu1 %v6227_v16  ;;  %5581 = vmatprep.mubr.bf16.mxu1 %v9114_v40  ;;  %v3756_v40 = vld [vmem:[%s9761_s16 + $0xf8] sm:$0xff]  ;;  %v6281_v16 = vcombine.low %v3783_v1, %v3787_v2  ;;  %v6292_v19 = vcombine.high %v3792_v51, %v3796_v14  ;;  %v3839_v2 = vld [vmem:[%s9761_s16 + $0x390] sm:$0xff] }
 0x865   :  { %5469 = vmatprep.subr.bf16.mxu0 %v6234_v17  ;;  %5551 = vmatprep.subr.bf16.mxu1 %v6236_v18  ;;  %v6252_v34 = vcombine.high %v3752_v30, %v3756_v40  ;;  %v6251_v38 = vcombine.low %v3752_v30, %v3756_v40  ;;  %v6283_v17 = vcombine.low %v3784_v4, %v3788_v7  ;;  %v3811_v30 = vld [vmem:[%s9761_s16 + $0x2b0] sm:$0xff]  ;;  %v3808_v40 = vld [vmem:[%s9761_s16 + $0x298] sm:$0xff] }
 0x866   :  { %v6290_v18 = vcombine.high %v3791_v12, %v3795_v13  ;;  %v3843_v4 = vld [vmem:[%s9761_s16 + $0x3b0] sm:$0xff]  ;;  %v3840_v7 = vld [vmem:[%s9761_s16 + $0x398] sm:$0xff] }
 0x867   :  { %5470 = vmatpush1.bf16.msra.mxu0 %v6233_v24  ;;  %v3804_v24 = vld [vmem:[%s9761_s16 + $0x278] sm:$0xff] }
 0x868   :  { %5552 = vmatpush1.bf16.msra.mxu1 %v6235_v9  ;;  %5471 = vmatprep.subr.bf16.mxu0 %v6242_v23  ;;  %v6289_v9 = vcombine.low %v3791_v12, %v3795_v13  ;;  %v6291_v23 = vcombine.low %v3792_v51, %v3796_v14  ;;  %v6300_v28 = vcombine.high %v3800_v22, %v3804_v24  ;;  %v3847_v13 = vld [vmem:[%s9761_s16 + $0x3d0] sm:$0xff]  ;;  %v3848_v14 = vld [vmem:[%s9761_s16 + $0x3d8] sm:$0xff] }
 0x869   :  { %5553 = vmatprep.subr.bf16.mxu1 %v6244_v27  ;;  %v6298_v27 = vcombine.high %v3799_v20, %v3803_v21  ;;  %v3851_v51 = vld [vmem:[%s9761_s16 + $0x3f0] sm:$0xff] }
 0x86b   :  { %5472 = vmatpush1.bf16.msra.mxu0 %v6241_v31  ;;  %v3812_v31 = vld [vmem:[%s9761_s16 + $0x2b8] sm:$0xff] }
 0x86c   :  { %5554 = vmatpush1.bf16.msra.mxu1 %v6243_v32  ;;  %5473 = vmatprep.subr.bf16.mxu0 %v6250_v33  ;;  %v6297_v32 = vcombine.low %v3799_v20, %v3803_v21  ;;  %v6299_v33 = vcombine.low %v3800_v22, %v3804_v24  ;;  %v6308_v35 = vcombine.high %v3808_v40, %v3812_v31  ;;  %v3855_v21 = vld [vmem:[%s9761_s16 + $0x410] sm:$0xff]  ;;  %v3856_v24 = vld [vmem:[%s9761_s16 + $0x418] sm:$0xff] }
 0x86d   :  { %5555 = vmatprep.subr.bf16.mxu1 %v6252_v34  ;;  %v6306_v34 = vcombine.high %v3807_v29, %v3811_v30  ;;  %v3859_v22 = vld [vmem:[%s9761_s16 + $0x430] sm:$0xff] }
 0x86f   :  { %5474 = vmatpush1.bf16.msra.mxu0 %v6249_v37  ;;  %v3820_v37 = vld [vmem:[%s9761_s16 + $0x2f8] sm:$0xff] }
 0x870   :  { %5556 = vmatpush1.bf16.msra.mxu1 %v6251_v38  ;;  %5475 = vmatprep.subr.bf16.mxu0 %v6258_v39  ;;  %v6305_v38 = vcombine.low %v3807_v29, %v3811_v30  ;;  %v6307_v39 = vcombine.low %v3808_v40, %v3812_v31  ;;  %v6316_v44 = vcombine.high %v3816_v26, %v3820_v37  ;;  %v3863_v30 = vld [vmem:[%s9761_s16 + $0x450] sm:$0xff] }
 0x871   :  { %5557 = vmatprep.subr.bf16.mxu1 %v6260_v42  ;;  %v6314_v42 = vcombine.high %v3815_v25, %v3819_v36  ;;  %v3867_v40 = vld [vmem:[%s9761_s16 + $0x470] sm:$0xff]  ;;  %v6353_v31 = vcombine.low %v3855_v21, %v3859_v22 }
 0x873   :  { %5476 = vmatpush1.bf16.msra.mxu0 %v6257_v57  ;;  %v3828_v57 = vld [vmem:[%s9761_s16 + $0x338] sm:$0xff] }
 0x874   :  { %5558 = vmatpush1.bf16.msra.mxu1 %v6259_v59  ;;  %5477 = vmatprep.subr.bf16.mxu0 %v6266_v61  ;;  %v6313_v59 = vcombine.low %v3815_v25, %v3819_v36  ;;  %v6315_v61 = vcombine.low %v3816_v26, %v3820_v37  ;;  %v6324_v63 = vcombine.high %v3824_v56, %v3828_v57  ;;  %v3871_v25 = vld [vmem:[%s9761_s16 + $0x490] sm:$0xff]  ;;  %v3872_v37 = vld [vmem:[%s9761_s16 + $0x498] sm:$0xff] }
 0x875   :  { %5559 = vmatprep.subr.bf16.mxu1 %v6268_v62  ;;  %v6322_v62 = vcombine.high %v3823_v48, %v3827_v54  ;;  %v3875_v36 = vld [vmem:[%s9761_s16 + $0x4b0] sm:$0xff] }
 0x877   :  { %5478 = vmatpush1.bf16.msra.mxu0 %v6265_v46  ;;  %v3836_v46 = vld [vmem:[%s9761_s16 + $0x378] sm:$0xff] }
 0x878   :  { %5560 = vmatpush1.bf16.msra.mxu1 %v6267_v47  ;;  %5479 = vmatprep.subr.bf16.mxu0 %v6274_v52  ;;  %v6321_v47 = vcombine.low %v3823_v48, %v3827_v54  ;;  %v6323_v52 = vcombine.low %v3824_v56, %v3828_v57  ;;  %v6332_v1 = vcombine.high %v3832_v45, %v3836_v46  ;;  %v3879_v54 = vld [vmem:[%s9761_s16 + $0x4d0] sm:$0xff]  ;;  %v3884_v57 = vld [vmem:[%s9761_s16 + $0x4f8] sm:$0xff] }
 0x879   :  { %5561 = vmatprep.subr.bf16.mxu1 %v6276_v53  ;;  %v6330_v53 = vcombine.high %v3831_v0, %v3835_v55  ;;  %v3883_v56 = vld [vmem:[%s9761_s16 + $0x4f0] sm:$0xff] }
 0x87b   :  { %5480 = vmatpush1.bf16.msra.mxu0 %v6273_v60  ;;  %v3844_v60 = vld [vmem:[%s9761_s16 + $0x3b8] sm:$0xff] }
 0x87c   :  { %5562 = vmatpush1.bf16.msra.mxu1 %v6275_v8  ;;  %5481 = vmatprep.subr.bf16.mxu0 %v6282_v10  ;;  %v6329_v8 = vcombine.low %v3831_v0, %v3835_v55  ;;  %v6331_v10 = vcombine.low %v3832_v45, %v3836_v46  ;;  %v6340_v12 = vcombine.high %v3840_v7, %v3844_v60  ;;  %v3891_v0 = vld [vmem:[%s9761_s16 + $0x530] sm:$0xff]  ;;  %v3888_v55 = vld [vmem:[%s9761_s16 + $0x518] sm:$0xff] }
 0x87d   :  { %5563 = vmatprep.subr.bf16.mxu1 %v6284_v11  ;;  %v6338_v11 = vcombine.high %v3839_v2, %v3843_v4  ;;  %v3892_v45 = vld [vmem:[%s9761_s16 + $0x538] sm:$0xff]  ;;  %v6377_v46 = vcombine.low %v3879_v54, %v3883_v56 }
 0x87f   :  { %5482 = vmatpush1.bf16.msra.mxu0 %v6281_v16  ;;  %v3852_v16 = vld [vmem:[%s9761_s16 + $0x3f8] sm:$0xff] }
 0x880   :  { %5564 = vmatpush1.bf16.msra.mxu1 %v6283_v17  ;;  %5483 = vmatprep.subr.bf16.mxu0 %v6290_v18  ;;  %v6337_v17 = vcombine.low %v3839_v2, %v3843_v4  ;;  %v6339_v18 = vcombine.low %v3840_v7, %v3844_v60  ;;  %v6348_v20 = vcombine.high %v3848_v14, %v3852_v16  ;;  %v3899_v2 = vld [vmem:[%s9761_s16 + $0x570] sm:$0xff]  ;;  %v3896_v4 = vld [vmem:[%s9761_s16 + $0x558] sm:$0xff] }
 0x881   :  { %5565 = vmatprep.subr.bf16.mxu1 %v6292_v19  ;;  %v6346_v19 = vcombine.high %v3847_v13, %v3851_v51  ;;  %v3900_v7 = vld [vmem:[%s9761_s16 + $0x578] sm:$0xff] }
 0x883   :  { %5484 = vmatpush1.bf16.msra.mxu0 %v6289_v9  ;;  %v3860_v9 = vld [vmem:[%s9761_s16 + $0x438] sm:$0xff] }
 0x884   :  { %5566 = vmatpush1.bf16.msra.mxu1 %v6291_v23  ;;  %5485 = vmatprep.subr.bf16.mxu0 %v6298_v27  ;;  %v6345_v23 = vcombine.low %v3847_v13, %v3851_v51  ;;  %v6347_v27 = vcombine.low %v3848_v14, %v3852_v16  ;;  %v6356_v29 = vcombine.high %v3856_v24, %v3860_v9  ;;  %v3907_v13 = vld [vmem:[%s9761_s16 + $0x5b0] sm:$0xff]  ;;  %v3904_v51 = vld [vmem:[%s9761_s16 + $0x598] sm:$0xff] }
 0x885   :  { %5567 = vmatprep.subr.bf16.mxu1 %v6300_v28  ;;  %v6354_v28 = vcombine.high %v3855_v21, %v3859_v22  ;;  %v3908_v14 = vld [vmem:[%s9761_s16 + $0x5b8] sm:$0xff]  ;;  %v3915_v21 = vld [vmem:[%s9761_s16 + $0x5f0] sm:$0xff] }
 0x886   :  { %v3912_v22 = vld [vmem:[%s9761_s16 + $0x5d8] sm:$0xff] }
 0x887   :  { %5486 = vmatpush1.bf16.msra.mxu0 %v6297_v32  ;;  %v3864_v32 = vld [vmem:[%s9761_s16 + $0x458] sm:$0xff] }
 0x888   :  { %5568 = vmatpush1.bf16.msra.mxu1 %v6299_v33  ;;  %5487 = vmatprep.subr.bf16.mxu0 %v6306_v34  ;;  %v3868_v33 = vld [vmem:[%s9761_s16 + $0x478] sm:$0xff]  ;;  %v6355_v34 = vcombine.low %v3856_v24, %v3860_v9 }
 0x889   :  { %5569 = vmatprep.subr.bf16.mxu1 %v6308_v35  ;;  %v6362_v35 = vcombine.high %v3863_v30, %v3867_v40  ;;  %v6364_v26 = vcombine.high %v3864_v32, %v3868_v33  ;;  %v3916_v24 = vld [vmem:[%s9761_s16 + $0x5f8] sm:$0xff] }
 0x88b   :  { %5488 = vmatpush1.bf16.msra.mxu0 %v6305_v38  ;;  %v3876_v38 = vld [vmem:[%s9761_s16 + $0x4b8] sm:$0xff] }
 0x88c   :  { %5570 = vmatpush1.bf16.msra.mxu1 %v6307_v39  ;;  %5489 = vmatprep.subr.bf16.mxu0 %v6314_v42  ;;  %v6361_v39 = vcombine.low %v3863_v30, %v3867_v40  ;;  %v6363_v42 = vcombine.low %v3864_v32, %v3868_v33  ;;  %v6372_v48 = vcombine.high %v3872_v37, %v3876_v38  ;;  %v3923_v30 = vld [vmem:[%s9761_s16 + $0x630] sm:$0xff]  ;;  %v3920_v40 = vld [vmem:[%s9761_s16 + $0x618] sm:$0xff] }
 0x88d   :  { %5571 = vmatprep.subr.bf16.mxu1 %v6316_v44  ;;  %v6370_v44 = vcombine.high %v3871_v25, %v3875_v36  ;;  %v6411_v33 = vcombine.low %v3912_v22, %v3916_v24 }
 0x88f   :  { %5490 = vmatpush1.bf16.msra.mxu0 %v6313_v59  ;;  %v6371_v59 = vcombine.low %v3872_v37, %v3876_v38  ;;  %v3932_v37 = vld [vmem:[%s9761_s16 + $0x678] sm:$0xff] }
 0x890   :  { %5572 = vmatpush1.bf16.msra.mxu1 %v6315_v61  ;;  %5491 = vmatprep.subr.bf16.mxu0 %v6322_v62  ;;  %v6378_v61 = vcombine.high %v3879_v54, %v3883_v56  ;;  %v3939_v54 = vld [vmem:[%s9761_s16 + $0x6b0] sm:$0xff]  ;;  %v3936_v56 = vld [vmem:[%s9761_s16 + $0x698] sm:$0xff] }
 0x891   :  { %5573 = vmatprep.subr.bf16.mxu1 %v6324_v63  ;;  %v3887_v63 = vld [vmem:[%s9761_s16 + $0x510] sm:$0xff] }
 0x892   :  { %v6385_v60 = vcombine.low %v3887_v63, %v3891_v0 }
 0x893   :  { %5492 = vmatpush1.bf16.msra.mxu0 %v6321_v47 }
 0x894   :  { %5574 = vmatpush1.bf16.msra.mxu1 %v6323_v52  ;;  %5493 = vmatprep.subr.bf16.mxu0 %v6330_v53  ;;  %v6386_v52 = vcombine.high %v3887_v63, %v3891_v0  ;;  %v6388_v53 = vcombine.high %v3888_v55, %v3892_v45  ;;  %v3947_v63 = vld [vmem:[%s9761_s16 + $0x6f0] sm:$0xff]  ;;  %v3944_v0 = vld [vmem:[%s9761_s16 + $0x6d8] sm:$0xff] }
 0x895   :  { %5575 = vmatprep.subr.bf16.mxu1 %v6332_v1  ;;  %v3895_v1 = vld [vmem:[%s9761_s16 + $0x550] sm:$0xff] }
 0x896   :  { %v6393_v16 = vcombine.low %v3895_v1, %v3899_v2 }
 0x897   :  { %5494 = vmatpush1.bf16.msra.mxu0 %v6329_v8  ;;  %v6387_v8 = vcombine.low %v3888_v55, %v3892_v45  ;;  %v3948_v55 = vld [vmem:[%s9761_s16 + $0x6f8] sm:$0xff] }
 0x898   :  { %5576 = vmatpush1.bf16.msra.mxu1 %v6331_v10  ;;  %5495 = vmatprep.subr.bf16.mxu0 %v6338_v11  ;;  %v6394_v10 = vcombine.high %v3895_v1, %v3899_v2  ;;  %v6396_v11 = vcombine.high %v3896_v4, %v3900_v7  ;;  %v3955_v1 = vld [vmem:[%s9761_s16 + $0x730] sm:$0xff]  ;;  %v3952_v2 = vld [vmem:[%s9761_s16 + $0x718] sm:$0xff] }
 0x899   :  { %5577 = vmatprep.subr.bf16.mxu1 %v6340_v12  ;;  %v3903_v12 = vld [vmem:[%s9761_s16 + $0x590] sm:$0xff] }
 0x89a   :  { %v6401_v9 = vcombine.low %v3903_v12, %v3907_v13 }
 0x89b   :  { %5496 = vmatpush1.bf16.msra.mxu0 %v6337_v17  ;;  %v6395_v17 = vcombine.low %v3896_v4, %v3900_v7  ;;  %v3956_v4 = vld [vmem:[%s9761_s16 + $0x738] sm:$0xff] }
 0x89c   :  { %5578 = vmatpush1.bf16.msra.mxu1 %v6339_v18  ;;  %5497 = vmatprep.subr.bf16.mxu0 %v6346_v19  ;;  %v6402_v18 = vcombine.high %v3903_v12, %v3907_v13  ;;  %v6404_v19 = vcombine.high %v3904_v51, %v3908_v14  ;;  %v3963_v12 = vld [vmem:[%s9761_s16 + $0x770] sm:$0xff]  ;;  %v3960_v13 = vld [vmem:[%s9761_s16 + $0x758] sm:$0xff] }
 0x89d   :  { %5579 = vmatprep.subr.bf16.mxu1 %v6348_v20  ;;  %v3911_v20 = vld [vmem:[%s9761_s16 + $0x5d0] sm:$0xff] }
 0x89e   :  { %v6409_v32 = vcombine.low %v3911_v20, %v3915_v21 }
 0x89f   :  { %5498 = vmatpush1.bf16.msra.mxu0 %v6345_v23  ;;  %v6403_v23 = vcombine.low %v3904_v51, %v3908_v14  ;;  %v3964_v51 = vld [vmem:[%s9761_s16 + $0x778] sm:$0xff] }
 0x8a0   :  { %5580 = vmatpush1.bf16.msra.mxu1 %v6347_v27  ;;  %5508 = vmatprep.subr.bf16.mxu0 %v6354_v28  ;;  %v6410_v27 = vcombine.high %v3911_v20, %v3915_v21  ;;  %v6412_v28 = vcombine.high %v3912_v22, %v3916_v24  ;;  %v3971_v20 = vld [vmem:[%s9761_s16 + $0x7b0] sm:$0xff]  ;;  %v3968_v21 = vld [vmem:[%s9761_s16 + $0x798] sm:$0xff] }
 0x8a1   :  { %5590 = vmatprep.subr.bf16.mxu1 %v6356_v29  ;;  %v3919_v29 = vld [vmem:[%s9761_s16 + $0x610] sm:$0xff]  ;;  %v3972_v22 = vld [vmem:[%s9761_s16 + $0x7b8] sm:$0xff] }
 0x8a2   :  { %5500 = vmatmul.mubr.bf16.vlgmr.msra.gmra.mrb[16].mxu0 %v9116_v41  ;;  %v6417_v38 = vcombine.low %v3919_v29, %v3923_v30 }
 0x8a3   :  { %5582 = vmatmul.mubr.bf16.vlgmr.msra.gmra.mrb[28].mxu1 %v9116_v41  ;;  %5509 = vmatpush1.bf16.msra.mxu0 %v6353_v31  ;;  %v3880_v41 = vld [vmem:[%s9761_s16 + $0x4d8] sm:$0xff] }
 0x8a4   :  { %5540 = vmatprep.mubr.bf16.mxu0 %v9132_v58  ;;  %5591 = vmatpush1.bf16.msra.mxu1 %v6355_v34  ;;  %v6380_v62 = vcombine.high %v3880_v41, %v3884_v57  ;;  %v6379_v47 = vcombine.low %v3880_v41, %v3884_v57  ;;  %v3924_v31 = vld [vmem:[%s9761_s16 + $0x638] sm:$0xff]  ;;  %v6418_v34 = vcombine.high %v3919_v29, %v3923_v30  ;;  %v3979_v29 = vld [vmem:[%s9761_s16 + $0x7f0] sm:$0xff] }
 0x8a5   :  { %5622 = vmatprep.mubr.bf16.mxu1 %v9132_v58  ;;  %5510 = vmatprep.subr.bf16.mxu0 %v6362_v35  ;;  %v6369_v58 = vcombine.low %v3871_v25, %v3875_v36  ;;  %v6420_v35 = vcombine.high %v3920_v40, %v3924_v31  ;;  %v3927_v25 = vld [vmem:[%s9761_s16 + $0x650] sm:$0xff]  ;;  %v3940_v41 = vld [vmem:[%s9761_s16 + $0x6b8] sm:$0xff] }
 0x8a6   :  { %5592 = vmatprep.subr.bf16.mxu1 %v6364_v26  ;;  %v3931_v36 = vld [vmem:[%s9761_s16 + $0x670] sm:$0xff]  ;;  %v3928_v26 = vld [vmem:[%s9761_s16 + $0x658] sm:$0xff] }
 0x8a7   :  { %5511 = vmatpush1.bf16.msra.mxu0 %v6361_v39  ;;  %v6419_v39 = vcombine.low %v3920_v40, %v3924_v31  ;;  %v6425_v57 = vcombine.low %v3927_v25, %v3931_v36  ;;  %v3976_v30 = vld [vmem:[%s9761_s16 + $0x7d8] sm:$0xff] }
 0x8a8   :  { %5593 = vmatpush1.bf16.msra.mxu1 %v6363_v42  ;;  %5512 = vmatprep.subr.bf16.mxu0 %v6370_v44  ;;  %v6426_v42 = vcombine.high %v3927_v25, %v3931_v36  ;;  %v6428_v44 = vcombine.high %v3928_v26, %v3932_v37  ;;  %v3980_v40 = vld [vmem:[%s9761_s16 + $0x7f8] sm:$0xff]  ;;  %v9711_v36 = vld [vmem:[%s9762_s17] sm:$0xff]  ;;  %s7359_s17 = smov [#allocation2]  }
 0x8a9   :  { %5594 = vmatprep.subr.bf16.mxu1 %v6372_v48  ;;  %v3935_v48 = vld [vmem:[%s9761_s16 + $0x690] sm:$0xff]  ;;  %v6475_v25 = vcombine.low %v3976_v30, %v3980_v40  ;;  %s5771_s9 = sshll.u32 %s7359_s17, 4  ;;  %s5772_s9 = int_to_ptr.vmem [resolvable:$true] %s5771_s9 }
 0x8aa   :  { %v6433_v45 = vcombine.low %v3935_v48, %v3939_v54  ;;  %s7331_s22 = scalar_lea.vmem %s5772_s9, 256  ;;  %p7336_p1 = scmp.lt.s32.totalorder %s5772_s9, %s5772_s9 }
 0x8ab   :  { %5513 = vmatpush1.bf16.msra.mxu0 %v6369_v58  ;;  %v6427_v58 = vcombine.low %v3928_v26, %v3932_v37  ;;  %v3986_v26 = vrot.slane %v9711_v36, %v8361_v3  ;;  %v3994_v37 = vrot.slane %v9711_v36, %v8381_v50  ;;  %p7332_p0 = scmp.ne.s32.totalorder %s5772_s9, %s7331_s22  ;;  %p7337_p2 = scmp.lt.s32.totalorder %s7331_s22, %s7331_s22 }
 0x8ac   :  { %5595 = vmatpush1.bf16.msra.mxu1 %v6371_v59  ;;  %5514 = vmatprep.subr.bf16.mxu0 %v6378_v61  ;;  %v6434_v59 = vcombine.high %v3935_v48, %v3939_v54  ;;  %v6436_v61 = vcombine.high %v3936_v56, %v3940_v41 }
 0x8ad   :  { %5596 = vmatprep.subr.bf16.mxu1 %v6380_v62  ;;  %v3943_v62 = vld [vmem:[%s9761_s16 + $0x6d0] sm:$0xff]  ;;  %p7338_p3 = por %p7337_p2, %p7336_p1 }
 0x8ae   :  { %v6441_v7 = vcombine.low %v3943_v62, %v3947_v63 }
 0x8af   :  { %5515 = vmatpush1.bf16.msra.mxu0 %v6377_v46  ;;  %v6435_v46 = vcombine.low %v3936_v56, %v3940_v41  ;;  %p7339_p4 = pnand %p7338_p3, %p7332_p0 }
 0x8b0   :  { %5597 = vmatpush1.bf16.msra.mxu1 %v6379_v47  ;;  %5516 = vmatprep.subr.bf16.mxu0 %v6386_v52  ;;  %v6442_v47 = vcombine.high %v3943_v62, %v3947_v63  ;;  %v6444_v52 = vcombine.high %v3944_v0, %v3948_v55 }
 0x8b1   :  { %5598 = vmatprep.subr.bf16.mxu1 %v6388_v53  ;;  %v3951_v53 = vld [vmem:[%s9761_s16 + $0x710] sm:$0xff] }
 0x8b2   :  { %v6449_v14 = vcombine.low %v3951_v53, %v3955_v1 }
 0x8b3   :  { %5517 = vmatpush1.bf16.msra.mxu0 %v6385_v60  ;;  %v6443_v60 = vcombine.low %v3944_v0, %v3948_v55 }
 0x8b4   :  { %5599 = vmatpush1.bf16.msra.mxu1 %v6387_v8  ;;  %5518 = vmatprep.subr.bf16.mxu0 %v6394_v10  ;;  %v6450_v8 = vcombine.high %v3951_v53, %v3955_v1  ;;  %v6452_v10 = vcombine.high %v3952_v2, %v3956_v4 }
 0x8b5   :  { %5600 = vmatprep.subr.bf16.mxu1 %v6396_v11  ;;  %v3959_v11 = vld [vmem:[%s9761_s16 + $0x750] sm:$0xff] }
 0x8b6   :  { %v6457_v24 = vcombine.low %v3959_v11, %v3963_v12 }
 0x8b7   :  { %5519 = vmatpush1.bf16.msra.mxu0 %v6393_v16  ;;  %v6451_v16 = vcombine.low %v3952_v2, %v3956_v4 }
 0x8b8   :  { %5601 = vmatpush1.bf16.msra.mxu1 %v6395_v17  ;;  %5520 = vmatprep.subr.bf16.mxu0 %v6402_v18  ;;  %v6458_v17 = vcombine.high %v3959_v11, %v3963_v12  ;;  %v6460_v18 = vcombine.high %v3960_v13, %v3964_v51 }
 0x8b9   :  { %5602 = vmatprep.subr.bf16.mxu1 %v6404_v19  ;;  %v3967_v19 = vld [vmem:[%s9761_s16 + $0x790] sm:$0xff] }
 0x8ba   :  { %v6465_v31 = vcombine.low %v3967_v19, %v3971_v20 }
 0x8bb   :  { %5521 = vmatpush1.bf16.msra.mxu0 %v6401_v9  ;;  %v6459_v9 = vcombine.low %v3960_v13, %v3964_v51 }
 0x8bc   :  { %5603 = vmatpush1.bf16.msra.mxu1 %v6403_v23  ;;  %5522 = vmatprep.subr.bf16.mxu0 %v6410_v27  ;;  %v6466_v23 = vcombine.high %v3967_v19, %v3971_v20  ;;  %v6468_v27 = vcombine.high %v3968_v21, %v3972_v22 }
 0x8bd   :  { %5604 = vmatprep.subr.bf16.mxu1 %v6412_v28  ;;  %v3975_v28 = vld [vmem:[%s9761_s16 + $0x7d0] sm:$0xff] }
 0x8bf   :  { %5523 = vmatpush1.bf16.msra.mxu0 %v6409_v32  ;;  %v6467_v32 = vcombine.low %v3968_v21, %v3972_v22 }
 0x8c0   :  { %5605 = vmatpush1.bf16.msra.mxu1 %v6411_v33  ;;  %5524 = vmatprep.subr.bf16.mxu0 %v6418_v34  ;;  %v6474_v33 = vcombine.high %v3975_v28, %v3979_v29  ;;  %v6476_v34 = vcombine.high %v3976_v30, %v3980_v40 }
 0x8c1   :  { %5606 = vmatprep.subr.bf16.mxu1 %v6420_v35  ;;  %v6473_v35 = vcombine.low %v3975_v28, %v3979_v29 }
 0x8c3   :  { %5525 = vmatpush1.bf16.msra.mxu0 %v6417_v38  ;;  %v3990_v38 = vrot.slane %v9711_v36, %v8369_v5 }
 0x8c4   :  { %5607 = vmatpush1.bf16.msra.mxu1 %v6419_v39  ;;  %5526 = vmatprep.subr.bf16.mxu0 %v6426_v42  ;;  %v3998_v39 = vrot.slane %v9711_v36, %v8372_v6 }
 0x8c5   :  { %5608 = vmatprep.subr.bf16.mxu1 %v6428_v44 }
 0x8c7   :  { %5527 = vmatpush1.bf16.msra.mxu0 %v6425_v57 }
 0x8c8   :  { %5609 = vmatpush1.bf16.msra.mxu1 %v6427_v58  ;;  %5528 = vmatprep.subr.bf16.mxu0 %v6434_v59 }
 0x8c9   :  { %5610 = vmatprep.subr.bf16.mxu1 %v6436_v61 }
 0x8cb   :  { %5529 = vmatpush1.bf16.msra.mxu0 %v6433_v45 }
 0x8cc   :  { %5611 = vmatpush1.bf16.msra.mxu1 %v6435_v46  ;;  %5530 = vmatprep.subr.bf16.mxu0 %v6442_v47 }
 0x8cd   :  { %5612 = vmatprep.subr.bf16.mxu1 %v6444_v52 }
 0x8cf   :  { %5531 = vmatpush1.bf16.msra.mxu0 %v6441_v7 }
 0x8d0   :  { %5613 = vmatpush1.bf16.msra.mxu1 %v6443_v60  ;;  %5532 = vmatprep.subr.bf16.mxu0 %v6450_v8 }
 0x8d1   :  { %5614 = vmatprep.subr.bf16.mxu1 %v6452_v10 }
 0x8d3   :  { %5533 = vmatpush1.bf16.msra.mxu0 %v6449_v14 }
 0x8d4   :  { %5615 = vmatpush1.bf16.msra.mxu1 %v6451_v16  ;;  %5534 = vmatprep.subr.bf16.mxu0 %v6458_v17 }
 0x8d5   :  { %5616 = vmatprep.subr.bf16.mxu1 %v6460_v18 }
 0x8d7   :  { %5535 = vmatpush1.bf16.msra.mxu0 %v6457_v24 }
 0x8d8   :  { %5617 = vmatpush1.bf16.msra.mxu1 %v6459_v9  ;;  %5536 = vmatprep.subr.bf16.mxu0 %v6466_v23 }
 0x8d9   :  { %5618 = vmatprep.subr.bf16.mxu1 %v6468_v27 }
 0x8db   :  { %5537 = vmatpush1.bf16.msra.mxu0 %v6465_v31 }
 0x8dc   :  { %5619 = vmatpush1.bf16.msra.mxu1 %v6467_v32  ;;  %5538 = vmatprep.subr.bf16.mxu0 %v6474_v33  ;;  %v4001_v33 = vsub.s32 4, %v7572_v43 }
 0x8dd   :  { %5620 = vmatprep.subr.bf16.mxu1 %v6476_v34  ;;  %v4009_v34 = vsub.s32 6, %v7572_v43 }
 0x8df   :  { %5539 = vmatpush1.bf16.msra.mxu0 %v6473_v35  ;;  %v4005_v35 = vsub.s32 5, %v7572_v43 }
 0x8e0   :  { %5621 = vmatpush1.bf16.msra.mxu1 %v6475_v25  ;;  %v4013_v25 = vsub.s32 7, %v7572_v43 }
 0x8e2   :  { %5541 = vmatmul.mubr.bf16.vlgmr.msra.gmra.mrb[16].mxu0 %v9336_v15 }
 0x8e3   :  { %5623 = vmatmul.mubr.bf16.vlgmr.msra.gmra.mrb[28].mxu1 %v9336_v15 }
 0x935   :  { %v5378_v42 = vpop.f32.mrb[12].mxu0  ;;  %v5460_v44 = vpop.f32.mrb[24].mxu1 }
 0x936   :  { %v6534_v15 = vadd.f32 %v5378_v42, %v3986_v26  ;;  %v6536_v48 = vadd.f32 %v5460_v44, %v3994_v37  ;;  %v5380_v54 = vpop.f32.mrb[13].mxu0  ;;  %v5462_v56 = vpop.f32.mrb[25].mxu1  ;;  %v4002_v26 = vrot.slane %v9711_v36, %v4001_v33  ;;  %v4010_v37 = vrot.slane %v9711_v36, %v4009_v34 }
 0x937   :  { %v6535_v41 = vadd.f32 %v5380_v54, %v3990_v38  ;;  %v6537_v57 = vadd.f32 %v5462_v56, %v3998_v39  ;;  %v5382_v58 = vpop.f32.mrb[14].mxu0  ;;  %v5464_v59 = vpop.f32.mrb[26].mxu1  ;;  %v4006_v38 = vrot.slane %v9711_v36, %v4005_v35  ;;  %v4014_v39 = vrot.slane %v9711_v36, %v4013_v25 }
 0x938   :  { %v5631_v3 = vand.u32 2147483647, %v6534_v15  ;;  %v5633_v61 = vand.u32 2147483647, %v6536_v48  ;;  %v5383_v5 = vpop.f32.mrb[15].mxu0  ;;  %v5465_v55 = vpop.f32.mrb[27].mxu1 }
 0x939   :  { %v5632_v62 = vand.u32 2147483647, %v6535_v41  ;;  %v5634_v50 = vand.u32 2147483647, %v6537_v57  ;;  %vm5663_vm15 = vcmp.ge.f32.partialorder %v6534_v15, 0.0  ;;  %vm5665_vm0 = vcmp.ge.f32.partialorder %v6536_v48, 0.0 }
 0x93a   :  { %v5639_v63 = vsub.f32 0.0, %v5631_v3  ;;  %v5641_v0 = vsub.f32 0.0, %v5633_v61  ;;  %vm5664_vm1 = vcmp.ge.f32.partialorder %v6535_v41, 0.0  ;;  %vm5666_vm2 = vcmp.ge.f32.partialorder %v6537_v57, 0.0 }
 0x93b   :  { %v5640_v45 = vsub.f32 0.0, %v5632_v62  ;;  %v5642_v6 = vsub.f32 0.0, %v5634_v50 }
 0x93c   :  { %v5647_v46 = vmul.f32 1.442695, %v5639_v63  ;;  %v5651_v47 = vmul.f32 1.442695, %v5641_v0 }
 0x93d   :  { %v5649_v52 = vmul.f32 1.442695, %v5640_v45  ;;  %v5653_v53 = vmul.f32 1.442695, %v5642_v6 }
 0x93e   :  { %7299 = vpow2.f32 %v5647_v46 }
 0x93f   :  { %7301 = vpow2.f32 %v5651_v47 }
 0x940   :  { %7303 = vpow2.f32 %v5649_v52 }
 0x941   :  { %7305 = vpow2.f32 %v5653_v53 }
 0x948   :  { %v7300_v1 = vpop.eup %7299 }
 0x949   :  { %v7302_v2 = vpop.eup %7301  ;;  %v5671_v4 = vadd.f32 1.0, %v7300_v1 }
 0x94a   :  { %v7304_v7 = vpop.eup %7303  ;;  %v5673_v60 = vadd.f32 1.0, %v7302_v2 }
 0x94b   :  { %v7306_v8 = vpop.eup %7305  ;;  %7307 = vrcp.f32 %v5671_v4  ;;  %v5672_v10 = vadd.f32 1.0, %v7304_v7 }
 0x94c   :  { %7309 = vrcp.f32 %v5673_v60  ;;  %v5674_v11 = vadd.f32 1.0, %v7306_v8 }
 0x94d   :  { %7311 = vrcp.f32 %v5672_v10 }
 0x94e   :  { %7313 = vrcp.f32 %v5674_v11 }
 0x955   :  { %v7308_v12 = vpop.eup %7307 }
 0x956   :  { %v7310_v13 = vpop.eup %7309  ;;  %v5695_v51 = vmul.f32 %v7308_v12, %v7300_v1 }
 0x957   :  { %v7312_v14 = vpop.eup %7311  ;;  %v5697_v16 = vmul.f32 %v7310_v13, %v7302_v2 }
 0x958   :  { %v7314_v17 = vpop.eup %7313  ;;  %v5703_v18 = vsel %vm5663_vm15, %v7308_v12, %v5695_v51  ;;  %v5696_v19 = vmul.f32 %v7312_v14, %v7304_v7 }
 0x959   :  { %v5711_v20 = vmul.f32 %v6534_v15, %v5703_v18  ;;  %v5705_v21 = vsel %vm5665_vm0, %v7310_v13, %v5697_v16  ;;  %v5698_v22 = vmul.f32 %v7314_v17, %v7306_v8 }
 0x95a   :  { %v5713_v24 = vmul.f32 %v6536_v48, %v5705_v21  ;;  %v5704_v9 = vsel %vm5664_vm1, %v7312_v14, %v5696_v19 }
 0x95b   :  { %v5712_v23 = vmul.f32 %v6535_v41, %v5704_v9  ;;  %v5706_v27 = vsel %vm5666_vm2, %v7314_v17, %v5698_v22 }
 0x95c   :  { %v5714_v28 = vmul.f32 %v6537_v57, %v5706_v27 }
 0x95d   :  { %v5727_v29 = vcombine.low %v5711_v20, %v5712_v23 }
 0x95e   :  { %v5728_v30 = vcombine.low %v5713_v24, %v5714_v28 }
 0x95f   :  { %v5735_v40 = vrot.slane %v5727_v29, %v7590_v49 }
 0x960   :  { %v5742_v31 = vrot.slane %v5728_v30, %v7590_v49 }
 0x962   :  { %v5743_v32 = vcombine.low %v5735_v40, %v5742_v31 }
 0x964   :  { %5763 = vst [vmem:[#allocation2] sm:$0xff] %v5743_v32 }
 0x9b5   :  { %v5542_v42 = vpop.f32.mrb[16].mxu0 }
 0x9b6   :  { %v6538_v44 = vadd.f32 %v5542_v42, %v4002_v26  ;;  %v5624_v15 = vpop.f32.mrb[28].mxu1  ;;  %v5544_v48 = vpop.f32.mrb[17].mxu0 }
 0x9b7   :  { %v6540_v54 = vadd.f32 %v5624_v15, %v4010_v37  ;;  %v6539_v56 = vadd.f32 %v5544_v48, %v4006_v38  ;;  %v5626_v41 = vpop.f32.mrb[29].mxu1  ;;  %v5546_v57 = vpop.f32.mrb[18].mxu0 }
 0x9b8   :  { %v5635_v58 = vand.u32 2147483647, %v6538_v44  ;;  %v6541_v59 = vadd.f32 %v5626_v41, %v4014_v39  ;;  %v5628_v3 = vpop.f32.mrb[30].mxu1  ;;  %v5547_v43 = vpop.f32.mrb[19].mxu0  ;;  %vm5667_vm3 = vcmp.ge.f32.partialorder %v6538_v44, 0.0 }
 0x9b9   :  { %v5637_v61 = vand.u32 2147483647, %v6540_v54  ;;  %v5636_v62 = vand.u32 2147483647, %v6539_v56  ;;  %v5629_v0 = vpop.f32.mrb[31].mxu1  ;;  %vm5669_vm4 = vcmp.ge.f32.partialorder %v6540_v54, 0.0 }
 0x9ba   :  { %v5643_v50 = vsub.f32 0.0, %v5635_v58  ;;  %v5638_v63 = vand.u32 2147483647, %v6541_v59  ;;  %vm5668_vm5 = vcmp.ge.f32.partialorder %v6539_v56, 0.0  ;;  %vm5670_vm6 = vcmp.ge.f32.partialorder %v6541_v59, 0.0 }
 0x9bb   :  { %v5645_v5 = vsub.f32 0.0, %v5637_v61  ;;  %v5644_v55 = vsub.f32 0.0, %v5636_v62 }
 0x9bc   :  { %v5655_v36 = vmul.f32 1.442695, %v5643_v50  ;;  %v5646_v45 = vsub.f32 0.0, %v5638_v63 }
 0x9bd   :  { %v5659_v6 = vmul.f32 1.442695, %v5645_v5  ;;  %v5657_v46 = vmul.f32 1.442695, %v5644_v55 }
 0x9be   :  { %7315 = vpow2.f32 %v5655_v36  ;;  %v5661_v47 = vmul.f32 1.442695, %v5646_v45 }
 0x9bf   :  { %7317 = vpow2.f32 %v5659_v6 }
 0x9c0   :  { %7319 = vpow2.f32 %v5657_v46 }
 0x9c1   :  { %7321 = vpow2.f32 %v5661_v47 }
 0x9c8   :  { %v7316_v52 = vpop.eup %7315 }
 0x9c9   :  { %v7318_v53 = vpop.eup %7317  ;;  %v5675_v1 = vadd.f32 1.0, %v7316_v52 }
 0x9ca   :  { %v7320_v2 = vpop.eup %7319  ;;  %v5677_v4 = vadd.f32 1.0, %v7318_v53 }
 0x9cb   :  { %v7322_v7 = vpop.eup %7321  ;;  %7323 = vrcp.f32 %v5675_v1  ;;  %v5676_v60 = vadd.f32 1.0, %v7320_v2 }
 0x9cc   :  { %7325 = vrcp.f32 %v5677_v4  ;;  %v5678_v8 = vadd.f32 1.0, %v7322_v7 }
 0x9cd   :  { %7327 = vrcp.f32 %v5676_v60 }
 0x9ce   :  { %7329 = vrcp.f32 %v5678_v8 }
 0x9d5   :  { %v7324_v10 = vpop.eup %7323 }
 0x9d6   :  { %v7326_v11 = vpop.eup %7325  ;;  %v5699_v12 = vmul.f32 %v7324_v10, %v7316_v52 }
 0x9d7   :  { %v7328_v13 = vpop.eup %7327  ;;  %v5701_v51 = vmul.f32 %v7326_v11, %v7318_v53 }
 0x9d8   :  { %v7330_v14 = vpop.eup %7329  ;;  %v5707_v16 = vsel %vm5667_vm3, %v7324_v10, %v5699_v12  ;;  %v5700_v17 = vmul.f32 %v7328_v13, %v7320_v2 }
 0x9d9   :  { %v5715_v18 = vmul.f32 %v6538_v44, %v5707_v16  ;;  %v5709_v19 = vsel %vm5669_vm4, %v7326_v11, %v5701_v51  ;;  %v5702_v20 = vmul.f32 %v7330_v14, %v7322_v7 }
 0x9da   :  { %v5717_v21 = vmul.f32 %v6540_v54, %v5709_v19  ;;  %v5708_v22 = vsel %vm5668_vm5, %v7328_v13, %v5700_v17 }
 0x9db   :  { %v5716_v24 = vmul.f32 %v6539_v56, %v5708_v22  ;;  %v5710_v9 = vsel %vm5670_vm6, %v7330_v14, %v5702_v20 }
 0x9dc   :  { %v5718_v23 = vmul.f32 %v6541_v59, %v5710_v9 }
 0x9dd   :  { %v5744_v27 = vcombine.low %v5715_v18, %v5716_v24 }
 0x9de   :  { %v5745_v28 = vcombine.low %v5717_v21, %v5718_v23 }
 0x9df   :  { %v5752_v29 = vrot.slane %v5744_v27, %v7590_v49 }
 0x9e0   :  { %v5759_v30 = vrot.slane %v5745_v28, %v7590_v49 }
 0x9e2   :  { %v5760_v40 = vcombine.low %v5752_v29, %v5759_v30 }
 0x9e4   :  { %5764 = vst [vmem:[#allocation2 + $0x8] sm:$0xff] %v5760_v40 }
 0x9e5   :  { %7342 = shalt.err (!%p7339_p4)
}
 0x9e6   :  { %s7343_s2 = scalar_lea.hbm %s9763_s18, 256 }
 0x9e7   :  { %p7344_p5 = scmp.ne.s32.totalorder %s9763_s18, %s7343_s2  ;;  %p7347_p6 = scmp.lt.u32.totalorder %s7343_s2, %s9763_s18 }
 0x9e9   :  { %p7349_p7 = pnand %p7347_p6, %p7344_p5 }
 0x9eb   :  { %7352 = shalt.err (!%p7349_p7)
}
 0x9ec   :  { %5774 = dma.vmem_to_hbm [thread:$0]  %s5772_s9, 256, %s9763_s18, [#allocation3]  }
 0x9ed   :  { %7353 = dma.done.wait [#allocation3], 256  }
 0x9ee   :  { %7354 = vsyncadd [#allocation3], 4294967040 }
 0x9ef   :  { %5778 = vsyncpa [#allocation3], 1 }

</bundles_post_ra>
